<compile_context>
chip_gen: v7x
topology: tpu7x:2x2x1
jax: 0.10.0
libtpu: 0.0.40
codegen_flags: <defaults>
</compile_context>

<pallas_src>
import functools

import jax
import jax.numpy as jnp
from jax.experimental import pallas as pl
from jax.experimental.pallas import tpu as pltpu

D_IN = 768
D_MODEL = 384
D_MLP = 1536
HEAD_PAD = 128           # lane-dense padded classifier width
SQRT1_2 = 0.7071067811865476


def _gelu(x, exact):
    if exact:
        # PyTorch nn.GELU() default: exact erf formulation (f32 VPU polynomial).
        return 0.5 * x * (1.0 + jax.scipy.special.erf(x * SQRT1_2))
    # Default: tanh approximation -> EUP slot, ~4x fewer VALU ops (not bit-exact).
    return jax.nn.gelu(x, approximate=True)


def vit_kernel(x_ref,
               w_f_ref, b_f_ref,        # fused patch_embed + attn(V,out_proj) + residual-1
               w_m1_ref, b_m1_ref,
               w_m2_ref, b_m2_ref,
               w_h_ref, b_h_ref,
               out_ref,
               *, exact_gelu):
    x = x_ref[...]                                                     # (TB, 768) bf16

    # Fused Linear(768 -> 384): patch_embed -> V -> out_proj -> +residual, folded offline.
    h = jnp.dot(x, w_f_ref[...],
                preferred_element_type=jnp.float32) + b_f_ref[...]     # (TB, 384) f32

    # MLP: Linear(384 -> 1536) -> GELU -> Linear(1536 -> 384), residual 2.
    m = jnp.dot(h.astype(jnp.bfloat16), w_m1_ref[...],
                preferred_element_type=jnp.float32) + b_m1_ref[...]    # (TB, 1536)
    m = _gelu(m, exact_gelu)
    m = jnp.dot(m.astype(jnp.bfloat16), w_m2_ref[...],
                preferred_element_type=jnp.float32) + b_m2_ref[...]    # (TB, 384)
    h = h + m

    # Classification head: Linear(384 -> HEAD_PAD), lane-dense padded output.
    out_ref[...] = jnp.dot(h.astype(jnp.bfloat16), w_h_ref[...],
                           preferred_element_type=jnp.float32) + b_h_ref[...]


def prepare_params(params):
    """One-time layout conversion + weight folding (all folds done in f32)."""
    f32 = lambda a: jnp.asarray(a, jnp.float32)
    num_classes = params["w_head"].shape[0]
    assert num_classes <= HEAD_PAD, "HEAD_PAD assumes num_classes <= 128"

    # torch Linear weights are (out, in); transpose to (in, out).
    Wpe = f32(params["w_pe"]).T                                  # (768, 384)
    Wv = f32(params["w_qkv"][2 * D_MODEL:3 * D_MODEL, :]).T      # (384, 384)  V slice of in_proj
    Wo = f32(params["w_o"]).T                                    # (384, 384)
    bpe = f32(params["b_pe"])
    bv = f32(params["b_qkv"][2 * D_MODEL:3 * D_MODEL])
    bo = f32(params["b_o"])

    # h2 = (x Wpe + bpe) + ((x Wpe + bpe) Wv + bv) Wo + bo  =  x [Wpe A] + [bpe A + bv Wo + bo]
    A = jnp.eye(D_MODEL, dtype=jnp.float32) + Wv @ Wo
    w_fused = Wpe @ A                                            # (768, 384)
    b_fused = bpe @ A + bv @ Wo + bo                             # (384,)

    # Head padded to HEAD_PAD output columns (zero weights/bias -> padded cols = 0).
    w_head_pad = jnp.zeros((D_MODEL, HEAD_PAD), jnp.float32)
    w_head_pad = w_head_pad.at[:, :num_classes].set(f32(params["w_head"]).T)
    b_head_pad = jnp.zeros((HEAD_PAD,), jnp.float32)
    b_head_pad = b_head_pad.at[:num_classes].set(f32(params["b_head"]))

    def wt(w):            # (out, in) f32 -> (in, out) bf16
        return f32(w).T.astype(jnp.bfloat16)

    return {
        "w_fused": w_fused.astype(jnp.bfloat16),
        "b_fused": b_fused[None, :],
        "w_m1": wt(params["w_m1"]), "b_m1": f32(params["b_m1"])[None, :],
        "w_m2": wt(params["w_m2"]), "b_m2": f32(params["b_m2"])[None, :],
        "w_head": w_head_pad.astype(jnp.bfloat16),
        "b_head": b_head_pad[None, :],
        "num_classes": num_classes,
    }


def _round_up(n, m):
    return (n + m - 1) // m * m


def _default_tb_max():
    try:
        kind = jax.devices()[0].device_kind.lower()
    except Exception:
        return 256
    if "v6" in kind:
        return 512   # single TC + 128 MiB VMEM: bigger tiles amortize per-step overhead
    return 256       # v5e (4x128 MXU) and v7x (64 MiB VMEM, 2 TCs)


def _pick_batch_tile(B, tb_max):
    if B <= 32:
        tb = _round_up(B, 16)
    elif B <= 2 * tb_max:
        # Force grid >= 2 so v7x's two TensorCores both get work; harmless elsewhere.
        tb = min(_round_up(-(-B // 2), 16), tb_max)
    else:
        tb = tb_max
    return tb, _round_up(B, tb)


def _build_call(tb, b_pad, weight_arrays, single_buffer_weights, exact_gelu, cost):
    in_specs = [pl.BlockSpec((tb, D_IN), lambda i: (i, 0))]
    for w in weight_arrays:
        # Weights/biases: full-array blocks, constant index_map -> resident across grid.
        if single_buffer_weights:
            in_specs.append(pl.BlockSpec(w.shape, lambda i: (0, 0),
                                         pipeline_mode=pl.Buffered(buffer_count=1)))
        else:
            in_specs.append(pl.BlockSpec(w.shape, lambda i: (0, 0)))

    return pl.pallas_call(
        functools.partial(vit_kernel, exact_gelu=exact_gelu),
        out_shape=jax.ShapeDtypeStruct((b_pad, HEAD_PAD), jnp.float32),
        grid=(b_pad // tb,),
        in_specs=in_specs,
        out_specs=pl.BlockSpec((tb, HEAD_PAD), lambda i: (i, 0)),
        compiler_params=pltpu.CompilerParams(
            dimension_semantics=("parallel",),          # shard batch over v7x's 2 TCs
            vmem_limit_bytes=32 * 1024 * 1024),
        cost_estimate=cost,
    )


def simple_vit_forward(x, prepped, *, exact_gelu=False):
    B = x.shape[0]
    num_classes = int(prepped["num_classes"])

    x_flat = x.reshape(B, -1)
    assert x_flat.shape[1] == D_IN, "flattened input must have 768 features"

    tb, b_pad = _pick_batch_tile(B, _default_tb_max())

    x_bf = x_flat.astype(jnp.bfloat16)
    if b_pad != B:
        x_bf = jnp.pad(x_bf, ((0, b_pad - B), (0, 0)))

    weights = (
        prepped["w_fused"], prepped["b_fused"],
        prepped["w_m1"], prepped["b_m1"],
        prepped["w_m2"], prepped["b_m2"],
        prepped["w_head"], prepped["b_head"],
    )

    macs = D_IN * D_MODEL + D_MODEL * D_MLP + D_MLP * D_MODEL + D_MODEL * HEAD_PAD
    weight_bytes = sum(int(w.size) * w.dtype.itemsize for w in weights)
    cost = pl.CostEstimate(
        flops=2 * macs * b_pad,
        transcendentals=b_pad * D_MLP,
        bytes_accessed=weight_bytes + b_pad * D_IN * 2 + b_pad * HEAD_PAD * 4)

    try:
        out = _build_call(tb, b_pad, weights, hasattr(pl, "Buffered"),
                          exact_gelu, cost)(x_bf, *weights)
    except Exception:
        # Fallback: default (double) buffering for the resident weights.
        out = _build_call(tb, b_pad, weights, False, exact_gelu, cost)(x_bf, *weights)

    return out[:B, :num_classes]


def reference_forward(x, params):
    """Pure-JAX f32 reference matching the PyTorch module (exact erf GELU)."""
    xf = jnp.asarray(x, jnp.float32).reshape(x.shape[0], -1)
    h = xf @ params["w_pe"].T + params["b_pe"]
    # seq_len == 1: softmax over a single key is exactly 1 -> attn_out = out_proj(V).
    v = h @ params["w_qkv"][2 * D_MODEL:].T + params["b_qkv"][2 * D_MODEL:]
    attn = v @ params["w_o"].T + params["b_o"]
    h = h + attn
    m = h @ params["w_m1"].T + params["b_m1"]
    m = 0.5 * m * (1.0 + jax.scipy.special.erf(m * SQRT1_2))
    m = m @ params["w_m2"].T + params["b_m2"]
    h = h + m
    return h @ params["w_head"].T + params["b_head"]


def init_params(key, num_classes=10):
    """Deterministic PyTorch-default-style init: U(-1/sqrt(fan_in), 1/sqrt(fan_in))."""
    def linear(k, out_f, in_f):
        kw, kb = jax.random.split(k)
        bound = 1.0 / (in_f ** 0.5)
        w = jax.random.uniform(kw, (out_f, in_f), jnp.float32, -bound, bound)
        b = jax.random.uniform(kb, (out_f,), jnp.float32, -bound, bound)
        return w, b

    keys = jax.random.split(key, 6)
    p = {}
    p["w_pe"],   p["b_pe"]   = linear(keys[0], D_MODEL, D_IN)          # patch_embed
    p["w_qkv"],  p["b_qkv"]  = linear(keys[1], 3 * D_MODEL, D_MODEL)   # MHA in_proj
    p["w_o"],    p["b_o"]    = linear(keys[2], D_MODEL, D_MODEL)       # MHA out_proj
    p["w_m1"],   p["b_m1"]   = linear(keys[3], D_MLP, D_MODEL)         # mlp[0]
    p["w_m2"],   p["b_m2"]   = linear(keys[4], D_MODEL, D_MLP)         # mlp[2]
    p["w_head"], p["b_head"] = linear(keys[5], num_classes, D_MODEL)   # head
    return p


if __name__ == "__main__":
    key = jax.random.PRNGKey(0)
    kx, kp = jax.random.split(key)

    # (B=2, C=3, H=16, W=16) -> flattens to 768 features, as patch_embed expects.
    x = jax.random.normal(kx, (2, 3, 16, 16), jnp.float32)
    params = init_params(kp, num_classes=10)
    prepped = prepare_params(params)            # one-time fold + layout conversion

    out = jax.block_until_ready(simple_vit_forward(x, prepped))

    assert out.shape == (2, 10) and out.dtype == jnp.float32
    assert bool(jnp.all(jnp.isfinite(out)))

    # Loose tolerance: bf16 matmuls + tanh-approx GELU vs f32 erf reference.
    ref = reference_forward(x, params)
    max_err = float(jnp.max(jnp.abs(out - ref)))
    assert max_err < 1e-1, f"max abs error vs reference too large: {max_err}"

    print("KERNEL_OK")
</pallas_src>

<mosaic_0001>
module attributes {stable_mosaic.version = 11 : i64} {
  func.func @vit_kernel(%arg0: i32, %arg1: memref<16x768xbf16, #tpu.memory_space<vmem>>, %arg2: memref<768x384xbf16, #tpu.memory_space<vmem>>, %arg3: memref<1x384xf32, #tpu.memory_space<vmem>>, %arg4: memref<384x1536xbf16, #tpu.memory_space<vmem>>, %arg5: memref<1x1536xf32, #tpu.memory_space<vmem>>, %arg6: memref<1536x384xbf16, #tpu.memory_space<vmem>>, %arg7: memref<1x384xf32, #tpu.memory_space<vmem>>, %arg8: memref<384x128xbf16, #tpu.memory_space<vmem>>, %arg9: memref<1x128xf32, #tpu.memory_space<vmem>>, %arg10: memref<16x128xf32, #tpu.memory_space<vmem>>) attributes {dimension_semantics = [#tpu.dimension_semantics<parallel>], iteration_bounds = array<i64: 1>, scalar_prefetch = 0 : i64, scratch_operands = 0 : i64, tpu.core_type = #tpu.core_type<tc>, window_params = [{transform_indices = @transform_0, window_bounds = array<i64: 16, 768>}, {pipeline_mode = #tpu.pipeline_mode<synchronous>, transform_indices = @transform_1, window_bounds = array<i64: 768, 384>}, {pipeline_mode = #tpu.pipeline_mode<synchronous>, transform_indices = @transform_2, window_bounds = array<i64: 1, 384>}, {pipeline_mode = #tpu.pipeline_mode<synchronous>, transform_indices = @transform_3, window_bounds = array<i64: 384, 1536>}, {pipeline_mode = #tpu.pipeline_mode<synchronous>, transform_indices = @transform_4, window_bounds = array<i64: 1, 1536>}, {pipeline_mode = #tpu.pipeline_mode<synchronous>, transform_indices = @transform_5, window_bounds = array<i64: 1536, 384>}, {pipeline_mode = #tpu.pipeline_mode<synchronous>, transform_indices = @transform_6, window_bounds = array<i64: 1, 384>}, {pipeline_mode = #tpu.pipeline_mode<synchronous>, transform_indices = @transform_7, window_bounds = array<i64: 384, 128>}, {pipeline_mode = #tpu.pipeline_mode<synchronous>, transform_indices = @transform_8, window_bounds = array<i64: 1, 128>}, {transform_indices = @transform_9, window_bounds = array<i64: 16, 128>}]} {
    %c0 = arith.constant 0 : index
    %c0_0 = arith.constant 0 : index
    %0 = vector.load %arg1[%c0, %c0_0] : memref<16x768xbf16, #tpu.memory_space<vmem>>, vector<16x768xbf16>
    %c0_1 = arith.constant 0 : index
    %c0_2 = arith.constant 0 : index
    %1 = vector.load %arg2[%c0_1, %c0_2] : memref<768x384xbf16, #tpu.memory_space<vmem>>, vector<768x384xbf16>
    %cst = arith.constant dense<0.000000e+00> : vector<16x384xf32>
    %2 = tpu.matmul %0, %1, %cst {dimension_numbers = #tpu.dot_dimension_numbers<[1], [0], [0], [1], [0, 0, 1, 1], [], []>} : vector<16x768xbf16>, vector<768x384xbf16>, vector<16x384xf32> -> vector<16x384xf32>
    %c0_3 = arith.constant 0 : index
    %c0_4 = arith.constant 0 : index
    %3 = vector.load %arg3[%c0_3, %c0_4] : memref<1x384xf32, #tpu.memory_space<vmem>>, vector<1x384xf32>
    %4 = vector.broadcast %3 : vector<1x384xf32> to vector<16x384xf32>
    %5 = arith.addf %2, %4 : vector<16x384xf32>
    %6 = arith.truncf %5 : vector<16x384xf32> to vector<16x384xbf16>
    %c0_5 = arith.constant 0 : index
    %c0_6 = arith.constant 0 : index
    %7 = vector.load %arg4[%c0_5, %c0_6] : memref<384x1536xbf16, #tpu.memory_space<vmem>>, vector<384x1536xbf16>
    %cst_7 = arith.constant dense<0.000000e+00> : vector<16x1536xf32>
    %8 = tpu.matmul %6, %7, %cst_7 {dimension_numbers = #tpu.dot_dimension_numbers<[1], [0], [0], [1], [0, 0, 1, 1], [], []>} : vector<16x384xbf16>, vector<384x1536xbf16>, vector<16x1536xf32> -> vector<16x1536xf32>
    %c0_8 = arith.constant 0 : index
    %c0_9 = arith.constant 0 : index
    %9 = vector.load %arg5[%c0_8, %c0_9] : memref<1x1536xf32, #tpu.memory_space<vmem>>, vector<1x1536xf32>
    %10 = vector.broadcast %9 : vector<1x1536xf32> to vector<16x1536xf32>
    %11 = arith.addf %8, %10 : vector<16x1536xf32>
    %12 = arith.mulf %11, %11 : vector<16x1536xf32>
    %13 = arith.mulf %11, %12 : vector<16x1536xf32>
    %cst_10 = arith.constant 4.471500e-02 : f32
    %14 = vector.broadcast %cst_10 : f32 to vector<16x1536xf32>
    %15 = arith.mulf %14, %13 : vector<16x1536xf32>
    %16 = arith.addf %11, %15 : vector<16x1536xf32>
    %cst_11 = arith.constant 0.797884583 : f32
    %17 = vector.broadcast %cst_11 : f32 to vector<16x1536xf32>
    %18 = arith.mulf %17, %16 : vector<16x1536xf32>
    %19 = math.tanh %18 : vector<16x1536xf32>
    %cst_12 = arith.constant 1.000000e+00 : f32
    %20 = vector.broadcast %cst_12 : f32 to vector<16x1536xf32>
    %21 = arith.addf %20, %19 : vector<16x1536xf32>
    %cst_13 = arith.constant 5.000000e-01 : f32
    %22 = vector.broadcast %cst_13 : f32 to vector<16x1536xf32>
    %23 = arith.mulf %22, %21 : vector<16x1536xf32>
    %24 = arith.mulf %11, %23 : vector<16x1536xf32>
    %25 = arith.truncf %24 : vector<16x1536xf32> to vector<16x1536xbf16>
    %c0_14 = arith.constant 0 : index
    %c0_15 = arith.constant 0 : index
    %26 = vector.load %arg6[%c0_14, %c0_15] : memref<1536x384xbf16, #tpu.memory_space<vmem>>, vector<1536x384xbf16>
    %cst_16 = arith.constant dense<0.000000e+00> : vector<16x384xf32>
    %27 = tpu.matmul %25, %26, %cst_16 {dimension_numbers = #tpu.dot_dimension_numbers<[1], [0], [0], [1], [0, 0, 1, 1], [], []>} : vector<16x1536xbf16>, vector<1536x384xbf16>, vector<16x384xf32> -> vector<16x384xf32>
    %c0_17 = arith.constant 0 : index
    %c0_18 = arith.constant 0 : index
    %28 = vector.load %arg7[%c0_17, %c0_18] : memref<1x384xf32, #tpu.memory_space<vmem>>, vector<1x384xf32>
    %29 = vector.broadcast %28 : vector<1x384xf32> to vector<16x384xf32>
    %30 = arith.addf %27, %29 : vector<16x384xf32>
    %31 = arith.addf %5, %30 : vector<16x384xf32>
    %32 = arith.truncf %31 : vector<16x384xf32> to vector<16x384xbf16>
    %c0_19 = arith.constant 0 : index
    %c0_20 = arith.constant 0 : index
    %33 = vector.load %arg8[%c0_19, %c0_20] : memref<384x128xbf16, #tpu.memory_space<vmem>>, vector<384x128xbf16>
    %cst_21 = arith.constant dense<0.000000e+00> : vector<16x128xf32>
    %34 = tpu.matmul %32, %33, %cst_21 {dimension_numbers = #tpu.dot_dimension_numbers<[1], [0], [0], [1], [0, 0, 1, 1], [], []>} : vector<16x384xbf16>, vector<384x128xbf16>, vector<16x128xf32> -> vector<16x128xf32>
    %c0_22 = arith.constant 0 : index
    %c0_23 = arith.constant 0 : index
    %35 = vector.load %arg9[%c0_22, %c0_23] : memref<1x128xf32, #tpu.memory_space<vmem>>, vector<1x128xf32>
    %36 = vector.broadcast %35 : vector<1x128xf32> to vector<16x128xf32>
    %37 = arith.addf %34, %36 : vector<16x128xf32>
    %c0_24 = arith.constant 0 : index
    %c0_25 = arith.constant 0 : index
    %38 = vector.load %arg10[%c0_24, %c0_25] : memref<16x128xf32, #tpu.memory_space<vmem>>, vector<16x128xf32>
    tpu.vector_store %arg10[%c0_24, %c0_25], %37 {strides = array<i32>} : memref<16x128xf32, #tpu.memory_space<vmem>>, vector<16x128xf32>,
    return
  }
  func.func @transform_0(%arg0: i32) -> (i32, i32) {
    %c0_i32 = arith.constant 0 : i32
    %c0_i32_0 = arith.constant 0 : i32
    return %arg0, %c0_i32 : i32, i32
  }
  func.func @transform_1(%arg0: i32) -> (i32, i32) {
    %c0_i32 = arith.constant 0 : i32
    %c0_i32_0 = arith.constant 0 : i32
    %c0_i32_1 = arith.constant 0 : i32
    return %c0_i32, %c0_i32_0 : i32, i32
  }
  func.func @transform_2(%arg0: i32) -> (i32, i32) {
    %c0_i32 = arith.constant 0 : i32
    %c0_i32_0 = arith.constant 0 : i32
    %c0_i32_1 = arith.constant 0 : i32
    return %c0_i32, %c0_i32_0 : i32, i32
  }
  func.func @transform_3(%arg0: i32) -> (i32, i32) {
    %c0_i32 = arith.constant 0 : i32
    %c0_i32_0 = arith.constant 0 : i32
    %c0_i32_1 = arith.constant 0 : i32
    return %c0_i32, %c0_i32_0 : i32, i32
  }
  func.func @transform_4(%arg0: i32) -> (i32, i32) {
    %c0_i32 = arith.constant 0 : i32
    %c0_i32_0 = arith.constant 0 : i32
    %c0_i32_1 = arith.constant 0 : i32
    return %c0_i32, %c0_i32_0 : i32, i32
  }
  func.func @transform_5(%arg0: i32) -> (i32, i32) {
    %c0_i32 = arith.constant 0 : i32
    %c0_i32_0 = arith.constant 0 : i32
    %c0_i32_1 = arith.constant 0 : i32
    return %c0_i32, %c0_i32_0 : i32, i32
  }
  func.func @transform_6(%arg0: i32) -> (i32, i32) {
    %c0_i32 = arith.constant 0 : i32
    %c0_i32_0 = arith.constant 0 : i32
    %c0_i32_1 = arith.constant 0 : i32
    return %c0_i32, %c0_i32_0 : i32, i32
  }
  func.func @transform_7(%arg0: i32) -> (i32, i32) {
    %c0_i32 = arith.constant 0 : i32
    %c0_i32_0 = arith.constant 0 : i32
    %c0_i32_1 = arith.constant 0 : i32
    return %c0_i32, %c0_i32_0 : i32, i32
  }
  func.func @transform_8(%arg0: i32) -> (i32, i32) {
    %c0_i32 = arith.constant 0 : i32
    %c0_i32_0 = arith.constant 0 : i32
    %c0_i32_1 = arith.constant 0 : i32
    return %c0_i32, %c0_i32_0 : i32, i32
  }
  func.func @transform_9(%arg0: i32) -> (i32, i32) {
    %c0_i32 = arith.constant 0 : i32
    %c0_i32_0 = arith.constant 0 : i32
    return %arg0, %c0_i32 : i32, i32
  }
}

module attributes {stable_mosaic.version = 11 : i64} {
  func.func @vit_kernel(%arg0: i32, %arg1: memref<16x768xbf16, #tpu.memory_space<vmem>>, %arg2: memref<768x384xbf16, #tpu.memory_space<vmem>>, %arg3: memref<1x384xf32, #tpu.memory_space<vmem>>, %arg4: memref<384x1536xbf16, #tpu.memory_space<vmem>>, %arg5: memref<1x1536xf32, #tpu.memory_space<vmem>>, %arg6: memref<1536x384xbf16, #tpu.memory_space<vmem>>, %arg7: memref<1x384xf32, #tpu.memory_space<vmem>>, %arg8: memref<384x128xbf16, #tpu.memory_space<vmem>>, %arg9: memref<1x128xf32, #tpu.memory_space<vmem>>, %arg10: memref<16x128xf32, #tpu.memory_space<vmem>>) attributes {dimension_semantics = [#tpu.dimension_semantics<parallel>], iteration_bounds = array<i64: 1>, scalar_prefetch = 0 : i64, scratch_operands = 0 : i64, tpu.core_type = #tpu.core_type<tc>, window_params = [{transform_indices = @transform_0, window_bounds = array<i64: 16, 768>}, {pipeline_mode = #tpu.pipeline_mode<synchronous>, transform_indices = @transform_1, window_bounds = array<i64: 768, 384>}, {pipeline_mode = #tpu.pipeline_mode<synchronous>, transform_indices = @transform_2, window_bounds = array<i64: 1, 384>}, {pipeline_mode = #tpu.pipeline_mode<synchronous>, transform_indices = @transform_3, window_bounds = array<i64: 384, 1536>}, {pipeline_mode = #tpu.pipeline_mode<synchronous>, transform_indices = @transform_4, window_bounds = array<i64: 1, 1536>}, {pipeline_mode = #tpu.pipeline_mode<synchronous>, transform_indices = @transform_5, window_bounds = array<i64: 1536, 384>}, {pipeline_mode = #tpu.pipeline_mode<synchronous>, transform_indices = @transform_6, window_bounds = array<i64: 1, 384>}, {pipeline_mode = #tpu.pipeline_mode<synchronous>, transform_indices = @transform_7, window_bounds = array<i64: 384, 128>}, {pipeline_mode = #tpu.pipeline_mode<synchronous>, transform_indices = @transform_8, window_bounds = array<i64: 1, 128>}, {transform_indices = @transform_9, window_bounds = array<i64: 16, 128>}]} {
    %c0 = arith.constant 0 : index
    %c0_0 = arith.constant 0 : index
    %0 = vector.load %arg1[%c0, %c0_0] : memref<16x768xbf16, #tpu.memory_space<vmem>>, vector<16x768xbf16>
    %c0_1 = arith.constant 0 : index
    %c0_2 = arith.constant 0 : index
    %1 = vector.load %arg2[%c0_1, %c0_2] : memref<768x384xbf16, #tpu.memory_space<vmem>>, vector<768x384xbf16>
    %cst = arith.constant dense<0.000000e+00> : vector<16x384xf32>
    %2 = tpu.matmul %0, %1, %cst {dimension_numbers = #tpu.dot_dimension_numbers<[1], [0], [0], [1], [0, 0, 1, 1], [], []>} : vector<16x768xbf16>, vector<768x384xbf16>, vector<16x384xf32> -> vector<16x384xf32>
    %c0_3 = arith.constant 0 : index
    %c0_4 = arith.constant 0 : index
    %3 = vector.load %arg3[%c0_3, %c0_4] : memref<1x384xf32, #tpu.memory_space<vmem>>, vector<1x384xf32>
    %4 = vector.broadcast %3 : vector<1x384xf32> to vector<16x384xf32>
    %5 = arith.addf %2, %4 : vector<16x384xf32>
    %6 = arith.truncf %5 : vector<16x384xf32> to vector<16x384xbf16>
    %c0_5 = arith.constant 0 : index
    %c0_6 = arith.constant 0 : index
    %7 = vector.load %arg4[%c0_5, %c0_6] : memref<384x1536xbf16, #tpu.memory_space<vmem>>, vector<384x1536xbf16>
    %cst_7 = arith.constant dense<0.000000e+00> : vector<16x1536xf32>
    %8 = tpu.matmul %6, %7, %cst_7 {dimension_numbers = #tpu.dot_dimension_numbers<[1], [0], [0], [1], [0, 0, 1, 1], [], []>} : vector<16x384xbf16>, vector<384x1536xbf16>, vector<16x1536xf32> -> vector<16x1536xf32>
    %c0_8 = arith.constant 0 : index
    %c0_9 = arith.constant 0 : index
    %9 = vector.load %arg5[%c0_8, %c0_9] : memref<1x1536xf32, #tpu.memory_space<vmem>>, vector<1x1536xf32>
    %10 = vector.broadcast %9 : vector<1x1536xf32> to vector<16x1536xf32>
    %11 = arith.addf %8, %10 : vector<16x1536xf32>
    %12 = arith.mulf %11, %11 : vector<16x1536xf32>
    %13 = arith.mulf %11, %12 : vector<16x1536xf32>
    %cst_10 = arith.constant 4.471500e-02 : f32
    %14 = vector.broadcast %cst_10 : f32 to vector<16x1536xf32>
    %15 = arith.mulf %14, %13 : vector<16x1536xf32>
    %16 = arith.addf %11, %15 : vector<16x1536xf32>
    %cst_11 = arith.constant 0.797884583 : f32
    %17 = vector.broadcast %cst_11 : f32 to vector<16x1536xf32>
    %18 = arith.mulf %17, %16 : vector<16x1536xf32>
    %19 = math.tanh %18 : vector<16x1536xf32>
    %cst_12 = arith.constant 1.000000e+00 : f32
    %20 = vector.broadcast %cst_12 : f32 to vector<16x1536xf32>
    %21 = arith.addf %20, %19 : vector<16x1536xf32>
    %cst_13 = arith.constant 5.000000e-01 : f32
    %22 = vector.broadcast %cst_13 : f32 to vector<16x1536xf32>
    %23 = arith.mulf %22, %21 : vector<16x1536xf32>
    %24 = arith.mulf %11, %23 : vector<16x1536xf32>
    %25 = arith.truncf %24 : vector<16x1536xf32> to vector<16x1536xbf16>
    %c0_14 = arith.constant 0 : index
    %c0_15 = arith.constant 0 : index
    %26 = vector.load %arg6[%c0_14, %c0_15] : memref<1536x384xbf16, #tpu.memory_space<vmem>>, vector<1536x384xbf16>
    %cst_16 = arith.constant dense<0.000000e+00> : vector<16x384xf32>
    %27 = tpu.matmul %25, %26, %cst_16 {dimension_numbers = #tpu.dot_dimension_numbers<[1], [0], [0], [1], [0, 0, 1, 1], [], []>} : vector<16x1536xbf16>, vector<1536x384xbf16>, vector<16x384xf32> -> vector<16x384xf32>
    %c0_17 = arith.constant 0 : index
    %c0_18 = arith.constant 0 : index
    %28 = vector.load %arg7[%c0_17, %c0_18] : memref<1x384xf32, #tpu.memory_space<vmem>>, vector<1x384xf32>
    %29 = vector.broadcast %28 : vector<1x384xf32> to vector<16x384xf32>
    %30 = arith.addf %27, %29 : vector<16x384xf32>
    %31 = arith.addf %5, %30 : vector<16x384xf32>
    %32 = arith.truncf %31 : vector<16x384xf32> to vector<16x384xbf16>
    %c0_19 = arith.constant 0 : index
    %c0_20 = arith.constant 0 : index
    %33 = vector.load %arg8[%c0_19, %c0_20] : memref<384x128xbf16, #tpu.memory_space<vmem>>, vector<384x128xbf16>
    %cst_21 = arith.constant dense<0.000000e+00> : vector<16x128xf32>
    %34 = tpu.matmul %32, %33, %cst_21 {dimension_numbers = #tpu.dot_dimension_numbers<[1], [0], [0], [1], [0, 0, 1, 1], [], []>} : vector<16x384xbf16>, vector<384x128xbf16>, vector<16x128xf32> -> vector<16x128xf32>
    %c0_22 = arith.constant 0 : index
    %c0_23 = arith.constant 0 : index
    %35 = vector.load %arg9[%c0_22, %c0_23] : memref<1x128xf32, #tpu.memory_space<vmem>>, vector<1x128xf32>
    %36 = vector.broadcast %35 : vector<1x128xf32> to vector<16x128xf32>
    %37 = arith.addf %34, %36 : vector<16x128xf32>
    %c0_24 = arith.constant 0 : index
    %c0_25 = arith.constant 0 : index
    %38 = vector.load %arg10[%c0_24, %c0_25] : memref<16x128xf32, #tpu.memory_space<vmem>>, vector<16x128xf32>
    tpu.vector_store %arg10[%c0_24, %c0_25], %37 {strides = array<i32>} : memref<16x128xf32, #tpu.memory_space<vmem>>, vector<16x128xf32>,
    return
  }
  func.func @transform_0(%arg0: i32) -> (i32, i32) {
    %c0_i32 = arith.constant 0 : i32
    %c0_i32_0 = arith.constant 0 : i32
    return %arg0, %c0_i32 : i32, i32
  }
  func.func @transform_1(%arg0: i32) -> (i32, i32) {
    %c0_i32 = arith.constant 0 : i32
    %c0_i32_0 = arith.constant 0 : i32
    %c0_i32_1 = arith.constant 0 : i32
    return %c0_i32, %c0_i32_0 : i32, i32
  }
  func.func @transform_2(%arg0: i32) -> (i32, i32) {
    %c0_i32 = arith.constant 0 : i32
    %c0_i32_0 = arith.constant 0 : i32
    %c0_i32_1 = arith.constant 0 : i32
    return %c0_i32, %c0_i32_0 : i32, i32
  }
  func.func @transform_3(%arg0: i32) -> (i32, i32) {
    %c0_i32 = arith.constant 0 : i32
    %c0_i32_0 = arith.constant 0 : i32
    %c0_i32_1 = arith.constant 0 : i32
    return %c0_i32, %c0_i32_0 : i32, i32
  }
  func.func @transform_4(%arg0: i32) -> (i32, i32) {
    %c0_i32 = arith.constant 0 : i32
    %c0_i32_0 = arith.constant 0 : i32
    %c0_i32_1 = arith.constant 0 : i32
    return %c0_i32, %c0_i32_0 : i32, i32
  }
  func.func @transform_5(%arg0: i32) -> (i32, i32) {
    %c0_i32 = arith.constant 0 : i32
    %c0_i32_0 = arith.constant 0 : i32
    %c0_i32_1 = arith.constant 0 : i32
    return %c0_i32, %c0_i32_0 : i32, i32
  }
  func.func @transform_6(%arg0: i32) -> (i32, i32) {
    %c0_i32 = arith.constant 0 : i32
    %c0_i32_0 = arith.constant 0 : i32
    %c0_i32_1 = arith.constant 0 : i32
    return %c0_i32, %c0_i32_0 : i32, i32
  }
  func.func @transform_7(%arg0: i32) -> (i32, i32) {
    %c0_i32 = arith.constant 0 : i32
    %c0_i32_0 = arith.constant 0 : i32
    %c0_i32_1 = arith.constant 0 : i32
    return %c0_i32, %c0_i32_0 : i32, i32
  }
  func.func @transform_8(%arg0: i32) -> (i32, i32) {
    %c0_i32 = arith.constant 0 : i32
    %c0_i32_0 = arith.constant 0 : i32
    %c0_i32_1 = arith.constant 0 : i32
    return %c0_i32, %c0_i32_0 : i32, i32
  }
  func.func @transform_9(%arg0: i32) -> (i32, i32) {
    %c0_i32 = arith.constant 0 : i32
    %c0_i32_0 = arith.constant 0 : i32
    return %arg0, %c0_i32 : i32, i32
  }
}

</mosaic_0001>

<bundles_post_ra>
// kernel: tpu_custom_call.1
= control target key start
LH: loop header
LB: loop body
LE: loop exit
PB: predicated region body
PF: predicated region fallthrough
CT: control target
= control target key end

     0   :  { %14 = vsyncpa [#allocation3], 0  ;;  %s9651_s0 = inlined_call_operand.hbm [shape: bf16[16,768], index: 0, kind: input, shape index: {}]   ;;  %s9652_s1 = inlined_call_operand.hbm [shape: bf16[768,384], index: 1, kind: input, shape index: {}]   ;;  %s9653_s2 = inlined_call_operand.hbm [shape: f32[1,384], index: 2, kind: input, shape index: {}]   ;;  %s9654_s3 = inlined_call_operand.hbm [shape: bf16[384,1536], index: 3, kind: input, shape index: {}]   ;;  %s9655_s4 = inlined_call_operand.hbm [shape: f32[1,1536], index: 4, kind: input, shape index: {}]   ;;  %s9656_s5 = inlined_call_operand.hbm [shape: bf16[1536,384], index: 5, kind: input, shape index: {}]   ;;  %s9657_s6 = inlined_call_operand.hbm [shape: f32[1,384], index: 6, kind: input, shape index: {}]   ;;  %s9658_s7 = inlined_call_operand.hbm [shape: bf16[384,128], index: 7, kind: input, shape index: {}]   ;;  %s9659_s8 = inlined_call_operand.hbm [shape: f32[1,128], index: 8, kind: input, shape index: {}]   ;;  %s9660_s9 = inlined_call_operand.hbm [shape: f32[16,128], index: 9, kind: output, shape index: {}]  }
   0x1   :  { %15 = vsyncpa [#allocation6], 0 }
   0x2   :  { %16 = vsyncpa [#allocation9], 0 }
   0x3   :  { %17 = vsyncpa [#allocation12], 0 }
   0x4   :  { %18 = vsyncpa [#allocation15], 0 }
   0x5   :  { %19 = vsyncpa [#allocation4], 0  ;;  %s9134_s30 = smov [#allocation5]   ;;  %s8902_s13 = scalar_lea.hbm %s9652_s1, 18432 }
   0x6   :  { %s37_s10 = sshll.u32 %s9134_s30, 4  ;;  %p8903_p0 = scmp.ne.s32.totalorder %s9652_s1, %s8902_s13  ;;  %s38_s10 = int_to_ptr.vmem [resolvable:$true] %s37_s10 }
   0x7   :  { %p8906_p1 = scmp.lt.u32.totalorder %s8902_s13, %s9652_s1 }
   0x9   :  { %p8908_p2 = pnand %p8906_p1, %p8903_p0 }
   0xb   :  { %8911 = shalt.err (!%p8908_p2)
}
   0xc   :  { %s8912_s18 = scalar_lea.vmem %s38_s10, 18432  ;;  %p8917_p4 = scmp.lt.s32.totalorder %s38_s10, %s38_s10 }
   0xd   :  { %p8913_p3 = scmp.ne.s32.totalorder %s38_s10, %s8912_s18  ;;  %p8918_p5 = scmp.lt.s32.totalorder %s8912_s18, %s8912_s18 }
   0xf   :  { %p8919_p6 = por %p8918_p5, %p8917_p4 }
  0x11   :  { %p8920_p7 = pnand %p8919_p6, %p8913_p3 }
  0x13   :  { %8923 = shalt.err (!%p8920_p7)
}
  0x14   :  { %s9135_s19 = smov 192   ;;  %s9136_s20 = smov 12  }
  0x15   :  { %43 = dma.hbm_to_vmem [thread:$0]  %s9652_s1, 18432, %s38_s10, [#allocation6], %s9135_s19, %s9135_s19, %s9136_s20  }
  0x16   :  { %s9137_s23 = smov [#allocation8]   ;;  %s8924_s27 = scalar_lea.hbm %s9654_s3, 36864 }
  0x17   :  { %s59_s24 = sshll.u32 %s9137_s23, 4  ;;  %p8925_p8 = scmp.ne.s32.totalorder %s9654_s3, %s8924_s27  ;;  %s60_s24 = int_to_ptr.vmem [resolvable:$true] %s59_s24 }
  0x18   :  { %p8928_p9 = scmp.lt.u32.totalorder %s8924_s27, %s9654_s3 }
  0x1a   :  { %p8930_p10 = pnand %p8928_p9, %p8925_p8 }
  0x1c   :  { %8933 = shalt.err (!%p8930_p10)
}
  0x1d   :  { %s8934_s12 = scalar_lea.vmem %s60_s24, 36864  ;;  %p8939_p12 = scmp.lt.s32.totalorder %s60_s24, %s60_s24 }
  0x1e   :  { %p8935_p11 = scmp.ne.s32.totalorder %s60_s24, %s8934_s12  ;;  %p8940_p13 = scmp.lt.s32.totalorder %s8934_s12, %s8934_s12 }
  0x20   :  { %p8941_p0 = por %p8940_p13, %p8939_p12 }
  0x22   :  { %p8942_p1 = pnand %p8941_p0, %p8935_p11 }
  0x24   :  { %8945 = shalt.err (!%p8942_p1)
}
  0x25   :  { %s9138_s1 = smov 768   ;;  %s9139_s10 = smov 48  }
  0x26   :  { %65 = dma.hbm_to_vmem [thread:$0]  %s9654_s3, 36864, %s60_s24, [#allocation9], %s9138_s1, %s9138_s1, %s9139_s10  }
  0x27   :  { %s9140_s15 = smov [#allocation11]   ;;  %s9141_s17 = smov [#allocation14]  }
  0x28   :  { %s81_s16 = sshll.u32 %s9140_s15, 4  ;;  %s103_s18 = sshll.u32 %s9141_s17, 4  ;;  %s82_s16 = int_to_ptr.vmem [resolvable:$true] %s81_s16  ;;  %s9234_s18 = int_to_ptr.vmem [resolvable:$true] %s103_s18 }
  0x29   :  { %s8946_s23 = scalar_lea.hbm %s9656_s5, 36864 }
  0x2a   :  { %p8947_p2 = scmp.ne.s32.totalorder %s9656_s5, %s8946_s23  ;;  %p8950_p3 = scmp.lt.u32.totalorder %s8946_s23, %s9656_s5 }
  0x2c   :  { %p8952_p4 = pnand %p8950_p3, %p8947_p2 }
  0x2e   :  { %8955 = shalt.err (!%p8952_p4)
}
  0x2f   :  { %s8956_s3 = scalar_lea.vmem %s82_s16, 36864  ;;  %p8961_p6 = scmp.lt.s32.totalorder %s82_s16, %s82_s16 }
  0x30   :  { %p8957_p5 = scmp.ne.s32.totalorder %s82_s16, %s8956_s3  ;;  %p8962_p7 = scmp.lt.s32.totalorder %s8956_s3, %s8956_s3 }
  0x32   :  { %p8963_p8 = por %p8962_p7, %p8961_p6 }
  0x34   :  { %p8964_p9 = pnand %p8963_p8, %p8957_p5 }
  0x36   :  { %8967 = shalt.err (!%p8964_p9)
}
  0x37   :  { %87 = dma.hbm_to_vmem [thread:$0]  %s9656_s5, 36864, %s82_s16, [#allocation12], %s9135_s19, %s9135_s19, %s9136_s20  }
  0x38   :  { %s8968_s12 = scalar_lea.hbm %s9658_s7, 3072 }
  0x39   :  { %p8969_p10 = scmp.ne.s32.totalorder %s9658_s7, %s8968_s12  ;;  %p8972_p11 = scmp.lt.u32.totalorder %s8968_s12, %s9658_s7 }
  0x3b   :  { %p8974_p12 = pnand %p8972_p11, %p8969_p10 }
  0x3d   :  { %8977 = shalt.err (!%p8974_p12)
}
  0x3e   :  { %s8978_s15 = scalar_lea.vmem %s9234_s18, 3072  ;;  %p8983_p0 = scmp.lt.s32.totalorder %s9234_s18, %s9234_s18 }
  0x3f   :  { %p8979_p13 = scmp.ne.s32.totalorder %s9234_s18, %s8978_s15  ;;  %p8984_p1 = scmp.lt.s32.totalorder %s8978_s15, %s8978_s15 }
  0x41   :  { %p8985_p2 = por %p8984_p1, %p8983_p0 }
  0x43   :  { %p8986_p3 = pnand %p8985_p2, %p8979_p13 }
  0x45   :  { %8989 = shalt.err (!%p8986_p3)
}
  0x46   :  { %s9142_s5 = smov 64   ;;  %s9143_s19 = smov 4  }
  0x47   :  { %109 = dma.hbm_to_vmem [thread:$0]  %s9658_s7, 3072, %s9234_s18, [#allocation15], %s9142_s5, %s9142_s5, %s9143_s19  }
  0x48   :  { %s9144_s17 = smov [#allocation2]   ;;  %s8990_s25 = scalar_lea.hbm %s9651_s0, 768 }
  0x49   :  { %s25_s21 = sshll.u32 %s9144_s17, 4  ;;  %p8991_p4 = scmp.ne.s32.totalorder %s9651_s0, %s8990_s25  ;;  %s26_s21 = int_to_ptr.vmem [resolvable:$true] %s25_s21 }
  0x4a   :  { %p8994_p5 = scmp.lt.u32.totalorder %s8990_s25, %s9651_s0 }
  0x4c   :  { %p8996_p6 = pnand %p8994_p5, %p8991_p4 }
  0x4e   :  { %8999 = shalt.err (!%p8996_p6)
}
  0x4f   :  { %s9000_s24 = scalar_lea.vmem %s26_s21, 768  ;;  %p9005_p8 = scmp.lt.s32.totalorder %s26_s21, %s26_s21 }
  0x50   :  { %p9001_p7 = scmp.ne.s32.totalorder %s26_s21, %s9000_s24  ;;  %p9006_p9 = scmp.lt.s32.totalorder %s9000_s24, %s9000_s24 }
  0x52   :  { %p9007_p10 = por %p9006_p9, %p9005_p8 }
  0x54   :  { %p9008_p11 = pnand %p9007_p10, %p9001_p7 }
  0x56   :  { %9011 = shalt.err (!%p9008_p11)
}
  0x57   :  { %s9145_s7 = smov 384   ;;  %s9146_s18 = smov 24  }
  0x58   :  { %31 = dma.hbm_to_vmem [thread:$0]  %s9651_s0, 768, %s26_s21, [#allocation3], %s9145_s7, %s9145_s7, %s9146_s18  }
  0x59   :  { %s9147_s11 = smov [#allocation7]   ;;  %s9148_s1 = smov [#allocation10]  }
  0x5a   :  { %s50_s12 = sshll.u32 %s9147_s11, 4  ;;  %s72_s10 = sshll.u32 %s9148_s1, 4  ;;  %s51_s12 = int_to_ptr.vmem [resolvable:$true] %s50_s12  ;;  %s73_s10 = int_to_ptr.vmem [resolvable:$true] %s72_s10 }
  0x5b   :  { %s9012_s15 = scalar_lea.hbm %s9653_s2, 48 }
  0x5c   :  { %p9013_p12 = scmp.ne.s32.totalorder %s9653_s2, %s9012_s15  ;;  %p9016_p13 = scmp.lt.u32.totalorder %s9012_s15, %s9653_s2 }
  0x5e   :  { %p9018_p0 = pnand %p9016_p13, %p9013_p12 }
  0x60   :  { %9021 = shalt.err (!%p9018_p0)
}
  0x61   :  { %s9022_s0 = scalar_lea.vmem %s51_s12, 48  ;;  %s9026_s17 = scalar_lea.vmem %s51_s12, 64 }
  0x62   :  { %p9023_p1 = scmp.ne.s32.totalorder %s51_s12, %s9022_s0  ;;  %p9027_p2 = scmp.lt.s32.totalorder %s51_s12, %s51_s12 }
  0x63   :  { %p9028_p3 = scmp.lt.s32.totalorder %s9026_s17, %s9022_s0 }
  0x65   :  { %p9029_p4 = por %p9028_p3, %p9027_p2 }
  0x67   :  { %p9030_p5 = pnand %p9029_p4, %p9023_p1 }
  0x69   :  { %9033 = shalt.err (!%p9030_p5)
}
  0x6a   :  { %53 = dma.hbm_to_vmem [thread:$0]  %s9653_s2, 48, %s51_s12, [#allocation6]  }
  0x6b   :  { %s9034_s26 = scalar_lea.hbm %s9655_s4, 192 }
  0x6c   :  { %p9035_p6 = scmp.ne.s32.totalorder %s9655_s4, %s9034_s26  ;;  %p9038_p7 = scmp.lt.u32.totalorder %s9034_s26, %s9655_s4 }
  0x6e   :  { %p9040_p8 = pnand %p9038_p7, %p9035_p6 }
  0x70   :  { %9043 = shalt.err (!%p9040_p8)
}
  0x71   :  { %s9044_s7 = scalar_lea.vmem %s73_s10, 192  ;;  %p9049_p10 = scmp.lt.s32.totalorder %s73_s10, %s73_s10 }
  0x72   :  { %p9045_p9 = scmp.ne.s32.totalorder %s73_s10, %s9044_s7  ;;  %p9050_p11 = scmp.lt.s32.totalorder %s9044_s7, %s9044_s7 }
  0x74   :  { %p9051_p12 = por %p9050_p11, %p9049_p10 }
  0x76   :  { %p9052_p13 = pnand %p9051_p12, %p9045_p9 }
  0x78   :  { %9055 = shalt.err (!%p9052_p13)
}
  0x79   :  { %75 = dma.hbm_to_vmem [thread:$0]  %s9655_s4, 192, %s73_s10, [#allocation9]  }
  0x7a   :  { %s9149_s29 = smov [#allocation13]   ;;  %s9150_s11 = smov [#allocation16]  }
  0x7b   :  { %s94_s30 = sshll.u32 %s9149_s29, 4  ;;  %s116_s12 = sshll.u32 %s9150_s11, 4  ;;  %s95_s30 = int_to_ptr.vmem [resolvable:$true] %s94_s30  ;;  %s117_s12 = int_to_ptr.vmem [resolvable:$true] %s116_s12 }
  0x7c   :  { %s9056_s14 = scalar_lea.hbm %s9657_s6, 48 }
  0x7d   :  { %p9057_p0 = scmp.ne.s32.totalorder %s9657_s6, %s9056_s14  ;;  %p9060_p1 = scmp.lt.u32.totalorder %s9056_s14, %s9657_s6 }
  0x7f   :  { %p9062_p2 = pnand %p9060_p1, %p9057_p0 }
  0x81   :  { %9065 = shalt.err (!%p9062_p2)
}
  0x82   :  { %s9066_s4 = scalar_lea.vmem %s95_s30, 48  ;;  %s9070_s10 = scalar_lea.vmem %s95_s30, 64 }
  0x83   :  { %p9067_p3 = scmp.ne.s32.totalorder %s95_s30, %s9066_s4  ;;  %p9071_p4 = scmp.lt.s32.totalorder %s95_s30, %s95_s30 }
  0x84   :  { %p9072_p5 = scmp.lt.s32.totalorder %s9070_s10, %s9066_s4 }
  0x86   :  { %p9073_p6 = por %p9072_p5, %p9071_p4 }
  0x88   :  { %p9074_p7 = pnand %p9073_p6, %p9067_p3 }
  0x8a   :  { %9077 = shalt.err (!%p9074_p7)
}
  0x8b   :  { %97 = dma.hbm_to_vmem [thread:$0]  %s9657_s6, 48, %s95_s30, [#allocation12]  }
  0x8c   :  { %s9078_s22 = scalar_lea.hbm %s9659_s8, 16 }
  0x8d   :  { %p9079_p8 = scmp.ne.s32.totalorder %s9659_s8, %s9078_s22  ;;  %p9082_p9 = scmp.lt.u32.totalorder %s9078_s22, %s9659_s8 }
  0x8f   :  { %p9084_p10 = pnand %p9082_p9, %p9079_p8 }
  0x91   :  { %9087 = shalt.err (!%p9084_p10)
}
  0x92   :  { %s9088_s28 = scalar_lea.vmem %s117_s12, 16  ;;  %s9092_s3 = scalar_lea.vmem %s117_s12, 32 }
  0x93   :  { %p9089_p11 = scmp.ne.s32.totalorder %s117_s12, %s9088_s28  ;;  %p9093_p12 = scmp.lt.s32.totalorder %s117_s12, %s117_s12 }
  0x94   :  { %p9094_p13 = scmp.lt.s32.totalorder %s9092_s3, %s9088_s28 }
  0x96   :  { %p9095_p0 = por %p9094_p13, %p9093_p12 }
  0x98   :  { %p9096_p1 = pnand %p9095_p0, %p9089_p11 }
  0x9a   :  { %9099 = shalt.err (!%p9096_p1)
}
  0x9b   :  { %119 = dma.hbm_to_vmem [thread:$0]  %s9659_s8, 16, %s117_s12, [#allocation15]  }
  0x9c   :  { %9122 = dma.done.wait [#allocation3], 768  }
  0x9d   :  { %9123 = vsyncadd [#allocation3], 4294966528 }
  0x9e   :  { %9124 = dma.done.wait [#allocation6], 18480  }
  0x9f   :  { %9125 = vsyncadd [#allocation6], 4294948816 }
  0xa0   :  { %9126 = dma.done.wait [#allocation9], 37056  }
  0xa1   :  { %9127 = vsyncadd [#allocation9], 4294930240 }
  0xa2   :  { %9128 = dma.done.wait [#allocation12], 36912  }
  0xa3   :  { %9129 = vsyncadd [#allocation12], 4294930384 }
  0xa4   :  { %9130 = dma.done.wait [#allocation15], 3088  }
  0xa5   :  { %9131 = vsyncadd [#allocation15], 4294964208  ;;  %v7813_v0 = vld [vmem:[#allocation5 + $0x4] ss:$12 sps:$4 sm:$0xff]   ;;  %v7815_v1 = vld [vmem:[#allocation5] ss:$12 sps:$4 sm:$0xff]  }
  0xa6   :  { %1161 = vmatprep.subr.bf16.mxu0 %v7813_v0  ;;  %v7816_v2 = vld [vmem:[#allocation5 + $0x1c] ss:$12 sps:$4 sm:$0xff]   ;;  %v7818_v3 = vld [vmem:[#allocation5 + $0x18] ss:$12 sps:$4 sm:$0xff]   ;;  %v7819_v4 = vld [vmem:[#allocation5 + $0x34] ss:$12 sps:$4 sm:$0xff]  }
  0xa7   :  { %1162 = vmatpush1.bf16.msra.mxu0 %v7815_v1  ;;  %v7821_v5 = vld [vmem:[#allocation5 + $0x30] ss:$12 sps:$4 sm:$0xff]   ;;  %v7822_v6 = vld [vmem:[#allocation5 + $0x4c] ss:$12 sps:$4 sm:$0xff]   ;;  %v7824_v7 = vld [vmem:[#allocation5 + $0x48] ss:$12 sps:$4 sm:$0xff]  }
  0xa8   :  { %1163 = vmatprep.subr.bf16.mxu0 %v7816_v2  ;;  %v7825_v8 = vld [vmem:[#allocation5 + $0x64] ss:$12 sps:$4 sm:$0xff]   ;;  %v7827_v9 = vld [vmem:[#allocation5 + $0x60] ss:$12 sps:$4 sm:$0xff]   ;;  %v7828_v10 = vld [vmem:[#allocation5 + $0x7c] ss:$12 sps:$4 sm:$0xff]  }
  0xa9   :  { %v7830_v11 = vld [vmem:[#allocation5 + $0x78] ss:$12 sps:$4 sm:$0xff]   ;;  %v7831_v12 = vld [vmem:[#allocation5 + $0x94] ss:$12 sps:$4 sm:$0xff]   ;;  %v7833_v14 = vld [vmem:[#allocation5 + $0x90] ss:$12 sps:$4 sm:$0xff]  }
  0xaa   :  { %v7863_v13 = vld [vmem:[#allocation2 + $0x4] ss:$24 sps:$4 sm:$0xff]   ;;  %v7837_v19 = vld [vmem:[#allocation5 + $0xc4] ss:$12 sps:$4 sm:$0xff]   ;;  %v7840_v23 = vld [vmem:[#allocation5 + $0xdc] ss:$12 sps:$4 sm:$0xff]  }
  0xab   :  { %1164 = vmatpush1.bf16.msra.mxu0 %v7818_v3  ;;  %v7834_v15 = vld [vmem:[#allocation5 + $0xac] ss:$12 sps:$4 sm:$0xff]   ;;  %1193 = vmatprep.mubr.bf16.mxu0 %v7863_v13  ;;  %v7867_v16 = vld [vmem:[#allocation5 + $0xc8] ss:$12 sps:$4 sm:$0xff]   ;;  %v7882_v27 = vld [vmem:[#allocation5 + $0x110] ss:$12 sps:$4 sm:$0xff]  }
  0xac   :  { %1165 = vmatprep.subr.bf16.mxu0 %v7819_v4  ;;  %v7868_v17 = vld [vmem:[#allocation5 + $0x8] ss:$12 sps:$4 sm:$0xff]   ;;  %1322 = vmatprep.mubr.bf16.mxu1 %v7863_v13  ;;  %v7872_v20 = vld [vmem:[#allocation5 + $0xe0] ss:$12 sps:$4 sm:$0xff]   ;;  %v7877_v24 = vld [vmem:[#allocation5 + $0xf8] ss:$12 sps:$4 sm:$0xff]  }
  0xad   :  { %v7836_v18 = vld [vmem:[#allocation5 + $0xa8] ss:$12 sps:$4 sm:$0xff]   ;;  %7457 = vmatprep.subr.bf16.mxu1 %v7867_v16  ;;  %v7873_v21 = vld [vmem:[#allocation5 + $0x20] ss:$12 sps:$4 sm:$0xff]   ;;  %v7878_v25 = vld [vmem:[#allocation5 + $0x38] ss:$12 sps:$4 sm:$0xff]  }
  0xae   :  { %7458 = vmatpush3.bf16.msra.mxu1 %v7868_v17  ;;  %v7839_v22 = vld [vmem:[#allocation5 + $0xc0] ss:$12 sps:$4 sm:$0xff]   ;;  %v7842_v26 = vld [vmem:[#allocation5 + $0xd8] ss:$12 sps:$4 sm:$0xff]   ;;  %v7883_v28 = vld [vmem:[#allocation5 + $0x50] ss:$12 sps:$4 sm:$0xff]  }
  0xaf   :  { %1166 = vmatpush1.bf16.msra.mxu0 %v7821_v5  ;;  %7459 = vmatprep.subr.bf16.mxu1 %v7872_v20  ;;  %v7843_v29 = vld [vmem:[#allocation5 + $0xf4] ss:$12 sps:$4 sm:$0xff]   ;;  %v7845_v30 = vld [vmem:[#allocation5 + $0xf0] ss:$12 sps:$4 sm:$0xff]   ;;  %v7846_v33 = vld [vmem:[#allocation5 + $0x10c] ss:$12 sps:$4 sm:$0xff]  }
  0xb0   :  { %1167 = vmatprep.subr.bf16.mxu0 %v7822_v6  ;;  %v7887_v31 = vld [vmem:[#allocation5 + $0x128] ss:$12 sps:$4 sm:$0xff]   ;;  %v7892_v34 = vld [vmem:[#allocation5 + $0x140] ss:$12 sps:$4 sm:$0xff]   ;;  %v7849_v36 = vld [vmem:[#allocation5 + $0x124] ss:$12 sps:$4 sm:$0xff]  }
  0xb1   :  { %v7888_v32 = vld [vmem:[#allocation5 + $0x68] ss:$12 sps:$4 sm:$0xff]   ;;  %v7893_v37 = vld [vmem:[#allocation5 + $0x80] ss:$12 sps:$4 sm:$0xff]   ;;  %v7897_v38 = vld [vmem:[#allocation5 + $0x158] ss:$12 sps:$4 sm:$0xff]  }
  0xb2   :  { %7460 = vmatpush3.bf16.msra.mxu1 %v7873_v21  ;;  %v7848_v35 = vld [vmem:[#allocation5 + $0x108] ss:$12 sps:$4 sm:$0xff]   ;;  %v7851_v39 = vld [vmem:[#allocation5 + $0x120] ss:$12 sps:$4 sm:$0xff]   ;;  %v7898_v41 = vld [vmem:[#allocation5 + $0x98] ss:$12 sps:$4 sm:$0xff]  }
  0xb3   :  { %1168 = vmatpush1.bf16.msra.mxu0 %v7824_v7  ;;  %7461 = vmatprep.subr.bf16.mxu1 %v7877_v24  ;;  %v7852_v40 = vld [vmem:[#allocation5 + $0x13c] ss:$12 sps:$4 sm:$0xff]   ;;  %v7854_v43 = vld [vmem:[#allocation5 + $0x138] ss:$12 sps:$4 sm:$0xff]   ;;  %v7855_v44 = vld [vmem:[#allocation5 + $0x154] ss:$12 sps:$4 sm:$0xff]  }
  0xb4   :  { %1169 = vmatprep.subr.bf16.mxu0 %v7825_v8  ;;  %v7902_v42 = vld [vmem:[#allocation5 + $0x170] ss:$12 sps:$4 sm:$0xff]   ;;  %v7907_v46 = vld [vmem:[#allocation5 + $0x248] ss:$12 sps:$4 sm:$0xff]   ;;  %v7858_v48 = vld [vmem:[#allocation5 + $0x16c] ss:$12 sps:$4 sm:$0xff]  }
  0xb5   :  { %v7903_v45 = vld [vmem:[#allocation5 + $0xb0] ss:$12 sps:$4 sm:$0xff]   ;;  %v7908_v50 = vld [vmem:[#allocation5 + $0x188] ss:$12 sps:$4 sm:$0xff]   ;;  %v7912_v51 = vld [vmem:[#allocation5 + $0x260] ss:$12 sps:$4 sm:$0xff]  }
  0xb6   :  { %7462 = vmatpush3.bf16.msra.mxu1 %v7878_v25  ;;  %v7857_v47 = vld [vmem:[#allocation5 + $0x150] ss:$12 sps:$4 sm:$0xff]   ;;  %v7860_v52 = vld [vmem:[#allocation5 + $0x168] ss:$12 sps:$4 sm:$0xff]   ;;  %v7913_v53 = vld [vmem:[#allocation5 + $0x1a0] ss:$12 sps:$4 sm:$0xff]  }
  0xb7   :  { %1170 = vmatpush1.bf16.msra.mxu0 %v7827_v9  ;;  %7463 = vmatprep.subr.bf16.mxu1 %v7882_v27  ;;  %v7861_v49 = vld [vmem:[#allocation2] ss:$24 sps:$4 sm:$0xff]   ;;  %v7917_v55 = vld [vmem:[#allocation5 + $0x278] ss:$12 sps:$4 sm:$0xff]   ;;  %v7864_v56 = vld [vmem:[#allocation5 + $0x180] ss:$12 sps:$4 sm:$0xff]  }
  0xb8   :  { %1171 = vmatprep.subr.bf16.mxu0 %v7828_v10  ;;  %v7866_v54 = vld [vmem:[#allocation5 + $0x184] ss:$12 sps:$4 sm:$0xff]   ;;  %v7871_v57 = vld [vmem:[#allocation5 + $0x19c] ss:$12 sps:$4 sm:$0xff]   ;;  %v7876_v61 = vld [vmem:[#allocation5 + $0x1b4] ss:$12 sps:$4 sm:$0xff]  }
  0xb9   :  { %v7918_v58 = vld [vmem:[#allocation5 + $0x1b8] ss:$12 sps:$4 sm:$0xff]   ;;  %v7922_v59 = vld [vmem:[#allocation5 + $0x290] ss:$12 sps:$4 sm:$0xff]   ;;  %v7927_v63 = vld [vmem:[#allocation5 + $0x2a8] ss:$12 sps:$4 sm:$0xff]  }
  0xba   :  { %7464 = vmatpush3.bf16.msra.mxu1 %v7883_v28  ;;  %v7869_v60 = vld [vmem:[#allocation5 + $0x198] ss:$12 sps:$4 sm:$0xff]   ;;  %v7923_v62 = vld [vmem:[#allocation5 + $0x1d0] ss:$12 sps:$4 sm:$0xff]   ;;  %v7928_v2 = vld [vmem:[#allocation5 + $0x1e8] ss:$12 sps:$4 sm:$0xff]  }
  0xbb   :  { %1172 = vmatpush1.bf16.msra.mxu0 %v7830_v11  ;;  %7465 = vmatprep.subr.bf16.mxu1 %v7887_v31  ;;  %v7874_v0 = vld [vmem:[#allocation5 + $0x1b0] ss:$12 sps:$4 sm:$0xff]   ;;  %v7881_v1 = vld [vmem:[#allocation5 + $0x1cc] ss:$12 sps:$4 sm:$0xff]   ;;  %v7879_v4 = vld [vmem:[#allocation5 + $0x1c8] ss:$12 sps:$4 sm:$0xff]  }
  0xbc   :  { %1173 = vmatprep.subr.bf16.mxu0 %v7831_v12  ;;  %v7932_v3 = vld [vmem:[#allocation5 + $0x2c0] ss:$12 sps:$4 sm:$0xff]   ;;  %v7886_v5 = vld [vmem:[#allocation5 + $0x1e4] ss:$12 sps:$4 sm:$0xff]   ;;  %v7946_v8 = vld [vmem:[#allocation2 + $0xc] ss:$24 sps:$4 sm:$0xff]  }
  0xbd   :  { %v7933_v6 = vld [vmem:[#allocation5 + $0x200] ss:$12 sps:$4 sm:$0xff]   ;;  %v7937_v7 = vld [vmem:[#allocation5 + $0x2d8] ss:$12 sps:$4 sm:$0xff]   ;;  %v7891_v10 = vld [vmem:[#allocation5 + $0x1fc] ss:$12 sps:$4 sm:$0xff]  }
  0xbe   :  { %7466 = vmatpush3.bf16.msra.mxu1 %v7888_v32  ;;  %v7884_v9 = vld [vmem:[#allocation5 + $0x1e0] ss:$12 sps:$4 sm:$0xff]   ;;  %v7938_v11 = vld [vmem:[#allocation5 + $0x218] ss:$12 sps:$4 sm:$0xff]   ;;  %v7942_v12 = vld [vmem:[#allocation5 + $0x2f0] ss:$12 sps:$4 sm:$0xff]  }
  0xbf   :  { %1174 = vmatpush1.bf16.msra.mxu0 %v7833_v14  ;;  %7467 = vmatprep.subr.bf16.mxu1 %v7892_v34  ;;  %v7889_v13 = vld [vmem:[#allocation5 + $0x1f8] ss:$12 sps:$4 sm:$0xff]   ;;  %v7896_v14 = vld [vmem:[#allocation5 + $0x214] ss:$12 sps:$4 sm:$0xff]   ;;  %v7894_v17 = vld [vmem:[#allocation5 + $0x210] ss:$12 sps:$4 sm:$0xff]  }
  0xc0   :  { %1175 = vmatprep.subr.bf16.mxu0 %v7834_v15  ;;  %v7943_v15 = vld [vmem:[#allocation5 + $0x230] ss:$12 sps:$4 sm:$0xff]   ;;  %v7950_v16 = vld [vmem:[#allocation5 + $0x3c8] ss:$12 sps:$4 sm:$0xff]   ;;  %v7901_v20 = vld [vmem:[#allocation5 + $0x22c] ss:$12 sps:$4 sm:$0xff]  }
  0xc1   :  { %v7955_v21 = vld [vmem:[#allocation5 + $0x3e0] ss:$12 sps:$4 sm:$0xff]   ;;  %v7960_v25 = vld [vmem:[#allocation5 + $0x3f8] ss:$12 sps:$4 sm:$0xff]   ;;  %v7911_v27 = vld [vmem:[#allocation5 + $0x25c] ss:$12 sps:$4 sm:$0xff]  }
  0xc2   :  { %7468 = vmatpush3.bf16.msra.mxu1 %v7893_v37  ;;  %v7956_v24 = vld [vmem:[#allocation5 + $0x320] ss:$12 sps:$4 sm:$0xff]   ;;  %v7961_v28 = vld [vmem:[#allocation5 + $0x338] ss:$12 sps:$4 sm:$0xff]   ;;  %v7966_v32 = vld [vmem:[#allocation5 + $0x350] ss:$12 sps:$4 sm:$0xff]  }
  0xc3   :  { %1176 = vmatpush1.bf16.msra.mxu0 %v7836_v18  ;;  %7469 = vmatprep.subr.bf16.mxu1 %v7897_v38  ;;  %v9328_v18 = vld [vmem:[#allocation2 + $0x8] ss:$24 sps:$4 sm:$0xff]   ;;  %v7916_v31 = vld [vmem:[#allocation5 + $0x274] ss:$12 sps:$4 sm:$0xff]   ;;  %vm9153_vm0 = vmmov 0   ;;  %s9154_s8 = smov [#allocation17]  }
  0xc4   :  { %1177 = vmatprep.subr.bf16.mxu0 %v7837_v19  ;;  %v7951_v19 = vld [vmem:[#allocation5 + $0x308] ss:$12 sps:$4 sm:$0xff]   ;;  %v7914_v34 = vld [vmem:[#allocation5 + $0x270] ss:$12 sps:$4 sm:$0xff]   ;;  %v7975_v37 = vld [vmem:[#allocation5 + $0x440] ss:$12 sps:$4 sm:$0xff]  }
  0xc5   :  { %v7919_v38 = vld [vmem:[#allocation5 + $0x288] ss:$12 sps:$4 sm:$0xff]   ;;  %s6690_s7 = sshll.u32 %s9154_s8, 4  ;;  %s6691_s7 = int_to_ptr.vmem [resolvable:$true] %s6690_s7 }
  0xc6   :  { %7470 = vmatpush3.bf16.msra.mxu1 %v7898_v41  ;;  %v7976_v41 = vld [vmem:[#allocation5 + $0x380] ss:$12 sps:$4 sm:$0xff]   ;;  %s9100_s2 = scalar_lea.vmem %s6691_s7, 256  ;;  %p9105_p3 = scmp.lt.s32.totalorder %s6691_s7, %s6691_s7 }
  0xc7   :  { %1178 = vmatpush1.bf16.msra.mxu0 %v7839_v22  ;;  %7471 = vmatprep.subr.bf16.mxu1 %v7902_v42  ;;  %v7899_v22 = vld [vmem:[#allocation5 + $0x228] ss:$12 sps:$4 sm:$0xff]   ;;  %v7980_v42 = vld [vmem:[#allocation5 + $0x458] ss:$12 sps:$4 sm:$0xff]   ;;  %p9101_p2 = scmp.ne.s32.totalorder %s6691_s7, %s9100_s2  ;;  %p9106_p4 = scmp.lt.s32.totalorder %s9100_s2, %s9100_s2 }
  0xc8   :  { %1179 = vmatprep.subr.bf16.mxu0 %v7840_v23  ;;  %v7906_v23 = vld [vmem:[#allocation5 + $0x244] ss:$12 sps:$4 sm:$0xff]  }
  0xc9   :  { %p9107_p5 = por %p9106_p4, %p9105_p3 }
  0xca   :  { %7472 = vmatpush3.bf16.msra.mxu1 %v7903_v45  ;;  %v7981_v45 = vld [vmem:[#allocation5 + $0x398] ss:$12 sps:$4 sm:$0xff]  }
  0xcb   :  { %1180 = vmatpush1.bf16.msra.mxu0 %v7842_v26  ;;  %7479 = vmatprep.subr.bf16.mxu1 %v7907_v46  ;;  %v7904_v26 = vld [vmem:[#allocation5 + $0x240] ss:$12 sps:$4 sm:$0xff]   ;;  %v7985_v46 = vld [vmem:[#allocation5 + $0x470] ss:$12 sps:$4 sm:$0xff]   ;;  %p9108_p6 = pnand %p9107_p5, %p9101_p2 }
  0xcc   :  { %1181 = vmatprep.subr.bf16.mxu0 %v7843_v29  ;;  %v7965_v29 = vld [vmem:[#allocation5 + $0x410] ss:$12 sps:$4 sm:$0xff]  }
  0xcd   :  { %1323 = vmatmul.mubr.bf16.vlgmr.msra.gmra.mrb[0].mxu1 %v7861_v49 }
  0xce   :  { %7480 = vmatpush3.bf16.msra.mxu1 %v7908_v50  ;;  %1363 = vmatprep.mubr.bf16.mxu1 %v7946_v8  ;;  %v8016_v50 = vld [vmem:[#allocation8 + $0x4] ss:$48 sps:$4 sm:$0xff]  }
  0xcf   :  { %1182 = vmatpush1.bf16.msra.mxu0 %v7845_v30  ;;  %7481 = vmatprep.subr.bf16.mxu1 %v7912_v51  ;;  %v7909_v30 = vld [vmem:[#allocation5 + $0x258] ss:$12 sps:$4 sm:$0xff]   ;;  %v7934_v51 = vld [vmem:[#allocation5 + $0x2d0] ss:$12 sps:$4 sm:$0xff]  }
  0xd0   :  { %1183 = vmatprep.subr.bf16.mxu0 %v7846_v33  ;;  %v7970_v33 = vld [vmem:[#allocation5 + $0x428] ss:$12 sps:$4 sm:$0xff]  }
  0xd2   :  { %7482 = vmatpush3.bf16.msra.mxu1 %v7913_v53  ;;  %v7941_v53 = vld [vmem:[#allocation5 + $0x2ec] ss:$12 sps:$4 sm:$0xff]  }
  0xd3   :  { %1184 = vmatpush1.bf16.msra.mxu0 %v7848_v35  ;;  %7483 = vmatprep.subr.bf16.mxu1 %v7917_v55  ;;  %v7921_v35 = vld [vmem:[#allocation5 + $0x28c] ss:$12 sps:$4 sm:$0xff]  }
  0xd4   :  { %1185 = vmatprep.subr.bf16.mxu0 %v7849_v36  ;;  %v7971_v36 = vld [vmem:[#allocation5 + $0x368] ss:$12 sps:$4 sm:$0xff]  }
  0xd5   :  { %v8022_v55 = vld [vmem:[#allocation8 + $0x64] ss:$48 sps:$4 sm:$0xff]  }
  0xd6   :  { %7484 = vmatpush3.bf16.msra.mxu1 %v7918_v58  ;;  %v8020_v58 = vld [vmem:[#allocation8 + $0x60] ss:$48 sps:$4 sm:$0xff]  }
  0xd7   :  { %1186 = vmatpush1.bf16.msra.mxu0 %v7851_v39  ;;  %7485 = vmatprep.subr.bf16.mxu1 %v7922_v59  ;;  %v7992_v39 = vld [vmem:[#allocation2 + $0x14] ss:$24 sps:$4 sm:$0xff]   ;;  %v8028_v59 = vld [vmem:[#allocation8 + $0xc4] ss:$48 sps:$4 sm:$0xff]  }
  0xd8   :  { %1187 = vmatprep.subr.bf16.mxu0 %v7852_v40  ;;  %v7926_v40 = vld [vmem:[#allocation5 + $0x2a4] ss:$12 sps:$4 sm:$0xff]  }
  0xda   :  { %7486 = vmatpush3.bf16.msra.mxu1 %v7923_v62  ;;  %v8026_v62 = vld [vmem:[#allocation8 + $0xc0] ss:$48 sps:$4 sm:$0xff]  }
  0xdb   :  { %1188 = vmatpush1.bf16.msra.mxu0 %v7854_v43  ;;  %7487 = vmatprep.subr.bf16.mxu1 %v7927_v63  ;;  %v7924_v43 = vld [vmem:[#allocation5 + $0x2a0] ss:$12 sps:$4 sm:$0xff]   ;;  %v7952_v63 = vld [vmem:[#allocation5 + $0x318] ss:$12 sps:$4 sm:$0xff]  }
  0xdc   :  { %1189 = vmatprep.subr.bf16.mxu0 %v7855_v44  ;;  %v7931_v44 = vld [vmem:[#allocation5 + $0x2bc] ss:$12 sps:$4 sm:$0xff]  }
  0xde   :  { %7488 = vmatpush3.bf16.msra.mxu1 %v7928_v2  ;;  %v8032_v2 = vld [vmem:[#allocation8 + $0x120] ss:$48 sps:$4 sm:$0xff]  }
  0xdf   :  { %1190 = vmatpush1.bf16.msra.mxu0 %v7857_v47  ;;  %7489 = vmatprep.subr.bf16.mxu1 %v7932_v3  ;;  %v7929_v47 = vld [vmem:[#allocation5 + $0x2b8] ss:$12 sps:$4 sm:$0xff]  }
  0xe0   :  { %1191 = vmatprep.subr.bf16.mxu0 %v7858_v48  ;;  %v7986_v48 = vld [vmem:[#allocation5 + $0x3b0] ss:$12 sps:$4 sm:$0xff]   ;;  %v8040_v3 = vld [vmem:[#allocation8 + $0x184] ss:$48 sps:$4 sm:$0xff]  }
  0xe2   :  { %7490 = vmatpush3.bf16.msra.mxu1 %v7933_v6  ;;  %v8038_v6 = vld [vmem:[#allocation8 + $0x180] ss:$48 sps:$4 sm:$0xff]  }
  0xe3   :  { %1192 = vmatpush1.bf16.msra.mxu0 %v7860_v52  ;;  %7491 = vmatprep.subr.bf16.mxu1 %v7937_v7  ;;  %v9331_v52 = vld [vmem:[#allocation2 + $0x10] ss:$24 sps:$4 sm:$0xff]   ;;  %v7962_v7 = vld [vmem:[#allocation5 + $0x348] ss:$12 sps:$4 sm:$0xff]  }
  0xe4   :  { %1204 = vmatprep.subr.bf16.mxu0 %v7866_v54  ;;  %v8014_v54 = vld [vmem:[#allocation8] ss:$48 sps:$4 sm:$0xff]  }
  0xe6   :  { %1194 = vmatmul.mubr.bf16.vlgmr.msra.gmra.mrb[0].mxu0 %v7861_v49  ;;  %7492 = vmatpush3.bf16.msra.mxu1 %v7938_v11  ;;  %v7936_v49 = vld [vmem:[#allocation5 + $0x2d4] ss:$12 sps:$4 sm:$0xff]   ;;  %v7972_v11 = vld [vmem:[#allocation5 + $0x378] ss:$12 sps:$4 sm:$0xff]  }
  0xe7   :  { %1205 = vmatpush1.bf16.msra.mxu0 %v7864_v56  ;;  %1236 = vmatprep.mubr.bf16.mxu0 %v7946_v8  ;;  %v7939_v56 = vld [vmem:[#allocation5 + $0x2e8] ss:$12 sps:$4 sm:$0xff]   ;;  %v7969_v8 = vld [vmem:[#allocation5 + $0x364] ss:$12 sps:$4 sm:$0xff]  }
  0xe8   :  { %1206 = vmatprep.subr.bf16.mxu0 %v7871_v57  ;;  %7493 = vmatprep.subr.bf16.mxu1 %v7942_v12  ;;  %v7949_v57 = vld [vmem:[#allocation5 + $0x304] ss:$12 sps:$4 sm:$0xff]  }
  0xe9   :  { %v8044_v12 = vld [vmem:[#allocation8 + $0x1e0] ss:$48 sps:$4 sm:$0xff]  }
  0xea   :  { %7494 = vmatpush3.bf16.msra.mxu1 %v7943_v15  ;;  %v7977_v15 = vld [vmem:[#allocation5 + $0x390] ss:$12 sps:$4 sm:$0xff]  }
  0xeb   :  { %1207 = vmatpush1.bf16.msra.mxu0 %v7869_v60  ;;  %7501 = vmatprep.subr.bf16.mxu1 %v7950_v16  ;;  %v7947_v60 = vld [vmem:[#allocation5 + $0x300] ss:$12 sps:$4 sm:$0xff]  }
  0xec   :  { %1208 = vmatprep.subr.bf16.mxu0 %v7876_v61  ;;  %v7954_v61 = vld [vmem:[#allocation5 + $0x31c] ss:$12 sps:$4 sm:$0xff]   ;;  %v7984_v16 = vld [vmem:[#allocation5 + $0x3ac] ss:$12 sps:$4 sm:$0xff]  }
  0xed   :  { %1364 = vmatmul.mubr.bf16.vlgmr.msra.gmra.mrb[4].mxu1 %v9328_v18 }
  0xee   :  { %7502 = vmatpush3.bf16.msra.mxu1 %v7951_v19  ;;  %1404 = vmatprep.mubr.bf16.mxu1 %v7992_v39  ;;  %v7987_v19 = vld [vmem:[#allocation5 + $0x3c0] ss:$12 sps:$4 sm:$0xff]  }
  0xef   :  { %1209 = vmatpush1.bf16.msra.mxu0 %v7874_v0  ;;  %7503 = vmatprep.subr.bf16.mxu1 %v7955_v21  ;;  %v8034_v0 = vld [vmem:[#allocation8 + $0x124] ss:$48 sps:$4 sm:$0xff]  }
  0xf0   :  { %1210 = vmatprep.subr.bf16.mxu0 %v7881_v1  ;;  %v7959_v1 = vld [vmem:[#allocation5 + $0x334] ss:$12 sps:$4 sm:$0xff]   ;;  %v7993_v21 = vld [vmem:[#allocation5 + $0x3d8] ss:$12 sps:$4 sm:$0xff]  }
  0xf2   :  { %7504 = vmatpush3.bf16.msra.mxu1 %v7956_v24  ;;  %v8001_v24 = vld [vmem:[#allocation5 + $0x40c] ss:$12 sps:$4 sm:$0xff]  }
  0xf3   :  { %1211 = vmatpush1.bf16.msra.mxu0 %v7879_v4  ;;  %7505 = vmatprep.subr.bf16.mxu1 %v7960_v25  ;;  %v7957_v4 = vld [vmem:[#allocation5 + $0x330] ss:$12 sps:$4 sm:$0xff]   ;;  %v7999_v25 = vld [vmem:[#allocation5 + $0x408] ss:$12 sps:$4 sm:$0xff]  }
  0xf4   :  { %1212 = vmatprep.subr.bf16.mxu0 %v7886_v5  ;;  %v7964_v5 = vld [vmem:[#allocation5 + $0x34c] ss:$12 sps:$4 sm:$0xff]  }
  0xf6   :  { %7506 = vmatpush3.bf16.msra.mxu1 %v7961_v28  ;;  %v8007_v28 = vld [vmem:[#allocation5 + $0x43c] ss:$12 sps:$4 sm:$0xff]  }
  0xf7   :  { %1213 = vmatpush1.bf16.msra.mxu0 %v7884_v9  ;;  %7507 = vmatprep.subr.bf16.mxu1 %v7965_v29  ;;  %v7967_v9 = vld [vmem:[#allocation5 + $0x360] ss:$12 sps:$4 sm:$0xff]   ;;  %v8005_v29 = vld [vmem:[#allocation5 + $0x438] ss:$12 sps:$4 sm:$0xff]  }
  0xf8   :  { %1214 = vmatprep.subr.bf16.mxu0 %v7891_v10  ;;  %v7974_v10 = vld [vmem:[#allocation5 + $0x37c] ss:$12 sps:$4 sm:$0xff]  }
  0xfa   :  { %7508 = vmatpush3.bf16.msra.mxu1 %v7966_v32  ;;  %v8010_v32 = vld [vmem:[#allocation5 + $0x454] ss:$12 sps:$4 sm:$0xff]  }
  0xfb   :  { %1215 = vmatpush1.bf16.msra.mxu0 %v7889_v13  ;;  %7509 = vmatprep.subr.bf16.mxu1 %v7970_v33  ;;  %v8046_v13 = vld [vmem:[#allocation8 + $0x1e4] ss:$48 sps:$4 sm:$0xff]   ;;  %v8008_v33 = vld [vmem:[#allocation5 + $0x450] ss:$12 sps:$4 sm:$0xff]  }
  0xfc   :  { %1216 = vmatprep.subr.bf16.mxu0 %v7896_v14  ;;  %v7979_v14 = vld [vmem:[#allocation5 + $0x394] ss:$12 sps:$4 sm:$0xff]  }
  0xfe   :  { %7510 = vmatpush3.bf16.msra.mxu1 %v7971_v36  ;;  %v8019_v36 = vld [vmem:[#allocation8 + $0xc] ss:$48 sps:$4 sm:$0xff]  }
  0xff   :  { %1217 = vmatpush1.bf16.msra.mxu0 %v7894_v17  ;;  %7511 = vmatprep.subr.bf16.mxu1 %v7975_v37  ;;  %v7982_v17 = vld [vmem:[#allocation5 + $0x3a8] ss:$12 sps:$4 sm:$0xff]   ;;  %v8017_v37 = vld [vmem:[#allocation8 + $0x8] ss:$48 sps:$4 sm:$0xff]  }
 0x100   :  { %1218 = vmatprep.subr.bf16.mxu0 %v7901_v20  ;;  %v7995_v20 = vld [vmem:[#allocation5 + $0x3dc] ss:$12 sps:$4 sm:$0xff]  }
 0x102   :  { %7512 = vmatpush3.bf16.msra.mxu1 %v7976_v41  ;;  %v8029_v41 = vld [vmem:[#allocation8 + $0xc8] ss:$48 sps:$4 sm:$0xff]  }
 0x103   :  { %1219 = vmatpush1.bf16.msra.mxu0 %v7899_v22  ;;  %7513 = vmatprep.subr.bf16.mxu1 %v7980_v42  ;;  %v7998_v22 = vld [vmem:[#allocation5 + $0x3f4] ss:$12 sps:$4 sm:$0xff]  }
 0x104   :  { %1220 = vmatprep.subr.bf16.mxu0 %v7906_v23  ;;  %v7996_v23 = vld [vmem:[#allocation5 + $0x3f0] ss:$12 sps:$4 sm:$0xff]  }
 0x105   :  { %v8037_v42 = vld [vmem:[#allocation8 + $0x12c] ss:$48 sps:$4 sm:$0xff]  }
 0x106   :  { %7514 = vmatpush3.bf16.msra.mxu1 %v7981_v45  ;;  %v8041_v45 = vld [vmem:[#allocation8 + $0x188] ss:$48 sps:$4 sm:$0xff]  }
 0x107   :  { %1221 = vmatpush1.bf16.msra.mxu0 %v7904_v26  ;;  %7515 = vmatprep.subr.bf16.mxu1 %v7985_v46  ;;  %v8004_v26 = vld [vmem:[#allocation5 + $0x424] ss:$12 sps:$4 sm:$0xff]  }
 0x108   :  { %1222 = vmatprep.subr.bf16.mxu0 %v7911_v27  ;;  %v8002_v27 = vld [vmem:[#allocation5 + $0x420] ss:$12 sps:$4 sm:$0xff]  }
 0x109   :  { %v8049_v46 = vld [vmem:[#allocation8 + $0x1ec] ss:$48 sps:$4 sm:$0xff]  }
 0x10a   :  { %7516 = vmatpush3.bf16.msra.mxu1 %v7986_v48  ;;  %v8055_v48 = vld [vmem:[#allocation8 + $0x24c] ss:$48 sps:$4 sm:$0xff]  }
 0x10b   :  { %1223 = vmatpush1.bf16.msra.mxu0 %v7909_v30  ;;  %3208 = vmatprep.subr.bf16.mxu1 %v8016_v50  ;;  %v8050_v30 = vld [vmem:[#allocation8 + $0x240] ss:$48 sps:$4 sm:$0xff]   ;;  %v8058_v50 = vld [vmem:[#allocation8 + $0x2a4] ss:$48 sps:$4 sm:$0xff]  }
 0x10c   :  { %1224 = vmatprep.subr.bf16.mxu0 %v7916_v31  ;;  %v8052_v31 = vld [vmem:[#allocation8 + $0x244] ss:$48 sps:$4 sm:$0xff]  }
 0x10d   :  { %1405 = vmatmul.mubr.bf16.vlgmr.msra.gmra.mrb[8].mxu1 %v9331_v52 }
 0x10e   :  { %3209 = vmatpush1.bf16.msra.mxu1 %v8014_v54  ;;  %v8062_v54 = vld [vmem:[#allocation8 + $0x300] ss:$48 sps:$4 sm:$0xff]  }
 0x10f   :  { %1225 = vmatpush1.bf16.msra.mxu0 %v7914_v34  ;;  %3210 = vmatprep.subr.bf16.mxu1 %v8022_v55  ;;  %v8013_v34 = vld [vmem:[#allocation5 + $0x46c] ss:$12 sps:$4 sm:$0xff]  }
 0x110   :  { %1226 = vmatprep.subr.bf16.mxu0 %v7921_v35  ;;  %v8011_v35 = vld [vmem:[#allocation5 + $0x468] ss:$12 sps:$4 sm:$0xff]  }
 0x111   :  { %v8070_v55 = vld [vmem:[#allocation8 + $0x364] ss:$48 sps:$4 sm:$0xff]  }
 0x112   :  { %3211 = vmatpush1.bf16.msra.mxu1 %v8020_v58  ;;  %v8068_v58 = vld [vmem:[#allocation8 + $0x360] ss:$48 sps:$4 sm:$0xff]  }
 0x113   :  { %1227 = vmatpush1.bf16.msra.mxu0 %v7919_v38  ;;  %3212 = vmatprep.subr.bf16.mxu1 %v8028_v59  ;;  %v8025_v38 = vld [vmem:[#allocation8 + $0x6c] ss:$48 sps:$4 sm:$0xff]   ;;  %v8065_v59 = vld [vmem:[#allocation8 + $0x308] ss:$48 sps:$4 sm:$0xff]  }
 0x114   :  { %1228 = vmatprep.subr.bf16.mxu0 %v7926_v40  ;;  %v8031_v40 = vld [vmem:[#allocation8 + $0xcc] ss:$48 sps:$4 sm:$0xff]  }
 0x116   :  { %3213 = vmatpush1.bf16.msra.mxu1 %v8026_v62  ;;  %v8074_v62 = vld [vmem:[#allocation8 + $0x3c0] ss:$48 sps:$4 sm:$0xff]  }
 0x117   :  { %1229 = vmatpush1.bf16.msra.mxu0 %v7924_v43  ;;  %3214 = vmatprep.subr.bf16.mxu1 %v8034_v0  ;;  %v8035_v43 = vld [vmem:[#allocation8 + $0x128] ss:$48 sps:$4 sm:$0xff]  }
 0x118   :  { %1230 = vmatprep.subr.bf16.mxu0 %v7931_v44  ;;  %v8043_v44 = vld [vmem:[#allocation8 + $0x18c] ss:$48 sps:$4 sm:$0xff]   ;;  %v8071_v0 = vld [vmem:[#allocation8 + $0x368] ss:$48 sps:$4 sm:$0xff]  }
 0x11a   :  { %3215 = vmatpush1.bf16.msra.mxu1 %v8032_v2  ;;  %v8080_v2 = vld [vmem:[#allocation8 + $0x420] ss:$48 sps:$4 sm:$0xff]  }
 0x11b   :  { %1231 = vmatpush1.bf16.msra.mxu0 %v7929_v47  ;;  %3216 = vmatprep.subr.bf16.mxu1 %v8040_v3  ;;  %v8047_v47 = vld [vmem:[#allocation8 + $0x1e8] ss:$48 sps:$4 sm:$0xff]   ;;  %v8088_v3 = vld [vmem:[#allocation8 + $0x484] ss:$48 sps:$4 sm:$0xff]  }
 0x11c   :  { %1232 = vmatprep.subr.bf16.mxu0 %v7936_v49  ;;  %v8056_v49 = vld [vmem:[#allocation8 + $0x2a0] ss:$48 sps:$4 sm:$0xff]  }
 0x11e   :  { %3217 = vmatpush1.bf16.msra.mxu1 %v8038_v6  ;;  %v8086_v6 = vld [vmem:[#allocation8 + $0x480] ss:$48 sps:$4 sm:$0xff]  }
 0x11f   :  { %1233 = vmatpush1.bf16.msra.mxu0 %v7934_v51  ;;  %3218 = vmatprep.subr.bf16.mxu1 %v8046_v13  ;;  %v8064_v51 = vld [vmem:[#allocation8 + $0x304] ss:$48 sps:$4 sm:$0xff]   ;;  %v8095_v13 = vld [vmem:[#allocation8 + $0x4e8] ss:$48 sps:$4 sm:$0xff]  }
 0x120   :  { %1234 = vmatprep.subr.bf16.mxu0 %v7941_v53  ;;  %v8061_v53 = vld [vmem:[#allocation8 + $0x2ac] ss:$48 sps:$4 sm:$0xff]  }
 0x122   :  { %3219 = vmatpush1.bf16.msra.mxu1 %v8044_v12  ;;  %v8097_v12 = vld [vmem:[#allocation8 + $0x4ec] ss:$48 sps:$4 sm:$0xff]  }
 0x123   :  { %1235 = vmatpush1.bf16.msra.mxu0 %v7939_v56  ;;  %3220 = vmatprep.subr.bf16.mxu1 %v8052_v31  ;;  %v8059_v56 = vld [vmem:[#allocation8 + $0x2a8] ss:$48 sps:$4 sm:$0xff]  }
 0x124   :  { %1247 = vmatprep.subr.bf16.mxu0 %v7949_v57  ;;  %v8067_v57 = vld [vmem:[#allocation8 + $0x30c] ss:$48 sps:$4 sm:$0xff]  }
 0x126   :  { %1237 = vmatmul.mubr.bf16.vlgmr.msra.gmra.mrb[0].mxu0 %v9328_v18  ;;  %v7989_v18 = vld [vmem:[#allocation5 + $0x3c4] ss:$12 sps:$4 sm:$0xff]   ;;  %3221 = vmatpush1.bf16.msra.mxu1 %v8050_v30  ;;  %v348_v30 = vlaneseq }
 0x127   :  { %1248 = vmatpush1.bf16.msra.mxu0 %v7947_v60  ;;  %1279 = vmatprep.mubr.bf16.mxu0 %v7992_v39  ;;  %v8023_v39 = vld [vmem:[#allocation8 + $0x68] ss:$48 sps:$4 sm:$0xff]   ;;  %v8076_v60 = vld [vmem:[#allocation8 + $0x3c4] ss:$48 sps:$4 sm:$0xff]  }
 0x128   :  { %1249 = vmatprep.subr.bf16.mxu0 %v7954_v61  ;;  %3222 = vmatprep.subr.bf16.mxu1 %v8058_v50  ;;  %v8073_v61 = vld [vmem:[#allocation8 + $0x36c] ss:$48 sps:$4 sm:$0xff]   ;;  %v9336_v31 = vshrl.u32 %v348_v30, 7  ;;  %v8154_v30 = vld [vmem:[#allocation8 + $0x8a4] ss:$48 sps:$4 sm:$0xff]  }
 0x12a   :  { %3223 = vmatpush1.bf16.msra.mxu1 %v8056_v49 }
 0x12b   :  { %1250 = vmatpush1.bf16.msra.mxu0 %v7952_v63  ;;  %3224 = vmatprep.subr.bf16.mxu1 %v8064_v51  ;;  %v8082_v63 = vld [vmem:[#allocation8 + $0x424] ss:$48 sps:$4 sm:$0xff]  }
 0x12c   :  { %1251 = vmatprep.subr.bf16.mxu0 %v7959_v1  ;;  %v8079_v1 = vld [vmem:[#allocation8 + $0x3cc] ss:$48 sps:$4 sm:$0xff]  }
 0x12e   :  { %3225 = vmatpush1.bf16.msra.mxu1 %v8062_v54  ;;  %v9350_v54 = vsub.s32 1, %v9336_v31 }
 0x12f   :  { %1252 = vmatpush1.bf16.msra.mxu0 %v7957_v4  ;;  %3226 = vmatprep.subr.bf16.mxu1 %v8070_v55  ;;  %v8077_v4 = vld [vmem:[#allocation8 + $0x3c8] ss:$48 sps:$4 sm:$0xff]  }
 0x130   :  { %1253 = vmatprep.subr.bf16.mxu0 %v7964_v5  ;;  %v8085_v5 = vld [vmem:[#allocation8 + $0x42c] ss:$48 sps:$4 sm:$0xff]  }
 0x132   :  { %3227 = vmatpush1.bf16.msra.mxu1 %v8068_v58 }
 0x133   :  { %1254 = vmatpush1.bf16.msra.mxu0 %v7962_v7  ;;  %3228 = vmatprep.subr.bf16.mxu1 %v8076_v60  ;;  %v8094_v7 = vld [vmem:[#allocation8 + $0x4e4] ss:$48 sps:$4 sm:$0xff]  }
 0x134   :  { %1255 = vmatprep.subr.bf16.mxu0 %v7969_v8  ;;  %v8083_v8 = vld [vmem:[#allocation8 + $0x428] ss:$48 sps:$4 sm:$0xff]  }
 0x136   :  { %3229 = vmatpush1.bf16.msra.mxu1 %v8074_v62 }
 0x137   :  { %1256 = vmatpush1.bf16.msra.mxu0 %v7967_v9  ;;  %3230 = vmatprep.subr.bf16.mxu1 %v8082_v63  ;;  %v8091_v9 = vld [vmem:[#allocation8 + $0x48c] ss:$48 sps:$4 sm:$0xff]  }
 0x138   :  { %1257 = vmatprep.subr.bf16.mxu0 %v7974_v10  ;;  %v8092_v10 = vld [vmem:[#allocation8 + $0x4e0] ss:$48 sps:$4 sm:$0xff]  }
 0x13a   :  { %3231 = vmatpush1.bf16.msra.mxu1 %v8080_v2 }
 0x13b   :  { %1258 = vmatpush1.bf16.msra.mxu0 %v7972_v11  ;;  %3232 = vmatprep.subr.bf16.mxu1 %v8088_v3  ;;  %v8089_v11 = vld [vmem:[#allocation8 + $0x488] ss:$48 sps:$4 sm:$0xff]   ;;  %v8118_v3 = vld [vmem:[#allocation8 + $0x664] ss:$48 sps:$4 sm:$0xff]  }
 0x13c   :  { %1259 = vmatprep.subr.bf16.mxu0 %v7979_v14 }
 0x13e   :  { %3233 = vmatpush1.bf16.msra.mxu1 %v8086_v6 }
 0x13f   :  { %1260 = vmatpush1.bf16.msra.mxu0 %v7977_v15  ;;  %3234 = vmatprep.subr.bf16.mxu1 %v8094_v7  ;;  %v8116_v7 = vld [vmem:[#allocation8 + $0x660] ss:$48 sps:$4 sm:$0xff]  }
 0x140   :  { %1261 = vmatprep.subr.bf16.mxu0 %v7984_v16 }
 0x142   :  { %3235 = vmatpush1.bf16.msra.mxu1 %v8092_v10  ;;  %v8127_v10 = vld [vmem:[#allocation8 + $0x6cc] ss:$48 sps:$4 sm:$0xff]  }
 0x143   :  { %1262 = vmatpush1.bf16.msra.mxu0 %v7982_v17 }
 0x144   :  { %1263 = vmatprep.subr.bf16.mxu0 %v7989_v18 }
 0x147   :  { %1264 = vmatpush1.bf16.msra.mxu0 %v7987_v19 }
 0x148   :  { %1265 = vmatprep.subr.bf16.mxu0 %v7995_v20  ;;  %v8100_v20 = vld [vmem:[#allocation8 + $0x544] ss:$48 sps:$4 sm:$0xff]  }
 0x149   :  { %3236 = vmatprep.subr.bf16.mxu1 %v8100_v20  ;;  %v8134_v20 = vld [vmem:[#allocation8 + $0x780] ss:$48 sps:$4 sm:$0xff]  }
 0x14b   :  { %1266 = vmatpush1.bf16.msra.mxu0 %v7993_v21  ;;  %v8103_v21 = vld [vmem:[#allocation8 + $0x54c] ss:$48 sps:$4 sm:$0xff]  }
 0x14c   :  { %1267 = vmatprep.subr.bf16.mxu0 %v7998_v22  ;;  %v8098_v22 = vld [vmem:[#allocation8 + $0x540] ss:$48 sps:$4 sm:$0xff]  }
 0x14d   :  { %3237 = vmatpush1.bf16.msra.mxu1 %v8098_v22  ;;  %v8142_v22 = vld [vmem:[#allocation8 + $0x7e4] ss:$48 sps:$4 sm:$0xff]  }
 0x14f   :  { %1268 = vmatpush1.bf16.msra.mxu0 %v7996_v23  ;;  %v8101_v23 = vld [vmem:[#allocation8 + $0x548] ss:$48 sps:$4 sm:$0xff]  }
 0x150   :  { %1269 = vmatprep.subr.bf16.mxu0 %v8001_v24  ;;  %v8106_v24 = vld [vmem:[#allocation8 + $0x5a4] ss:$48 sps:$4 sm:$0xff]  }
 0x151   :  { %3238 = vmatprep.subr.bf16.mxu1 %v8106_v24  ;;  %v8140_v24 = vld [vmem:[#allocation8 + $0x7e0] ss:$48 sps:$4 sm:$0xff]  }
 0x153   :  { %1270 = vmatpush1.bf16.msra.mxu0 %v7999_v25  ;;  %v8109_v25 = vld [vmem:[#allocation8 + $0x5ac] ss:$48 sps:$4 sm:$0xff]  }
 0x154   :  { %1271 = vmatprep.subr.bf16.mxu0 %v8004_v26  ;;  %v8104_v26 = vld [vmem:[#allocation8 + $0x5a0] ss:$48 sps:$4 sm:$0xff]  }
 0x155   :  { %3239 = vmatpush1.bf16.msra.mxu1 %v8104_v26  ;;  %v8148_v26 = vld [vmem:[#allocation8 + $0x844] ss:$48 sps:$4 sm:$0xff]  }
 0x157   :  { %1272 = vmatpush1.bf16.msra.mxu0 %v8002_v27  ;;  %v8107_v27 = vld [vmem:[#allocation8 + $0x5a8] ss:$48 sps:$4 sm:$0xff]  }
 0x158   :  { %1273 = vmatprep.subr.bf16.mxu0 %v8007_v28  ;;  %v8112_v28 = vld [vmem:[#allocation8 + $0x604] ss:$48 sps:$4 sm:$0xff]  }
 0x159   :  { %3251 = vmatprep.subr.bf16.mxu1 %v8112_v28  ;;  %v8146_v28 = vld [vmem:[#allocation8 + $0x840] ss:$48 sps:$4 sm:$0xff]  }
 0x15b   :  { %1274 = vmatpush1.bf16.msra.mxu0 %v8005_v29  ;;  %v8115_v29 = vld [vmem:[#allocation8 + $0x60c] ss:$48 sps:$4 sm:$0xff]  }
 0x15c   :  { %1275 = vmatprep.subr.bf16.mxu0 %v8010_v32  ;;  %v346_v32 = vld [vmem:[#allocation7] sm:$0x7] }
 0x15f   :  { %1276 = vmatpush1.bf16.msra.mxu0 %v8008_v33  ;;  %v9339_v33 = vsub.s32 2, %v9336_v31 }
 0x160   :  { %1277 = vmatprep.subr.bf16.mxu0 %v8013_v34 }
 0x161   :  { %v359_v34 = vrot.slane %v346_v32, %v9339_v33 }
 0x163   :  { %1278 = vmatpush1.bf16.msra.mxu0 %v8011_v35 }
 0x164   :  { %3294 = vmatprep.subr.bf16.mxu0 %v8019_v36 }
 0x166   :  { %1280 = vmatmul.mubr.bf16.vlgmr.msra.gmra.mrb[0].mxu0 %v9331_v52  ;;  %v8053_v52 = vld [vmem:[#allocation8 + $0x248] ss:$48 sps:$4 sm:$0xff]  }
 0x167   :  { %3295 = vmatpush1.bf16.msra.mxu0 %v8017_v37 }
 0x168   :  { %3296 = vmatprep.subr.bf16.mxu0 %v8025_v38 }
 0x16b   :  { %3297 = vmatpush1.bf16.msra.mxu0 %v8023_v39 }
 0x16c   :  { %3298 = vmatprep.subr.bf16.mxu0 %v8031_v40 }
 0x16f   :  { %3299 = vmatpush1.bf16.msra.mxu0 %v8029_v41 }
 0x170   :  { %3300 = vmatprep.subr.bf16.mxu0 %v8037_v42 }
 0x173   :  { %3301 = vmatpush1.bf16.msra.mxu0 %v8035_v43 }
 0x174   :  { %3302 = vmatprep.subr.bf16.mxu0 %v8043_v44 }
 0x177   :  { %3303 = vmatpush1.bf16.msra.mxu0 %v8041_v45 }
 0x178   :  { %3304 = vmatprep.subr.bf16.mxu0 %v8049_v46 }
 0x17b   :  { %3305 = vmatpush1.bf16.msra.mxu0 %v8047_v47 }
 0x17c   :  { %3306 = vmatprep.subr.bf16.mxu0 %v8055_v48 }
 0x17f   :  { %3307 = vmatpush1.bf16.msra.mxu0 %v8053_v52 }
 0x180   :  { %3308 = vmatprep.subr.bf16.mxu0 %v8061_v53  ;;  %v9347_v53 = vsub.s32 0, %v9336_v31 }
 0x183   :  { %3309 = vmatpush1.bf16.msra.mxu0 %v8059_v56  ;;  %v355_v56 = vrot.slane %v346_v32, %v9350_v54 }
 0x184   :  { %3310 = vmatprep.subr.bf16.mxu0 %v8067_v57  ;;  %v351_v57 = vrot.slane %v346_v32, %v9347_v53  ;;  %v8157_v32 = vld [vmem:[#allocation8 + $0x8ac] ss:$48 sps:$4 sm:$0xff]  }
 0x187   :  { %3311 = vmatpush1.bf16.msra.mxu0 %v8065_v59 }
 0x188   :  { %3312 = vmatprep.subr.bf16.mxu0 %v8073_v61 }
 0x18b   :  { %3313 = vmatpush1.bf16.msra.mxu0 %v8071_v0  ;;  %v8110_v0 = vld [vmem:[#allocation8 + $0x600] ss:$48 sps:$4 sm:$0xff]  }
 0x18c   :  { %3314 = vmatprep.subr.bf16.mxu0 %v8079_v1  ;;  %v8113_v1 = vld [vmem:[#allocation8 + $0x608] ss:$48 sps:$4 sm:$0xff]  }
 0x18f   :  { %3315 = vmatpush1.bf16.msra.mxu0 %v8077_v4  ;;  %v8121_v4 = vld [vmem:[#allocation8 + $0x66c] ss:$48 sps:$4 sm:$0xff]  }
 0x190   :  { %3316 = vmatprep.subr.bf16.mxu0 %v8085_v5 }
 0x193   :  { %3317 = vmatpush1.bf16.msra.mxu0 %v8083_v8  ;;  %v8119_v8 = vld [vmem:[#allocation8 + $0x668] ss:$48 sps:$4 sm:$0xff]  }
 0x194   :  { %3318 = vmatprep.subr.bf16.mxu0 %v8091_v9  ;;  %v8124_v9 = vld [vmem:[#allocation8 + $0x6c4] ss:$48 sps:$4 sm:$0xff]  }
 0x197   :  { %3319 = vmatpush1.bf16.msra.mxu0 %v8089_v11  ;;  %v8122_v11 = vld [vmem:[#allocation8 + $0x6c0] ss:$48 sps:$4 sm:$0xff]  }
 0x198   :  { %3320 = vmatprep.subr.bf16.mxu0 %v8097_v12  ;;  %v9151_v12 = vmov 0  }
 0x19b   :  { %3321 = vmatpush1.bf16.msra.mxu0 %v8095_v13  ;;  %v8125_v13 = vld [vmem:[#allocation8 + $0x6c8] ss:$48 sps:$4 sm:$0xff]  }
 0x19c   :  { %3322 = vmatprep.subr.bf16.mxu0 %v8103_v21  ;;  %v8137_v21 = vld [vmem:[#allocation8 + $0x788] ss:$48 sps:$4 sm:$0xff]  }
 0x19f   :  { %3323 = vmatpush1.bf16.msra.mxu0 %v8101_v23  ;;  %v8145_v23 = vld [vmem:[#allocation8 + $0x7ec] ss:$48 sps:$4 sm:$0xff]  }
 0x1a0   :  { %v7473_v14 = vpop.f32.mrb[0].mxu1  ;;  %3324 = vmatprep.subr.bf16.mxu0 %v8109_v25  ;;  %v8143_v25 = vld [vmem:[#allocation8 + $0x7e8] ss:$48 sps:$4 sm:$0xff]  }
 0x1a1   :  { %v7474_v15 = vpop.f32.mrb[1].mxu1 }
 0x1a2   :  { %v7475_v16 = vadd.f32 %v7474_v15, %v7473_v14  ;;  %v7476_v17 = vpop.f32.mrb[2].mxu1  ;;  %v8130_v14 = vld [vmem:[#allocation8 + $0x724] ss:$48 sps:$4 sm:$0xff]   ;;  %v8133_v15 = vld [vmem:[#allocation8 + $0x72c] ss:$48 sps:$4 sm:$0xff]  }
 0x1a3   :  { %v7477_v18 = vpop.f32.mrb[3].mxu1  ;;  %3325 = vmatpush1.bf16.msra.mxu0 %v8107_v27  ;;  %v8151_v27 = vld [vmem:[#allocation8 + $0x84c] ss:$48 sps:$4 sm:$0xff]  }
 0x1a4   :  { %v7478_v19 = vadd.f32 %v7477_v18, %v7476_v17  ;;  %3337 = vmatprep.subr.bf16.mxu0 %v8115_v29  ;;  %v1325_v35 = vadd.f32 %v7475_v16, %v359_v34  ;;  %v8128_v16 = vld [vmem:[#allocation8 + $0x720] ss:$48 sps:$4 sm:$0xff]   ;;  %v8131_v17 = vld [vmem:[#allocation8 + $0x728] ss:$48 sps:$4 sm:$0xff]   ;;  %v8136_v18 = vld [vmem:[#allocation8 + $0x784] ss:$48 sps:$4 sm:$0xff]  }
 0x1a5   :  { %v8149_v29 = vld [vmem:[#allocation8 + $0x848] ss:$48 sps:$4 sm:$0xff]  }
 0x1a6   :  { %v1328_v38 = vadd.f32 %v7478_v19, %v359_v34  ;;  %v8139_v19 = vld [vmem:[#allocation8 + $0x78c] ss:$48 sps:$4 sm:$0xff]   ;;  %v8152_v34 = vld [vmem:[#allocation8 + $0x8a0] ss:$48 sps:$4 sm:$0xff]  }
 0x1c0   :  { %v7495_v36 = vpop.f32.mrb[4].mxu1 }
 0x1c1   :  { %v7496_v37 = vpop.f32.mrb[5].mxu1 }
 0x1c2   :  { %v7497_v39 = vadd.f32 %v7496_v37, %v7495_v36  ;;  %v7498_v40 = vpop.f32.mrb[6].mxu1  ;;  %v8160_v36 = vld [vmem:[#allocation8 + $0x14] ss:$48 sps:$4 sm:$0xff]   ;;  %v8163_v37 = vld [vmem:[#allocation8 + $0x1c] ss:$48 sps:$4 sm:$0xff]  }
 0x1c3   :  { %v7499_v41 = vpop.f32.mrb[7].mxu1 }
 0x1c4   :  { %v1366_v42 = vadd.f32 %v7497_v39, %v1325_v35  ;;  %v7500_v43 = vadd.f32 %v7499_v41, %v7498_v40  ;;  %v8155_v35 = vld [vmem:[#allocation8 + $0x8a8] ss:$48 sps:$4 sm:$0xff]   ;;  %v8166_v41 = vld [vmem:[#allocation8 + $0x74] ss:$48 sps:$4 sm:$0xff]  }
 0x1c5   :  { %v8161_v40 = vld [vmem:[#allocation8 + $0x18] ss:$48 sps:$4 sm:$0xff]  }
 0x1c6   :  { %v1369_v44 = vadd.f32 %v7500_v43, %v1328_v38  ;;  %v8158_v38 = vld [vmem:[#allocation8 + $0x10] ss:$48 sps:$4 sm:$0xff]  }
 0x1c7   :  { %v8164_v43 = vld [vmem:[#allocation8 + $0x70] ss:$48 sps:$4 sm:$0xff]  }
 0x1e0   :  { %v7517_v45 = vpop.f32.mrb[8].mxu1 }
 0x1e1   :  { %v7518_v46 = vpop.f32.mrb[9].mxu1 }
 0x1e2   :  { %v7519_v47 = vadd.f32 %v7518_v46, %v7517_v45  ;;  %v7520_v48 = vpop.f32.mrb[10].mxu1  ;;  %v8172_v45 = vld [vmem:[#allocation8 + $0xd4] ss:$48 sps:$4 sm:$0xff]   ;;  %v8175_v46 = vld [vmem:[#allocation8 + $0xdc] ss:$48 sps:$4 sm:$0xff]  }
 0x1e3   :  { %v7521_v49 = vpop.f32.mrb[11].mxu1 }
 0x1e4   :  { %v9342_v50 = vadd.f32 %v7519_v47, %v1366_v42  ;;  %v7522_v51 = vadd.f32 %v7521_v49, %v7520_v48  ;;  %v8169_v42 = vld [vmem:[#allocation8 + $0x7c] ss:$48 sps:$4 sm:$0xff]   ;;  %v8170_v47 = vld [vmem:[#allocation8 + $0xd0] ss:$48 sps:$4 sm:$0xff]   ;;  %v8173_v48 = vld [vmem:[#allocation8 + $0xd8] ss:$48 sps:$4 sm:$0xff]  }
 0x1e5   :  { %v8178_v49 = vld [vmem:[#allocation8 + $0x134] ss:$48 sps:$4 sm:$0xff]  }
 0x1e6   :  { %v9344_v52 = vadd.f32 %v7522_v51, %v1369_v44  ;;  %v8167_v44 = vld [vmem:[#allocation8 + $0x78] ss:$48 sps:$4 sm:$0xff]   ;;  %v8181_v51 = vld [vmem:[#allocation8 + $0x13c] ss:$48 sps:$4 sm:$0xff]  }
 0x1e8   :  { %v9378_v39 = vpack.c.bf16 %v9344_v52, %v9342_v50 }
 0x239   :  { %v1281_v55 = vpop.f32.mrb[0].mxu0 }
 0x23a   :  { %v1283_v58 = vpop.f32.mrb[1].mxu0  ;;  %v9360_v2 = vadd.f32 %v1281_v55, %v351_v57  ;;  %v8176_v55 = vld [vmem:[#allocation8 + $0x130] ss:$48 sps:$4 sm:$0xff]  }
 0x23b   :  { %v1285_v59 = vpop.f32.mrb[2].mxu0  ;;  %v9356_v62 = vadd.f32 %v1283_v58, %v355_v56  ;;  %v8187_v58 = vld [vmem:[#allocation8 + $0x19c] ss:$48 sps:$4 sm:$0xff]  }
 0x23c   :  { %v9354_v60 = vadd.f32 %v1285_v59, %v351_v57  ;;  %v1287_v61 = vpop.f32.mrb[3].mxu0  ;;  %v8184_v57 = vld [vmem:[#allocation8 + $0x194] ss:$48 sps:$4 sm:$0xff]   ;;  %v8182_v59 = vld [vmem:[#allocation8 + $0x190] ss:$48 sps:$4 sm:$0xff]  }
 0x23d   :  { %v9358_v63 = vadd.f32 %v1287_v61, %v355_v56  ;;  %v8179_v56 = vld [vmem:[#allocation8 + $0x138] ss:$48 sps:$4 sm:$0xff]  }
 0x23e   :  { %v9368_v6 = vpack.c.bf16 %v9354_v60, %v9360_v2  ;;  %v8185_v61 = vld [vmem:[#allocation8 + $0x198] ss:$48 sps:$4 sm:$0xff]  }
 0x23f   :  { %v9364_v5 = vpack.c.bf16 %v9358_v63, %v9356_v62 }
 0x241   :  { %3240 = vmatprep.mubr.bf16.mxu1 %v9364_v5  ;;  %3326 = vmatprep.mubr.bf16.mxu0 %v9364_v5 }
 0x242   :  { %3241 = vmatmul.mubr.bf16.vlgmr.msra.gmra.mrb[12].mxu1 %v9368_v6  ;;  %3327 = vmatmul.mubr.bf16.vlgmr.msra.gmra.mrb[4].mxu0 %v9368_v6 }
 0x243   :  { %3252 = vmatpush1.bf16.msra.mxu1 %v8110_v0  ;;  %3338 = vmatpush1.bf16.msra.mxu0 %v8113_v1  ;;  %v8190_v0 = vld [vmem:[#allocation8 + $0x1f4] ss:$48 sps:$4 sm:$0xff]   ;;  %v8193_v1 = vld [vmem:[#allocation8 + $0x1fc] ss:$48 sps:$4 sm:$0xff]  }
 0x244   :  { %3253 = vmatprep.subr.bf16.mxu1 %v8118_v3  ;;  %3339 = vmatprep.subr.bf16.mxu0 %v8121_v4  ;;  %v8188_v3 = vld [vmem:[#allocation8 + $0x1f0] ss:$48 sps:$4 sm:$0xff]   ;;  %v8191_v4 = vld [vmem:[#allocation8 + $0x1f8] ss:$48 sps:$4 sm:$0xff]  }
 0x245   :  { %3283 = vmatprep.mubr.bf16.mxu1 %v9151_v12  ;;  %3369 = vmatprep.mubr.bf16.mxu0 %v9151_v12 }
 0x247   :  { %3254 = vmatpush1.bf16.msra.mxu1 %v8116_v7  ;;  %3340 = vmatpush1.bf16.msra.mxu0 %v8119_v8  ;;  %v8196_v7 = vld [vmem:[#allocation8 + $0x254] ss:$48 sps:$4 sm:$0xff]   ;;  %v8199_v8 = vld [vmem:[#allocation8 + $0x25c] ss:$48 sps:$4 sm:$0xff]  }
 0x248   :  { %3255 = vmatprep.subr.bf16.mxu1 %v8124_v9  ;;  %3341 = vmatprep.subr.bf16.mxu0 %v8127_v10  ;;  %v8194_v9 = vld [vmem:[#allocation8 + $0x250] ss:$48 sps:$4 sm:$0xff]   ;;  %v8197_v10 = vld [vmem:[#allocation8 + $0x258] ss:$48 sps:$4 sm:$0xff]  }
 0x24b   :  { %3256 = vmatpush1.bf16.msra.mxu1 %v8122_v11  ;;  %3342 = vmatpush1.bf16.msra.mxu0 %v8125_v13  ;;  %v8202_v11 = vld [vmem:[#allocation8 + $0x2b4] ss:$48 sps:$4 sm:$0xff]   ;;  %v8205_v13 = vld [vmem:[#allocation8 + $0x2bc] ss:$48 sps:$4 sm:$0xff]  }
 0x24c   :  { %3257 = vmatprep.subr.bf16.mxu1 %v8130_v14  ;;  %3343 = vmatprep.subr.bf16.mxu0 %v8133_v15  ;;  %v8200_v14 = vld [vmem:[#allocation8 + $0x2b0] ss:$48 sps:$4 sm:$0xff]   ;;  %v8203_v15 = vld [vmem:[#allocation8 + $0x2b8] ss:$48 sps:$4 sm:$0xff]  }
 0x24f   :  { %3258 = vmatpush1.bf16.msra.mxu1 %v8128_v16  ;;  %3344 = vmatpush1.bf16.msra.mxu0 %v8131_v17  ;;  %v8208_v16 = vld [vmem:[#allocation8 + $0x314] ss:$48 sps:$4 sm:$0xff]   ;;  %v8211_v17 = vld [vmem:[#allocation8 + $0x31c] ss:$48 sps:$4 sm:$0xff]  }
 0x250   :  { %3259 = vmatprep.subr.bf16.mxu1 %v8136_v18  ;;  %3345 = vmatprep.subr.bf16.mxu0 %v8139_v19  ;;  %v8206_v18 = vld [vmem:[#allocation8 + $0x310] ss:$48 sps:$4 sm:$0xff]   ;;  %v8209_v19 = vld [vmem:[#allocation8 + $0x318] ss:$48 sps:$4 sm:$0xff]  }
 0x253   :  { %3260 = vmatpush1.bf16.msra.mxu1 %v8134_v20  ;;  %3346 = vmatpush1.bf16.msra.mxu0 %v8137_v21  ;;  %v8214_v20 = vld [vmem:[#allocation8 + $0x374] ss:$48 sps:$4 sm:$0xff]   ;;  %v8217_v21 = vld [vmem:[#allocation8 + $0x37c] ss:$48 sps:$4 sm:$0xff]  }
 0x254   :  { %3261 = vmatprep.subr.bf16.mxu1 %v8142_v22  ;;  %3347 = vmatprep.subr.bf16.mxu0 %v8145_v23  ;;  %v8212_v22 = vld [vmem:[#allocation8 + $0x370] ss:$48 sps:$4 sm:$0xff]   ;;  %v8215_v23 = vld [vmem:[#allocation8 + $0x378] ss:$48 sps:$4 sm:$0xff]  }
 0x257   :  { %3262 = vmatpush1.bf16.msra.mxu1 %v8140_v24  ;;  %3348 = vmatpush1.bf16.msra.mxu0 %v8143_v25  ;;  %v8220_v24 = vld [vmem:[#allocation8 + $0x3d4] ss:$48 sps:$4 sm:$0xff]   ;;  %v8223_v25 = vld [vmem:[#allocation8 + $0x3dc] ss:$48 sps:$4 sm:$0xff]  }
 0x258   :  { %3263 = vmatprep.subr.bf16.mxu1 %v8148_v26  ;;  %3349 = vmatprep.subr.bf16.mxu0 %v8151_v27  ;;  %v8218_v26 = vld [vmem:[#allocation8 + $0x3d0] ss:$48 sps:$4 sm:$0xff]   ;;  %v8221_v27 = vld [vmem:[#allocation8 + $0x3d8] ss:$48 sps:$4 sm:$0xff]  }
 0x25b   :  { %3264 = vmatpush1.bf16.msra.mxu1 %v8146_v28  ;;  %3350 = vmatpush1.bf16.msra.mxu0 %v8149_v29  ;;  %v8226_v28 = vld [vmem:[#allocation8 + $0x434] ss:$48 sps:$4 sm:$0xff]   ;;  %v8229_v29 = vld [vmem:[#allocation8 + $0x43c] ss:$48 sps:$4 sm:$0xff]  }
 0x25c   :  { %3265 = vmatprep.subr.bf16.mxu1 %v8154_v30  ;;  %3351 = vmatprep.subr.bf16.mxu0 %v8157_v32  ;;  %v8224_v30 = vld [vmem:[#allocation8 + $0x430] ss:$48 sps:$4 sm:$0xff]   ;;  %v8227_v32 = vld [vmem:[#allocation8 + $0x438] ss:$48 sps:$4 sm:$0xff]  }
 0x25f   :  { %3266 = vmatpush1.bf16.msra.mxu1 %v8152_v34  ;;  %3352 = vmatpush1.bf16.msra.mxu0 %v8155_v35  ;;  %v8232_v34 = vld [vmem:[#allocation8 + $0x494] ss:$48 sps:$4 sm:$0xff]   ;;  %v8235_v35 = vld [vmem:[#allocation8 + $0x49c] ss:$48 sps:$4 sm:$0xff]  }
 0x260   :  { %3380 = vmatprep.subr.bf16.mxu1 %v8160_v36  ;;  %3466 = vmatprep.subr.bf16.mxu0 %v8163_v37  ;;  %v8230_v36 = vld [vmem:[#allocation8 + $0x490] ss:$48 sps:$4 sm:$0xff]   ;;  %v8233_v37 = vld [vmem:[#allocation8 + $0x498] ss:$48 sps:$4 sm:$0xff]  }
 0x262   :  { %3284 = vmatmul.mubr.bf16.vlgmr.msra.gmra.mrb[12].mxu1 %v9378_v39  ;;  %3370 = vmatmul.mubr.bf16.vlgmr.msra.gmra.mrb[4].mxu0 %v9378_v39 }
 0x263   :  { %3381 = vmatpush1.bf16.msra.mxu1 %v8158_v38  ;;  %3412 = vmatprep.mubr.bf16.mxu1 %v9364_v5  ;;  %v8238_v38 = vld [vmem:[#allocation8 + $0x4f4] ss:$48 sps:$4 sm:$0xff]  }
 0x264   :  { %3467 = vmatpush1.bf16.msra.mxu0 %v8161_v40  ;;  %3498 = vmatprep.mubr.bf16.mxu0 %v9364_v5  ;;  %v8241_v40 = vld [vmem:[#allocation8 + $0x4fc] ss:$48 sps:$4 sm:$0xff]  }
 0x265   :  { %3382 = vmatprep.subr.bf16.mxu1 %v8166_v41  ;;  %3468 = vmatprep.subr.bf16.mxu0 %v8169_v42  ;;  %v8236_v41 = vld [vmem:[#allocation8 + $0x4f0] ss:$48 sps:$4 sm:$0xff]   ;;  %v8239_v42 = vld [vmem:[#allocation8 + $0x4f8] ss:$48 sps:$4 sm:$0xff]  }
 0x267   :  { %3383 = vmatpush1.bf16.msra.mxu1 %v8164_v43  ;;  %v8244_v43 = vld [vmem:[#allocation8 + $0x554] ss:$48 sps:$4 sm:$0xff]  }
 0x268   :  { %3469 = vmatpush1.bf16.msra.mxu0 %v8167_v44  ;;  %3384 = vmatprep.subr.bf16.mxu1 %v8172_v45  ;;  %v8247_v44 = vld [vmem:[#allocation8 + $0x55c] ss:$48 sps:$4 sm:$0xff]   ;;  %v8242_v45 = vld [vmem:[#allocation8 + $0x550] ss:$48 sps:$4 sm:$0xff]  }
 0x269   :  { %3470 = vmatprep.subr.bf16.mxu0 %v8175_v46  ;;  %v8245_v46 = vld [vmem:[#allocation8 + $0x558] ss:$48 sps:$4 sm:$0xff]  }
 0x26b   :  { %3385 = vmatpush1.bf16.msra.mxu1 %v8170_v47  ;;  %v8250_v47 = vld [vmem:[#allocation8 + $0x5b4] ss:$48 sps:$4 sm:$0xff]  }
 0x26c   :  { %3471 = vmatpush1.bf16.msra.mxu0 %v8173_v48  ;;  %3386 = vmatprep.subr.bf16.mxu1 %v8178_v49  ;;  %v8253_v48 = vld [vmem:[#allocation8 + $0x5bc] ss:$48 sps:$4 sm:$0xff]   ;;  %v8248_v49 = vld [vmem:[#allocation8 + $0x5b0] ss:$48 sps:$4 sm:$0xff]  }
 0x26d   :  { %3472 = vmatprep.subr.bf16.mxu0 %v8181_v51  ;;  %v8251_v51 = vld [vmem:[#allocation8 + $0x5b8] ss:$48 sps:$4 sm:$0xff]  }
 0x26f   :  { %3387 = vmatpush1.bf16.msra.mxu1 %v8176_v55  ;;  %v8256_v55 = vld [vmem:[#allocation8 + $0x614] ss:$48 sps:$4 sm:$0xff]  }
 0x270   :  { %3473 = vmatpush1.bf16.msra.mxu0 %v8179_v56  ;;  %3388 = vmatprep.subr.bf16.mxu1 %v8184_v57  ;;  %v8259_v56 = vld [vmem:[#allocation8 + $0x61c] ss:$48 sps:$4 sm:$0xff]   ;;  %v8254_v57 = vld [vmem:[#allocation8 + $0x610] ss:$48 sps:$4 sm:$0xff]  }
 0x271   :  { %3474 = vmatprep.subr.bf16.mxu0 %v8187_v58  ;;  %v8257_v58 = vld [vmem:[#allocation8 + $0x618] ss:$48 sps:$4 sm:$0xff]  }
 0x273   :  { %3389 = vmatpush1.bf16.msra.mxu1 %v8182_v59  ;;  %v8262_v59 = vld [vmem:[#allocation8 + $0x674] ss:$48 sps:$4 sm:$0xff]  }
 0x274   :  { %3475 = vmatpush1.bf16.msra.mxu0 %v8185_v61  ;;  %3390 = vmatprep.subr.bf16.mxu1 %v8190_v0  ;;  %v8265_v61 = vld [vmem:[#allocation8 + $0x67c] ss:$48 sps:$4 sm:$0xff]   ;;  %v8260_v0 = vld [vmem:[#allocation8 + $0x670] ss:$48 sps:$4 sm:$0xff]  }
 0x275   :  { %3476 = vmatprep.subr.bf16.mxu0 %v8193_v1  ;;  %v8263_v1 = vld [vmem:[#allocation8 + $0x678] ss:$48 sps:$4 sm:$0xff]  }
 0x277   :  { %3391 = vmatpush1.bf16.msra.mxu1 %v8188_v3  ;;  %v8268_v3 = vld [vmem:[#allocation8 + $0x6d4] ss:$48 sps:$4 sm:$0xff]  }
 0x278   :  { %3477 = vmatpush1.bf16.msra.mxu0 %v8191_v4  ;;  %3392 = vmatprep.subr.bf16.mxu1 %v8196_v7  ;;  %v8271_v4 = vld [vmem:[#allocation8 + $0x6dc] ss:$48 sps:$4 sm:$0xff]   ;;  %v8266_v7 = vld [vmem:[#allocation8 + $0x6d0] ss:$48 sps:$4 sm:$0xff]  }
 0x279   :  { %3478 = vmatprep.subr.bf16.mxu0 %v8199_v8  ;;  %v8269_v8 = vld [vmem:[#allocation8 + $0x6d8] ss:$48 sps:$4 sm:$0xff]  }
 0x27b   :  { %3393 = vmatpush1.bf16.msra.mxu1 %v8194_v9  ;;  %v8274_v9 = vld [vmem:[#allocation8 + $0x734] ss:$48 sps:$4 sm:$0xff]  }
 0x27c   :  { %3479 = vmatpush1.bf16.msra.mxu0 %v8197_v10  ;;  %3394 = vmatprep.subr.bf16.mxu1 %v8202_v11  ;;  %v8277_v10 = vld [vmem:[#allocation8 + $0x73c] ss:$48 sps:$4 sm:$0xff]   ;;  %v8272_v11 = vld [vmem:[#allocation8 + $0x730] ss:$48 sps:$4 sm:$0xff]  }
 0x27d   :  { %3480 = vmatprep.subr.bf16.mxu0 %v8205_v13  ;;  %v8275_v13 = vld [vmem:[#allocation8 + $0x738] ss:$48 sps:$4 sm:$0xff]  }
 0x27f   :  { %3395 = vmatpush1.bf16.msra.mxu1 %v8200_v14  ;;  %v8280_v14 = vld [vmem:[#allocation8 + $0x794] ss:$48 sps:$4 sm:$0xff]  }
 0x280   :  { %3481 = vmatpush1.bf16.msra.mxu0 %v8203_v15  ;;  %3396 = vmatprep.subr.bf16.mxu1 %v8208_v16  ;;  %v8283_v15 = vld [vmem:[#allocation8 + $0x79c] ss:$48 sps:$4 sm:$0xff]   ;;  %v8278_v16 = vld [vmem:[#allocation8 + $0x790] ss:$48 sps:$4 sm:$0xff]  }
 0x281   :  { %3482 = vmatprep.subr.bf16.mxu0 %v8211_v17  ;;  %v8281_v17 = vld [vmem:[#allocation8 + $0x798] ss:$48 sps:$4 sm:$0xff]  }
 0x283   :  { %3397 = vmatpush1.bf16.msra.mxu1 %v8206_v18  ;;  %v8286_v18 = vld [vmem:[#allocation8 + $0x7f4] ss:$48 sps:$4 sm:$0xff]  }
 0x284   :  { %3483 = vmatpush1.bf16.msra.mxu0 %v8209_v19  ;;  %3398 = vmatprep.subr.bf16.mxu1 %v8214_v20  ;;  %v8289_v19 = vld [vmem:[#allocation8 + $0x7fc] ss:$48 sps:$4 sm:$0xff]   ;;  %v8284_v20 = vld [vmem:[#allocation8 + $0x7f0] ss:$48 sps:$4 sm:$0xff]  }
 0x285   :  { %3484 = vmatprep.subr.bf16.mxu0 %v8217_v21  ;;  %v8287_v21 = vld [vmem:[#allocation8 + $0x7f8] ss:$48 sps:$4 sm:$0xff]  }
 0x287   :  { %3399 = vmatpush1.bf16.msra.mxu1 %v8212_v22  ;;  %v8292_v22 = vld [vmem:[#allocation8 + $0x854] ss:$48 sps:$4 sm:$0xff]  }
 0x288   :  { %3485 = vmatpush1.bf16.msra.mxu0 %v8215_v23  ;;  %3400 = vmatprep.subr.bf16.mxu1 %v8220_v24  ;;  %v8295_v23 = vld [vmem:[#allocation8 + $0x85c] ss:$48 sps:$4 sm:$0xff]   ;;  %v8290_v24 = vld [vmem:[#allocation8 + $0x850] ss:$48 sps:$4 sm:$0xff]  }
 0x289   :  { %3486 = vmatprep.subr.bf16.mxu0 %v8223_v25  ;;  %v8293_v25 = vld [vmem:[#allocation8 + $0x858] ss:$48 sps:$4 sm:$0xff]  }
 0x28b   :  { %3401 = vmatpush1.bf16.msra.mxu1 %v8218_v26  ;;  %v8298_v26 = vld [vmem:[#allocation8 + $0x8b4] ss:$48 sps:$4 sm:$0xff]  }
 0x28c   :  { %3487 = vmatpush1.bf16.msra.mxu0 %v8221_v27  ;;  %3402 = vmatprep.subr.bf16.mxu1 %v8226_v28  ;;  %v8301_v27 = vld [vmem:[#allocation8 + $0x8bc] ss:$48 sps:$4 sm:$0xff]   ;;  %v8296_v28 = vld [vmem:[#allocation8 + $0x8b0] ss:$48 sps:$4 sm:$0xff]  }
 0x28d   :  { %3488 = vmatprep.subr.bf16.mxu0 %v8229_v29  ;;  %v8299_v29 = vld [vmem:[#allocation8 + $0x8b8] ss:$48 sps:$4 sm:$0xff]  }
 0x28f   :  { %3403 = vmatpush1.bf16.msra.mxu1 %v8224_v30  ;;  %v8304_v30 = vld [vmem:[#allocation8 + $0x24] ss:$48 sps:$4 sm:$0xff]  }
 0x290   :  { %3489 = vmatpush1.bf16.msra.mxu0 %v8227_v32  ;;  %3404 = vmatprep.subr.bf16.mxu1 %v8232_v34  ;;  %v8307_v32 = vld [vmem:[#allocation8 + $0x2c] ss:$48 sps:$4 sm:$0xff]   ;;  %v8302_v34 = vld [vmem:[#allocation8 + $0x20] ss:$48 sps:$4 sm:$0xff]  }
 0x291   :  { %3490 = vmatprep.subr.bf16.mxu0 %v8235_v35  ;;  %v8305_v35 = vld [vmem:[#allocation8 + $0x28] ss:$48 sps:$4 sm:$0xff]  }
 0x293   :  { %3405 = vmatpush1.bf16.msra.mxu1 %v8230_v36  ;;  %v8310_v36 = vld [vmem:[#allocation8 + $0x84] ss:$48 sps:$4 sm:$0xff]  }
 0x294   :  { %3491 = vmatpush1.bf16.msra.mxu0 %v8233_v37  ;;  %3406 = vmatprep.subr.bf16.mxu1 %v8238_v38  ;;  %v8313_v37 = vld [vmem:[#allocation8 + $0x8c] ss:$48 sps:$4 sm:$0xff]   ;;  %v8308_v38 = vld [vmem:[#allocation8 + $0x80] ss:$48 sps:$4 sm:$0xff]  }
 0x295   :  { %3492 = vmatprep.subr.bf16.mxu0 %v8241_v40  ;;  %v8311_v40 = vld [vmem:[#allocation8 + $0x88] ss:$48 sps:$4 sm:$0xff]  }
 0x297   :  { %3407 = vmatpush1.bf16.msra.mxu1 %v8236_v41  ;;  %v8316_v41 = vld [vmem:[#allocation8 + $0xe4] ss:$48 sps:$4 sm:$0xff]  }
 0x298   :  { %3493 = vmatpush1.bf16.msra.mxu0 %v8239_v42  ;;  %3408 = vmatprep.subr.bf16.mxu1 %v8244_v43  ;;  %v8319_v42 = vld [vmem:[#allocation8 + $0xec] ss:$48 sps:$4 sm:$0xff]   ;;  %v8314_v43 = vld [vmem:[#allocation8 + $0xe0] ss:$48 sps:$4 sm:$0xff]  }
 0x299   :  { %3494 = vmatprep.subr.bf16.mxu0 %v8247_v44  ;;  %v8317_v44 = vld [vmem:[#allocation8 + $0xe8] ss:$48 sps:$4 sm:$0xff]  }
 0x29b   :  { %3409 = vmatpush1.bf16.msra.mxu1 %v8242_v45  ;;  %v8322_v45 = vld [vmem:[#allocation8 + $0x144] ss:$48 sps:$4 sm:$0xff]  }
 0x29c   :  { %3495 = vmatpush1.bf16.msra.mxu0 %v8245_v46  ;;  %3410 = vmatprep.subr.bf16.mxu1 %v8250_v47  ;;  %v8325_v46 = vld [vmem:[#allocation8 + $0x14c] ss:$48 sps:$4 sm:$0xff]   ;;  %v8320_v47 = vld [vmem:[#allocation8 + $0x140] ss:$48 sps:$4 sm:$0xff]  }
 0x29d   :  { %3496 = vmatprep.subr.bf16.mxu0 %v8253_v48  ;;  %v8323_v48 = vld [vmem:[#allocation8 + $0x148] ss:$48 sps:$4 sm:$0xff]  }
 0x29f   :  { %3411 = vmatpush1.bf16.msra.mxu1 %v8248_v49  ;;  %v8328_v49 = vld [vmem:[#allocation8 + $0x1a4] ss:$48 sps:$4 sm:$0xff]  }
 0x2a0   :  { %3497 = vmatpush1.bf16.msra.mxu0 %v8251_v51  ;;  %3423 = vmatprep.subr.bf16.mxu1 %v8256_v55  ;;  %v8331_v51 = vld [vmem:[#allocation8 + $0x1ac] ss:$48 sps:$4 sm:$0xff]   ;;  %v8329_v55 = vld [vmem:[#allocation8 + $0x1a8] ss:$48 sps:$4 sm:$0xff]  }
 0x2a1   :  { %3509 = vmatprep.subr.bf16.mxu0 %v8259_v56  ;;  %v8334_v56 = vld [vmem:[#allocation8 + $0x204] ss:$48 sps:$4 sm:$0xff]  }
 0x2a2   :  { %3413 = vmatmul.mubr.bf16.vlgmr.msra.gmra.mrb[16].mxu1 %v9368_v6 }
 0x2a3   :  { %3499 = vmatmul.mubr.bf16.vlgmr.msra.gmra.mrb[8].mxu0 %v9368_v6  ;;  %3424 = vmatpush1.bf16.msra.mxu1 %v8254_v57  ;;  %v8337_v57 = vld [vmem:[#allocation8 + $0x20c] ss:$48 sps:$4 sm:$0xff]  }
 0x2a4   :  { %3510 = vmatpush1.bf16.msra.mxu0 %v8257_v58  ;;  %3425 = vmatprep.subr.bf16.mxu1 %v8262_v59  ;;  %v8332_v58 = vld [vmem:[#allocation8 + $0x200] ss:$48 sps:$4 sm:$0xff]   ;;  %v8335_v59 = vld [vmem:[#allocation8 + $0x208] ss:$48 sps:$4 sm:$0xff]  }
 0x2a5   :  { %3511 = vmatprep.subr.bf16.mxu0 %v8265_v61  ;;  %3455 = vmatprep.mubr.bf16.mxu1 %v9151_v12  ;;  %v8340_v61 = vld [vmem:[#allocation8 + $0x264] ss:$48 sps:$4 sm:$0xff]  }
 0x2a6   :  { %3541 = vmatprep.mubr.bf16.mxu0 %v9151_v12 }
 0x2a7   :  { %3426 = vmatpush1.bf16.msra.mxu1 %v8260_v0  ;;  %v8343_v0 = vld [vmem:[#allocation8 + $0x26c] ss:$48 sps:$4 sm:$0xff]  }
 0x2a8   :  { %3512 = vmatpush1.bf16.msra.mxu0 %v8263_v1  ;;  %3427 = vmatprep.subr.bf16.mxu1 %v8268_v3  ;;  %v8338_v1 = vld [vmem:[#allocation8 + $0x260] ss:$48 sps:$4 sm:$0xff]   ;;  %v8341_v3 = vld [vmem:[#allocation8 + $0x268] ss:$48 sps:$4 sm:$0xff]  }
 0x2a9   :  { %3513 = vmatprep.subr.bf16.mxu0 %v8271_v4  ;;  %v8346_v4 = vld [vmem:[#allocation8 + $0x2c4] ss:$48 sps:$4 sm:$0xff]  }
 0x2ab   :  { %3428 = vmatpush1.bf16.msra.mxu1 %v8266_v7  ;;  %v8349_v7 = vld [vmem:[#allocation8 + $0x2cc] ss:$48 sps:$4 sm:$0xff]  }
 0x2ac   :  { %3514 = vmatpush1.bf16.msra.mxu0 %v8269_v8  ;;  %3429 = vmatprep.subr.bf16.mxu1 %v8274_v9  ;;  %v8344_v8 = vld [vmem:[#allocation8 + $0x2c0] ss:$48 sps:$4 sm:$0xff]   ;;  %v8347_v9 = vld [vmem:[#allocation8 + $0x2c8] ss:$48 sps:$4 sm:$0xff]  }
 0x2ad   :  { %3515 = vmatprep.subr.bf16.mxu0 %v8277_v10  ;;  %v8352_v10 = vld [vmem:[#allocation8 + $0x324] ss:$48 sps:$4 sm:$0xff]  }
 0x2af   :  { %3430 = vmatpush1.bf16.msra.mxu1 %v8272_v11  ;;  %v8355_v11 = vld [vmem:[#allocation8 + $0x32c] ss:$48 sps:$4 sm:$0xff]  }
 0x2b0   :  { %3516 = vmatpush1.bf16.msra.mxu0 %v8275_v13  ;;  %3431 = vmatprep.subr.bf16.mxu1 %v8280_v14  ;;  %v8350_v13 = vld [vmem:[#allocation8 + $0x320] ss:$48 sps:$4 sm:$0xff]   ;;  %v8353_v14 = vld [vmem:[#allocation8 + $0x328] ss:$48 sps:$4 sm:$0xff]  }
 0x2b1   :  { %3517 = vmatprep.subr.bf16.mxu0 %v8283_v15  ;;  %v8358_v15 = vld [vmem:[#allocation8 + $0x384] ss:$48 sps:$4 sm:$0xff]  }
 0x2b3   :  { %3432 = vmatpush1.bf16.msra.mxu1 %v8278_v16  ;;  %v8361_v16 = vld [vmem:[#allocation8 + $0x38c] ss:$48 sps:$4 sm:$0xff]  }
 0x2b4   :  { %3518 = vmatpush1.bf16.msra.mxu0 %v8281_v17  ;;  %3433 = vmatprep.subr.bf16.mxu1 %v8286_v18  ;;  %v8356_v17 = vld [vmem:[#allocation8 + $0x380] ss:$48 sps:$4 sm:$0xff]   ;;  %v8359_v18 = vld [vmem:[#allocation8 + $0x388] ss:$48 sps:$4 sm:$0xff]  }
 0x2b5   :  { %3519 = vmatprep.subr.bf16.mxu0 %v8289_v19  ;;  %v8364_v19 = vld [vmem:[#allocation8 + $0x3e4] ss:$48 sps:$4 sm:$0xff]  }
 0x2b7   :  { %3434 = vmatpush1.bf16.msra.mxu1 %v8284_v20  ;;  %v8367_v20 = vld [vmem:[#allocation8 + $0x3ec] ss:$48 sps:$4 sm:$0xff]  }
 0x2b8   :  { %3520 = vmatpush1.bf16.msra.mxu0 %v8287_v21  ;;  %3435 = vmatprep.subr.bf16.mxu1 %v8292_v22  ;;  %v8362_v21 = vld [vmem:[#allocation8 + $0x3e0] ss:$48 sps:$4 sm:$0xff]   ;;  %v8365_v22 = vld [vmem:[#allocation8 + $0x3e8] ss:$48 sps:$4 sm:$0xff]  }
 0x2b9   :  { %3521 = vmatprep.subr.bf16.mxu0 %v8295_v23  ;;  %v8370_v23 = vld [vmem:[#allocation8 + $0x444] ss:$48 sps:$4 sm:$0xff]  }
 0x2bb   :  { %3436 = vmatpush1.bf16.msra.mxu1 %v8290_v24  ;;  %v8373_v24 = vld [vmem:[#allocation8 + $0x44c] ss:$48 sps:$4 sm:$0xff]  }
 0x2bc   :  { %3522 = vmatpush1.bf16.msra.mxu0 %v8293_v25  ;;  %3437 = vmatprep.subr.bf16.mxu1 %v8298_v26  ;;  %v8368_v25 = vld [vmem:[#allocation8 + $0x440] ss:$48 sps:$4 sm:$0xff]   ;;  %v8371_v26 = vld [vmem:[#allocation8 + $0x448] ss:$48 sps:$4 sm:$0xff]  }
 0x2bd   :  { %3523 = vmatprep.subr.bf16.mxu0 %v8301_v27  ;;  %v8376_v27 = vld [vmem:[#allocation8 + $0x4a4] ss:$48 sps:$4 sm:$0xff]  }
 0x2bf   :  { %3438 = vmatpush1.bf16.msra.mxu1 %v8296_v28  ;;  %v8379_v28 = vld [vmem:[#allocation8 + $0x4ac] ss:$48 sps:$4 sm:$0xff]  }
 0x2c0   :  { %3524 = vmatpush1.bf16.msra.mxu0 %v8299_v29  ;;  %3552 = vmatprep.subr.bf16.mxu1 %v8304_v30  ;;  %v8374_v29 = vld [vmem:[#allocation8 + $0x4a0] ss:$48 sps:$4 sm:$0xff]   ;;  %v8377_v30 = vld [vmem:[#allocation8 + $0x4a8] ss:$48 sps:$4 sm:$0xff]  }
 0x2c1   :  { %3638 = vmatprep.subr.bf16.mxu0 %v8307_v32  ;;  %v8382_v32 = vld [vmem:[#allocation8 + $0x504] ss:$48 sps:$4 sm:$0xff]  }
 0x2c2   :  { %3456 = vmatmul.mubr.bf16.vlgmr.msra.gmra.mrb[16].mxu1 %v9378_v39 }
 0x2c3   :  { %3542 = vmatmul.mubr.bf16.vlgmr.msra.gmra.mrb[8].mxu0 %v9378_v39  ;;  %3553 = vmatpush1.bf16.msra.mxu1 %v8302_v34  ;;  %v8385_v34 = vld [vmem:[#allocation8 + $0x50c] ss:$48 sps:$4 sm:$0xff]  }
 0x2c4   :  { %3584 = vmatprep.mubr.bf16.mxu1 %v9364_v5  ;;  %3639 = vmatpush1.bf16.msra.mxu0 %v8305_v35  ;;  %v8380_v35 = vld [vmem:[#allocation8 + $0x500] ss:$48 sps:$4 sm:$0xff]  }
 0x2c5   :  { %3670 = vmatprep.mubr.bf16.mxu0 %v9364_v5  ;;  %3554 = vmatprep.subr.bf16.mxu1 %v8310_v36  ;;  %v8326_v5 = vld [vmem:[#allocation8 + $0x1a0] ss:$48 sps:$4 sm:$0xff]   ;;  %v8383_v36 = vld [vmem:[#allocation8 + $0x508] ss:$48 sps:$4 sm:$0xff]  }
 0x2c6   :  { %3640 = vmatprep.subr.bf16.mxu0 %v8313_v37  ;;  %v8388_v37 = vld [vmem:[#allocation8 + $0x564] ss:$48 sps:$4 sm:$0xff]  }
 0x2c7   :  { %3555 = vmatpush1.bf16.msra.mxu1 %v8308_v38  ;;  %v8391_v38 = vld [vmem:[#allocation8 + $0x56c] ss:$48 sps:$4 sm:$0xff]  }
 0x2c8   :  { %3641 = vmatpush1.bf16.msra.mxu0 %v8311_v40  ;;  %3556 = vmatprep.subr.bf16.mxu1 %v8316_v41  ;;  %v8386_v40 = vld [vmem:[#allocation8 + $0x560] ss:$48 sps:$4 sm:$0xff]   ;;  %v8389_v41 = vld [vmem:[#allocation8 + $0x568] ss:$48 sps:$4 sm:$0xff]  }
 0x2c9   :  { %3642 = vmatprep.subr.bf16.mxu0 %v8319_v42  ;;  %v8394_v42 = vld [vmem:[#allocation8 + $0x5c4] ss:$48 sps:$4 sm:$0xff]  }
 0x2cb   :  { %3557 = vmatpush1.bf16.msra.mxu1 %v8314_v43  ;;  %v8397_v43 = vld [vmem:[#allocation8 + $0x5cc] ss:$48 sps:$4 sm:$0xff]  }
 0x2cc   :  { %3643 = vmatpush1.bf16.msra.mxu0 %v8317_v44  ;;  %3558 = vmatprep.subr.bf16.mxu1 %v8322_v45  ;;  %v8392_v44 = vld [vmem:[#allocation8 + $0x5c0] ss:$48 sps:$4 sm:$0xff]   ;;  %v8395_v45 = vld [vmem:[#allocation8 + $0x5c8] ss:$48 sps:$4 sm:$0xff]  }
 0x2cd   :  { %3644 = vmatprep.subr.bf16.mxu0 %v8325_v46  ;;  %v8400_v46 = vld [vmem:[#allocation8 + $0x624] ss:$48 sps:$4 sm:$0xff]  }
 0x2cf   :  { %3559 = vmatpush1.bf16.msra.mxu1 %v8320_v47  ;;  %v8403_v47 = vld [vmem:[#allocation8 + $0x62c] ss:$48 sps:$4 sm:$0xff]  }
 0x2d0   :  { %3645 = vmatpush1.bf16.msra.mxu0 %v8323_v48  ;;  %3560 = vmatprep.subr.bf16.mxu1 %v8328_v49  ;;  %v8398_v48 = vld [vmem:[#allocation8 + $0x620] ss:$48 sps:$4 sm:$0xff]   ;;  %v8401_v49 = vld [vmem:[#allocation8 + $0x628] ss:$48 sps:$4 sm:$0xff]  }
 0x2d1   :  { %3646 = vmatprep.subr.bf16.mxu0 %v8331_v51  ;;  %v8406_v51 = vld [vmem:[#allocation8 + $0x684] ss:$48 sps:$4 sm:$0xff]  }
 0x2d3   :  { %3561 = vmatpush1.bf16.msra.mxu1 %v8326_v5  ;;  %v8409_v5 = vld [vmem:[#allocation8 + $0x68c] ss:$48 sps:$4 sm:$0xff]  }
 0x2d4   :  { %3647 = vmatpush1.bf16.msra.mxu0 %v8329_v55  ;;  %3562 = vmatprep.subr.bf16.mxu1 %v8334_v56  ;;  %v8404_v55 = vld [vmem:[#allocation8 + $0x680] ss:$48 sps:$4 sm:$0xff]   ;;  %v8407_v56 = vld [vmem:[#allocation8 + $0x688] ss:$48 sps:$4 sm:$0xff]  }
 0x2d5   :  { %3648 = vmatprep.subr.bf16.mxu0 %v8337_v57  ;;  %v8412_v57 = vld [vmem:[#allocation8 + $0x6e4] ss:$48 sps:$4 sm:$0xff]  }
 0x2d7   :  { %3563 = vmatpush1.bf16.msra.mxu1 %v8332_v58  ;;  %v8415_v58 = vld [vmem:[#allocation8 + $0x6ec] ss:$48 sps:$4 sm:$0xff]  }
 0x2d8   :  { %3649 = vmatpush1.bf16.msra.mxu0 %v8335_v59  ;;  %3564 = vmatprep.subr.bf16.mxu1 %v8340_v61  ;;  %v8410_v59 = vld [vmem:[#allocation8 + $0x6e0] ss:$48 sps:$4 sm:$0xff]   ;;  %v8413_v61 = vld [vmem:[#allocation8 + $0x6e8] ss:$48 sps:$4 sm:$0xff]  }
 0x2d9   :  { %3650 = vmatprep.subr.bf16.mxu0 %v8343_v0  ;;  %v8418_v0 = vld [vmem:[#allocation8 + $0x744] ss:$48 sps:$4 sm:$0xff]  }
 0x2db   :  { %3565 = vmatpush1.bf16.msra.mxu1 %v8338_v1  ;;  %v8416_v1 = vld [vmem:[#allocation8 + $0x740] ss:$48 sps:$4 sm:$0xff]  }
 0x2dc   :  { %3651 = vmatpush1.bf16.msra.mxu0 %v8341_v3  ;;  %3566 = vmatprep.subr.bf16.mxu1 %v8346_v4  ;;  %v8419_v3 = vld [vmem:[#allocation8 + $0x748] ss:$48 sps:$4 sm:$0xff]   ;;  %v8424_v4 = vld [vmem:[#allocation8 + $0x7a4] ss:$48 sps:$4 sm:$0xff]  }
 0x2dd   :  { %3652 = vmatprep.subr.bf16.mxu0 %v8349_v7  ;;  %v8427_v7 = vld [vmem:[#allocation8 + $0x7ac] ss:$48 sps:$4 sm:$0xff]  }
 0x2df   :  { %3567 = vmatpush1.bf16.msra.mxu1 %v8344_v8  ;;  %v8422_v8 = vld [vmem:[#allocation8 + $0x7a0] ss:$48 sps:$4 sm:$0xff]  }
 0x2e0   :  { %3653 = vmatpush1.bf16.msra.mxu0 %v8347_v9  ;;  %3568 = vmatprep.subr.bf16.mxu1 %v8352_v10  ;;  %v8430_v9 = vld [vmem:[#allocation8 + $0x804] ss:$48 sps:$4 sm:$0xff]   ;;  %v8433_v10 = vld [vmem:[#allocation8 + $0x80c] ss:$48 sps:$4 sm:$0xff]  }
 0x2e1   :  { %3654 = vmatprep.subr.bf16.mxu0 %v8355_v11  ;;  %v8428_v11 = vld [vmem:[#allocation8 + $0x800] ss:$48 sps:$4 sm:$0xff]  }
 0x2e3   :  { %3569 = vmatpush1.bf16.msra.mxu1 %v8350_v13  ;;  %v8431_v13 = vld [vmem:[#allocation8 + $0x808] ss:$48 sps:$4 sm:$0xff]  }
 0x2e4   :  { %3655 = vmatpush1.bf16.msra.mxu0 %v8353_v14  ;;  %3570 = vmatprep.subr.bf16.mxu1 %v8358_v15  ;;  %v8436_v14 = vld [vmem:[#allocation8 + $0x864] ss:$48 sps:$4 sm:$0xff]   ;;  %v8439_v15 = vld [vmem:[#allocation8 + $0x86c] ss:$48 sps:$4 sm:$0xff]  }
 0x2e5   :  { %3656 = vmatprep.subr.bf16.mxu0 %v8361_v16  ;;  %v8434_v16 = vld [vmem:[#allocation8 + $0x860] ss:$48 sps:$4 sm:$0xff]  }
 0x2e7   :  { %3571 = vmatpush1.bf16.msra.mxu1 %v8356_v17  ;;  %v8437_v17 = vld [vmem:[#allocation8 + $0x868] ss:$48 sps:$4 sm:$0xff]  }
 0x2e8   :  { %3657 = vmatpush1.bf16.msra.mxu0 %v8359_v18  ;;  %3572 = vmatprep.subr.bf16.mxu1 %v8364_v19  ;;  %v8442_v18 = vld [vmem:[#allocation8 + $0x8c4] ss:$48 sps:$4 sm:$0xff]   ;;  %v8445_v19 = vld [vmem:[#allocation8 + $0x8cc] ss:$48 sps:$4 sm:$0xff]  }
 0x2e9   :  { %3658 = vmatprep.subr.bf16.mxu0 %v8367_v20  ;;  %v8440_v20 = vld [vmem:[#allocation8 + $0x8c0] ss:$48 sps:$4 sm:$0xff]  }
 0x2eb   :  { %3573 = vmatpush1.bf16.msra.mxu1 %v8362_v21  ;;  %v8443_v21 = vld [vmem:[#allocation8 + $0x8c8] ss:$48 sps:$4 sm:$0xff]  }
 0x2ec   :  { %3659 = vmatpush1.bf16.msra.mxu0 %v8365_v22  ;;  %3574 = vmatprep.subr.bf16.mxu1 %v8370_v23  ;;  %v8448_v22 = vld [vmem:[#allocation11 + $0x4] ss:$12 sps:$4 sm:$0xff]   ;;  %v8464_v23 = vld [vmem:[#allocation11 + $0xc8] ss:$12 sps:$4 sm:$0xff]  }
 0x2ed   :  { %3660 = vmatprep.subr.bf16.mxu0 %v8373_v24  ;;  %v8446_v24 = vld [vmem:[#allocation11] ss:$12 sps:$4 sm:$0xff]  }
 0x2ef   :  { %3575 = vmatpush1.bf16.msra.mxu1 %v8368_v25  ;;  %v8451_v25 = vld [vmem:[#allocation11 + $0x1c] ss:$12 sps:$4 sm:$0xff]  }
 0x2f0   :  { %3661 = vmatpush1.bf16.msra.mxu0 %v8371_v26  ;;  %3576 = vmatprep.subr.bf16.mxu1 %v8376_v27  ;;  %v8465_v26 = vld [vmem:[#allocation11 + $0x8] ss:$12 sps:$4 sm:$0xff]   ;;  %v8469_v27 = vld [vmem:[#allocation11 + $0xe0] ss:$12 sps:$4 sm:$0xff]  }
 0x2f1   :  { %3662 = vmatprep.subr.bf16.mxu0 %v8379_v28  ;;  %v8449_v28 = vld [vmem:[#allocation11 + $0x18] ss:$12 sps:$4 sm:$0xff]  }
 0x2f3   :  { %3577 = vmatpush1.bf16.msra.mxu1 %v8374_v29  ;;  %v8454_v29 = vld [vmem:[#allocation11 + $0x34] ss:$12 sps:$4 sm:$0xff]  }
 0x2f4   :  { %3663 = vmatpush1.bf16.msra.mxu0 %v8377_v30  ;;  %3578 = vmatprep.subr.bf16.mxu1 %v8382_v32  ;;  %v8470_v30 = vld [vmem:[#allocation11 + $0x20] ss:$12 sps:$4 sm:$0xff]   ;;  %v8474_v32 = vld [vmem:[#allocation11 + $0xf8] ss:$12 sps:$4 sm:$0xff]  }
 0x2f5   :  { %3664 = vmatprep.subr.bf16.mxu0 %v8385_v34  ;;  %v8452_v34 = vld [vmem:[#allocation11 + $0x30] ss:$12 sps:$4 sm:$0xff]  }
 0x2f7   :  { %3579 = vmatpush1.bf16.msra.mxu1 %v8380_v35  ;;  %v8457_v35 = vld [vmem:[#allocation11 + $0x4c] ss:$12 sps:$4 sm:$0xff]  }
 0x2f8   :  { %3665 = vmatpush1.bf16.msra.mxu0 %v8383_v36  ;;  %3580 = vmatprep.subr.bf16.mxu1 %v8388_v37  ;;  %v8475_v36 = vld [vmem:[#allocation11 + $0x38] ss:$12 sps:$4 sm:$0xff]   ;;  %v8479_v37 = vld [vmem:[#allocation11 + $0x110] ss:$12 sps:$4 sm:$0xff]  }
 0x2f9   :  { %3666 = vmatprep.subr.bf16.mxu0 %v8391_v38  ;;  %v8455_v38 = vld [vmem:[#allocation11 + $0x48] ss:$12 sps:$4 sm:$0xff]  }
 0x2fb   :  { %3581 = vmatpush1.bf16.msra.mxu1 %v8386_v40  ;;  %v8480_v40 = vld [vmem:[#allocation11 + $0x50] ss:$12 sps:$4 sm:$0xff]  }
 0x2fc   :  { %3667 = vmatpush1.bf16.msra.mxu0 %v8389_v41  ;;  %3582 = vmatprep.subr.bf16.mxu1 %v8394_v42  ;;  %v8484_v41 = vld [vmem:[#allocation11 + $0x128] ss:$12 sps:$4 sm:$0xff]   ;;  %v8458_v42 = vld [vmem:[#allocation11 + $0x60] ss:$12 sps:$4 sm:$0xff]  }
 0x2fd   :  { %3668 = vmatprep.subr.bf16.mxu0 %v8397_v43  ;;  %v9398_v43 = vld [vmem:[#allocation10] sm:$0xff] }
 0x2ff   :  { %3583 = vmatpush1.bf16.msra.mxu1 %v8392_v44  ;;  %v1722_v44 = vsub.s32 3, %v9336_v31 }
 0x300   :  { %3669 = vmatpush1.bf16.msra.mxu0 %v8395_v45  ;;  %3595 = vmatprep.subr.bf16.mxu1 %v8400_v46  ;;  %v8463_v45 = vld [vmem:[#allocation11 + $0x7c] ss:$12 sps:$4 sm:$0xff]  }
 0x301   :  { %3681 = vmatprep.subr.bf16.mxu0 %v8403_v47  ;;  %v8485_v46 = vld [vmem:[#allocation11 + $0x68] ss:$12 sps:$4 sm:$0xff]   ;;  %v8489_v47 = vld [vmem:[#allocation11 + $0x140] ss:$12 sps:$4 sm:$0xff]  }
 0x302   :  { %3585 = vmatmul.mubr.bf16.vlgmr.msra.gmra.mrb[20].mxu1 %v9368_v6 }
 0x303   :  { %3671 = vmatmul.mubr.bf16.vlgmr.msra.gmra.mrb[12].mxu0 %v9368_v6  ;;  %3596 = vmatpush1.bf16.msra.mxu1 %v8398_v48  ;;  %v8421_v6 = vld [vmem:[#allocation8 + $0x74c] ss:$48 sps:$4 sm:$0xff]   ;;  %v1711_v48 = vrot.slane %v9398_v43, %v9347_v53 }
 0x304   :  { %3682 = vmatpush1.bf16.msra.mxu0 %v8401_v49  ;;  %3597 = vmatprep.subr.bf16.mxu1 %v8406_v51  ;;  %v1719_v49 = vrot.slane %v9398_v43, %v9339_v33  ;;  %v1715_v51 = vrot.slane %v9398_v43, %v9350_v54 }
 0x305   :  { %3683 = vmatprep.subr.bf16.mxu0 %v8409_v5  ;;  %3627 = vmatprep.mubr.bf16.mxu1 %v9151_v12  ;;  %v1723_v5 = vrot.slane %v9398_v43, %v1722_v44 }
 0x306   :  { %3713 = vmatprep.mubr.bf16.mxu0 %v9151_v12  ;;  %v8425_v12 = vld [vmem:[#allocation8 + $0x7a8] ss:$48 sps:$4 sm:$0xff]  }
 0x307   :  { %3598 = vmatpush1.bf16.msra.mxu1 %v8404_v55  ;;  %v8461_v55 = vld [vmem:[#allocation11 + $0x78] ss:$12 sps:$4 sm:$0xff]  }
 0x308   :  { %3684 = vmatpush1.bf16.msra.mxu0 %v8407_v56  ;;  %3599 = vmatprep.subr.bf16.mxu1 %v8412_v57  ;;  %v8468_v56 = vld [vmem:[#allocation11 + $0x94] ss:$12 sps:$4 sm:$0xff]  }
 0x309   :  { %3685 = vmatprep.subr.bf16.mxu0 %v8415_v58 }
 0x30b   :  { %3600 = vmatpush1.bf16.msra.mxu1 %v8410_v59  ;;  %v8490_v59 = vld [vmem:[#allocation11 + $0x80] ss:$12 sps:$4 sm:$0xff]  }
 0x30c   :  { %3686 = vmatpush1.bf16.msra.mxu0 %v8413_v61  ;;  %3601 = vmatprep.subr.bf16.mxu1 %v8418_v0 }
 0x30d   :  { %3687 = vmatprep.subr.bf16.mxu0 %v8421_v6 }
 0x30f   :  { %3602 = vmatpush1.bf16.msra.mxu1 %v8416_v1 }
 0x310   :  { %3688 = vmatpush1.bf16.msra.mxu0 %v8419_v3  ;;  %3603 = vmatprep.subr.bf16.mxu1 %v8424_v4  ;;  %v8494_v3 = vld [vmem:[#allocation11 + $0x158] ss:$12 sps:$4 sm:$0xff]  }
 0x311   :  { %3689 = vmatprep.subr.bf16.mxu0 %v8427_v7 }
 0x313   :  { %3604 = vmatpush1.bf16.msra.mxu1 %v8422_v8 }
 0x314   :  { %3690 = vmatpush1.bf16.msra.mxu0 %v8425_v12  ;;  %3605 = vmatprep.subr.bf16.mxu1 %v8430_v9  ;;  %v8466_v9 = vld [vmem:[#allocation11 + $0x90] ss:$12 sps:$4 sm:$0xff]  }
 0x315   :  { %3691 = vmatprep.subr.bf16.mxu0 %v8433_v10 }
 0x317   :  { %3606 = vmatpush1.bf16.msra.mxu1 %v8428_v11 }
 0x318   :  { %3692 = vmatpush1.bf16.msra.mxu0 %v8431_v13  ;;  %3607 = vmatprep.subr.bf16.mxu1 %v8436_v14 }
 0x319   :  { %3693 = vmatprep.subr.bf16.mxu0 %v8439_v15 }
 0x31b   :  { %3608 = vmatpush1.bf16.msra.mxu1 %v8434_v16 }
 0x31c   :  { %3694 = vmatpush1.bf16.msra.mxu0 %v8437_v17  ;;  %3609 = vmatprep.subr.bf16.mxu1 %v8442_v18  ;;  %v8473_v17 = vld [vmem:[#allocation11 + $0xac] ss:$12 sps:$4 sm:$0xff]  }
 0x31d   :  { %3695 = vmatprep.subr.bf16.mxu0 %v8445_v19 }
 0x31f   :  { %3610 = vmatpush1.bf16.msra.mxu1 %v8440_v20 }
 0x320   :  { %3696 = vmatpush1.bf16.msra.mxu0 %v8443_v21  ;;  %5889 = vmatprep.subr.bf16.mxu1 %v8448_v22  ;;  %v8495_v22 = vld [vmem:[#allocation11 + $0x98] ss:$12 sps:$4 sm:$0xff]  }
 0x321   :  { %7523 = vmatprep.subr.bf16.mxu0 %v8464_v23 }
 0x322   :  { %3628 = vmatmul.mubr.bf16.vlgmr.msra.gmra.mrb[20].mxu1 %v9378_v39 }
 0x323   :  { %3714 = vmatmul.mubr.bf16.vlgmr.msra.gmra.mrb[12].mxu0 %v9378_v39  ;;  %5890 = vmatpush1.bf16.msra.mxu1 %v8446_v24  ;;  %v8460_v39 = vld [vmem:[#allocation11 + $0x64] ss:$12 sps:$4 sm:$0xff]  }
 0x324   :  { %5891 = vmatprep.subr.bf16.mxu1 %v8451_v25  ;;  %7524 = vmatpush3.bf16.msra.mxu0 %v8465_v26 }
 0x325   :  { %7525 = vmatprep.subr.bf16.mxu0 %v8469_v27  ;;  %v8499_v27 = vld [vmem:[#allocation11 + $0x170] ss:$12 sps:$4 sm:$0xff]  }
 0x327   :  { %5892 = vmatpush1.bf16.msra.mxu1 %v8449_v28 }
 0x328   :  { %5893 = vmatprep.subr.bf16.mxu1 %v8454_v29  ;;  %7526 = vmatpush3.bf16.msra.mxu0 %v8470_v30 }
 0x329   :  { %7527 = vmatprep.subr.bf16.mxu0 %v8474_v32 }
 0x32b   :  { %5894 = vmatpush1.bf16.msra.mxu1 %v8452_v34  ;;  %v8471_v34 = vld [vmem:[#allocation11 + $0xa8] ss:$12 sps:$4 sm:$0xff]  }
 0x32c   :  { %5895 = vmatprep.subr.bf16.mxu1 %v8457_v35  ;;  %7528 = vmatpush3.bf16.msra.mxu0 %v8475_v36 }
 0x32d   :  { %7529 = vmatprep.subr.bf16.mxu0 %v8479_v37 }
 0x32f   :  { %5896 = vmatpush1.bf16.msra.mxu1 %v8455_v38 }
 0x330   :  { %5897 = vmatprep.subr.bf16.mxu1 %v8460_v39  ;;  %7530 = vmatpush3.bf16.msra.mxu0 %v8480_v40  ;;  %v8478_v39 = vld [vmem:[#allocation11 + $0xc4] ss:$12 sps:$4 sm:$0xff]  }
 0x331   :  { %7531 = vmatprep.subr.bf16.mxu0 %v8484_v41 }
 0x333   :  { %5898 = vmatpush1.bf16.msra.mxu1 %v8458_v42 }
 0x334   :  { %5899 = vmatprep.subr.bf16.mxu1 %v8463_v45  ;;  %7532 = vmatpush3.bf16.msra.mxu0 %v8485_v46  ;;  %v8500_v46 = vld [vmem:[#allocation11 + $0xb0] ss:$12 sps:$4 sm:$0xff]  }
 0x335   :  { %v3285_v57 = vpop.f32.mrb[12].mxu1  ;;  %v3371_v58 = vpop.f32.mrb[4].mxu0  ;;  %7533 = vmatprep.subr.bf16.mxu0 %v8489_v47 }
 0x336   :  { %v9410_v61 = vadd.f32 %v3285_v57, %v1711_v48  ;;  %v9412_v0 = vadd.f32 %v3371_v58, %v1719_v49  ;;  %v3287_v6 = vpop.f32.mrb[13].mxu1  ;;  %v3373_v1 = vpop.f32.mrb[5].mxu0 }
 0x337   :  { %v9414_v4 = vadd.f32 %v3287_v6, %v1715_v51  ;;  %v9416_v7 = vadd.f32 %v3373_v1, %v1723_v5  ;;  %v3289_v8 = vpop.f32.mrb[14].mxu1  ;;  %v3375_v12 = vpop.f32.mrb[6].mxu0  ;;  %5900 = vmatpush1.bf16.msra.mxu1 %v8461_v55 }
 0x338   :  { %v3724_v10 = vmul.f32 %v9410_v61, %v9410_v61  ;;  %v3726_v11 = vmul.f32 %v9412_v0, %v9412_v0  ;;  %v9422_v13 = vadd.f32 %v3289_v8, %v1711_v48  ;;  %v9424_v14 = vadd.f32 %v3375_v12, %v1719_v49  ;;  %v3291_v15 = vpop.f32.mrb[15].mxu1  ;;  %v3377_v16 = vpop.f32.mrb[7].mxu0  ;;  %5901 = vmatprep.subr.bf16.mxu1 %v8468_v56  ;;  %v8483_v12 = vld [vmem:[#allocation11 + $0xdc] ss:$12 sps:$4 sm:$0xff]  }
 0x339   :  { %v3725_v18 = vmul.f32 %v9414_v4, %v9414_v4  ;;  %v3727_v19 = vmul.f32 %v9416_v7, %v9416_v7  ;;  %v9430_v20 = vadd.f32 %v3291_v15, %v1715_v51  ;;  %v9432_v21 = vadd.f32 %v3377_v16, %v1723_v5  ;;  %7534 = vmatpush3.bf16.msra.mxu0 %v8490_v59  ;;  %v8504_v5 = vld [vmem:[#allocation11 + $0x248] ss:$12 sps:$4 sm:$0xff]   ;;  %v8476_v59 = vld [vmem:[#allocation11 + $0xc0] ss:$12 sps:$4 sm:$0xff]  }
 0x33a   :  { %v3748_v23 = vmul.f32 %v9410_v61, %v3724_v10  ;;  %v3750_v24 = vmul.f32 %v9412_v0, %v3726_v11  ;;  %v3736_v25 = vmul.f32 %v9422_v13, %v9422_v13  ;;  %v3738_v26 = vmul.f32 %v9424_v14, %v9424_v14  ;;  %7535 = vmatprep.subr.bf16.mxu0 %v8494_v3 }
 0x33b   :  { %v3749_v28 = vmul.f32 %v9414_v4, %v3725_v18  ;;  %v3751_v29 = vmul.f32 %v9416_v7, %v3727_v19  ;;  %v3737_v30 = vmul.f32 %v9430_v20, %v9430_v20  ;;  %v3739_v32 = vmul.f32 %v9432_v21, %v9432_v21  ;;  %5902 = vmatpush1.bf16.msra.mxu1 %v8466_v9  ;;  %v8481_v18 = vld [vmem:[#allocation11 + $0xd8] ss:$12 sps:$4 sm:$0xff]  }
 0x33c   :  { %v3772_v35 = vmul.f32 0.044715, %v3748_v23  ;;  %v3774_v36 = vmul.f32 0.044715, %v3750_v24  ;;  %v3760_v37 = vmul.f32 %v9422_v13, %v3736_v25  ;;  %v3762_v38 = vmul.f32 %v9424_v14, %v3738_v26  ;;  %5903 = vmatprep.subr.bf16.mxu1 %v8473_v17  ;;  %v8486_v24 = vld [vmem:[#allocation11 + $0xf0] ss:$12 sps:$4 sm:$0xff]  }
 0x33d   :  { %v3773_v40 = vmul.f32 0.044715, %v3749_v28  ;;  %v3775_v41 = vmul.f32 0.044715, %v3751_v29  ;;  %v3761_v42 = vmul.f32 %v9430_v20, %v3737_v30  ;;  %v3763_v45 = vmul.f32 %v9432_v21, %v3739_v32  ;;  %7536 = vmatpush3.bf16.msra.mxu0 %v8495_v22  ;;  %v8488_v22 = vld [vmem:[#allocation11 + $0xf4] ss:$12 sps:$4 sm:$0xff]  }
 0x33e   :  { %v3796_v47 = vadd.f32 %v9410_v61, %v3772_v35  ;;  %v3798_v48 = vadd.f32 %v9412_v0, %v3774_v36  ;;  %v3784_v49 = vmul.f32 0.044715, %v3760_v37  ;;  %v3786_v51 = vmul.f32 0.044715, %v3762_v38  ;;  %7537 = vmatprep.subr.bf16.mxu0 %v8499_v27  ;;  %v8493_v25 = vld [vmem:[#allocation11 + $0x10c] ss:$12 sps:$4 sm:$0xff]  }
 0x33f   :  { %v3797_v55 = vadd.f32 %v9414_v4, %v3773_v40  ;;  %v3799_v56 = vadd.f32 %v9416_v7, %v3775_v41  ;;  %v3785_v57 = vmul.f32 0.044715, %v3761_v42  ;;  %v3787_v58 = vmul.f32 0.044715, %v3763_v45  ;;  %5904 = vmatpush1.bf16.msra.mxu1 %v8471_v34  ;;  %v8491_v26 = vld [vmem:[#allocation11 + $0x108] ss:$12 sps:$4 sm:$0xff]  }
 0x340   :  { %v3820_v6 = vmul.f32 0.7978846, %v3796_v47  ;;  %v3822_v1 = vmul.f32 0.7978846, %v3798_v48  ;;  %v3808_v3 = vadd.f32 %v9422_v13, %v3784_v49  ;;  %v3810_v8 = vadd.f32 %v9424_v14, %v3786_v51  ;;  %5905 = vmatprep.subr.bf16.mxu1 %v8478_v39  ;;  %v8498_v28 = vld [vmem:[#allocation11 + $0x124] ss:$12 sps:$4 sm:$0xff]  }
 0x341   :  { %v3821_v9 = vmul.f32 0.7978846, %v3797_v55  ;;  %v3823_v10 = vmul.f32 0.7978846, %v3799_v56  ;;  %v3809_v11 = vadd.f32 %v9430_v20, %v3785_v57  ;;  %v3811_v15 = vadd.f32 %v9432_v21, %v3787_v58  ;;  %7538 = vmatpush3.bf16.msra.mxu0 %v8500_v46  ;;  %v8496_v36 = vld [vmem:[#allocation11 + $0x120] ss:$12 sps:$4 sm:$0xff]  }
 0x342   :  { %8854 = vtanh.f32 %v3820_v6  ;;  %v3832_v16 = vmul.f32 0.7978846, %v3808_v3  ;;  %7545 = vmatprep.subr.bf16.mxu0 %v8504_v5  ;;  %v3834_v17 = vmul.f32 0.7978846, %v3810_v8  ;;  %v8503_v39 = vld [vmem:[#allocation11 + $0x13c] ss:$12 sps:$4 sm:$0xff]  }
 0x343   :  { %8856 = vtanh.f32 %v3822_v1  ;;  %5906 = vmatpush1.bf16.msra.mxu1 %v8476_v59  ;;  %v3833_v19 = vmul.f32 0.7978846, %v3809_v11  ;;  %v3835_v23 = vmul.f32 0.7978846, %v3811_v15  ;;  %v8501_v5 = vld [vmem:[#allocation11 + $0x138] ss:$12 sps:$4 sm:$0xff]  }
 0x344   :  { %8858 = vtanh.f32 %v3821_v9  ;;  %5907 = vmatprep.subr.bf16.mxu1 %v8483_v12  ;;  %v8508_v58 = vld [vmem:[#allocation11 + $0x154] ss:$12 sps:$4 sm:$0xff]  }
 0x345   :  { %8860 = vtanh.f32 %v3823_v10 }
 0x346   :  { %8862 = vtanh.f32 %v3832_v16 }
 0x347   :  { %8864 = vtanh.f32 %v3834_v17  ;;  %5908 = vmatpush1.bf16.msra.mxu1 %v8481_v18  ;;  %v8506_v17 = vld [vmem:[#allocation11 + $0x150] ss:$12 sps:$4 sm:$0xff]  }
 0x348   :  { %8866 = vtanh.f32 %v3833_v19  ;;  %5909 = vmatprep.subr.bf16.mxu1 %v8488_v22  ;;  %v8505_v22 = vld [vmem:[#allocation11 + $0x188] ss:$12 sps:$4 sm:$0xff]  }
 0x349   :  { %8868 = vtanh.f32 %v3835_v23  ;;  %v8509_v23 = vld [vmem:[#allocation11 + $0x260] ss:$12 sps:$4 sm:$0xff]  }
 0x34b   :  { %5910 = vmatpush1.bf16.msra.mxu1 %v8486_v24  ;;  %v8518_v24 = vld [vmem:[#allocation11 + $0x184] ss:$12 sps:$4 sm:$0xff]  }
 0x34c   :  { %v8855_v27 = vpop.eup %8854  ;;  %5911 = vmatprep.subr.bf16.mxu1 %v8493_v25  ;;  %v8515_v25 = vld [vmem:[#allocation11 + $0x1b8] ss:$12 sps:$4 sm:$0xff]  }
 0x34d   :  { %v8857_v29 = vpop.eup %8856  ;;  %v3868_v30 = vadd.f32 1.0, %v8855_v27  ;;  %v8519_v27 = vld [vmem:[#allocation11 + $0x290] ss:$12 sps:$4 sm:$0xff]  }
 0x34e   :  { %v8859_v32 = vpop.eup %8858  ;;  %v3870_v34 = vadd.f32 1.0, %v8857_v29  ;;  %v8520_v29 = vld [vmem:[#allocation11 + $0x1d0] ss:$12 sps:$4 sm:$0xff]  }
 0x34f   :  { %v8861_v35 = vpop.eup %8860  ;;  %5912 = vmatpush1.bf16.msra.mxu1 %v8491_v26  ;;  %v3869_v37 = vadd.f32 1.0, %v8859_v32  ;;  %v3892_v42 = vmul.f32 0.5, %v3868_v30  ;;  %v8523_v26 = vld [vmem:[#allocation11 + $0x19c] ss:$12 sps:$4 sm:$0xff]   ;;  %v8528_v30 = vld [vmem:[#allocation11 + $0x1b4] ss:$12 sps:$4 sm:$0xff]  }
 0x350   :  { %v8863_v38 = vpop.eup %8862  ;;  %5913 = vmatprep.subr.bf16.mxu1 %v8498_v28  ;;  %v3871_v40 = vadd.f32 1.0, %v8861_v35  ;;  %v3894_v47 = vmul.f32 0.5, %v3870_v34  ;;  %v8521_v28 = vld [vmem:[#allocation11 + $0x198] ss:$12 sps:$4 sm:$0xff]   ;;  %v8524_v32 = vld [vmem:[#allocation11 + $0x2a8] ss:$12 sps:$4 sm:$0xff]  }
 0x351   :  { %v8865_v41 = vpop.eup %8864  ;;  %v3880_v45 = vadd.f32 1.0, %v8863_v38  ;;  %v3893_v56 = vmul.f32 0.5, %v3869_v37  ;;  %v3916_v1 = vmul.f32 %v9410_v61, %v3892_v42  ;;  %v8526_v34 = vld [vmem:[#allocation11 + $0x1b0] ss:$12 sps:$4 sm:$0xff]   ;;  %v8525_v35 = vld [vmem:[#allocation11 + $0x1e8] ss:$12 sps:$4 sm:$0xff]  }
 0x352   :  { %v8867_v46 = vpop.eup %8866  ;;  %v3882_v48 = vadd.f32 1.0, %v8865_v41  ;;  %v3895_v6 = vmul.f32 0.5, %v3871_v40  ;;  %v3918_v12 = vmul.f32 %v9412_v0, %v3894_v47  ;;  %v8529_v37 = vld [vmem:[#allocation11 + $0x2c0] ss:$12 sps:$4 sm:$0xff]   ;;  %v8531_v38 = vld [vmem:[#allocation11 + $0x1c8] ss:$12 sps:$4 sm:$0xff]  }
 0x353   :  { %v8869_v49 = vpop.eup %8868  ;;  %v3904_v51 = vmul.f32 0.5, %v3880_v45  ;;  %5914 = vmatpush1.bf16.msra.mxu1 %v8496_v36  ;;  %v3881_v55 = vadd.f32 1.0, %v8867_v46  ;;  %v3917_v11 = vmul.f32 %v9414_v4, %v3893_v56  ;;  %v8511_v4 = vld [vmem:[#allocation11 + $0x168] ss:$12 sps:$4 sm:$0xff]   ;;  %v8533_v36 = vld [vmem:[#allocation11 + $0x1cc] ss:$12 sps:$4 sm:$0xff]  }
 0x354   :  { %v3906_v57 = vmul.f32 0.5, %v3882_v48  ;;  %5915 = vmatprep.subr.bf16.mxu1 %v8503_v39  ;;  %v3883_v59 = vadd.f32 1.0, %v8869_v49  ;;  %v3919_v18 = vmul.f32 %v9416_v7, %v3895_v6  ;;  %v8514_v7 = vld [vmem:[#allocation11 + $0x278] ss:$12 sps:$4 sm:$0xff]   ;;  %v8530_v39 = vld [vmem:[#allocation11 + $0x200] ss:$12 sps:$4 sm:$0xff]  }
 0x355   :  { %v3928_v3 = vmul.f32 %v9422_v13, %v3904_v51  ;;  %v3905_v8 = vmul.f32 0.5, %v3881_v55  ;;  %v8538_v40 = vld [vmem:[#allocation11 + $0x1e4] ss:$12 sps:$4 sm:$0xff]   ;;  %v8536_v42 = vld [vmem:[#allocation11 + $0x1e0] ss:$12 sps:$4 sm:$0xff]  }
 0x356   :  { %v3930_v9 = vmul.f32 %v9424_v14, %v3906_v57  ;;  %v3907_v10 = vmul.f32 0.5, %v3883_v59  ;;  %v8513_v14 = vld [vmem:[#allocation11 + $0x16c] ss:$12 sps:$4 sm:$0xff]   ;;  %v8543_v46 = vld [vmem:[#allocation11 + $0x1fc] ss:$12 sps:$4 sm:$0xff]  }
 0x357   :  { %5916 = vmatpush1.bf16.msra.mxu1 %v8501_v5  ;;  %v3929_v15 = vmul.f32 %v9430_v20, %v3905_v8  ;;  %v3940_v16 = vpack.c.bf16 %v3928_v3, %v3916_v1  ;;  %v8510_v20 = vld [vmem:[#allocation11 + $0x1a0] ss:$12 sps:$4 sm:$0xff]   ;;  %v8534_v41 = vld [vmem:[#allocation11 + $0x2d8] ss:$12 sps:$4 sm:$0xff]   ;;  %v8539_v47 = vld [vmem:[#allocation11 + $0x2f0] ss:$12 sps:$4 sm:$0xff]  }
 0x358   :  { %5917 = vmatprep.subr.bf16.mxu1 %v8508_v58  ;;  %v3931_v61 = vmul.f32 %v9432_v21, %v3907_v10  ;;  %v9466_v19 = vpack.c.bf16 %v3930_v9, %v3918_v12  ;;  %v8516_v21 = vld [vmem:[#allocation11 + $0x180] ss:$12 sps:$4 sm:$0xff]   ;;  %v8535_v45 = vld [vmem:[#allocation11 + $0x218] ss:$12 sps:$4 sm:$0xff]   ;;  %v8540_v49 = vld [vmem:[#allocation11 + $0x230] ss:$12 sps:$4 sm:$0xff]  }
 0x359   :  { %v3941_v13 = vpack.c.bf16 %v3929_v15, %v3917_v11  ;;  %v8541_v48 = vld [vmem:[#allocation11 + $0x1f8] ss:$12 sps:$4 sm:$0xff]   ;;  %v8546_v51 = vld [vmem:[#allocation11 + $0x214] ss:$12 sps:$4 sm:$0xff]   ;;  %v8544_v55 = vld [vmem:[#allocation11 + $0x210] ss:$12 sps:$4 sm:$0xff]  }
 0x35a   :  { %v3943_v0 = vpack.c.bf16 %v3931_v61, %v3919_v18  ;;  %v8568_v5 = vld [vmem:[#allocation11 + $0x3c8] ss:$12 sps:$4 sm:$0xff]   ;;  %v8549_v56 = vld [vmem:[#allocation11 + $0x22c] ss:$12 sps:$4 sm:$0xff]   ;;  %v8552_v6 = vld [vmem:[#allocation11 + $0x244] ss:$12 sps:$4 sm:$0xff]  }
 0x35b   :  { %5921 = vmatprep.mubr.bf16.mxu1 %v3941_v13  ;;  %6179 = vmatprep.mubr.bf16.mxu0 %v3941_v13  ;;  %v8569_v57 = vld [vmem:[#allocation11 + $0x308] ss:$12 sps:$4 sm:$0xff]   ;;  %v8573_v58 = vld [vmem:[#allocation11 + $0x3e0] ss:$12 sps:$4 sm:$0xff]   ;;  %v8578_v3 = vld [vmem:[#allocation11 + $0x3f8] ss:$12 sps:$4 sm:$0xff]  }
 0x35c   :  { %6180 = vmatmul.mubr.bf16.vlgmr.msra.gmra.mrb[16].mxu0 %v3940_v16  ;;  %5918 = vmatpush1.bf16.msra.mxu1 %v8506_v17  ;;  %v8547_v59 = vld [vmem:[#allocation11 + $0x228] ss:$12 sps:$4 sm:$0xff]   ;;  %v8574_v1 = vld [vmem:[#allocation11 + $0x320] ss:$12 sps:$4 sm:$0xff]   ;;  %v8579_v9 = vld [vmem:[#allocation11 + $0x338] ss:$12 sps:$4 sm:$0xff]  }
 0x35d   :  { %7546 = vmatpush3.bf16.msra.mxu0 %v8505_v22  ;;  %6220 = vmatprep.mubr.bf16.mxu0 %v3943_v0  ;;  %v8550_v8 = vld [vmem:[#allocation11 + $0x240] ss:$12 sps:$4 sm:$0xff]   ;;  %v8555_v12 = vld [vmem:[#allocation11 + $0x25c] ss:$12 sps:$4 sm:$0xff]   ;;  %v8553_v11 = vld [vmem:[#allocation11 + $0x258] ss:$12 sps:$4 sm:$0xff]  }
 0x35e   :  { %7547 = vmatprep.subr.bf16.mxu0 %v8509_v23  ;;  %5919 = vmatprep.subr.bf16.mxu1 %v8513_v14  ;;  %v8583_v10 = vld [vmem:[#allocation11 + $0x410] ss:$12 sps:$4 sm:$0xff]   ;;  %v8558_v15 = vld [vmem:[#allocation11 + $0x274] ss:$12 sps:$4 sm:$0xff]   ;;  %v8561_v61 = vld [vmem:[#allocation11 + $0x28c] ss:$12 sps:$4 sm:$0xff]  }
 0x35f   :  { %v8588_v17 = vld [vmem:[#allocation11 + $0x428] ss:$12 sps:$4 sm:$0xff]   ;;  %v8556_v18 = vld [vmem:[#allocation11 + $0x270] ss:$12 sps:$4 sm:$0xff]   ;;  %v8593_v22 = vld [vmem:[#allocation11 + $0x440] ss:$12 sps:$4 sm:$0xff]  }
 0x360   :  { %5920 = vmatpush1.bf16.msra.mxu1 %v8511_v4  ;;  %v8589_v13 = vld [vmem:[#allocation11 + $0x368] ss:$12 sps:$4 sm:$0xff]   ;;  %v8564_v23 = vld [vmem:[#allocation11 + $0x2a4] ss:$12 sps:$4 sm:$0xff]   ;;  %v8594_v14 = vld [vmem:[#allocation11 + $0x380] ss:$12 sps:$4 sm:$0xff]  }
 0x361   :  { %7548 = vmatpush3.bf16.msra.mxu0 %v8510_v20  ;;  %5932 = vmatprep.subr.bf16.mxu1 %v8518_v24  ;;  %v1726_v4 = vsub.s32 4, %v9336_v31  ;;  %v8598_v20 = vld [vmem:[#allocation11 + $0x458] ss:$12 sps:$4 sm:$0xff]   ;;  %v1734_v24 = vsub.s32 6, %v9336_v31 }
 0x362   :  { %7549 = vmatprep.subr.bf16.mxu0 %v8514_v7  ;;  %v1730_v7 = vsub.s32 5, %v9336_v31 }
 0x363   :  { %5922 = vmatmul.mubr.bf16.vlgmr.msra.gmra.mrb[24].mxu1 %v3940_v16  ;;  %v8584_v16 = vld [vmem:[#allocation11 + $0x350] ss:$12 sps:$4 sm:$0xff]  }
 0x364   :  { %5933 = vmatpush1.bf16.msra.mxu1 %v8516_v21  ;;  %5964 = vmatprep.mubr.bf16.mxu1 %v3943_v0  ;;  %v8559_v0 = vld [vmem:[#allocation11 + $0x288] ss:$12 sps:$4 sm:$0xff]   ;;  %v8562_v21 = vld [vmem:[#allocation11 + $0x2a0] ss:$12 sps:$4 sm:$0xff]  }
 0x365   :  { %7550 = vmatpush3.bf16.msra.mxu0 %v8515_v25  ;;  %5934 = vmatprep.subr.bf16.mxu1 %v8523_v26  ;;  %v1738_v25 = vsub.s32 7, %v9336_v31  ;;  %v8567_v26 = vld [vmem:[#allocation11 + $0x2bc] ss:$12 sps:$4 sm:$0xff]  }
 0x366   :  { %7551 = vmatprep.subr.bf16.mxu0 %v8519_v27  ;;  %v8599_v27 = vld [vmem:[#allocation11 + $0x398] ss:$12 sps:$4 sm:$0xff]  }
 0x368   :  { %5935 = vmatpush1.bf16.msra.mxu1 %v8521_v28  ;;  %v1727_v28 = vrot.slane %v9398_v43, %v1726_v4 }
 0x369   :  { %7552 = vmatpush3.bf16.msra.mxu0 %v8520_v29  ;;  %5936 = vmatprep.subr.bf16.mxu1 %v8528_v30  ;;  %v8603_v29 = vld [vmem:[#allocation11 + $0x470] ss:$12 sps:$4 sm:$0xff]   ;;  %v1735_v30 = vrot.slane %v9398_v43, %v1734_v24 }
 0x36a   :  { %7553 = vmatprep.subr.bf16.mxu0 %v8524_v32  ;;  %v1731_v32 = vrot.slane %v9398_v43, %v1730_v7  ;;  %v8582_v24 = vld [vmem:[#allocation11 + $0x304] ss:$12 sps:$4 sm:$0xff]  }
 0x36c   :  { %5937 = vmatpush1.bf16.msra.mxu1 %v8526_v34  ;;  %v1739_v34 = vrot.slane %v9398_v43, %v1738_v25 }
 0x36d   :  { %7554 = vmatpush3.bf16.msra.mxu0 %v8525_v35  ;;  %5938 = vmatprep.subr.bf16.mxu1 %v8533_v36  ;;  %v8565_v35 = vld [vmem:[#allocation11 + $0x2b8] ss:$12 sps:$4 sm:$0xff]  }
 0x36e   :  { %7555 = vmatprep.subr.bf16.mxu0 %v8529_v37  ;;  %v8572_v37 = vld [vmem:[#allocation11 + $0x2d4] ss:$12 sps:$4 sm:$0xff]  }
 0x370   :  { %5939 = vmatpush1.bf16.msra.mxu1 %v8531_v38 }
 0x371   :  { %7556 = vmatpush3.bf16.msra.mxu0 %v8530_v39  ;;  %5940 = vmatprep.subr.bf16.mxu1 %v8538_v40 }
 0x372   :  { %7557 = vmatprep.subr.bf16.mxu0 %v8534_v41  ;;  %v8604_v41 = vld [vmem:[#allocation11 + $0x3b0] ss:$12 sps:$4 sm:$0xff]  }
 0x374   :  { %5941 = vmatpush1.bf16.msra.mxu1 %v8536_v42 }
 0x375   :  { %7558 = vmatpush3.bf16.msra.mxu0 %v8535_v45  ;;  %5942 = vmatprep.subr.bf16.mxu1 %v8543_v46 }
 0x376   :  { %7559 = vmatprep.subr.bf16.mxu0 %v8539_v47 }
 0x378   :  { %5943 = vmatpush1.bf16.msra.mxu1 %v8541_v48  ;;  %v8608_v48 = vld [vmem:[#allocation11 + $0x548] ss:$12 sps:$4 sm:$0xff]  }
 0x379   :  { %7560 = vmatpush3.bf16.msra.mxu0 %v8540_v49  ;;  %5944 = vmatprep.subr.bf16.mxu1 %v8546_v51 }
 0x37a   :  { %7567 = vmatprep.subr.bf16.mxu0 %v8568_v5 }
 0x37c   :  { %6221 = vmatmul.mubr.bf16.vlgmr.msra.gmra.mrb[20].mxu0 %v9466_v19  ;;  %5945 = vmatpush1.bf16.msra.mxu1 %v8544_v55 }
 0x37d   :  { %5946 = vmatprep.subr.bf16.mxu1 %v8549_v56  ;;  %7568 = vmatpush3.bf16.msra.mxu0 %v8569_v57  ;;  %v8570_v56 = vld [vmem:[#allocation11 + $0x2d0] ss:$12 sps:$4 sm:$0xff]  }
 0x37e   :  { %7569 = vmatprep.subr.bf16.mxu0 %v8573_v58 }
 0x380   :  { %5947 = vmatpush1.bf16.msra.mxu1 %v8547_v59 }
 0x381   :  { %5948 = vmatprep.subr.bf16.mxu1 %v8552_v6  ;;  %7570 = vmatpush3.bf16.msra.mxu0 %v8574_v1 }
 0x382   :  { %7571 = vmatprep.subr.bf16.mxu0 %v8578_v3  ;;  %v8577_v3 = vld [vmem:[#allocation11 + $0x2ec] ss:$12 sps:$4 sm:$0xff]  }
 0x384   :  { %5949 = vmatpush1.bf16.msra.mxu1 %v8550_v8 }
 0x385   :  { %5950 = vmatprep.subr.bf16.mxu1 %v8555_v12  ;;  %7572 = vmatpush3.bf16.msra.mxu0 %v8579_v9 }
 0x386   :  { %7573 = vmatprep.subr.bf16.mxu0 %v8583_v10 }
 0x388   :  { %5951 = vmatpush1.bf16.msra.mxu1 %v8553_v11 }
 0x389   :  { %5952 = vmatprep.subr.bf16.mxu1 %v8558_v15  ;;  %7574 = vmatpush3.bf16.msra.mxu0 %v8584_v16 }
 0x38a   :  { %7575 = vmatprep.subr.bf16.mxu0 %v8588_v17 }
 0x38c   :  { %5953 = vmatpush1.bf16.msra.mxu1 %v8556_v18 }
 0x38d   :  { %5954 = vmatprep.subr.bf16.mxu1 %v8561_v61  ;;  %7576 = vmatpush3.bf16.msra.mxu0 %v8589_v13 }
 0x38e   :  { %7577 = vmatprep.subr.bf16.mxu0 %v8593_v22 }
 0x390   :  { %5955 = vmatpush1.bf16.msra.mxu1 %v8559_v0  ;;  %v8575_v0 = vld [vmem:[#allocation11 + $0x2e8] ss:$12 sps:$4 sm:$0xff]  }
 0x391   :  { %5956 = vmatprep.subr.bf16.mxu1 %v8564_v23  ;;  %7578 = vmatpush3.bf16.msra.mxu0 %v8594_v14 }
 0x392   :  { %7579 = vmatprep.subr.bf16.mxu0 %v8598_v20 }
 0x394   :  { %5957 = vmatpush1.bf16.msra.mxu1 %v8562_v21 }
 0x395   :  { %v3457_v36 = vpop.f32.mrb[16].mxu1  ;;  %5958 = vmatprep.subr.bf16.mxu1 %v8567_v26  ;;  %7580 = vmatpush3.bf16.msra.mxu0 %v8599_v27 }
 0x396   :  { %v9477_v38 = vadd.f32 %v3457_v36, %v1727_v28  ;;  %v3543_v39 = vpop.f32.mrb[8].mxu0  ;;  %v3459_v40 = vpop.f32.mrb[17].mxu1  ;;  %7581 = vmatprep.subr.bf16.mxu0 %v8603_v29 }
 0x397   :  { %v9479_v42 = vadd.f32 %v3543_v39, %v1735_v30  ;;  %v9481_v45 = vadd.f32 %v3459_v40, %v1731_v32  ;;  %v3545_v46 = vpop.f32.mrb[9].mxu0  ;;  %v3461_v47 = vpop.f32.mrb[18].mxu1 }
 0x398   :  { %v3728_v43 = vmul.f32 %v9477_v38, %v9477_v38  ;;  %v9485_v49 = vadd.f32 %v3545_v46, %v1739_v34  ;;  %v9487_v51 = vadd.f32 %v3461_v47, %v1727_v28  ;;  %v3547_v5 = vpop.f32.mrb[10].mxu0  ;;  %5959 = vmatpush1.bf16.msra.mxu1 %v8565_v35  ;;  %v3463_v55 = vpop.f32.mrb[19].mxu1  ;;  %v8587_v47 = vld [vmem:[#allocation11 + $0x31c] ss:$12 sps:$4 sm:$0xff]  }
 0x399   :  { %v3730_v57 = vmul.f32 %v9479_v42, %v9479_v42  ;;  %v3729_v58 = vmul.f32 %v9481_v45, %v9481_v45  ;;  %v9493_v59 = vadd.f32 %v3547_v5, %v1735_v30  ;;  %v9495_v6 = vadd.f32 %v3463_v55, %v1731_v32  ;;  %v3549_v1 = vpop.f32.mrb[11].mxu0  ;;  %5960 = vmatprep.subr.bf16.mxu1 %v8572_v37  ;;  %v8580_v37 = vld [vmem:[#allocation11 + $0x300] ss:$12 sps:$4 sm:$0xff]  }
 0x39a   :  { %v3752_v8 = vmul.f32 %v9477_v38, %v3728_v43  ;;  %v3731_v12 = vmul.f32 %v9485_v49, %v9485_v49  ;;  %v3740_v9 = vmul.f32 %v9487_v51, %v9487_v51  ;;  %v9502_v10 = vadd.f32 %v3549_v1, %v1739_v34  ;;  %7582 = vmatpush3.bf16.msra.mxu0 %v8604_v41  ;;  %v8592_v1 = vld [vmem:[#allocation11 + $0x334] ss:$12 sps:$4 sm:$0xff]  }
 0x39b   :  { %v3754_v11 = vmul.f32 %v9479_v42, %v3730_v57  ;;  %v3753_v15 = vmul.f32 %v9481_v45, %v3729_v58  ;;  %v3742_v16 = vmul.f32 %v9493_v59, %v9493_v59  ;;  %v3741_v17 = vmul.f32 %v9495_v6, %v9495_v6  ;;  %7589 = vmatprep.subr.bf16.mxu0 %v8608_v48  ;;  %v8585_v57 = vld [vmem:[#allocation11 + $0x318] ss:$12 sps:$4 sm:$0xff]  }
 0x39c   :  { %v3776_v18 = vmul.f32 0.044715, %v3752_v8  ;;  %v3755_v61 = vmul.f32 %v9485_v49, %v3731_v12  ;;  %v3764_v13 = vmul.f32 %v9487_v51, %v3740_v9  ;;  %v3743_v22 = vmul.f32 %v9502_v10, %v9502_v10  ;;  %5961 = vmatpush1.bf16.msra.mxu1 %v8570_v56  ;;  %v8597_v8 = vld [vmem:[#allocation11 + $0x34c] ss:$12 sps:$4 sm:$0xff]   ;;  %v8595_v9 = vld [vmem:[#allocation11 + $0x348] ss:$12 sps:$4 sm:$0xff]  }
 0x39d   :  { %v3778_v23 = vmul.f32 0.044715, %v3754_v11  ;;  %v3777_v14 = vmul.f32 0.044715, %v3753_v15  ;;  %v3766_v4 = vmul.f32 %v9493_v59, %v3742_v16  ;;  %v3765_v20 = vmul.f32 %v9495_v6, %v3741_v17  ;;  %5962 = vmatprep.subr.bf16.mxu1 %v8577_v3  ;;  %v8590_v3 = vld [vmem:[#allocation11 + $0x330] ss:$12 sps:$4 sm:$0xff]  }
 0x39e   :  { %v3800_v7 = vadd.f32 %v9477_v38, %v3776_v18  ;;  %v3779_v21 = vmul.f32 0.044715, %v3755_v61  ;;  %v3788_v25 = vmul.f32 0.044715, %v3764_v13  ;;  %v3767_v26 = vmul.f32 %v9502_v10, %v3743_v22  ;;  %v8602_v15 = vld [vmem:[#allocation11 + $0x364] ss:$12 sps:$4 sm:$0xff]  }
 0x39f   :  { %v3802_v27 = vadd.f32 %v9479_v42, %v3778_v23  ;;  %v3801_v28 = vadd.f32 %v9481_v45, %v3777_v14  ;;  %v3790_v29 = vmul.f32 0.044715, %v3766_v4  ;;  %v3789_v30 = vmul.f32 0.044715, %v3765_v20  ;;  %v8600_v22 = vld [vmem:[#allocation11 + $0x360] ss:$12 sps:$4 sm:$0xff]  }
 0x3a0   :  { %v3824_v32 = vmul.f32 0.7978846, %v3800_v7  ;;  %v3803_v34 = vadd.f32 %v9485_v49, %v3779_v21  ;;  %v3812_v35 = vadd.f32 %v9487_v51, %v3788_v25  ;;  %v3791_v36 = vmul.f32 0.044715, %v3767_v26  ;;  %5963 = vmatpush1.bf16.msra.mxu1 %v8575_v0  ;;  %v8607_v20 = vld [vmem:[#allocation11 + $0x37c] ss:$12 sps:$4 sm:$0xff]  }
 0x3a1   :  { %v3826_v39 = vmul.f32 0.7978846, %v3802_v27  ;;  %v3825_v40 = vmul.f32 0.7978846, %v3801_v28  ;;  %v3814_v41 = vadd.f32 %v9493_v59, %v3790_v29  ;;  %v3813_v46 = vadd.f32 %v9495_v6, %v3789_v30  ;;  %5975 = vmatprep.subr.bf16.mxu1 %v8582_v24  ;;  %v8605_v30 = vld [vmem:[#allocation11 + $0x378] ss:$12 sps:$4 sm:$0xff]  }
 0x3a2   :  { %8870 = vtanh.f32 %v3824_v32  ;;  %v3827_v48 = vmul.f32 0.7978846, %v3803_v34  ;;  %v3836_v43 = vmul.f32 0.7978846, %v3812_v35  ;;  %v3815_v5 = vadd.f32 %v9502_v10, %v3791_v36 }
 0x3a3   :  { %8872 = vtanh.f32 %v3826_v39  ;;  %v3838_v55 = vmul.f32 0.7978846, %v3814_v41  ;;  %5965 = vmatmul.mubr.bf16.vlgmr.msra.gmra.mrb[24].mxu1 %v9466_v19  ;;  %v3837_v56 = vmul.f32 0.7978846, %v3813_v46  ;;  %v8612_v39 = vld [vmem:[#allocation11 + $0x394] ss:$12 sps:$4 sm:$0xff]  }
 0x3a4   :  { %8874 = vtanh.f32 %v3825_v40  ;;  %5976 = vmatpush1.bf16.msra.mxu1 %v8580_v37  ;;  %v3839_v58 = vmul.f32 0.7978846, %v3815_v5  ;;  %v8610_v5 = vld [vmem:[#allocation11 + $0x390] ss:$12 sps:$4 sm:$0xff]  }
 0x3a5   :  { %8876 = vtanh.f32 %v3827_v48  ;;  %5977 = vmatprep.subr.bf16.mxu1 %v8587_v47 }
 0x3a6   :  { %8878 = vtanh.f32 %v3836_v43 }
 0x3a7   :  { %8880 = vtanh.f32 %v3838_v55 }
 0x3a8   :  { %8882 = vtanh.f32 %v3837_v56  ;;  %5978 = vmatpush1.bf16.msra.mxu1 %v8585_v57  ;;  %v8609_v57 = vld [vmem:[#allocation11 + $0x488] ss:$12 sps:$4 sm:$0xff]  }
 0x3a9   :  { %8884 = vtanh.f32 %v3839_v58  ;;  %5979 = vmatprep.subr.bf16.mxu1 %v8592_v1  ;;  %v8617_v58 = vld [vmem:[#allocation11 + $0x3ac] ss:$12 sps:$4 sm:$0xff]  }
 0x3aa   :  { %v8620_v1 = vld [vmem:[#allocation11 + $0x3c0] ss:$12 sps:$4 sm:$0xff]  }
 0x3ac   :  { %v8871_v12 = vpop.eup %8870  ;;  %5980 = vmatpush1.bf16.msra.mxu1 %v8590_v3  ;;  %v8619_v3 = vld [vmem:[#allocation11 + $0x4b8] ss:$12 sps:$4 sm:$0xff]  }
 0x3ad   :  { %v8873_v19 = vpop.eup %8872  ;;  %v3872_v11 = vadd.f32 1.0, %v8871_v12  ;;  %5981 = vmatprep.subr.bf16.mxu1 %v8597_v8  ;;  %v8627_v8 = vld [vmem:[#allocation11 + $0x3dc] ss:$12 sps:$4 sm:$0xff]  }
 0x3ae   :  { %v8875_v16 = vpop.eup %8874  ;;  %v3874_v17 = vadd.f32 1.0, %v8873_v19  ;;  %v8623_v12 = vld [vmem:[#allocation11 + $0x590] ss:$12 sps:$4 sm:$0xff]  }
 0x3af   :  { %v8877_v18 = vpop.eup %8876  ;;  %v3873_v61 = vadd.f32 1.0, %v8875_v16  ;;  %v3896_v14 = vmul.f32 0.5, %v3872_v11  ;;  %v8624_v19 = vld [vmem:[#allocation11 + $0x4d0] ss:$12 sps:$4 sm:$0xff]   ;;  %v8632_v11 = vld [vmem:[#allocation11 + $0x3f4] ss:$12 sps:$4 sm:$0xff]  }
 0x3b0   :  { %v8879_v13 = vpop.eup %8878  ;;  %5982 = vmatpush1.bf16.msra.mxu1 %v8595_v9  ;;  %v3875_v0 = vadd.f32 1.0, %v8877_v18  ;;  %v3898_v7 = vmul.f32 0.5, %v3874_v17  ;;  %v8625_v9 = vld [vmem:[#allocation11 + $0x3d8] ss:$12 sps:$4 sm:$0xff]   ;;  %v8630_v16 = vld [vmem:[#allocation11 + $0x3f0] ss:$12 sps:$4 sm:$0xff]  }
 0x3b1   :  { %v8881_v23 = vpop.eup %8880  ;;  %v3884_v4 = vadd.f32 1.0, %v8879_v13  ;;  %5983 = vmatprep.subr.bf16.mxu1 %v8602_v15  ;;  %v3897_v28 = vmul.f32 0.5, %v3873_v61  ;;  %v3920_v35 = vmul.f32 %v9477_v38, %v3896_v14  ;;  %v8628_v15 = vld [vmem:[#allocation11 + $0x5a8] ss:$12 sps:$4 sm:$0xff]   ;;  %v8637_v18 = vld [vmem:[#allocation11 + $0x40c] ss:$12 sps:$4 sm:$0xff]  }
 0x3b2   :  { %v8883_v24 = vpop.eup %8882  ;;  %v3886_v21 = vadd.f32 1.0, %v8881_v23  ;;  %v3899_v34 = vmul.f32 0.5, %v3875_v0  ;;  %v3922_v40 = vmul.f32 %v9479_v42, %v3898_v7  ;;  %v8629_v17 = vld [vmem:[#allocation11 + $0x4e8] ss:$12 sps:$4 sm:$0xff]   ;;  %v8633_v61 = vld [vmem:[#allocation11 + $0x5c0] ss:$12 sps:$4 sm:$0xff]  }
 0x3b3   :  { %v8885_v25 = vpop.eup %8884  ;;  %v3908_v26 = vmul.f32 0.5, %v3884_v4  ;;  %v3885_v27 = vadd.f32 1.0, %v8883_v24  ;;  %v3921_v47 = vmul.f32 %v9481_v45, %v3897_v28  ;;  %v8615_v45 = vld [vmem:[#allocation11 + $0x3a8] ss:$12 sps:$4 sm:$0xff]   ;;  %v8642_v0 = vld [vmem:[#allocation11 + $0x424] ss:$12 sps:$4 sm:$0xff]  }
 0x3b4   :  { %v3910_v29 = vmul.f32 0.5, %v3886_v21  ;;  %5984 = vmatpush1.bf16.msra.mxu1 %v8600_v22  ;;  %v3887_v32 = vadd.f32 1.0, %v8885_v25  ;;  %v3923_v38 = vmul.f32 %v9485_v49, %v3899_v34  ;;  %v8614_v49 = vld [vmem:[#allocation11 + $0x4a0] ss:$12 sps:$4 sm:$0xff]   ;;  %v8635_v13 = vld [vmem:[#allocation11 + $0x408] ss:$12 sps:$4 sm:$0xff]  }
 0x3b5   :  { %v3932_v36 = vmul.f32 %v9487_v51, %v3908_v26  ;;  %5985 = vmatprep.subr.bf16.mxu1 %v8607_v20  ;;  %v3909_v37 = vmul.f32 0.5, %v3885_v27  ;;  %v8634_v22 = vld [vmem:[#allocation11 + $0x500] ss:$12 sps:$4 sm:$0xff]   ;;  %v8638_v23 = vld [vmem:[#allocation11 + $0x5d8] ss:$12 sps:$4 sm:$0xff]  }
 0x3b6   :  { %v3934_v41 = vmul.f32 %v9493_v59, %v3910_v29  ;;  %v3911_v46 = vmul.f32 0.5, %v3887_v32  ;;  %v8613_v59 = vld [vmem:[#allocation11 + $0x560] ss:$12 sps:$4 sm:$0xff]   ;;  %v8639_v4 = vld [vmem:[#allocation11 + $0x518] ss:$12 sps:$4 sm:$0xff]  }
 0x3b7   :  { %v3933_v48 = vmul.f32 %v9495_v6, %v3909_v37  ;;  %v9532_v43 = vpack.c.bf16 %v3932_v36, %v3920_v35  ;;  %v8622_v6 = vld [vmem:[#allocation11 + $0x3c4] ss:$12 sps:$4 sm:$0xff]   ;;  %v8640_v14 = vld [vmem:[#allocation11 + $0x420] ss:$12 sps:$4 sm:$0xff]   ;;  %v8647_v20 = vld [vmem:[#allocation11 + $0x43c] ss:$12 sps:$4 sm:$0xff]  }
 0x3b8   :  { %5986 = vmatpush1.bf16.msra.mxu1 %v8605_v30  ;;  %v3935_v51 = vmul.f32 %v9502_v10, %v3911_v46  ;;  %v9536_v55 = vpack.c.bf16 %v3934_v41, %v3922_v40  ;;  %v8618_v10 = vld [vmem:[#allocation11 + $0x578] ss:$12 sps:$4 sm:$0xff]   ;;  %v8643_v24 = vld [vmem:[#allocation11 + $0x5f0] ss:$12 sps:$4 sm:$0xff]   ;;  %v8650_v25 = vld [vmem:[#allocation11 + $0x454] ss:$12 sps:$4 sm:$0xff]  }
 0x3b9   :  { %v3945_v56 = vpack.c.bf16 %v3933_v48, %v3921_v47  ;;  %5987 = vmatprep.subr.bf16.mxu1 %v8612_v39  ;;  %v8645_v7 = vld [vmem:[#allocation11 + $0x438] ss:$12 sps:$4 sm:$0xff]   ;;  %v8644_v21 = vld [vmem:[#allocation11 + $0x530] ss:$12 sps:$4 sm:$0xff]   ;;  %v8672_v26 = vld [vmem:[#allocation11 + $0x6c8] ss:$12 sps:$4 sm:$0xff]  }
 0x3ba   :  { %v9538_v42 = vpack.c.bf16 %v3935_v51, %v3923_v38  ;;  %v8648_v27 = vld [vmem:[#allocation11 + $0x450] ss:$12 sps:$4 sm:$0xff]   ;;  %v8653_v28 = vld [vmem:[#allocation11 + $0x46c] ss:$12 sps:$4 sm:$0xff]   ;;  %v8673_v29 = vld [vmem:[#allocation11 + $0x608] ss:$12 sps:$4 sm:$0xff]  }
 0x3bb   :  { %6007 = vmatprep.mubr.bf16.mxu1 %v3945_v56  ;;  %6261 = vmatprep.mubr.bf16.mxu0 %v3945_v56  ;;  %v8677_v30 = vld [vmem:[#allocation11 + $0x6e0] ss:$12 sps:$4 sm:$0xff]   ;;  %v8651_v32 = vld [vmem:[#allocation11 + $0x468] ss:$12 sps:$4 sm:$0xff]   ;;  %v8656_v34 = vld [vmem:[#allocation11 + $0x484] ss:$12 sps:$4 sm:$0xff]  }
 0x3bc   :  { %6262 = vmatmul.mubr.bf16.vlgmr.msra.gmra.mrb[24].mxu0 %v9532_v43  ;;  %5988 = vmatpush1.bf16.msra.mxu1 %v8610_v5  ;;  %v8678_v35 = vld [vmem:[#allocation11 + $0x620] ss:$12 sps:$4 sm:$0xff]   ;;  %v8682_v36 = vld [vmem:[#allocation11 + $0x6f8] ss:$12 sps:$4 sm:$0xff]   ;;  %v8659_v39 = vld [vmem:[#allocation11 + $0x49c] ss:$12 sps:$4 sm:$0xff]  }
 0x3bd   :  { %7590 = vmatpush3.bf16.msra.mxu0 %v8609_v57  ;;  %6302 = vmatprep.mubr.bf16.mxu0 %v9538_v42  ;;  %v8654_v37 = vld [vmem:[#allocation11 + $0x480] ss:$12 sps:$4 sm:$0xff]   ;;  %v8683_v40 = vld [vmem:[#allocation11 + $0x638] ss:$12 sps:$4 sm:$0xff]   ;;  %v8687_v41 = vld [vmem:[#allocation11 + $0x710] ss:$12 sps:$4 sm:$0xff]  }
 0x3be   :  { %7591 = vmatprep.subr.bf16.mxu0 %v8613_v59  ;;  %5989 = vmatprep.subr.bf16.mxu1 %v8617_v58  ;;  %v8657_v46 = vld [vmem:[#allocation11 + $0x498] ss:$12 sps:$4 sm:$0xff]   ;;  %v8662_v47 = vld [vmem:[#allocation11 + $0x4b4] ss:$12 sps:$4 sm:$0xff]   ;;  %v8688_v48 = vld [vmem:[#allocation11 + $0x650] ss:$12 sps:$4 sm:$0xff]  }
 0x3bf   :  { %v8692_v5 = vld [vmem:[#allocation11 + $0x728] ss:$12 sps:$4 sm:$0xff]   ;;  %v8660_v38 = vld [vmem:[#allocation11 + $0x4b0] ss:$12 sps:$4 sm:$0xff]   ;;  %v8665_v51 = vld [vmem:[#allocation11 + $0x4cc] ss:$12 sps:$4 sm:$0xff]  }
 0x3c0   :  { %5990 = vmatpush1.bf16.msra.mxu1 %v8615_v45  ;;  %v8693_v56 = vld [vmem:[#allocation11 + $0x668] ss:$12 sps:$4 sm:$0xff]   ;;  %v8697_v57 = vld [vmem:[#allocation11 + $0x740] ss:$12 sps:$4 sm:$0xff]   ;;  %v8668_v59 = vld [vmem:[#allocation11 + $0x4e4] ss:$12 sps:$4 sm:$0xff]  }
 0x3c1   :  { %7592 = vmatpush3.bf16.msra.mxu0 %v8614_v49  ;;  %5991 = vmatprep.subr.bf16.mxu1 %v8622_v6  ;;  %v8702_v58 = vld [vmem:[#allocation11 + $0x758] ss:$12 sps:$4 sm:$0xff]   ;;  %v1705_v45 = vld [vmem:[#allocation10 + $0x8] sm:$0xf]  ;;  %v8666_v49 = vld [vmem:[#allocation11 + $0x4e0] ss:$12 sps:$4 sm:$0xff]  }
 0x3c2   :  { %7593 = vmatprep.subr.bf16.mxu0 %v8618_v10  ;;  %v8671_v6 = vld [vmem:[#allocation11 + $0x4fc] ss:$12 sps:$4 sm:$0xff]   ;;  %v8703_v10 = vld [vmem:[#allocation11 + $0x698] ss:$12 sps:$4 sm:$0xff]  }
 0x3c4   :  { %5992 = vmatpush1.bf16.msra.mxu1 %v8620_v1  ;;  %v1743_v1 = vrot.slane %v1705_v45, %v9347_v53 }
 0x3c5   :  { %7594 = vmatpush3.bf16.msra.mxu0 %v8619_v3  ;;  %5993 = vmatprep.subr.bf16.mxu1 %v8627_v8  ;;  %v8707_v3 = vld [vmem:[#allocation11 + $0x770] ss:$12 sps:$4 sm:$0xff]   ;;  %v1751_v8 = vrot.slane %v1705_v45, %v9339_v33 }
 0x3c6   :  { %7595 = vmatprep.subr.bf16.mxu0 %v8623_v12  ;;  %v1747_v12 = vrot.slane %v1705_v45, %v9350_v54 }
 0x3c8   :  { %5994 = vmatpush1.bf16.msra.mxu1 %v8625_v9  ;;  %v1755_v9 = vrot.slane %v1705_v45, %v1722_v44 }
 0x3c9   :  { %7596 = vmatpush3.bf16.msra.mxu0 %v8624_v19  ;;  %5995 = vmatprep.subr.bf16.mxu1 %v8632_v11  ;;  %v8669_v19 = vld [vmem:[#allocation11 + $0x4f8] ss:$12 sps:$4 sm:$0xff]  }
 0x3ca   :  { %7597 = vmatprep.subr.bf16.mxu0 %v8628_v15  ;;  %v8676_v15 = vld [vmem:[#allocation11 + $0x514] ss:$12 sps:$4 sm:$0xff]  }
 0x3cc   :  { %5996 = vmatpush1.bf16.msra.mxu1 %v8630_v16 }
 0x3cd   :  { %7598 = vmatpush3.bf16.msra.mxu0 %v8629_v17  ;;  %5997 = vmatprep.subr.bf16.mxu1 %v8637_v18 }
 0x3ce   :  { %7599 = vmatprep.subr.bf16.mxu0 %v8633_v61  ;;  %v8708_v61 = vld [vmem:[#allocation11 + $0x6b0] ss:$12 sps:$4 sm:$0xff]  }
 0x3d0   :  { %5998 = vmatpush1.bf16.msra.mxu1 %v8635_v13 }
 0x3d1   :  { %7600 = vmatpush3.bf16.msra.mxu0 %v8634_v22  ;;  %5999 = vmatprep.subr.bf16.mxu1 %v8642_v0 }
 0x3d2   :  { %7601 = vmatprep.subr.bf16.mxu0 %v8638_v23 }
 0x3d4   :  { %6000 = vmatpush1.bf16.msra.mxu1 %v8640_v14  ;;  %v8712_v14 = vld [vmem:[#allocation11 + $0x848] ss:$12 sps:$4 sm:$0xff]  }
 0x3d5   :  { %7602 = vmatpush3.bf16.msra.mxu0 %v8639_v4  ;;  %6001 = vmatprep.subr.bf16.mxu1 %v8647_v20 }
 0x3d6   :  { %7603 = vmatprep.subr.bf16.mxu0 %v8643_v24 }
 0x3d8   :  { %6002 = vmatpush1.bf16.msra.mxu1 %v8645_v7  ;;  %v8674_v7 = vld [vmem:[#allocation11 + $0x510] ss:$12 sps:$4 sm:$0xff]  }
 0x3d9   :  { %7604 = vmatpush3.bf16.msra.mxu0 %v8644_v21  ;;  %6003 = vmatprep.subr.bf16.mxu1 %v8650_v25 }
 0x3da   :  { %7611 = vmatprep.subr.bf16.mxu0 %v8672_v26 }
 0x3dc   :  { %6303 = vmatmul.mubr.bf16.vlgmr.msra.gmra.mrb[28].mxu0 %v9536_v55  ;;  %6004 = vmatpush1.bf16.msra.mxu1 %v8648_v27 }
 0x3dd   :  { %6005 = vmatprep.subr.bf16.mxu1 %v8653_v28  ;;  %7612 = vmatpush3.bf16.msra.mxu0 %v8673_v29  ;;  %v8681_v29 = vld [vmem:[#allocation11 + $0x52c] ss:$12 sps:$4 sm:$0xff]  }
 0x3de   :  { %7613 = vmatprep.subr.bf16.mxu0 %v8677_v30 }
 0x3e0   :  { %6006 = vmatpush1.bf16.msra.mxu1 %v8651_v32 }
 0x3e1   :  { %6018 = vmatprep.subr.bf16.mxu1 %v8656_v34  ;;  %7614 = vmatpush3.bf16.msra.mxu0 %v8678_v35 }
 0x3e2   :  { %7615 = vmatprep.subr.bf16.mxu0 %v8682_v36 }
 0x3e3   :  { %6008 = vmatmul.mubr.bf16.vlgmr.msra.gmra.mrb[24].mxu1 %v9532_v43  ;;  %v8663_v43 = vld [vmem:[#allocation11 + $0x4c8] ss:$12 sps:$4 sm:$0xff]  }
 0x3e4   :  { %6019 = vmatpush1.bf16.msra.mxu1 %v8654_v37  ;;  %6050 = vmatprep.mubr.bf16.mxu1 %v9538_v42  ;;  %v8698_v42 = vld [vmem:[#allocation11 + $0x680] ss:$12 sps:$4 sm:$0xff]  }
 0x3e5   :  { %6020 = vmatprep.subr.bf16.mxu1 %v8659_v39  ;;  %7616 = vmatpush3.bf16.msra.mxu0 %v8683_v40 }
 0x3e6   :  { %7617 = vmatprep.subr.bf16.mxu0 %v8687_v41 }
 0x3e8   :  { %6021 = vmatpush1.bf16.msra.mxu1 %v8657_v46 }
 0x3e9   :  { %6022 = vmatprep.subr.bf16.mxu1 %v8662_v47  ;;  %7618 = vmatpush3.bf16.msra.mxu0 %v8688_v48 }
 0x3ea   :  { %7619 = vmatprep.subr.bf16.mxu0 %v8692_v5  ;;  %v8679_v5 = vld [vmem:[#allocation11 + $0x528] ss:$12 sps:$4 sm:$0xff]  }
 0x3ec   :  { %6023 = vmatpush1.bf16.msra.mxu1 %v8660_v38 }
 0x3ed   :  { %6024 = vmatprep.subr.bf16.mxu1 %v8665_v51  ;;  %7620 = vmatpush3.bf16.msra.mxu0 %v8693_v56 }
 0x3ee   :  { %7621 = vmatprep.subr.bf16.mxu0 %v8697_v57 }
 0x3f0   :  { %6025 = vmatpush1.bf16.msra.mxu1 %v8663_v43  ;;  %v8686_v43 = vld [vmem:[#allocation11 + $0x544] ss:$12 sps:$4 sm:$0xff]  }
 0x3f1   :  { %6026 = vmatprep.subr.bf16.mxu1 %v8668_v59  ;;  %7622 = vmatpush3.bf16.msra.mxu0 %v8698_v42 }
 0x3f2   :  { %7623 = vmatprep.subr.bf16.mxu0 %v8702_v58 }
 0x3f4   :  { %6027 = vmatpush1.bf16.msra.mxu1 %v8666_v49 }
 0x3f5   :  { %v3629_v11 = vpop.f32.mrb[20].mxu1  ;;  %6028 = vmatprep.subr.bf16.mxu1 %v8671_v6  ;;  %7624 = vmatpush3.bf16.msra.mxu0 %v8703_v10 }
 0x3f6   :  { %v9550_v16 = vadd.f32 %v3629_v11, %v1743_v1  ;;  %v3715_v17 = vpop.f32.mrb[12].mxu0  ;;  %v3631_v18 = vpop.f32.mrb[21].mxu1  ;;  %7625 = vmatprep.subr.bf16.mxu0 %v8707_v3 }
 0x3f7   :  { %v9552_v13 = vadd.f32 %v3715_v17, %v1751_v8  ;;  %v9554_v22 = vadd.f32 %v3631_v18, %v1747_v12  ;;  %v3717_v0 = vpop.f32.mrb[13].mxu0  ;;  %v3633_v23 = vpop.f32.mrb[22].mxu1 }
 0x3f8   :  { %v3732_v31 = vmul.f32 %v9550_v16, %v9550_v16  ;;  %v9558_v44 = vadd.f32 %v3717_v0, %v1755_v9  ;;  %v9560_v4 = vadd.f32 %v3633_v23, %v1743_v1  ;;  %v3719_v20 = vpop.f32.mrb[14].mxu0  ;;  %6029 = vmatpush1.bf16.msra.mxu1 %v8669_v19  ;;  %v3635_v24 = vpop.f32.mrb[23].mxu1  ;;  %v8684_v19 = vld [vmem:[#allocation11 + $0x540] ss:$12 sps:$4 sm:$0xff]  }
 0x3f9   :  { %v3734_v21 = vmul.f32 %v9552_v13, %v9552_v13  ;;  %v3733_v25 = vmul.f32 %v9554_v22, %v9554_v22  ;;  %v9566_v26 = vadd.f32 %v3719_v20, %v1751_v8  ;;  %v9568_v27 = vadd.f32 %v3635_v24, %v1747_v12  ;;  %v3721_v28 = vpop.f32.mrb[15].mxu0  ;;  %6030 = vmatprep.subr.bf16.mxu1 %v8676_v15  ;;  %v8689_v24 = vld [vmem:[#allocation11 + $0x558] ss:$12 sps:$4 sm:$0xff]  }
 0x3fa   :  { %v3756_v30 = vmul.f32 %v9550_v16, %v3732_v31  ;;  %v3735_v32 = vmul.f32 %v9558_v44, %v9558_v44  ;;  %v3744_v34 = vmul.f32 %v9560_v4, %v9560_v4  ;;  %v9575_v35 = vadd.f32 %v3721_v28, %v1755_v9  ;;  %7626 = vmatpush3.bf16.msra.mxu0 %v8708_v61  ;;  %v8691_v61 = vld [vmem:[#allocation11 + $0x55c] ss:$12 sps:$4 sm:$0xff]   ;;  %v8701_v28 = vld [vmem:[#allocation11 + $0x58c] ss:$12 sps:$4 sm:$0xff]  }
 0x3fb   :  { %v3758_v36 = vmul.f32 %v9552_v13, %v3734_v21  ;;  %v3757_v37 = vmul.f32 %v9554_v22, %v3733_v25  ;;  %v3746_v39 = vmul.f32 %v9566_v26, %v9566_v26  ;;  %v3745_v40 = vmul.f32 %v9568_v27, %v9568_v27  ;;  %7633 = vmatprep.subr.bf16.mxu0 %v8712_v14  ;;  %v8696_v21 = vld [vmem:[#allocation11 + $0x574] ss:$12 sps:$4 sm:$0xff]   ;;  %v8694_v25 = vld [vmem:[#allocation11 + $0x570] ss:$12 sps:$4 sm:$0xff]  }
 0x3fc   :  { %v3780_v41 = vmul.f32 0.044715, %v3756_v30  ;;  %v3759_v46 = vmul.f32 %v9558_v44, %v3735_v32  ;;  %v3768_v47 = vmul.f32 %v9560_v4, %v3744_v34  ;;  %v3747_v48 = vmul.f32 %v9575_v35, %v9575_v35  ;;  %6031 = vmatpush1.bf16.msra.mxu1 %v8674_v7  ;;  %v8699_v30 = vld [vmem:[#allocation11 + $0x588] ss:$12 sps:$4 sm:$0xff]  }
 0x3fd   :  { %v3782_v38 = vmul.f32 0.044715, %v3758_v36  ;;  %v3781_v51 = vmul.f32 0.044715, %v3757_v37  ;;  %v3770_v56 = vmul.f32 %v9566_v26, %v3746_v39  ;;  %v3769_v57 = vmul.f32 %v9568_v27, %v3745_v40  ;;  %6032 = vmatprep.subr.bf16.mxu1 %v8681_v29  ;;  %v8706_v36 = vld [vmem:[#allocation11 + $0x5a4] ss:$12 sps:$4 sm:$0xff]  }
 0x3fe   :  { %v3804_v59 = vadd.f32 %v9550_v16, %v3780_v41  ;;  %v3783_v42 = vmul.f32 0.044715, %v3759_v46  ;;  %v3792_v58 = vmul.f32 0.044715, %v3768_v47  ;;  %v3771_v45 = vmul.f32 %v9575_v35, %v3747_v48  ;;  %v8704_v47 = vld [vmem:[#allocation11 + $0x5a0] ss:$12 sps:$4 sm:$0xff]  }
 0x3ff   :  { %v3806_v49 = vadd.f32 %v9552_v13, %v3782_v38  ;;  %v3805_v6 = vadd.f32 %v9554_v22, %v3781_v51  ;;  %v3794_v10 = vmul.f32 0.044715, %v3770_v56  ;;  %v3793_v1 = vmul.f32 0.044715, %v3769_v57  ;;  %v8711_v56 = vld [vmem:[#allocation11 + $0x5bc] ss:$12 sps:$4 sm:$0xff]  }
 0x400   :  { %v3828_v3 = vmul.f32 0.7978846, %v3804_v59  ;;  %v3807_v8 = vadd.f32 %v9558_v44, %v3783_v42  ;;  %v3816_v12 = vadd.f32 %v9560_v4, %v3792_v58  ;;  %v3795_v9 = vmul.f32 0.044715, %v3771_v45  ;;  %6033 = vmatpush1.bf16.msra.mxu1 %v8679_v5 }
 0x401   :  { %v3830_v11 = vmul.f32 0.7978846, %v3806_v49  ;;  %v3829_v15 = vmul.f32 0.7978846, %v3805_v6  ;;  %v3818_v17 = vadd.f32 %v9566_v26, %v3794_v10  ;;  %v3817_v18 = vadd.f32 %v9568_v27, %v3793_v1  ;;  %6034 = vmatprep.subr.bf16.mxu1 %v8686_v43  ;;  %v8709_v10 = vld [vmem:[#allocation11 + $0x5b8] ss:$12 sps:$4 sm:$0xff]  }
 0x402   :  { %8886 = vtanh.f32 %v3828_v3  ;;  %v3831_v0 = vmul.f32 0.7978846, %v3807_v8  ;;  %v3840_v23 = vmul.f32 0.7978846, %v3816_v12  ;;  %v3819_v14 = vadd.f32 %v9575_v35, %v3795_v9 }
 0x403   :  { %8888 = vtanh.f32 %v3830_v11  ;;  %v3842_v31 = vmul.f32 0.7978846, %v3818_v17  ;;  %v3841_v20 = vmul.f32 0.7978846, %v3817_v18 }
 0x404   :  { %8890 = vtanh.f32 %v3829_v15  ;;  %6035 = vmatpush1.bf16.msra.mxu1 %v8684_v19  ;;  %v3843_v7 = vmul.f32 0.7978846, %v3819_v14  ;;  %v8716_v19 = vld [vmem:[#allocation11 + $0x5d4] ss:$12 sps:$4 sm:$0xff]  }
 0x405   :  { %8892 = vtanh.f32 %v3831_v0  ;;  %6036 = vmatprep.subr.bf16.mxu1 %v8691_v61 }
 0x406   :  { %8894 = vtanh.f32 %v3840_v23  ;;  %v8714_v23 = vld [vmem:[#allocation11 + $0x5d0] ss:$12 sps:$4 sm:$0xff]  }
 0x407   :  { %8896 = vtanh.f32 %v3842_v31 }
 0x408   :  { %8898 = vtanh.f32 %v3841_v20  ;;  %6037 = vmatpush1.bf16.msra.mxu1 %v8689_v24  ;;  %v8713_v20 = vld [vmem:[#allocation11 + $0x788] ss:$12 sps:$4 sm:$0xff]   ;;  %v8721_v24 = vld [vmem:[#allocation11 + $0x5ec] ss:$12 sps:$4 sm:$0xff]  }
 0x409   :  { %8900 = vtanh.f32 %v3843_v7  ;;  %6038 = vmatprep.subr.bf16.mxu1 %v8696_v21  ;;  %v8724_v7 = vld [vmem:[#allocation11 + $0x600] ss:$12 sps:$4 sm:$0xff]   ;;  %v8723_v21 = vld [vmem:[#allocation11 + $0x7b8] ss:$12 sps:$4 sm:$0xff]  }
 0x40c   :  { %v8887_v29 = vpop.eup %8886  ;;  %6039 = vmatpush1.bf16.msra.mxu1 %v8694_v25  ;;  %v8731_v25 = vld [vmem:[#allocation11 + $0x61c] ss:$12 sps:$4 sm:$0xff]  }
 0x40d   :  { %v8889_v32 = vpop.eup %8888  ;;  %v3876_v34 = vadd.f32 1.0, %v8887_v29  ;;  %6040 = vmatprep.subr.bf16.mxu1 %v8701_v28  ;;  %v8727_v28 = vld [vmem:[#allocation11 + $0x890] ss:$12 sps:$4 sm:$0xff]   ;;  %v8729_v29 = vld [vmem:[#allocation11 + $0x618] ss:$12 sps:$4 sm:$0xff]  }
 0x40e   :  { %v8891_v37 = vpop.eup %8890  ;;  %v3878_v39 = vadd.f32 1.0, %v8889_v32  ;;  %v8736_v32 = vld [vmem:[#allocation11 + $0x634] ss:$12 sps:$4 sm:$0xff]  }
 0x40f   :  { %v8893_v40 = vpop.eup %8892  ;;  %v3877_v41 = vadd.f32 1.0, %v8891_v37  ;;  %v3900_v38 = vmul.f32 0.5, %v3876_v34  ;;  %v8732_v34 = vld [vmem:[#allocation11 + $0x8a8] ss:$12 sps:$4 sm:$0xff]  }
 0x410   :  { %v8895_v46 = vpop.eup %8894  ;;  %6041 = vmatpush1.bf16.msra.mxu1 %v8699_v30  ;;  %v3879_v48 = vadd.f32 1.0, %v8893_v40  ;;  %v3902_v43 = vmul.f32 0.5, %v3878_v39  ;;  %v8728_v30 = vld [vmem:[#allocation11 + $0x7d0] ss:$12 sps:$4 sm:$0xff]   ;;  %v8733_v37 = vld [vmem:[#allocation11 + $0x7e8] ss:$12 sps:$4 sm:$0xff]  }
 0x411   :  { %v8897_v5 = vpop.eup %8896  ;;  %v3888_v51 = vadd.f32 1.0, %v8895_v46  ;;  %6042 = vmatprep.subr.bf16.mxu1 %v8706_v36  ;;  %v3901_v49 = vmul.f32 0.5, %v3877_v41  ;;  %v3924_v8 = vmul.f32 %v9550_v16, %v3900_v38  ;;  %v8734_v36 = vld [vmem:[#allocation11 + $0x630] ss:$12 sps:$4 sm:$0xff]   ;;  %v8741_v39 = vld [vmem:[#allocation11 + $0x64c] ss:$12 sps:$4 sm:$0xff]  }
 0x412   :  { %v8899_v57 = vpop.eup %8898  ;;  %v3890_v59 = vadd.f32 1.0, %v8897_v5  ;;  %v3903_v3 = vmul.f32 0.5, %v3879_v48  ;;  %v3926_v11 = vmul.f32 %v9552_v13, %v3902_v43  ;;  %v8737_v40 = vld [vmem:[#allocation11 + $0x8c0] ss:$12 sps:$4 sm:$0xff]   ;;  %v8739_v41 = vld [vmem:[#allocation11 + $0x648] ss:$12 sps:$4 sm:$0xff]  }
 0x413   :  { %v8901_v42 = vpop.eup %8900  ;;  %v3912_v58 = vmul.f32 0.5, %v3888_v51  ;;  %v3889_v45 = vadd.f32 1.0, %v8899_v57  ;;  %v3925_v18 = vmul.f32 %v9554_v22, %v3901_v49  ;;  %v8719_v22 = vld [vmem:[#allocation11 + $0x5e8] ss:$12 sps:$4 sm:$0xff]   ;;  %v8746_v46 = vld [vmem:[#allocation11 + $0x664] ss:$12 sps:$4 sm:$0xff]  }
 0x414   :  { %v3914_v6 = vmul.f32 0.5, %v3890_v59  ;;  %6043 = vmatpush1.bf16.msra.mxu1 %v8704_v47  ;;  %v3891_v1 = vadd.f32 1.0, %v8901_v42  ;;  %v3927_v16 = vmul.f32 %v9558_v44, %v3903_v3  ;;  %v8718_v44 = vld [vmem:[#allocation11 + $0x7a0] ss:$12 sps:$4 sm:$0xff]   ;;  %v8742_v47 = vld [vmem:[#allocation11 + $0x8d8] ss:$12 sps:$4 sm:$0xff]  }
 0x415   :  { %v3936_v12 = vmul.f32 %v9560_v4, %v3912_v58  ;;  %6044 = vmatprep.subr.bf16.mxu1 %v8711_v56  ;;  %v3913_v9 = vmul.f32 0.5, %v3889_v45  ;;  %v8744_v38 = vld [vmem:[#allocation11 + $0x660] ss:$12 sps:$4 sm:$0xff]   ;;  %v8743_v57 = vld [vmem:[#allocation11 + $0x818] ss:$12 sps:$4 sm:$0xff]  }
 0x416   :  { %v3938_v15 = vmul.f32 %v9566_v26, %v3914_v6  ;;  %v3915_v17 = vmul.f32 0.5, %v3891_v1  ;;  %v8717_v26 = vld [vmem:[#allocation11 + $0x860] ss:$12 sps:$4 sm:$0xff]   ;;  %v8751_v43 = vld [vmem:[#allocation11 + $0x67c] ss:$12 sps:$4 sm:$0xff]  }
 0x417   :  { %v3937_v61 = vmul.f32 %v9568_v27, %v3913_v9  ;;  %v9604_v0 = vpack.c.bf16 %v3936_v12, %v3924_v8  ;;  %v8726_v27 = vld [vmem:[#allocation11 + $0x604] ss:$12 sps:$4 sm:$0xff]   ;;  %v8754_v6 = vld [vmem:[#allocation11 + $0x694] ss:$12 sps:$4 sm:$0xff]   ;;  %v8757_v1 = vld [vmem:[#allocation11 + $0x6ac] ss:$12 sps:$4 sm:$0xff]  }
 0x418   :  { %6045 = vmatpush1.bf16.msra.mxu1 %v8709_v10  ;;  %v3939_v4 = vmul.f32 %v9575_v35, %v3915_v17  ;;  %v9608_v14 = vpack.c.bf16 %v3938_v15, %v3926_v11  ;;  %v8722_v35 = vld [vmem:[#allocation11 + $0x878] ss:$12 sps:$4 sm:$0xff]   ;;  %v8747_v42 = vld [vmem:[#allocation11 + $0x8f0] ss:$12 sps:$4 sm:$0xff]   ;;  %v8755_v3 = vld [vmem:[#allocation11 + $0x6a8] ss:$12 sps:$4 sm:$0xff]  }
 0x419   :  { %v3949_v31 = vpack.c.bf16 %v3937_v61, %v3925_v18  ;;  %6046 = vmatprep.subr.bf16.mxu1 %v8716_v19  ;;  %v8749_v45 = vld [vmem:[#allocation11 + $0x678] ss:$12 sps:$4 sm:$0xff]   ;;  %v8748_v49 = vld [vmem:[#allocation11 + $0x830] ss:$12 sps:$4 sm:$0xff]   ;;  %v8758_v12 = vld [vmem:[#allocation11 + $0x6c0] ss:$12 sps:$4 sm:$0xff]  }
 0x41a   :  { %v9610_v13 = vpack.c.bf16 %v3939_v4, %v3927_v16  ;;  %v8752_v10 = vld [vmem:[#allocation11 + $0x690] ss:$12 sps:$4 sm:$0xff]   ;;  %v8761_v19 = vld [vmem:[#allocation11 + $0x6d8] ss:$12 sps:$4 sm:$0xff]   ;;  %v8766_v11 = vld [vmem:[#allocation11 + $0x6f4] ss:$12 sps:$4 sm:$0xff]  }
 0x41b   :  { %6343 = vmatprep.mubr.bf16.mxu0 %v3949_v31  ;;  %v8760_v8 = vld [vmem:[#allocation11 + $0x6c4] ss:$12 sps:$4 sm:$0xff]   ;;  %v8763_v9 = vld [vmem:[#allocation11 + $0x6dc] ss:$12 sps:$4 sm:$0xff]   ;;  %v8769_v17 = vld [vmem:[#allocation11 + $0x70c] ss:$12 sps:$4 sm:$0xff]  }
 0x41c   :  { %6344 = vmatmul.mubr.bf16.vlgmr.msra.gmra.mrb[32].mxu0 %v9604_v0  ;;  %6047 = vmatpush1.bf16.msra.mxu1 %v8714_v23  ;;  %v8764_v15 = vld [vmem:[#allocation11 + $0x6f0] ss:$12 sps:$4 sm:$0xff]   ;;  %v9616_v18 = vld [vmem:[#allocation13] sm:$0x7]  ;;  %v8767_v61 = vld [vmem:[#allocation11 + $0x708] ss:$12 sps:$4 sm:$0xff]  }
 0x41d   :  { %7634 = vmatpush3.bf16.msra.mxu0 %v8713_v20  ;;  %6384 = vmatprep.mubr.bf16.mxu0 %v9610_v13  ;;  %v4349_v23 = vrot.slane %v9616_v18, %v9339_v33  ;;  %v8772_v16 = vld [vmem:[#allocation11 + $0x724] ss:$12 sps:$4 sm:$0xff]   ;;  %v8770_v20 = vld [vmem:[#allocation11 + $0x720] ss:$12 sps:$4 sm:$0xff]  }
 0x41e   :  { %7635 = vmatprep.subr.bf16.mxu0 %v8717_v26  ;;  %6048 = vmatprep.subr.bf16.mxu1 %v8721_v24  ;;  %v8778_v33 = vld [vmem:[#allocation11 + $0x754] ss:$12 sps:$4 sm:$0xff]  }
 0x420   :  { %6049 = vmatpush1.bf16.msra.mxu1 %v8719_v22 }
 0x421   :  { %7636 = vmatpush3.bf16.msra.mxu0 %v8718_v44  ;;  %6061 = vmatprep.subr.bf16.mxu1 %v8726_v27  ;;  %v8775_v44 = vld [vmem:[#allocation11 + $0x73c] ss:$12 sps:$4 sm:$0xff]  }
 0x422   :  { %7637 = vmatprep.subr.bf16.mxu0 %v8722_v35 }
 0x423   :  { %6051 = vmatmul.mubr.bf16.vlgmr.msra.gmra.mrb[24].mxu1 %v9536_v55  ;;  %v8738_v55 = vld [vmem:[#allocation11 + $0x800] ss:$12 sps:$4 sm:$0xff]  }
 0x424   :  { %6062 = vmatpush1.bf16.msra.mxu1 %v8724_v7  ;;  %6093 = vmatprep.mubr.bf16.mxu1 %v3949_v31 }
 0x425   :  { %7638 = vmatpush3.bf16.msra.mxu0 %v8723_v21  ;;  %6063 = vmatprep.subr.bf16.mxu1 %v8731_v25  ;;  %v8773_v25 = vld [vmem:[#allocation11 + $0x738] ss:$12 sps:$4 sm:$0xff]  }
 0x426   :  { %7639 = vmatprep.subr.bf16.mxu0 %v8727_v28 }
 0x428   :  { %6064 = vmatpush1.bf16.msra.mxu1 %v8729_v29  ;;  %v8776_v29 = vld [vmem:[#allocation11 + $0x750] ss:$12 sps:$4 sm:$0xff]  }
 0x429   :  { %7640 = vmatpush3.bf16.msra.mxu0 %v8728_v30  ;;  %6065 = vmatprep.subr.bf16.mxu1 %v8736_v32  ;;  %v8781_v30 = vld [vmem:[#allocation11 + $0x76c] ss:$12 sps:$4 sm:$0xff]   ;;  %v8779_v32 = vld [vmem:[#allocation11 + $0x768] ss:$12 sps:$4 sm:$0xff]  }
 0x42a   :  { %7641 = vmatprep.subr.bf16.mxu0 %v8732_v34  ;;  %v8784_v34 = vld [vmem:[#allocation11 + $0x784] ss:$12 sps:$4 sm:$0xff]  }
 0x42c   :  { %6066 = vmatpush1.bf16.msra.mxu1 %v8734_v36  ;;  %v8782_v36 = vld [vmem:[#allocation11 + $0x780] ss:$12 sps:$4 sm:$0xff]  }
 0x42d   :  { %7642 = vmatpush3.bf16.msra.mxu0 %v8733_v37  ;;  %6067 = vmatprep.subr.bf16.mxu1 %v8741_v39  ;;  %v8787_v37 = vld [vmem:[#allocation11 + $0x79c] ss:$12 sps:$4 sm:$0xff]   ;;  %v8785_v39 = vld [vmem:[#allocation11 + $0x798] ss:$12 sps:$4 sm:$0xff]  }
 0x42e   :  { %7643 = vmatprep.subr.bf16.mxu0 %v8737_v40  ;;  %v8790_v40 = vld [vmem:[#allocation11 + $0x7b4] ss:$12 sps:$4 sm:$0xff]  }
 0x42f   :  { %v7539_v48 = vpop.f32.mrb[16].mxu0 }
 0x430   :  { %v7540_v5 = vpop.f32.mrb[17].mxu0  ;;  %6068 = vmatpush1.bf16.msra.mxu1 %v8739_v41  ;;  %v8788_v41 = vld [vmem:[#allocation11 + $0x7b0] ss:$12 sps:$4 sm:$0xff]  }
 0x431   :  { %v7541_v51 = vadd.f32 %v7540_v5, %v7539_v48  ;;  %7644 = vmatpush3.bf16.msra.mxu0 %v8738_v55  ;;  %v7542_v56 = vpop.f32.mrb[18].mxu0  ;;  %6069 = vmatprep.subr.bf16.mxu1 %v8746_v46  ;;  %v8793_v55 = vld [vmem:[#allocation11 + $0x7cc] ss:$12 sps:$4 sm:$0xff]   ;;  %v8791_v46 = vld [vmem:[#allocation11 + $0x7c8] ss:$12 sps:$4 sm:$0xff]  }
 0x432   :  { %v7543_v59 = vpop.f32.mrb[19].mxu0  ;;  %7645 = vmatprep.subr.bf16.mxu0 %v8742_v47  ;;  %v8796_v47 = vld [vmem:[#allocation11 + $0x7e4] ss:$12 sps:$4 sm:$0xff]   ;;  %v8794_v48 = vld [vmem:[#allocation11 + $0x7e0] ss:$12 sps:$4 sm:$0xff]  }
 0x433   :  { %v7544_v58 = vadd.f32 %v7543_v59, %v7542_v56  ;;  %v6182_v26 = vadd.f32 %v7541_v51, %v4349_v23  ;;  %v8799_v5 = vld [vmem:[#allocation11 + $0x7fc] ss:$12 sps:$4 sm:$0xff]   ;;  %v8805_v51 = vld [vmem:[#allocation11 + $0x82c] ss:$12 sps:$4 sm:$0xff]  }
 0x434   :  { %6070 = vmatpush1.bf16.msra.mxu1 %v8744_v38  ;;  %v8802_v38 = vld [vmem:[#allocation11 + $0x814] ss:$12 sps:$4 sm:$0xff]   ;;  %v8811_v59 = vld [vmem:[#allocation11 + $0x85c] ss:$12 sps:$4 sm:$0xff]  }
 0x435   :  { %7646 = vmatpush3.bf16.msra.mxu0 %v8743_v57  ;;  %6071 = vmatprep.subr.bf16.mxu1 %v8751_v43  ;;  %v6185_v35 = vadd.f32 %v7544_v58, %v4349_v23  ;;  %v8803_v56 = vld [vmem:[#allocation11 + $0x828] ss:$12 sps:$4 sm:$0xff]   ;;  %v8808_v57 = vld [vmem:[#allocation11 + $0x844] ss:$12 sps:$4 sm:$0xff]   ;;  %v8806_v43 = vld [vmem:[#allocation11 + $0x840] ss:$12 sps:$4 sm:$0xff]  }
 0x436   :  { %7647 = vmatprep.subr.bf16.mxu0 %v8747_v42  ;;  %v8809_v42 = vld [vmem:[#allocation11 + $0x858] ss:$12 sps:$4 sm:$0xff]   ;;  %v8814_v58 = vld [vmem:[#allocation11 + $0x874] ss:$12 sps:$4 sm:$0xff]  }
 0x438   :  { %6072 = vmatpush1.bf16.msra.mxu1 %v8749_v45  ;;  %v8812_v45 = vld [vmem:[#allocation11 + $0x870] ss:$12 sps:$4 sm:$0xff]  }
 0x439   :  { %7648 = vmatpush3.bf16.msra.mxu0 %v8748_v49  ;;  %6073 = vmatprep.subr.bf16.mxu1 %v8754_v6  ;;  %v8817_v49 = vld [vmem:[#allocation11 + $0x88c] ss:$12 sps:$4 sm:$0xff]   ;;  %v8815_v6 = vld [vmem:[#allocation11 + $0x888] ss:$12 sps:$4 sm:$0xff]  }
 0x43c   :  { %6385 = vmatmul.mubr.bf16.vlgmr.msra.gmra.mrb[36].mxu0 %v9608_v14  ;;  %6074 = vmatpush1.bf16.msra.mxu1 %v8752_v10  ;;  %v8820_v10 = vld [vmem:[#allocation11 + $0x8a4] ss:$12 sps:$4 sm:$0xff]  }
 0x43d   :  { %6075 = vmatprep.subr.bf16.mxu1 %v8757_v1 }
 0x440   :  { %6076 = vmatpush1.bf16.msra.mxu1 %v8755_v3 }
 0x441   :  { %6077 = vmatprep.subr.bf16.mxu1 %v8760_v8  ;;  %v8818_v8 = vld [vmem:[#allocation11 + $0x8a0] ss:$12 sps:$4 sm:$0xff]  }
 0x444   :  { %6078 = vmatpush1.bf16.msra.mxu1 %v8758_v12 }
 0x445   :  { %6079 = vmatprep.subr.bf16.mxu1 %v8763_v9 }
 0x448   :  { %6080 = vmatpush1.bf16.msra.mxu1 %v8761_v19  ;;  %v8823_v19 = vld [vmem:[#allocation11 + $0x8bc] ss:$12 sps:$4 sm:$0xff]  }
 0x449   :  { %6081 = vmatprep.subr.bf16.mxu1 %v8766_v11 }
 0x44c   :  { %6082 = vmatpush1.bf16.msra.mxu1 %v8764_v15 }
 0x44d   :  { %6083 = vmatprep.subr.bf16.mxu1 %v8769_v17 }
 0x44f   :  { %v7561_v4 = vpop.f32.mrb[20].mxu0 }
 0x450   :  { %v7562_v31 = vpop.f32.mrb[21].mxu0  ;;  %6084 = vmatpush1.bf16.msra.mxu1 %v8767_v61  ;;  %v8821_v61 = vld [vmem:[#allocation11 + $0x8b8] ss:$12 sps:$4 sm:$0xff]  }
 0x451   :  { %v7563_v24 = vadd.f32 %v7562_v31, %v7561_v4  ;;  %v7564_v22 = vpop.f32.mrb[22].mxu0  ;;  %6085 = vmatprep.subr.bf16.mxu1 %v8772_v16  ;;  %v8826_v16 = vld [vmem:[#allocation11 + $0x8d4] ss:$12 sps:$4 sm:$0xff]   ;;  %v8824_v4 = vld [vmem:[#allocation11 + $0x8d0] ss:$12 sps:$4 sm:$0xff]  }
 0x452   :  { %v7565_v27 = vpop.f32.mrb[23].mxu0  ;;  %v8829_v31 = vld [vmem:[#allocation11 + $0x8ec] ss:$12 sps:$4 sm:$0xff]  }
 0x453   :  { %v9620_v7 = vadd.f32 %v7563_v24, %v6182_v26  ;;  %v7566_v21 = vadd.f32 %v7565_v27, %v7564_v22  ;;  %v8831_v26 = vld [vmem:[#allocation14] sm:$0xff]   ;;  %v8832_v24 = vld [vmem:[#allocation14 + $0x48] sm:$0xff]   ;;  %v8834_v27 = vld [vmem:[#allocation14 + $0x50] sm:$0xff]  }
 0x454   :  { %6086 = vmatpush1.bf16.msra.mxu1 %v8770_v20  ;;  %v8830_v20 = vld [vmem:[#allocation14 + $0x40] sm:$0xff]  }
 0x455   :  { %v9622_v28 = vadd.f32 %v7566_v21, %v6185_v35  ;;  %6087 = vmatprep.subr.bf16.mxu1 %v8775_v44  ;;  %7655 = vmatprep.subr.bf16.mxu0 %v8830_v20  ;;  %v8827_v22 = vld [vmem:[#allocation11 + $0x8e8] ss:$12 sps:$4 sm:$0xff]   ;;  %v8833_v44 = vld [vmem:[#allocation14 + $0x8] sm:$0xff]   ;;  %v8837_v21 = vld [vmem:[#allocation14 + $0x18] sm:$0xff]  }
 0x456   :  { %7656 = vmatpush3.bf16.msra.mxu0 %v8831_v26  ;;  %v8835_v35 = vld [vmem:[#allocation14 + $0x10] sm:$0xff]  }
 0x457   :  { %7657 = vmatprep.subr.bf16.mxu0 %v8832_v24 }
 0x458   :  { %6088 = vmatpush1.bf16.msra.mxu1 %v8773_v25  ;;  %v8838_v25 = vld [vmem:[#allocation14 + $0x60] sm:$0xff]  }
 0x459   :  { %6089 = vmatprep.subr.bf16.mxu1 %v8778_v33  ;;  %v8840_v33 = vld [vmem:[#allocation14 + $0x68] sm:$0xff]  }
 0x45a   :  { %7658 = vmatpush3.bf16.msra.mxu0 %v8833_v44  ;;  %v8853_v44 = vld [vmem:[#allocation14 + $0xb8] sm:$0xff]  }
 0x45b   :  { %7659 = vmatprep.subr.bf16.mxu0 %v8834_v27 }
 0x45c   :  { %6090 = vmatpush1.bf16.msra.mxu1 %v8776_v29  ;;  %v8841_v29 = vld [vmem:[#allocation14 + $0x28] sm:$0xff]  }
 0x45d   :  { %6091 = vmatprep.subr.bf16.mxu1 %v8781_v30 }
 0x45e   :  { %7660 = vmatpush3.bf16.msra.mxu0 %v8835_v35 }
 0x460   :  { %6092 = vmatpush1.bf16.msra.mxu1 %v8779_v32 }
 0x461   :  { %6104 = vmatprep.subr.bf16.mxu1 %v8784_v34 }
 0x463   :  { %6094 = vmatmul.mubr.bf16.vlgmr.msra.gmra.mrb[24].mxu1 %v9604_v0  ;;  %v8797_v0 = vld [vmem:[#allocation11 + $0x7f8] ss:$12 sps:$4 sm:$0xff]  }
 0x464   :  { %6105 = vmatpush1.bf16.msra.mxu1 %v8782_v36  ;;  %6136 = vmatprep.mubr.bf16.mxu1 %v9610_v13  ;;  %v8800_v13 = vld [vmem:[#allocation11 + $0x810] ss:$12 sps:$4 sm:$0xff]  }
 0x465   :  { %6106 = vmatprep.subr.bf16.mxu1 %v8787_v37 }
 0x468   :  { %6107 = vmatpush1.bf16.msra.mxu1 %v8785_v39 }
 0x469   :  { %6108 = vmatprep.subr.bf16.mxu1 %v8790_v40 }
 0x46c   :  { %6109 = vmatpush1.bf16.msra.mxu1 %v8788_v41 }
 0x46d   :  { %6110 = vmatprep.subr.bf16.mxu1 %v8793_v55 }
 0x470   :  { %6111 = vmatpush1.bf16.msra.mxu1 %v8791_v46 }
 0x471   :  { %6112 = vmatprep.subr.bf16.mxu1 %v8796_v47 }
 0x474   :  { %6113 = vmatpush1.bf16.msra.mxu1 %v8794_v48 }
 0x475   :  { %6114 = vmatprep.subr.bf16.mxu1 %v8799_v5 }
 0x478   :  { %6115 = vmatpush1.bf16.msra.mxu1 %v8797_v0 }
 0x479   :  { %6116 = vmatprep.subr.bf16.mxu1 %v8802_v38 }
 0x47c   :  { %6117 = vmatpush1.bf16.msra.mxu1 %v8800_v13  ;;  %v8842_v13 = vld [vmem:[#allocation14 + $0x70] sm:$0xff]  }
 0x47d   :  { %6118 = vmatprep.subr.bf16.mxu1 %v8805_v51  ;;  %v8843_v51 = vld [vmem:[#allocation14 + $0x30] sm:$0xff]  }
 0x480   :  { %6119 = vmatpush1.bf16.msra.mxu1 %v8803_v56  ;;  %v8844_v56 = vld [vmem:[#allocation14 + $0x78] sm:$0xff]  }
 0x481   :  { %6120 = vmatprep.subr.bf16.mxu1 %v8808_v57  ;;  %v8845_v57 = vld [vmem:[#allocation14 + $0x38] sm:$0xff]  }
 0x484   :  { %6121 = vmatpush1.bf16.msra.mxu1 %v8806_v43  ;;  %v9152_v43 = vmov 0.0  }
 0x485   :  { %6122 = vmatprep.subr.bf16.mxu1 %v8811_v59 }
 0x488   :  { %6123 = vmatpush1.bf16.msra.mxu1 %v8809_v42 }
 0x489   :  { %6124 = vmatprep.subr.bf16.mxu1 %v8814_v58 }
 0x48c   :  { %6125 = vmatpush1.bf16.msra.mxu1 %v8812_v45 }
 0x48d   :  { %6126 = vmatprep.subr.bf16.mxu1 %v8817_v49 }
 0x48f   :  { %v7583_v1 = vpop.f32.mrb[24].mxu0 }
 0x490   :  { %v7584_v3 = vpop.f32.mrb[25].mxu0  ;;  %6127 = vmatpush1.bf16.msra.mxu1 %v8815_v6 }
 0x491   :  { %v7585_v12 = vadd.f32 %v7584_v3, %v7583_v1  ;;  %v7586_v9 = vpop.f32.mrb[26].mxu0  ;;  %6128 = vmatprep.subr.bf16.mxu1 %v8820_v10 }
 0x492   :  { %v7587_v11 = vpop.f32.mrb[27].mxu0 }
 0x493   :  { %v6264_v15 = vadd.f32 %v7585_v12, %v9620_v7  ;;  %v7588_v17 = vadd.f32 %v7587_v11, %v7586_v9  ;;  %v8836_v7 = vld [vmem:[#allocation14 + $0x58] sm:$0xff]   ;;  %v4341_v9 = vrot.slane %v9616_v18, %v9347_v53 }
 0x494   :  { %6129 = vmatpush1.bf16.msra.mxu1 %v8818_v8  ;;  %7661 = vmatprep.subr.bf16.mxu0 %v8836_v7 }
 0x495   :  { %v6267_v23 = vadd.f32 %v7588_v17, %v9622_v28  ;;  %6130 = vmatprep.subr.bf16.mxu1 %v8823_v19  ;;  %7662 = vmatpush3.bf16.msra.mxu0 %v8837_v21  ;;  %v8839_v28 = vld [vmem:[#allocation14 + $0x20] sm:$0xff]   ;;  %v4345_v19 = vrot.slane %v9616_v18, %v9350_v54  ;;  %v8847_v54 = vld [vmem:[#allocation14 + $0x88] sm:$0xff]   ;;  %v8848_v18 = vld [vmem:[#allocation14 + $0x90] sm:$0xff]  }
 0x496   :  { %7663 = vmatprep.subr.bf16.mxu0 %v8838_v25 }
 0x498   :  { %6131 = vmatpush1.bf16.msra.mxu1 %v8821_v61 }
 0x499   :  { %6132 = vmatprep.subr.bf16.mxu1 %v8826_v16  ;;  %7664 = vmatpush3.bf16.msra.mxu0 %v8839_v28 }
 0x49a   :  { %7665 = vmatprep.subr.bf16.mxu0 %v8840_v33  ;;  %v7432_v33 = vld [vmem:[#allocation16] ss:$0 sm:$0xff] }
 0x49c   :  { %6133 = vmatpush1.bf16.msra.mxu1 %v8824_v4 }
 0x49d   :  { %6134 = vmatprep.subr.bf16.mxu1 %v8829_v31  ;;  %7666 = vmatpush3.bf16.msra.mxu0 %v8841_v29 }
 0x49e   :  { %7667 = vmatprep.subr.bf16.mxu0 %v8842_v13 }
 0x4a0   :  { %6135 = vmatpush1.bf16.msra.mxu1 %v8827_v22  ;;  %v8846_v22 = vld [vmem:[#allocation14 + $0x80] sm:$0xff]  }
 0x4a1   :  { %7668 = vmatpush3.bf16.msra.mxu0 %v8843_v51 }
 0x4a2   :  { %7669 = vmatprep.subr.bf16.mxu0 %v8844_v56 }
 0x4a3   :  { %6137 = vmatmul.mubr.bf16.vlgmr.msra.gmra.mrb[24].mxu1 %v9608_v14 }
 0x4a5   :  { %7670 = vmatpush3.bf16.msra.mxu0 %v8845_v57 }
 0x4a6   :  { %7686 = vmatprep.subr.bf16.mxu0 %v9152_v43 }
 0x4af   :  { %v7605_v30 = vpop.f32.mrb[28].mxu0 }
 0x4b0   :  { %v7606_v32 = vpop.f32.mrb[29].mxu0 }
 0x4b1   :  { %v7607_v34 = vadd.f32 %v7606_v32, %v7605_v30  ;;  %v7608_v36 = vpop.f32.mrb[30].mxu0 }
 0x4b2   :  { %v7609_v37 = vpop.f32.mrb[31].mxu0 }
 0x4b3   :  { %v6305_v39 = vadd.f32 %v7607_v34, %v6264_v15  ;;  %v7610_v40 = vadd.f32 %v7609_v37, %v7608_v36 }
 0x4b5   :  { %v6308_v14 = vadd.f32 %v7610_v40, %v6267_v23 }
 0x4ef   :  { %v7627_v41 = vpop.f32.mrb[32].mxu0 }
 0x4f0   :  { %v7628_v55 = vpop.f32.mrb[33].mxu0 }
 0x4f1   :  { %v7629_v46 = vadd.f32 %v7628_v55, %v7627_v41  ;;  %v7630_v47 = vpop.f32.mrb[34].mxu0 }
 0x4f2   :  { %v7631_v48 = vpop.f32.mrb[35].mxu0 }
 0x4f3   :  { %v6346_v5 = vadd.f32 %v7629_v46, %v6305_v39  ;;  %v7632_v0 = vadd.f32 %v7631_v48, %v7630_v47 }
 0x4f5   :  { %v6349_v38 = vadd.f32 %v7632_v0, %v6308_v14 }
 0x50f   :  { %v7649_v59 = vpop.f32.mrb[36].mxu0 }
 0x510   :  { %v7650_v42 = vpop.f32.mrb[37].mxu0 }
 0x511   :  { %v7651_v58 = vadd.f32 %v7650_v42, %v7649_v59  ;;  %v7652_v45 = vpop.f32.mrb[38].mxu0 }
 0x512   :  { %v7653_v49 = vpop.f32.mrb[39].mxu0 }
 0x513   :  { %v6387_v6 = vadd.f32 %v7651_v58, %v6346_v5  ;;  %v7654_v10 = vadd.f32 %v7653_v49, %v7652_v45 }
 0x515   :  { %v6390_v1 = vadd.f32 %v7654_v10, %v6349_v38  ;;  %v6395_v3 = vadd.f32 %v6387_v6, %v9342_v50 }
 0x517   :  { %v6398_v8 = vadd.f32 %v6390_v1, %v9344_v52 }
 0x519   :  { %v6401_v12 = vpack.c.bf16 %v6398_v8, %v6395_v3 }
 0x576   :  { %v6138_v11 = vpop.f32.mrb[24].mxu1 }
 0x577   :  { %v7734_v15 = vadd.f32 %v6138_v11, %v4341_v9  ;;  %v6140_v17 = vpop.f32.mrb[25].mxu1 }
 0x578   :  { %v7735_v61 = vadd.f32 %v6140_v17, %v4345_v19  ;;  %v6142_v23 = vpop.f32.mrb[26].mxu1 }
 0x579   :  { %v7736_v16 = vadd.f32 %v6142_v23, %v4341_v9  ;;  %v6144_v4 = vpop.f32.mrb[27].mxu1  ;;  %v6393_v20 = vadd.f32 %v7734_v15, %v9360_v2  ;;  %v8849_v2 = vld [vmem:[#allocation14 + $0x98] sm:$0xff]  }
 0x57a   :  { %v7737_v31 = vadd.f32 %v6144_v4, %v4345_v19  ;;  %v6394_v52 = vadd.f32 %v7735_v61, %v9356_v62  ;;  %v8851_v62 = vld [vmem:[#allocation14 + $0xa8] sm:$0xff]  }
 0x57b   :  { %v6396_v50 = vadd.f32 %v7736_v16, %v9354_v60  ;;  %v8850_v60 = vld [vmem:[#allocation14 + $0xa0] sm:$0xff]  }
 0x57c   :  { %v6397_v26 = vadd.f32 %v7737_v31, %v9358_v63  ;;  %v8852_v63 = vld [vmem:[#allocation14 + $0xb0] sm:$0xff]  }
 0x57d   :  { %v6399_v53 = vpack.c.bf16 %v6396_v50, %v6393_v20 }
 0x57e   :  { %v6400_v24 = vpack.c.bf16 %v6397_v26, %v6394_v52 }
 0x580   :  { %6633 = vmatprep.mubr.bf16.mxu0 %v6400_v24 }
 0x581   :  { %6634 = vmatmul.mubr.bf16.vlgmr.msra.gmra.mrb[40].mxu0 %v6399_v53 }
 0x582   :  { %7687 = vmatpush3.bf16.msra.mxu0 %v8846_v22  ;;  %7702 = vmatprep.mubr.msk.bf16.mxu0 %vm9153_vm0, %v9152_v43 }
 0x583   :  { %7688 = vmatprep.subr.bf16.mxu0 %v9152_v43 }
 0x586   :  { %7689 = vmatpush3.bf16.msra.mxu0 %v8847_v54 }
 0x587   :  { %7690 = vmatprep.subr.bf16.mxu0 %v9152_v43 }
 0x58a   :  { %7691 = vmatpush3.bf16.msra.mxu0 %v8848_v18 }
 0x58b   :  { %7692 = vmatprep.subr.bf16.mxu0 %v9152_v43 }
 0x58e   :  { %7693 = vmatpush3.bf16.msra.mxu0 %v8849_v2 }
 0x58f   :  { %7694 = vmatprep.subr.bf16.mxu0 %v9152_v43 }
 0x592   :  { %7695 = vmatpush3.bf16.msra.mxu0 %v8850_v60 }
 0x593   :  { %7696 = vmatprep.subr.bf16.mxu0 %v9152_v43 }
 0x596   :  { %7697 = vmatpush3.bf16.msra.mxu0 %v8851_v62 }
 0x597   :  { %7698 = vmatprep.subr.bf16.mxu0 %v9152_v43 }
 0x59a   :  { %7699 = vmatpush3.bf16.msra.mxu0 %v8852_v63 }
 0x59b   :  { %7700 = vmatprep.subr.bf16.mxu0 %v9152_v43 }
 0x59e   :  { %7701 = vmatpush3.bf16.msra.mxu0 %v8853_v44 }
 0x5a1   :  { %7703 = vmatmul.mubr.bf16.vlgmr.msra.gmra.mrb[44].mxu0 %v6401_v12 }
 0x654   :  { %v7671_v27 = vpop.f32.mrb[40].mxu0 }
 0x655   :  { %v7672_v35 = vpop.f32.mrb[41].mxu0 }
 0x656   :  { %v7673_v7 = vadd.f32 %v7672_v35, %v7671_v27  ;;  %v7674_v21 = vpop.f32.mrb[42].mxu0 }
 0x657   :  { %v7675_v25 = vpop.f32.mrb[43].mxu0 }
 0x658   :  { %v7676_v28 = vadd.f32 %v7675_v25, %v7674_v21  ;;  %v6636_v29 = vadd.f32 %v7673_v7, %v7432_v33 }
 0x65a   :  { %v6639_v36 = vadd.f32 %v7676_v28, %v7432_v33 }
 0x674   :  { %v6676_v30 = vpop.f32.mrb[44].mxu0 }
 0x675   :  { %v6677_v32 = vadd.f32 %v6676_v30, %v6636_v29  ;;  %v7704_v34 = vpop.f32.mrb[45].mxu0 }
 0x676   :  { %v6679_v37 = vpop.f32.mrb[46].mxu0 }
 0x677   :  { %6683 = vst [vmem:[#allocation17] sm:$0xff] %v6677_v32  ;;  %v6680_v39 = vadd.f32 %v6679_v37, %v6639_v36  ;;  %v7705_v40 = vpop.f32.mrb[47].mxu0 }
 0x679   :  { %6684 = vst [vmem:[#allocation17 + $0x8] sm:$0xff] %v6680_v39 }
 0x67a   :  { %9111 = shalt.err (!%p9108_p6)
}
 0x67b   :  { %s9112_s30 = scalar_lea.hbm %s9660_s9, 256 }
 0x67c   :  { %p9113_p7 = scmp.ne.s32.totalorder %s9660_s9, %s9112_s30  ;;  %p9116_p8 = scmp.lt.u32.totalorder %s9112_s30, %s9660_s9 }
 0x67e   :  { %p9118_p9 = pnand %p9116_p8, %p9113_p7 }
 0x680   :  { %9121 = shalt.err (!%p9118_p9)
}
 0x681   :  { %s9155_s14 = smov 128   ;;  %s9156_s15 = smov 8  }
 0x682   :  { %6696 = dma.vmem_to_hbm [thread:$0]  %s6691_s7, 256, %s9660_s9, [#allocation4], %s9155_s14, %s9155_s14, %s9156_s15  }
 0x683   :  { %9132 = dma.done.wait [#allocation4], 256  }
 0x684   :  { %9133 = vsyncadd [#allocation4], 4294967040 }
 0x685   :  { %6700 = vsyncpa [#allocation3], 1 }
 0x686   :  { %6701 = vsyncpa [#allocation6], 1 }
 0x687   :  { %6702 = vsyncpa [#allocation9], 1 }
 0x688   :  { %6703 = vsyncpa [#allocation12], 1 }
 0x689   :  { %6704 = vsyncpa [#allocation15], 1 }
 0x68a   :  { %6705 = vsyncpa [#allocation4], 1 }

// kernel: tpu_custom_call.1
= control target key start
LH: loop header
LB: loop body
LE: loop exit
PB: predicated region body
PF: predicated region fallthrough
CT: control target
= control target key end

     0   :  { %14 = vsyncpa [#allocation3], 0  ;;  %s9651_s0 = inlined_call_operand.hbm [shape: bf16[16,768], index: 0, kind: input, shape index: {}]   ;;  %s9652_s1 = inlined_call_operand.hbm [shape: bf16[768,384], index: 1, kind: input, shape index: {}]   ;;  %s9653_s2 = inlined_call_operand.hbm [shape: f32[1,384], index: 2, kind: input, shape index: {}]   ;;  %s9654_s3 = inlined_call_operand.hbm [shape: bf16[384,1536], index: 3, kind: input, shape index: {}]   ;;  %s9655_s4 = inlined_call_operand.hbm [shape: f32[1,1536], index: 4, kind: input, shape index: {}]   ;;  %s9656_s5 = inlined_call_operand.hbm [shape: bf16[1536,384], index: 5, kind: input, shape index: {}]   ;;  %s9657_s6 = inlined_call_operand.hbm [shape: f32[1,384], index: 6, kind: input, shape index: {}]   ;;  %s9658_s7 = inlined_call_operand.hbm [shape: bf16[384,128], index: 7, kind: input, shape index: {}]   ;;  %s9659_s8 = inlined_call_operand.hbm [shape: f32[1,128], index: 8, kind: input, shape index: {}]   ;;  %s9660_s9 = inlined_call_operand.hbm [shape: f32[16,128], index: 9, kind: output, shape index: {}]  }
   0x1   :  { %15 = vsyncpa [#allocation6], 0 }
   0x2   :  { %16 = vsyncpa [#allocation9], 0 }
   0x3   :  { %17 = vsyncpa [#allocation12], 0 }
   0x4   :  { %18 = vsyncpa [#allocation15], 0 }
   0x5   :  { %19 = vsyncpa [#allocation4], 0  ;;  %s9134_s30 = smov [#allocation5]   ;;  %s8902_s13 = scalar_lea.hbm %s9652_s1, 18432 }
   0x6   :  { %s37_s10 = sshll.u32 %s9134_s30, 4  ;;  %p8903_p0 = scmp.ne.s32.totalorder %s9652_s1, %s8902_s13  ;;  %s38_s10 = int_to_ptr.vmem [resolvable:$true] %s37_s10 }
   0x7   :  { %p8906_p1 = scmp.lt.u32.totalorder %s8902_s13, %s9652_s1 }
   0x9   :  { %p8908_p2 = pnand %p8906_p1, %p8903_p0 }
   0xb   :  { %8911 = shalt.err (!%p8908_p2)
}
   0xc   :  { %s8912_s18 = scalar_lea.vmem %s38_s10, 18432  ;;  %p8917_p4 = scmp.lt.s32.totalorder %s38_s10, %s38_s10 }
   0xd   :  { %p8913_p3 = scmp.ne.s32.totalorder %s38_s10, %s8912_s18  ;;  %p8918_p5 = scmp.lt.s32.totalorder %s8912_s18, %s8912_s18 }
   0xf   :  { %p8919_p6 = por %p8918_p5, %p8917_p4 }
  0x11   :  { %p8920_p7 = pnand %p8919_p6, %p8913_p3 }
  0x13   :  { %8923 = shalt.err (!%p8920_p7)
}
  0x14   :  { %s9135_s19 = smov 192   ;;  %s9136_s20 = smov 12  }
  0x15   :  { %43 = dma.hbm_to_vmem [thread:$0]  %s9652_s1, 18432, %s38_s10, [#allocation6], %s9135_s19, %s9135_s19, %s9136_s20  }
  0x16   :  { %s9137_s23 = smov [#allocation8]   ;;  %s8924_s27 = scalar_lea.hbm %s9654_s3, 36864 }
  0x17   :  { %s59_s24 = sshll.u32 %s9137_s23, 4  ;;  %p8925_p8 = scmp.ne.s32.totalorder %s9654_s3, %s8924_s27  ;;  %s60_s24 = int_to_ptr.vmem [resolvable:$true] %s59_s24 }
  0x18   :  { %p8928_p9 = scmp.lt.u32.totalorder %s8924_s27, %s9654_s3 }
  0x1a   :  { %p8930_p10 = pnand %p8928_p9, %p8925_p8 }
  0x1c   :  { %8933 = shalt.err (!%p8930_p10)
}
  0x1d   :  { %s8934_s12 = scalar_lea.vmem %s60_s24, 36864  ;;  %p8939_p12 = scmp.lt.s32.totalorder %s60_s24, %s60_s24 }
  0x1e   :  { %p8935_p11 = scmp.ne.s32.totalorder %s60_s24, %s8934_s12  ;;  %p8940_p13 = scmp.lt.s32.totalorder %s8934_s12, %s8934_s12 }
  0x20   :  { %p8941_p0 = por %p8940_p13, %p8939_p12 }
  0x22   :  { %p8942_p1 = pnand %p8941_p0, %p8935_p11 }
  0x24   :  { %8945 = shalt.err (!%p8942_p1)
}
  0x25   :  { %s9138_s1 = smov 768   ;;  %s9139_s10 = smov 48  }
  0x26   :  { %65 = dma.hbm_to_vmem [thread:$0]  %s9654_s3, 36864, %s60_s24, [#allocation9], %s9138_s1, %s9138_s1, %s9139_s10  }
  0x27   :  { %s9140_s15 = smov [#allocation11]   ;;  %s9141_s17 = smov [#allocation14]  }
  0x28   :  { %s81_s16 = sshll.u32 %s9140_s15, 4  ;;  %s103_s18 = sshll.u32 %s9141_s17, 4  ;;  %s82_s16 = int_to_ptr.vmem [resolvable:$true] %s81_s16  ;;  %s9234_s18 = int_to_ptr.vmem [resolvable:$true] %s103_s18 }
  0x29   :  { %s8946_s23 = scalar_lea.hbm %s9656_s5, 36864 }
  0x2a   :  { %p8947_p2 = scmp.ne.s32.totalorder %s9656_s5, %s8946_s23  ;;  %p8950_p3 = scmp.lt.u32.totalorder %s8946_s23, %s9656_s5 }
  0x2c   :  { %p8952_p4 = pnand %p8950_p3, %p8947_p2 }
  0x2e   :  { %8955 = shalt.err (!%p8952_p4)
}
  0x2f   :  { %s8956_s3 = scalar_lea.vmem %s82_s16, 36864  ;;  %p8961_p6 = scmp.lt.s32.totalorder %s82_s16, %s82_s16 }
  0x30   :  { %p8957_p5 = scmp.ne.s32.totalorder %s82_s16, %s8956_s3  ;;  %p8962_p7 = scmp.lt.s32.totalorder %s8956_s3, %s8956_s3 }
  0x32   :  { %p8963_p8 = por %p8962_p7, %p8961_p6 }
  0x34   :  { %p8964_p9 = pnand %p8963_p8, %p8957_p5 }
  0x36   :  { %8967 = shalt.err (!%p8964_p9)
}
  0x37   :  { %87 = dma.hbm_to_vmem [thread:$0]  %s9656_s5, 36864, %s82_s16, [#allocation12], %s9135_s19, %s9135_s19, %s9136_s20  }
  0x38   :  { %s8968_s12 = scalar_lea.hbm %s9658_s7, 3072 }
  0x39   :  { %p8969_p10 = scmp.ne.s32.totalorder %s9658_s7, %s8968_s12  ;;  %p8972_p11 = scmp.lt.u32.totalorder %s8968_s12, %s9658_s7 }
  0x3b   :  { %p8974_p12 = pnand %p8972_p11, %p8969_p10 }
  0x3d   :  { %8977 = shalt.err (!%p8974_p12)
}
  0x3e   :  { %s8978_s15 = scalar_lea.vmem %s9234_s18, 3072  ;;  %p8983_p0 = scmp.lt.s32.totalorder %s9234_s18, %s9234_s18 }
  0x3f   :  { %p8979_p13 = scmp.ne.s32.totalorder %s9234_s18, %s8978_s15  ;;  %p8984_p1 = scmp.lt.s32.totalorder %s8978_s15, %s8978_s15 }
  0x41   :  { %p8985_p2 = por %p8984_p1, %p8983_p0 }
  0x43   :  { %p8986_p3 = pnand %p8985_p2, %p8979_p13 }
  0x45   :  { %8989 = shalt.err (!%p8986_p3)
}
  0x46   :  { %s9142_s5 = smov 64   ;;  %s9143_s19 = smov 4  }
  0x47   :  { %109 = dma.hbm_to_vmem [thread:$0]  %s9658_s7, 3072, %s9234_s18, [#allocation15], %s9142_s5, %s9142_s5, %s9143_s19  }
  0x48   :  { %s9144_s17 = smov [#allocation2]   ;;  %s8990_s25 = scalar_lea.hbm %s9651_s0, 768 }
  0x49   :  { %s25_s21 = sshll.u32 %s9144_s17, 4  ;;  %p8991_p4 = scmp.ne.s32.totalorder %s9651_s0, %s8990_s25  ;;  %s26_s21 = int_to_ptr.vmem [resolvable:$true] %s25_s21 }
  0x4a   :  { %p8994_p5 = scmp.lt.u32.totalorder %s8990_s25, %s9651_s0 }
  0x4c   :  { %p8996_p6 = pnand %p8994_p5, %p8991_p4 }
  0x4e   :  { %8999 = shalt.err (!%p8996_p6)
}
  0x4f   :  { %s9000_s24 = scalar_lea.vmem %s26_s21, 768  ;;  %p9005_p8 = scmp.lt.s32.totalorder %s26_s21, %s26_s21 }
  0x50   :  { %p9001_p7 = scmp.ne.s32.totalorder %s26_s21, %s9000_s24  ;;  %p9006_p9 = scmp.lt.s32.totalorder %s9000_s24, %s9000_s24 }
  0x52   :  { %p9007_p10 = por %p9006_p9, %p9005_p8 }
  0x54   :  { %p9008_p11 = pnand %p9007_p10, %p9001_p7 }
  0x56   :  { %9011 = shalt.err (!%p9008_p11)
}
  0x57   :  { %s9145_s7 = smov 384   ;;  %s9146_s18 = smov 24  }
  0x58   :  { %31 = dma.hbm_to_vmem [thread:$0]  %s9651_s0, 768, %s26_s21, [#allocation3], %s9145_s7, %s9145_s7, %s9146_s18  }
  0x59   :  { %s9147_s11 = smov [#allocation7]   ;;  %s9148_s1 = smov [#allocation10]  }
  0x5a   :  { %s50_s12 = sshll.u32 %s9147_s11, 4  ;;  %s72_s10 = sshll.u32 %s9148_s1, 4  ;;  %s51_s12 = int_to_ptr.vmem [resolvable:$true] %s50_s12  ;;  %s73_s10 = int_to_ptr.vmem [resolvable:$true] %s72_s10 }
  0x5b   :  { %s9012_s15 = scalar_lea.hbm %s9653_s2, 48 }
  0x5c   :  { %p9013_p12 = scmp.ne.s32.totalorder %s9653_s2, %s9012_s15  ;;  %p9016_p13 = scmp.lt.u32.totalorder %s9012_s15, %s9653_s2 }
  0x5e   :  { %p9018_p0 = pnand %p9016_p13, %p9013_p12 }
  0x60   :  { %9021 = shalt.err (!%p9018_p0)
}
  0x61   :  { %s9022_s0 = scalar_lea.vmem %s51_s12, 48  ;;  %s9026_s17 = scalar_lea.vmem %s51_s12, 64 }
  0x62   :  { %p9023_p1 = scmp.ne.s32.totalorder %s51_s12, %s9022_s0  ;;  %p9027_p2 = scmp.lt.s32.totalorder %s51_s12, %s51_s12 }
  0x63   :  { %p9028_p3 = scmp.lt.s32.totalorder %s9026_s17, %s9022_s0 }
  0x65   :  { %p9029_p4 = por %p9028_p3, %p9027_p2 }
  0x67   :  { %p9030_p5 = pnand %p9029_p4, %p9023_p1 }
  0x69   :  { %9033 = shalt.err (!%p9030_p5)
}
  0x6a   :  { %53 = dma.hbm_to_vmem [thread:$0]  %s9653_s2, 48, %s51_s12, [#allocation6]  }
  0x6b   :  { %s9034_s26 = scalar_lea.hbm %s9655_s4, 192 }
  0x6c   :  { %p9035_p6 = scmp.ne.s32.totalorder %s9655_s4, %s9034_s26  ;;  %p9038_p7 = scmp.lt.u32.totalorder %s9034_s26, %s9655_s4 }
  0x6e   :  { %p9040_p8 = pnand %p9038_p7, %p9035_p6 }
  0x70   :  { %9043 = shalt.err (!%p9040_p8)
}
  0x71   :  { %s9044_s7 = scalar_lea.vmem %s73_s10, 192  ;;  %p9049_p10 = scmp.lt.s32.totalorder %s73_s10, %s73_s10 }
  0x72   :  { %p9045_p9 = scmp.ne.s32.totalorder %s73_s10, %s9044_s7  ;;  %p9050_p11 = scmp.lt.s32.totalorder %s9044_s7, %s9044_s7 }
  0x74   :  { %p9051_p12 = por %p9050_p11, %p9049_p10 }
  0x76   :  { %p9052_p13 = pnand %p9051_p12, %p9045_p9 }
  0x78   :  { %9055 = shalt.err (!%p9052_p13)
}
  0x79   :  { %75 = dma.hbm_to_vmem [thread:$0]  %s9655_s4, 192, %s73_s10, [#allocation9]  }
  0x7a   :  { %s9149_s29 = smov [#allocation13]   ;;  %s9150_s11 = smov [#allocation16]  }
  0x7b   :  { %s94_s30 = sshll.u32 %s9149_s29, 4  ;;  %s116_s12 = sshll.u32 %s9150_s11, 4  ;;  %s95_s30 = int_to_ptr.vmem [resolvable:$true] %s94_s30  ;;  %s117_s12 = int_to_ptr.vmem [resolvable:$true] %s116_s12 }
  0x7c   :  { %s9056_s14 = scalar_lea.hbm %s9657_s6, 48 }
  0x7d   :  { %p9057_p0 = scmp.ne.s32.totalorder %s9657_s6, %s9056_s14  ;;  %p9060_p1 = scmp.lt.u32.totalorder %s9056_s14, %s9657_s6 }
  0x7f   :  { %p9062_p2 = pnand %p9060_p1, %p9057_p0 }
  0x81   :  { %9065 = shalt.err (!%p9062_p2)
}
  0x82   :  { %s9066_s4 = scalar_lea.vmem %s95_s30, 48  ;;  %s9070_s10 = scalar_lea.vmem %s95_s30, 64 }
  0x83   :  { %p9067_p3 = scmp.ne.s32.totalorder %s95_s30, %s9066_s4  ;;  %p9071_p4 = scmp.lt.s32.totalorder %s95_s30, %s95_s30 }
  0x84   :  { %p9072_p5 = scmp.lt.s32.totalorder %s9070_s10, %s9066_s4 }
  0x86   :  { %p9073_p6 = por %p9072_p5, %p9071_p4 }
  0x88   :  { %p9074_p7 = pnand %p9073_p6, %p9067_p3 }
  0x8a   :  { %9077 = shalt.err (!%p9074_p7)
}
  0x8b   :  { %97 = dma.hbm_to_vmem [thread:$0]  %s9657_s6, 48, %s95_s30, [#allocation12]  }
  0x8c   :  { %s9078_s22 = scalar_lea.hbm %s9659_s8, 16 }
  0x8d   :  { %p9079_p8 = scmp.ne.s32.totalorder %s9659_s8, %s9078_s22  ;;  %p9082_p9 = scmp.lt.u32.totalorder %s9078_s22, %s9659_s8 }
  0x8f   :  { %p9084_p10 = pnand %p9082_p9, %p9079_p8 }
  0x91   :  { %9087 = shalt.err (!%p9084_p10)
}
  0x92   :  { %s9088_s28 = scalar_lea.vmem %s117_s12, 16  ;;  %s9092_s3 = scalar_lea.vmem %s117_s12, 32 }
  0x93   :  { %p9089_p11 = scmp.ne.s32.totalorder %s117_s12, %s9088_s28  ;;  %p9093_p12 = scmp.lt.s32.totalorder %s117_s12, %s117_s12 }
  0x94   :  { %p9094_p13 = scmp.lt.s32.totalorder %s9092_s3, %s9088_s28 }
  0x96   :  { %p9095_p0 = por %p9094_p13, %p9093_p12 }
  0x98   :  { %p9096_p1 = pnand %p9095_p0, %p9089_p11 }
  0x9a   :  { %9099 = shalt.err (!%p9096_p1)
}
  0x9b   :  { %119 = dma.hbm_to_vmem [thread:$0]  %s9659_s8, 16, %s117_s12, [#allocation15]  }
  0x9c   :  { %9122 = dma.done.wait [#allocation3], 768  }
  0x9d   :  { %9123 = vsyncadd [#allocation3], 4294966528 }
  0x9e   :  { %9124 = dma.done.wait [#allocation6], 18480  }
  0x9f   :  { %9125 = vsyncadd [#allocation6], 4294948816 }
  0xa0   :  { %9126 = dma.done.wait [#allocation9], 37056  }
  0xa1   :  { %9127 = vsyncadd [#allocation9], 4294930240 }
  0xa2   :  { %9128 = dma.done.wait [#allocation12], 36912  }
  0xa3   :  { %9129 = vsyncadd [#allocation12], 4294930384 }
  0xa4   :  { %9130 = dma.done.wait [#allocation15], 3088  }
  0xa5   :  { %9131 = vsyncadd [#allocation15], 4294964208  ;;  %v7813_v0 = vld [vmem:[#allocation5 + $0x4] ss:$12 sps:$4 sm:$0xff]   ;;  %v7815_v1 = vld [vmem:[#allocation5] ss:$12 sps:$4 sm:$0xff]  }
  0xa6   :  { %1161 = vmatprep.subr.bf16.mxu0 %v7813_v0  ;;  %v7816_v2 = vld [vmem:[#allocation5 + $0x1c] ss:$12 sps:$4 sm:$0xff]   ;;  %v7818_v3 = vld [vmem:[#allocation5 + $0x18] ss:$12 sps:$4 sm:$0xff]   ;;  %v7819_v4 = vld [vmem:[#allocation5 + $0x34] ss:$12 sps:$4 sm:$0xff]  }
  0xa7   :  { %1162 = vmatpush1.bf16.msra.mxu0 %v7815_v1  ;;  %v7821_v5 = vld [vmem:[#allocation5 + $0x30] ss:$12 sps:$4 sm:$0xff]   ;;  %v7822_v6 = vld [vmem:[#allocation5 + $0x4c] ss:$12 sps:$4 sm:$0xff]   ;;  %v7824_v7 = vld [vmem:[#allocation5 + $0x48] ss:$12 sps:$4 sm:$0xff]  }
  0xa8   :  { %1163 = vmatprep.subr.bf16.mxu0 %v7816_v2  ;;  %v7825_v8 = vld [vmem:[#allocation5 + $0x64] ss:$12 sps:$4 sm:$0xff]   ;;  %v7827_v9 = vld [vmem:[#allocation5 + $0x60] ss:$12 sps:$4 sm:$0xff]   ;;  %v7828_v10 = vld [vmem:[#allocation5 + $0x7c] ss:$12 sps:$4 sm:$0xff]  }
  0xa9   :  { %v7830_v11 = vld [vmem:[#allocation5 + $0x78] ss:$12 sps:$4 sm:$0xff]   ;;  %v7831_v12 = vld [vmem:[#allocation5 + $0x94] ss:$12 sps:$4 sm:$0xff]   ;;  %v7833_v14 = vld [vmem:[#allocation5 + $0x90] ss:$12 sps:$4 sm:$0xff]  }
  0xaa   :  { %v7863_v13 = vld [vmem:[#allocation2 + $0x4] ss:$24 sps:$4 sm:$0xff]   ;;  %v7837_v19 = vld [vmem:[#allocation5 + $0xc4] ss:$12 sps:$4 sm:$0xff]   ;;  %v7840_v23 = vld [vmem:[#allocation5 + $0xdc] ss:$12 sps:$4 sm:$0xff]  }
  0xab   :  { %1164 = vmatpush1.bf16.msra.mxu0 %v7818_v3  ;;  %v7834_v15 = vld [vmem:[#allocation5 + $0xac] ss:$12 sps:$4 sm:$0xff]   ;;  %1193 = vmatprep.mubr.bf16.mxu0 %v7863_v13  ;;  %v7867_v16 = vld [vmem:[#allocation5 + $0xc8] ss:$12 sps:$4 sm:$0xff]   ;;  %v7882_v27 = vld [vmem:[#allocation5 + $0x110] ss:$12 sps:$4 sm:$0xff]  }
  0xac   :  { %1165 = vmatprep.subr.bf16.mxu0 %v7819_v4  ;;  %v7868_v17 = vld [vmem:[#allocation5 + $0x8] ss:$12 sps:$4 sm:$0xff]   ;;  %1322 = vmatprep.mubr.bf16.mxu1 %v7863_v13  ;;  %v7872_v20 = vld [vmem:[#allocation5 + $0xe0] ss:$12 sps:$4 sm:$0xff]   ;;  %v7877_v24 = vld [vmem:[#allocation5 + $0xf8] ss:$12 sps:$4 sm:$0xff]  }
  0xad   :  { %v7836_v18 = vld [vmem:[#allocation5 + $0xa8] ss:$12 sps:$4 sm:$0xff]   ;;  %7457 = vmatprep.subr.bf16.mxu1 %v7867_v16  ;;  %v7873_v21 = vld [vmem:[#allocation5 + $0x20] ss:$12 sps:$4 sm:$0xff]   ;;  %v7878_v25 = vld [vmem:[#allocation5 + $0x38] ss:$12 sps:$4 sm:$0xff]  }
  0xae   :  { %7458 = vmatpush3.bf16.msra.mxu1 %v7868_v17  ;;  %v7839_v22 = vld [vmem:[#allocation5 + $0xc0] ss:$12 sps:$4 sm:$0xff]   ;;  %v7842_v26 = vld [vmem:[#allocation5 + $0xd8] ss:$12 sps:$4 sm:$0xff]   ;;  %v7883_v28 = vld [vmem:[#allocation5 + $0x50] ss:$12 sps:$4 sm:$0xff]  }
  0xaf   :  { %1166 = vmatpush1.bf16.msra.mxu0 %v7821_v5  ;;  %7459 = vmatprep.subr.bf16.mxu1 %v7872_v20  ;;  %v7843_v29 = vld [vmem:[#allocation5 + $0xf4] ss:$12 sps:$4 sm:$0xff]   ;;  %v7845_v30 = vld [vmem:[#allocation5 + $0xf0] ss:$12 sps:$4 sm:$0xff]   ;;  %v7846_v33 = vld [vmem:[#allocation5 + $0x10c] ss:$12 sps:$4 sm:$0xff]  }
  0xb0   :  { %1167 = vmatprep.subr.bf16.mxu0 %v7822_v6  ;;  %v7887_v31 = vld [vmem:[#allocation5 + $0x128] ss:$12 sps:$4 sm:$0xff]   ;;  %v7892_v34 = vld [vmem:[#allocation5 + $0x140] ss:$12 sps:$4 sm:$0xff]   ;;  %v7849_v36 = vld [vmem:[#allocation5 + $0x124] ss:$12 sps:$4 sm:$0xff]  }
  0xb1   :  { %v7888_v32 = vld [vmem:[#allocation5 + $0x68] ss:$12 sps:$4 sm:$0xff]   ;;  %v7893_v37 = vld [vmem:[#allocation5 + $0x80] ss:$12 sps:$4 sm:$0xff]   ;;  %v7897_v38 = vld [vmem:[#allocation5 + $0x158] ss:$12 sps:$4 sm:$0xff]  }
  0xb2   :  { %7460 = vmatpush3.bf16.msra.mxu1 %v7873_v21  ;;  %v7848_v35 = vld [vmem:[#allocation5 + $0x108] ss:$12 sps:$4 sm:$0xff]   ;;  %v7851_v39 = vld [vmem:[#allocation5 + $0x120] ss:$12 sps:$4 sm:$0xff]   ;;  %v7898_v41 = vld [vmem:[#allocation5 + $0x98] ss:$12 sps:$4 sm:$0xff]  }
  0xb3   :  { %1168 = vmatpush1.bf16.msra.mxu0 %v7824_v7  ;;  %7461 = vmatprep.subr.bf16.mxu1 %v7877_v24  ;;  %v7852_v40 = vld [vmem:[#allocation5 + $0x13c] ss:$12 sps:$4 sm:$0xff]   ;;  %v7854_v43 = vld [vmem:[#allocation5 + $0x138] ss:$12 sps:$4 sm:$0xff]   ;;  %v7855_v44 = vld [vmem:[#allocation5 + $0x154] ss:$12 sps:$4 sm:$0xff]  }
  0xb4   :  { %1169 = vmatprep.subr.bf16.mxu0 %v7825_v8  ;;  %v7902_v42 = vld [vmem:[#allocation5 + $0x170] ss:$12 sps:$4 sm:$0xff]   ;;  %v7907_v46 = vld [vmem:[#allocation5 + $0x248] ss:$12 sps:$4 sm:$0xff]   ;;  %v7858_v48 = vld [vmem:[#allocation5 + $0x16c] ss:$12 sps:$4 sm:$0xff]  }
  0xb5   :  { %v7903_v45 = vld [vmem:[#allocation5 + $0xb0] ss:$12 sps:$4 sm:$0xff]   ;;  %v7908_v50 = vld [vmem:[#allocation5 + $0x188] ss:$12 sps:$4 sm:$0xff]   ;;  %v7912_v51 = vld [vmem:[#allocation5 + $0x260] ss:$12 sps:$4 sm:$0xff]  }
  0xb6   :  { %7462 = vmatpush3.bf16.msra.mxu1 %v7878_v25  ;;  %v7857_v47 = vld [vmem:[#allocation5 + $0x150] ss:$12 sps:$4 sm:$0xff]   ;;  %v7860_v52 = vld [vmem:[#allocation5 + $0x168] ss:$12 sps:$4 sm:$0xff]   ;;  %v7913_v53 = vld [vmem:[#allocation5 + $0x1a0] ss:$12 sps:$4 sm:$0xff]  }
  0xb7   :  { %1170 = vmatpush1.bf16.msra.mxu0 %v7827_v9  ;;  %7463 = vmatprep.subr.bf16.mxu1 %v7882_v27  ;;  %v7861_v49 = vld [vmem:[#allocation2] ss:$24 sps:$4 sm:$0xff]   ;;  %v7917_v55 = vld [vmem:[#allocation5 + $0x278] ss:$12 sps:$4 sm:$0xff]   ;;  %v7864_v56 = vld [vmem:[#allocation5 + $0x180] ss:$12 sps:$4 sm:$0xff]  }
  0xb8   :  { %1171 = vmatprep.subr.bf16.mxu0 %v7828_v10  ;;  %v7866_v54 = vld [vmem:[#allocation5 + $0x184] ss:$12 sps:$4 sm:$0xff]   ;;  %v7871_v57 = vld [vmem:[#allocation5 + $0x19c] ss:$12 sps:$4 sm:$0xff]   ;;  %v7876_v61 = vld [vmem:[#allocation5 + $0x1b4] ss:$12 sps:$4 sm:$0xff]  }
  0xb9   :  { %v7918_v58 = vld [vmem:[#allocation5 + $0x1b8] ss:$12 sps:$4 sm:$0xff]   ;;  %v7922_v59 = vld [vmem:[#allocation5 + $0x290] ss:$12 sps:$4 sm:$0xff]   ;;  %v7927_v63 = vld [vmem:[#allocation5 + $0x2a8] ss:$12 sps:$4 sm:$0xff]  }
  0xba   :  { %7464 = vmatpush3.bf16.msra.mxu1 %v7883_v28  ;;  %v7869_v60 = vld [vmem:[#allocation5 + $0x198] ss:$12 sps:$4 sm:$0xff]   ;;  %v7923_v62 = vld [vmem:[#allocation5 + $0x1d0] ss:$12 sps:$4 sm:$0xff]   ;;  %v7928_v2 = vld [vmem:[#allocation5 + $0x1e8] ss:$12 sps:$4 sm:$0xff]  }
  0xbb   :  { %1172 = vmatpush1.bf16.msra.mxu0 %v7830_v11  ;;  %7465 = vmatprep.subr.bf16.mxu1 %v7887_v31  ;;  %v7874_v0 = vld [vmem:[#allocation5 + $0x1b0] ss:$12 sps:$4 sm:$0xff]   ;;  %v7881_v1 = vld [vmem:[#allocation5 + $0x1cc] ss:$12 sps:$4 sm:$0xff]   ;;  %v7879_v4 = vld [vmem:[#allocation5 + $0x1c8] ss:$12 sps:$4 sm:$0xff]  }
  0xbc   :  { %1173 = vmatprep.subr.bf16.mxu0 %v7831_v12  ;;  %v7932_v3 = vld [vmem:[#allocation5 + $0x2c0] ss:$12 sps:$4 sm:$0xff]   ;;  %v7886_v5 = vld [vmem:[#allocation5 + $0x1e4] ss:$12 sps:$4 sm:$0xff]   ;;  %v7946_v8 = vld [vmem:[#allocation2 + $0xc] ss:$24 sps:$4 sm:$0xff]  }
  0xbd   :  { %v7933_v6 = vld [vmem:[#allocation5 + $0x200] ss:$12 sps:$4 sm:$0xff]   ;;  %v7937_v7 = vld [vmem:[#allocation5 + $0x2d8] ss:$12 sps:$4 sm:$0xff]   ;;  %v7891_v10 = vld [vmem:[#allocation5 + $0x1fc] ss:$12 sps:$4 sm:$0xff]  }
  0xbe   :  { %7466 = vmatpush3.bf16.msra.mxu1 %v7888_v32  ;;  %v7884_v9 = vld [vmem:[#allocation5 + $0x1e0] ss:$12 sps:$4 sm:$0xff]   ;;  %v7938_v11 = vld [vmem:[#allocation5 + $0x218] ss:$12 sps:$4 sm:$0xff]   ;;  %v7942_v12 = vld [vmem:[#allocation5 + $0x2f0] ss:$12 sps:$4 sm:$0xff]  }
  0xbf   :  { %1174 = vmatpush1.bf16.msra.mxu0 %v7833_v14  ;;  %7467 = vmatprep.subr.bf16.mxu1 %v7892_v34  ;;  %v7889_v13 = vld [vmem:[#allocation5 + $0x1f8] ss:$12 sps:$4 sm:$0xff]   ;;  %v7896_v14 = vld [vmem:[#allocation5 + $0x214] ss:$12 sps:$4 sm:$0xff]   ;;  %v7894_v17 = vld [vmem:[#allocation5 + $0x210] ss:$12 sps:$4 sm:$0xff]  }
  0xc0   :  { %1175 = vmatprep.subr.bf16.mxu0 %v7834_v15  ;;  %v7943_v15 = vld [vmem:[#allocation5 + $0x230] ss:$12 sps:$4 sm:$0xff]   ;;  %v7950_v16 = vld [vmem:[#allocation5 + $0x3c8] ss:$12 sps:$4 sm:$0xff]   ;;  %v7901_v20 = vld [vmem:[#allocation5 + $0x22c] ss:$12 sps:$4 sm:$0xff]  }
  0xc1   :  { %v7955_v21 = vld [vmem:[#allocation5 + $0x3e0] ss:$12 sps:$4 sm:$0xff]   ;;  %v7960_v25 = vld [vmem:[#allocation5 + $0x3f8] ss:$12 sps:$4 sm:$0xff]   ;;  %v7911_v27 = vld [vmem:[#allocation5 + $0x25c] ss:$12 sps:$4 sm:$0xff]  }
  0xc2   :  { %7468 = vmatpush3.bf16.msra.mxu1 %v7893_v37  ;;  %v7956_v24 = vld [vmem:[#allocation5 + $0x320] ss:$12 sps:$4 sm:$0xff]   ;;  %v7961_v28 = vld [vmem:[#allocation5 + $0x338] ss:$12 sps:$4 sm:$0xff]   ;;  %v7966_v32 = vld [vmem:[#allocation5 + $0x350] ss:$12 sps:$4 sm:$0xff]  }
  0xc3   :  { %1176 = vmatpush1.bf16.msra.mxu0 %v7836_v18  ;;  %7469 = vmatprep.subr.bf16.mxu1 %v7897_v38  ;;  %v9328_v18 = vld [vmem:[#allocation2 + $0x8] ss:$24 sps:$4 sm:$0xff]   ;;  %v7916_v31 = vld [vmem:[#allocation5 + $0x274] ss:$12 sps:$4 sm:$0xff]   ;;  %vm9153_vm0 = vmmov 0   ;;  %s9154_s8 = smov [#allocation17]  }
  0xc4   :  { %1177 = vmatprep.subr.bf16.mxu0 %v7837_v19  ;;  %v7951_v19 = vld [vmem:[#allocation5 + $0x308] ss:$12 sps:$4 sm:$0xff]   ;;  %v7914_v34 = vld [vmem:[#allocation5 + $0x270] ss:$12 sps:$4 sm:$0xff]   ;;  %v7975_v37 = vld [vmem:[#allocation5 + $0x440] ss:$12 sps:$4 sm:$0xff]  }
  0xc5   :  { %v7919_v38 = vld [vmem:[#allocation5 + $0x288] ss:$12 sps:$4 sm:$0xff]   ;;  %s6690_s7 = sshll.u32 %s9154_s8, 4  ;;  %s6691_s7 = int_to_ptr.vmem [resolvable:$true] %s6690_s7 }
  0xc6   :  { %7470 = vmatpush3.bf16.msra.mxu1 %v7898_v41  ;;  %v7976_v41 = vld [vmem:[#allocation5 + $0x380] ss:$12 sps:$4 sm:$0xff]   ;;  %s9100_s2 = scalar_lea.vmem %s6691_s7, 256  ;;  %p9105_p3 = scmp.lt.s32.totalorder %s6691_s7, %s6691_s7 }
  0xc7   :  { %1178 = vmatpush1.bf16.msra.mxu0 %v7839_v22  ;;  %7471 = vmatprep.subr.bf16.mxu1 %v7902_v42  ;;  %v7899_v22 = vld [vmem:[#allocation5 + $0x228] ss:$12 sps:$4 sm:$0xff]   ;;  %v7980_v42 = vld [vmem:[#allocation5 + $0x458] ss:$12 sps:$4 sm:$0xff]   ;;  %p9101_p2 = scmp.ne.s32.totalorder %s6691_s7, %s9100_s2  ;;  %p9106_p4 = scmp.lt.s32.totalorder %s9100_s2, %s9100_s2 }
  0xc8   :  { %1179 = vmatprep.subr.bf16.mxu0 %v7840_v23  ;;  %v7906_v23 = vld [vmem:[#allocation5 + $0x244] ss:$12 sps:$4 sm:$0xff]  }
  0xc9   :  { %p9107_p5 = por %p9106_p4, %p9105_p3 }
  0xca   :  { %7472 = vmatpush3.bf16.msra.mxu1 %v7903_v45  ;;  %v7981_v45 = vld [vmem:[#allocation5 + $0x398] ss:$12 sps:$4 sm:$0xff]  }
  0xcb   :  { %1180 = vmatpush1.bf16.msra.mxu0 %v7842_v26  ;;  %7479 = vmatprep.subr.bf16.mxu1 %v7907_v46  ;;  %v7904_v26 = vld [vmem:[#allocation5 + $0x240] ss:$12 sps:$4 sm:$0xff]   ;;  %v7985_v46 = vld [vmem:[#allocation5 + $0x470] ss:$12 sps:$4 sm:$0xff]   ;;  %p9108_p6 = pnand %p9107_p5, %p9101_p2 }
  0xcc   :  { %1181 = vmatprep.subr.bf16.mxu0 %v7843_v29  ;;  %v7965_v29 = vld [vmem:[#allocation5 + $0x410] ss:$12 sps:$4 sm:$0xff]  }
  0xcd   :  { %1323 = vmatmul.mubr.bf16.vlgmr.msra.gmra.mrb[0].mxu1 %v7861_v49 }
  0xce   :  { %7480 = vmatpush3.bf16.msra.mxu1 %v7908_v50  ;;  %1363 = vmatprep.mubr.bf16.mxu1 %v7946_v8  ;;  %v8016_v50 = vld [vmem:[#allocation8 + $0x4] ss:$48 sps:$4 sm:$0xff]  }
  0xcf   :  { %1182 = vmatpush1.bf16.msra.mxu0 %v7845_v30  ;;  %7481 = vmatprep.subr.bf16.mxu1 %v7912_v51  ;;  %v7909_v30 = vld [vmem:[#allocation5 + $0x258] ss:$12 sps:$4 sm:$0xff]   ;;  %v7934_v51 = vld [vmem:[#allocation5 + $0x2d0] ss:$12 sps:$4 sm:$0xff]  }
  0xd0   :  { %1183 = vmatprep.subr.bf16.mxu0 %v7846_v33  ;;  %v7970_v33 = vld [vmem:[#allocation5 + $0x428] ss:$12 sps:$4 sm:$0xff]  }
  0xd2   :  { %7482 = vmatpush3.bf16.msra.mxu1 %v7913_v53  ;;  %v7941_v53 = vld [vmem:[#allocation5 + $0x2ec] ss:$12 sps:$4 sm:$0xff]  }
  0xd3   :  { %1184 = vmatpush1.bf16.msra.mxu0 %v7848_v35  ;;  %7483 = vmatprep.subr.bf16.mxu1 %v7917_v55  ;;  %v7921_v35 = vld [vmem:[#allocation5 + $0x28c] ss:$12 sps:$4 sm:$0xff]  }
  0xd4   :  { %1185 = vmatprep.subr.bf16.mxu0 %v7849_v36  ;;  %v7971_v36 = vld [vmem:[#allocation5 + $0x368] ss:$12 sps:$4 sm:$0xff]  }
  0xd5   :  { %v8022_v55 = vld [vmem:[#allocation8 + $0x64] ss:$48 sps:$4 sm:$0xff]  }
  0xd6   :  { %7484 = vmatpush3.bf16.msra.mxu1 %v7918_v58  ;;  %v8020_v58 = vld [vmem:[#allocation8 + $0x60] ss:$48 sps:$4 sm:$0xff]  }
  0xd7   :  { %1186 = vmatpush1.bf16.msra.mxu0 %v7851_v39  ;;  %7485 = vmatprep.subr.bf16.mxu1 %v7922_v59  ;;  %v7992_v39 = vld [vmem:[#allocation2 + $0x14] ss:$24 sps:$4 sm:$0xff]   ;;  %v8028_v59 = vld [vmem:[#allocation8 + $0xc4] ss:$48 sps:$4 sm:$0xff]  }
  0xd8   :  { %1187 = vmatprep.subr.bf16.mxu0 %v7852_v40  ;;  %v7926_v40 = vld [vmem:[#allocation5 + $0x2a4] ss:$12 sps:$4 sm:$0xff]  }
  0xda   :  { %7486 = vmatpush3.bf16.msra.mxu1 %v7923_v62  ;;  %v8026_v62 = vld [vmem:[#allocation8 + $0xc0] ss:$48 sps:$4 sm:$0xff]  }
  0xdb   :  { %1188 = vmatpush1.bf16.msra.mxu0 %v7854_v43  ;;  %7487 = vmatprep.subr.bf16.mxu1 %v7927_v63  ;;  %v7924_v43 = vld [vmem:[#allocation5 + $0x2a0] ss:$12 sps:$4 sm:$0xff]   ;;  %v7952_v63 = vld [vmem:[#allocation5 + $0x318] ss:$12 sps:$4 sm:$0xff]  }
  0xdc   :  { %1189 = vmatprep.subr.bf16.mxu0 %v7855_v44  ;;  %v7931_v44 = vld [vmem:[#allocation5 + $0x2bc] ss:$12 sps:$4 sm:$0xff]  }
  0xde   :  { %7488 = vmatpush3.bf16.msra.mxu1 %v7928_v2  ;;  %v8032_v2 = vld [vmem:[#allocation8 + $0x120] ss:$48 sps:$4 sm:$0xff]  }
  0xdf   :  { %1190 = vmatpush1.bf16.msra.mxu0 %v7857_v47  ;;  %7489 = vmatprep.subr.bf16.mxu1 %v7932_v3  ;;  %v7929_v47 = vld [vmem:[#allocation5 + $0x2b8] ss:$12 sps:$4 sm:$0xff]  }
  0xe0   :  { %1191 = vmatprep.subr.bf16.mxu0 %v7858_v48  ;;  %v7986_v48 = vld [vmem:[#allocation5 + $0x3b0] ss:$12 sps:$4 sm:$0xff]   ;;  %v8040_v3 = vld [vmem:[#allocation8 + $0x184] ss:$48 sps:$4 sm:$0xff]  }
  0xe2   :  { %7490 = vmatpush3.bf16.msra.mxu1 %v7933_v6  ;;  %v8038_v6 = vld [vmem:[#allocation8 + $0x180] ss:$48 sps:$4 sm:$0xff]  }
  0xe3   :  { %1192 = vmatpush1.bf16.msra.mxu0 %v7860_v52  ;;  %7491 = vmatprep.subr.bf16.mxu1 %v7937_v7  ;;  %v9331_v52 = vld [vmem:[#allocation2 + $0x10] ss:$24 sps:$4 sm:$0xff]   ;;  %v7962_v7 = vld [vmem:[#allocation5 + $0x348] ss:$12 sps:$4 sm:$0xff]  }
  0xe4   :  { %1204 = vmatprep.subr.bf16.mxu0 %v7866_v54  ;;  %v8014_v54 = vld [vmem:[#allocation8] ss:$48 sps:$4 sm:$0xff]  }
  0xe6   :  { %1194 = vmatmul.mubr.bf16.vlgmr.msra.gmra.mrb[0].mxu0 %v7861_v49  ;;  %7492 = vmatpush3.bf16.msra.mxu1 %v7938_v11  ;;  %v7936_v49 = vld [vmem:[#allocation5 + $0x2d4] ss:$12 sps:$4 sm:$0xff]   ;;  %v7972_v11 = vld [vmem:[#allocation5 + $0x378] ss:$12 sps:$4 sm:$0xff]  }
  0xe7   :  { %1205 = vmatpush1.bf16.msra.mxu0 %v7864_v56  ;;  %1236 = vmatprep.mubr.bf16.mxu0 %v7946_v8  ;;  %v7939_v56 = vld [vmem:[#allocation5 + $0x2e8] ss:$12 sps:$4 sm:$0xff]   ;;  %v7969_v8 = vld [vmem:[#allocation5 + $0x364] ss:$12 sps:$4 sm:$0xff]  }
  0xe8   :  { %1206 = vmatprep.subr.bf16.mxu0 %v7871_v57  ;;  %7493 = vmatprep.subr.bf16.mxu1 %v7942_v12  ;;  %v7949_v57 = vld [vmem:[#allocation5 + $0x304] ss:$12 sps:$4 sm:$0xff]  }
  0xe9   :  { %v8044_v12 = vld [vmem:[#allocation8 + $0x1e0] ss:$48 sps:$4 sm:$0xff]  }
  0xea   :  { %7494 = vmatpush3.bf16.msra.mxu1 %v7943_v15  ;;  %v7977_v15 = vld [vmem:[#allocation5 + $0x390] ss:$12 sps:$4 sm:$0xff]  }
  0xeb   :  { %1207 = vmatpush1.bf16.msra.mxu0 %v7869_v60  ;;  %7501 = vmatprep.subr.bf16.mxu1 %v7950_v16  ;;  %v7947_v60 = vld [vmem:[#allocation5 + $0x300] ss:$12 sps:$4 sm:$0xff]  }
  0xec   :  { %1208 = vmatprep.subr.bf16.mxu0 %v7876_v61  ;;  %v7954_v61 = vld [vmem:[#allocation5 + $0x31c] ss:$12 sps:$4 sm:$0xff]   ;;  %v7984_v16 = vld [vmem:[#allocation5 + $0x3ac] ss:$12 sps:$4 sm:$0xff]  }
  0xed   :  { %1364 = vmatmul.mubr.bf16.vlgmr.msra.gmra.mrb[4].mxu1 %v9328_v18 }
  0xee   :  { %7502 = vmatpush3.bf16.msra.mxu1 %v7951_v19  ;;  %1404 = vmatprep.mubr.bf16.mxu1 %v7992_v39  ;;  %v7987_v19 = vld [vmem:[#allocation5 + $0x3c0] ss:$12 sps:$4 sm:$0xff]  }
  0xef   :  { %1209 = vmatpush1.bf16.msra.mxu0 %v7874_v0  ;;  %7503 = vmatprep.subr.bf16.mxu1 %v7955_v21  ;;  %v8034_v0 = vld [vmem:[#allocation8 + $0x124] ss:$48 sps:$4 sm:$0xff]  }
  0xf0   :  { %1210 = vmatprep.subr.bf16.mxu0 %v7881_v1  ;;  %v7959_v1 = vld [vmem:[#allocation5 + $0x334] ss:$12 sps:$4 sm:$0xff]   ;;  %v7993_v21 = vld [vmem:[#allocation5 + $0x3d8] ss:$12 sps:$4 sm:$0xff]  }
  0xf2   :  { %7504 = vmatpush3.bf16.msra.mxu1 %v7956_v24  ;;  %v8001_v24 = vld [vmem:[#allocation5 + $0x40c] ss:$12 sps:$4 sm:$0xff]  }
  0xf3   :  { %1211 = vmatpush1.bf16.msra.mxu0 %v7879_v4  ;;  %7505 = vmatprep.subr.bf16.mxu1 %v7960_v25  ;;  %v7957_v4 = vld [vmem:[#allocation5 + $0x330] ss:$12 sps:$4 sm:$0xff]   ;;  %v7999_v25 = vld [vmem:[#allocation5 + $0x408] ss:$12 sps:$4 sm:$0xff]  }
  0xf4   :  { %1212 = vmatprep.subr.bf16.mxu0 %v7886_v5  ;;  %v7964_v5 = vld [vmem:[#allocation5 + $0x34c] ss:$12 sps:$4 sm:$0xff]  }
  0xf6   :  { %7506 = vmatpush3.bf16.msra.mxu1 %v7961_v28  ;;  %v8007_v28 = vld [vmem:[#allocation5 + $0x43c] ss:$12 sps:$4 sm:$0xff]  }
  0xf7   :  { %1213 = vmatpush1.bf16.msra.mxu0 %v7884_v9  ;;  %7507 = vmatprep.subr.bf16.mxu1 %v7965_v29  ;;  %v7967_v9 = vld [vmem:[#allocation5 + $0x360] ss:$12 sps:$4 sm:$0xff]   ;;  %v8005_v29 = vld [vmem:[#allocation5 + $0x438] ss:$12 sps:$4 sm:$0xff]  }
  0xf8   :  { %1214 = vmatprep.subr.bf16.mxu0 %v7891_v10  ;;  %v7974_v10 = vld [vmem:[#allocation5 + $0x37c] ss:$12 sps:$4 sm:$0xff]  }
  0xfa   :  { %7508 = vmatpush3.bf16.msra.mxu1 %v7966_v32  ;;  %v8010_v32 = vld [vmem:[#allocation5 + $0x454] ss:$12 sps:$4 sm:$0xff]  }
  0xfb   :  { %1215 = vmatpush1.bf16.msra.mxu0 %v7889_v13  ;;  %7509 = vmatprep.subr.bf16.mxu1 %v7970_v33  ;;  %v8046_v13 = vld [vmem:[#allocation8 + $0x1e4] ss:$48 sps:$4 sm:$0xff]   ;;  %v8008_v33 = vld [vmem:[#allocation5 + $0x450] ss:$12 sps:$4 sm:$0xff]  }
  0xfc   :  { %1216 = vmatprep.subr.bf16.mxu0 %v7896_v14  ;;  %v7979_v14 = vld [vmem:[#allocation5 + $0x394] ss:$12 sps:$4 sm:$0xff]  }
  0xfe   :  { %7510 = vmatpush3.bf16.msra.mxu1 %v7971_v36  ;;  %v8019_v36 = vld [vmem:[#allocation8 + $0xc] ss:$48 sps:$4 sm:$0xff]  }
  0xff   :  { %1217 = vmatpush1.bf16.msra.mxu0 %v7894_v17  ;;  %7511 = vmatprep.subr.bf16.mxu1 %v7975_v37  ;;  %v7982_v17 = vld [vmem:[#allocation5 + $0x3a8] ss:$12 sps:$4 sm:$0xff]   ;;  %v8017_v37 = vld [vmem:[#allocation8 + $0x8] ss:$48 sps:$4 sm:$0xff]  }
 0x100   :  { %1218 = vmatprep.subr.bf16.mxu0 %v7901_v20  ;;  %v7995_v20 = vld [vmem:[#allocation5 + $0x3dc] ss:$12 sps:$4 sm:$0xff]  }
 0x102   :  { %7512 = vmatpush3.bf16.msra.mxu1 %v7976_v41  ;;  %v8029_v41 = vld [vmem:[#allocation8 + $0xc8] ss:$48 sps:$4 sm:$0xff]  }
 0x103   :  { %1219 = vmatpush1.bf16.msra.mxu0 %v7899_v22  ;;  %7513 = vmatprep.subr.bf16.mxu1 %v7980_v42  ;;  %v7998_v22 = vld [vmem:[#allocation5 + $0x3f4] ss:$12 sps:$4 sm:$0xff]  }
 0x104   :  { %1220 = vmatprep.subr.bf16.mxu0 %v7906_v23  ;;  %v7996_v23 = vld [vmem:[#allocation5 + $0x3f0] ss:$12 sps:$4 sm:$0xff]  }
 0x105   :  { %v8037_v42 = vld [vmem:[#allocation8 + $0x12c] ss:$48 sps:$4 sm:$0xff]  }
 0x106   :  { %7514 = vmatpush3.bf16.msra.mxu1 %v7981_v45  ;;  %v8041_v45 = vld [vmem:[#allocation8 + $0x188] ss:$48 sps:$4 sm:$0xff]  }
 0x107   :  { %1221 = vmatpush1.bf16.msra.mxu0 %v7904_v26  ;;  %7515 = vmatprep.subr.bf16.mxu1 %v7985_v46  ;;  %v8004_v26 = vld [vmem:[#allocation5 + $0x424] ss:$12 sps:$4 sm:$0xff]  }
 0x108   :  { %1222 = vmatprep.subr.bf16.mxu0 %v7911_v27  ;;  %v8002_v27 = vld [vmem:[#allocation5 + $0x420] ss:$12 sps:$4 sm:$0xff]  }
 0x109   :  { %v8049_v46 = vld [vmem:[#allocation8 + $0x1ec] ss:$48 sps:$4 sm:$0xff]  }
 0x10a   :  { %7516 = vmatpush3.bf16.msra.mxu1 %v7986_v48  ;;  %v8055_v48 = vld [vmem:[#allocation8 + $0x24c] ss:$48 sps:$4 sm:$0xff]  }
 0x10b   :  { %1223 = vmatpush1.bf16.msra.mxu0 %v7909_v30  ;;  %3208 = vmatprep.subr.bf16.mxu1 %v8016_v50  ;;  %v8050_v30 = vld [vmem:[#allocation8 + $0x240] ss:$48 sps:$4 sm:$0xff]   ;;  %v8058_v50 = vld [vmem:[#allocation8 + $0x2a4] ss:$48 sps:$4 sm:$0xff]  }
 0x10c   :  { %1224 = vmatprep.subr.bf16.mxu0 %v7916_v31  ;;  %v8052_v31 = vld [vmem:[#allocation8 + $0x244] ss:$48 sps:$4 sm:$0xff]  }
 0x10d   :  { %1405 = vmatmul.mubr.bf16.vlgmr.msra.gmra.mrb[8].mxu1 %v9331_v52 }
 0x10e   :  { %3209 = vmatpush1.bf16.msra.mxu1 %v8014_v54  ;;  %v8062_v54 = vld [vmem:[#allocation8 + $0x300] ss:$48 sps:$4 sm:$0xff]  }
 0x10f   :  { %1225 = vmatpush1.bf16.msra.mxu0 %v7914_v34  ;;  %3210 = vmatprep.subr.bf16.mxu1 %v8022_v55  ;;  %v8013_v34 = vld [vmem:[#allocation5 + $0x46c] ss:$12 sps:$4 sm:$0xff]  }
 0x110   :  { %1226 = vmatprep.subr.bf16.mxu0 %v7921_v35  ;;  %v8011_v35 = vld [vmem:[#allocation5 + $0x468] ss:$12 sps:$4 sm:$0xff]  }
 0x111   :  { %v8070_v55 = vld [vmem:[#allocation8 + $0x364] ss:$48 sps:$4 sm:$0xff]  }
 0x112   :  { %3211 = vmatpush1.bf16.msra.mxu1 %v8020_v58  ;;  %v8068_v58 = vld [vmem:[#allocation8 + $0x360] ss:$48 sps:$4 sm:$0xff]  }
 0x113   :  { %1227 = vmatpush1.bf16.msra.mxu0 %v7919_v38  ;;  %3212 = vmatprep.subr.bf16.mxu1 %v8028_v59  ;;  %v8025_v38 = vld [vmem:[#allocation8 + $0x6c] ss:$48 sps:$4 sm:$0xff]   ;;  %v8065_v59 = vld [vmem:[#allocation8 + $0x308] ss:$48 sps:$4 sm:$0xff]  }
 0x114   :  { %1228 = vmatprep.subr.bf16.mxu0 %v7926_v40  ;;  %v8031_v40 = vld [vmem:[#allocation8 + $0xcc] ss:$48 sps:$4 sm:$0xff]  }
 0x116   :  { %3213 = vmatpush1.bf16.msra.mxu1 %v8026_v62  ;;  %v8074_v62 = vld [vmem:[#allocation8 + $0x3c0] ss:$48 sps:$4 sm:$0xff]  }
 0x117   :  { %1229 = vmatpush1.bf16.msra.mxu0 %v7924_v43  ;;  %3214 = vmatprep.subr.bf16.mxu1 %v8034_v0  ;;  %v8035_v43 = vld [vmem:[#allocation8 + $0x128] ss:$48 sps:$4 sm:$0xff]  }
 0x118   :  { %1230 = vmatprep.subr.bf16.mxu0 %v7931_v44  ;;  %v8043_v44 = vld [vmem:[#allocation8 + $0x18c] ss:$48 sps:$4 sm:$0xff]   ;;  %v8071_v0 = vld [vmem:[#allocation8 + $0x368] ss:$48 sps:$4 sm:$0xff]  }
 0x11a   :  { %3215 = vmatpush1.bf16.msra.mxu1 %v8032_v2  ;;  %v8080_v2 = vld [vmem:[#allocation8 + $0x420] ss:$48 sps:$4 sm:$0xff]  }
 0x11b   :  { %1231 = vmatpush1.bf16.msra.mxu0 %v7929_v47  ;;  %3216 = vmatprep.subr.bf16.mxu1 %v8040_v3  ;;  %v8047_v47 = vld [vmem:[#allocation8 + $0x1e8] ss:$48 sps:$4 sm:$0xff]   ;;  %v8088_v3 = vld [vmem:[#allocation8 + $0x484] ss:$48 sps:$4 sm:$0xff]  }
 0x11c   :  { %1232 = vmatprep.subr.bf16.mxu0 %v7936_v49  ;;  %v8056_v49 = vld [vmem:[#allocation8 + $0x2a0] ss:$48 sps:$4 sm:$0xff]  }
 0x11e   :  { %3217 = vmatpush1.bf16.msra.mxu1 %v8038_v6  ;;  %v8086_v6 = vld [vmem:[#allocation8 + $0x480] ss:$48 sps:$4 sm:$0xff]  }
 0x11f   :  { %1233 = vmatpush1.bf16.msra.mxu0 %v7934_v51  ;;  %3218 = vmatprep.subr.bf16.mxu1 %v8046_v13  ;;  %v8064_v51 = vld [vmem:[#allocation8 + $0x304] ss:$48 sps:$4 sm:$0xff]   ;;  %v8095_v13 = vld [vmem:[#allocation8 + $0x4e8] ss:$48 sps:$4 sm:$0xff]  }
 0x120   :  { %1234 = vmatprep.subr.bf16.mxu0 %v7941_v53  ;;  %v8061_v53 = vld [vmem:[#allocation8 + $0x2ac] ss:$48 sps:$4 sm:$0xff]  }
 0x122   :  { %3219 = vmatpush1.bf16.msra.mxu1 %v8044_v12  ;;  %v8097_v12 = vld [vmem:[#allocation8 + $0x4ec] ss:$48 sps:$4 sm:$0xff]  }
 0x123   :  { %1235 = vmatpush1.bf16.msra.mxu0 %v7939_v56  ;;  %3220 = vmatprep.subr.bf16.mxu1 %v8052_v31  ;;  %v8059_v56 = vld [vmem:[#allocation8 + $0x2a8] ss:$48 sps:$4 sm:$0xff]  }
 0x124   :  { %1247 = vmatprep.subr.bf16.mxu0 %v7949_v57  ;;  %v8067_v57 = vld [vmem:[#allocation8 + $0x30c] ss:$48 sps:$4 sm:$0xff]  }
 0x126   :  { %1237 = vmatmul.mubr.bf16.vlgmr.msra.gmra.mrb[0].mxu0 %v9328_v18  ;;  %v7989_v18 = vld [vmem:[#allocation5 + $0x3c4] ss:$12 sps:$4 sm:$0xff]   ;;  %3221 = vmatpush1.bf16.msra.mxu1 %v8050_v30  ;;  %v348_v30 = vlaneseq }
 0x127   :  { %1248 = vmatpush1.bf16.msra.mxu0 %v7947_v60  ;;  %1279 = vmatprep.mubr.bf16.mxu0 %v7992_v39  ;;  %v8023_v39 = vld [vmem:[#allocation8 + $0x68] ss:$48 sps:$4 sm:$0xff]   ;;  %v8076_v60 = vld [vmem:[#allocation8 + $0x3c4] ss:$48 sps:$4 sm:$0xff]  }
 0x128   :  { %1249 = vmatprep.subr.bf16.mxu0 %v7954_v61  ;;  %3222 = vmatprep.subr.bf16.mxu1 %v8058_v50  ;;  %v8073_v61 = vld [vmem:[#allocation8 + $0x36c] ss:$48 sps:$4 sm:$0xff]   ;;  %v9336_v31 = vshrl.u32 %v348_v30, 7  ;;  %v8154_v30 = vld [vmem:[#allocation8 + $0x8a4] ss:$48 sps:$4 sm:$0xff]  }
 0x12a   :  { %3223 = vmatpush1.bf16.msra.mxu1 %v8056_v49 }
 0x12b   :  { %1250 = vmatpush1.bf16.msra.mxu0 %v7952_v63  ;;  %3224 = vmatprep.subr.bf16.mxu1 %v8064_v51  ;;  %v8082_v63 = vld [vmem:[#allocation8 + $0x424] ss:$48 sps:$4 sm:$0xff]  }
 0x12c   :  { %1251 = vmatprep.subr.bf16.mxu0 %v7959_v1  ;;  %v8079_v1 = vld [vmem:[#allocation8 + $0x3cc] ss:$48 sps:$4 sm:$0xff]  }
 0x12e   :  { %3225 = vmatpush1.bf16.msra.mxu1 %v8062_v54  ;;  %v9350_v54 = vsub.s32 1, %v9336_v31 }
 0x12f   :  { %1252 = vmatpush1.bf16.msra.mxu0 %v7957_v4  ;;  %3226 = vmatprep.subr.bf16.mxu1 %v8070_v55  ;;  %v8077_v4 = vld [vmem:[#allocation8 + $0x3c8] ss:$48 sps:$4 sm:$0xff]  }
 0x130   :  { %1253 = vmatprep.subr.bf16.mxu0 %v7964_v5  ;;  %v8085_v5 = vld [vmem:[#allocation8 + $0x42c] ss:$48 sps:$4 sm:$0xff]  }
 0x132   :  { %3227 = vmatpush1.bf16.msra.mxu1 %v8068_v58 }
 0x133   :  { %1254 = vmatpush1.bf16.msra.mxu0 %v7962_v7  ;;  %3228 = vmatprep.subr.bf16.mxu1 %v8076_v60  ;;  %v8094_v7 = vld [vmem:[#allocation8 + $0x4e4] ss:$48 sps:$4 sm:$0xff]  }
 0x134   :  { %1255 = vmatprep.subr.bf16.mxu0 %v7969_v8  ;;  %v8083_v8 = vld [vmem:[#allocation8 + $0x428] ss:$48 sps:$4 sm:$0xff]  }
 0x136   :  { %3229 = vmatpush1.bf16.msra.mxu1 %v8074_v62 }
 0x137   :  { %1256 = vmatpush1.bf16.msra.mxu0 %v7967_v9  ;;  %3230 = vmatprep.subr.bf16.mxu1 %v8082_v63  ;;  %v8091_v9 = vld [vmem:[#allocation8 + $0x48c] ss:$48 sps:$4 sm:$0xff]  }
 0x138   :  { %1257 = vmatprep.subr.bf16.mxu0 %v7974_v10  ;;  %v8092_v10 = vld [vmem:[#allocation8 + $0x4e0] ss:$48 sps:$4 sm:$0xff]  }
 0x13a   :  { %3231 = vmatpush1.bf16.msra.mxu1 %v8080_v2 }
 0x13b   :  { %1258 = vmatpush1.bf16.msra.mxu0 %v7972_v11  ;;  %3232 = vmatprep.subr.bf16.mxu1 %v8088_v3  ;;  %v8089_v11 = vld [vmem:[#allocation8 + $0x488] ss:$48 sps:$4 sm:$0xff]   ;;  %v8118_v3 = vld [vmem:[#allocation8 + $0x664] ss:$48 sps:$4 sm:$0xff]  }
 0x13c   :  { %1259 = vmatprep.subr.bf16.mxu0 %v7979_v14 }
 0x13e   :  { %3233 = vmatpush1.bf16.msra.mxu1 %v8086_v6 }
 0x13f   :  { %1260 = vmatpush1.bf16.msra.mxu0 %v7977_v15  ;;  %3234 = vmatprep.subr.bf16.mxu1 %v8094_v7  ;;  %v8116_v7 = vld [vmem:[#allocation8 + $0x660] ss:$48 sps:$4 sm:$0xff]  }
 0x140   :  { %1261 = vmatprep.subr.bf16.mxu0 %v7984_v16 }
 0x142   :  { %3235 = vmatpush1.bf16.msra.mxu1 %v8092_v10  ;;  %v8127_v10 = vld [vmem:[#allocation8 + $0x6cc] ss:$48 sps:$4 sm:$0xff]  }
 0x143   :  { %1262 = vmatpush1.bf16.msra.mxu0 %v7982_v17 }
 0x144   :  { %1263 = vmatprep.subr.bf16.mxu0 %v7989_v18 }
 0x147   :  { %1264 = vmatpush1.bf16.msra.mxu0 %v7987_v19 }
 0x148   :  { %1265 = vmatprep.subr.bf16.mxu0 %v7995_v20  ;;  %v8100_v20 = vld [vmem:[#allocation8 + $0x544] ss:$48 sps:$4 sm:$0xff]  }
 0x149   :  { %3236 = vmatprep.subr.bf16.mxu1 %v8100_v20  ;;  %v8134_v20 = vld [vmem:[#allocation8 + $0x780] ss:$48 sps:$4 sm:$0xff]  }
 0x14b   :  { %1266 = vmatpush1.bf16.msra.mxu0 %v7993_v21  ;;  %v8103_v21 = vld [vmem:[#allocation8 + $0x54c] ss:$48 sps:$4 sm:$0xff]  }
 0x14c   :  { %1267 = vmatprep.subr.bf16.mxu0 %v7998_v22  ;;  %v8098_v22 = vld [vmem:[#allocation8 + $0x540] ss:$48 sps:$4 sm:$0xff]  }
 0x14d   :  { %3237 = vmatpush1.bf16.msra.mxu1 %v8098_v22  ;;  %v8142_v22 = vld [vmem:[#allocation8 + $0x7e4] ss:$48 sps:$4 sm:$0xff]  }
 0x14f   :  { %1268 = vmatpush1.bf16.msra.mxu0 %v7996_v23  ;;  %v8101_v23 = vld [vmem:[#allocation8 + $0x548] ss:$48 sps:$4 sm:$0xff]  }
 0x150   :  { %1269 = vmatprep.subr.bf16.mxu0 %v8001_v24  ;;  %v8106_v24 = vld [vmem:[#allocation8 + $0x5a4] ss:$48 sps:$4 sm:$0xff]  }
 0x151   :  { %3238 = vmatprep.subr.bf16.mxu1 %v8106_v24  ;;  %v8140_v24 = vld [vmem:[#allocation8 + $0x7e0] ss:$48 sps:$4 sm:$0xff]  }
 0x153   :  { %1270 = vmatpush1.bf16.msra.mxu0 %v7999_v25  ;;  %v8109_v25 = vld [vmem:[#allocation8 + $0x5ac] ss:$48 sps:$4 sm:$0xff]  }
 0x154   :  { %1271 = vmatprep.subr.bf16.mxu0 %v8004_v26  ;;  %v8104_v26 = vld [vmem:[#allocation8 + $0x5a0] ss:$48 sps:$4 sm:$0xff]  }
 0x155   :  { %3239 = vmatpush1.bf16.msra.mxu1 %v8104_v26  ;;  %v8148_v26 = vld [vmem:[#allocation8 + $0x844] ss:$48 sps:$4 sm:$0xff]  }
 0x157   :  { %1272 = vmatpush1.bf16.msra.mxu0 %v8002_v27  ;;  %v8107_v27 = vld [vmem:[#allocation8 + $0x5a8] ss:$48 sps:$4 sm:$0xff]  }
 0x158   :  { %1273 = vmatprep.subr.bf16.mxu0 %v8007_v28  ;;  %v8112_v28 = vld [vmem:[#allocation8 + $0x604] ss:$48 sps:$4 sm:$0xff]  }
 0x159   :  { %3251 = vmatprep.subr.bf16.mxu1 %v8112_v28  ;;  %v8146_v28 = vld [vmem:[#allocation8 + $0x840] ss:$48 sps:$4 sm:$0xff]  }
 0x15b   :  { %1274 = vmatpush1.bf16.msra.mxu0 %v8005_v29  ;;  %v8115_v29 = vld [vmem:[#allocation8 + $0x60c] ss:$48 sps:$4 sm:$0xff]  }
 0x15c   :  { %1275 = vmatprep.subr.bf16.mxu0 %v8010_v32  ;;  %v346_v32 = vld [vmem:[#allocation7] sm:$0x7] }
 0x15f   :  { %1276 = vmatpush1.bf16.msra.mxu0 %v8008_v33  ;;  %v9339_v33 = vsub.s32 2, %v9336_v31 }
 0x160   :  { %1277 = vmatprep.subr.bf16.mxu0 %v8013_v34 }
 0x161   :  { %v359_v34 = vrot.slane %v346_v32, %v9339_v33 }
 0x163   :  { %1278 = vmatpush1.bf16.msra.mxu0 %v8011_v35 }
 0x164   :  { %3294 = vmatprep.subr.bf16.mxu0 %v8019_v36 }
 0x166   :  { %1280 = vmatmul.mubr.bf16.vlgmr.msra.gmra.mrb[0].mxu0 %v9331_v52  ;;  %v8053_v52 = vld [vmem:[#allocation8 + $0x248] ss:$48 sps:$4 sm:$0xff]  }
 0x167   :  { %3295 = vmatpush1.bf16.msra.mxu0 %v8017_v37 }
 0x168   :  { %3296 = vmatprep.subr.bf16.mxu0 %v8025_v38 }
 0x16b   :  { %3297 = vmatpush1.bf16.msra.mxu0 %v8023_v39 }
 0x16c   :  { %3298 = vmatprep.subr.bf16.mxu0 %v8031_v40 }
 0x16f   :  { %3299 = vmatpush1.bf16.msra.mxu0 %v8029_v41 }
 0x170   :  { %3300 = vmatprep.subr.bf16.mxu0 %v8037_v42 }
 0x173   :  { %3301 = vmatpush1.bf16.msra.mxu0 %v8035_v43 }
 0x174   :  { %3302 = vmatprep.subr.bf16.mxu0 %v8043_v44 }
 0x177   :  { %3303 = vmatpush1.bf16.msra.mxu0 %v8041_v45 }
 0x178   :  { %3304 = vmatprep.subr.bf16.mxu0 %v8049_v46 }
 0x17b   :  { %3305 = vmatpush1.bf16.msra.mxu0 %v8047_v47 }
 0x17c   :  { %3306 = vmatprep.subr.bf16.mxu0 %v8055_v48 }
 0x17f   :  { %3307 = vmatpush1.bf16.msra.mxu0 %v8053_v52 }
 0x180   :  { %3308 = vmatprep.subr.bf16.mxu0 %v8061_v53  ;;  %v9347_v53 = vsub.s32 0, %v9336_v31 }
 0x183   :  { %3309 = vmatpush1.bf16.msra.mxu0 %v8059_v56  ;;  %v355_v56 = vrot.slane %v346_v32, %v9350_v54 }
 0x184   :  { %3310 = vmatprep.subr.bf16.mxu0 %v8067_v57  ;;  %v351_v57 = vrot.slane %v346_v32, %v9347_v53  ;;  %v8157_v32 = vld [vmem:[#allocation8 + $0x8ac] ss:$48 sps:$4 sm:$0xff]  }
 0x187   :  { %3311 = vmatpush1.bf16.msra.mxu0 %v8065_v59 }
 0x188   :  { %3312 = vmatprep.subr.bf16.mxu0 %v8073_v61 }
 0x18b   :  { %3313 = vmatpush1.bf16.msra.mxu0 %v8071_v0  ;;  %v8110_v0 = vld [vmem:[#allocation8 + $0x600] ss:$48 sps:$4 sm:$0xff]  }
 0x18c   :  { %3314 = vmatprep.subr.bf16.mxu0 %v8079_v1  ;;  %v8113_v1 = vld [vmem:[#allocation8 + $0x608] ss:$48 sps:$4 sm:$0xff]  }
 0x18f   :  { %3315 = vmatpush1.bf16.msra.mxu0 %v8077_v4  ;;  %v8121_v4 = vld [vmem:[#allocation8 + $0x66c] ss:$48 sps:$4 sm:$0xff]  }
 0x190   :  { %3316 = vmatprep.subr.bf16.mxu0 %v8085_v5 }
 0x193   :  { %3317 = vmatpush1.bf16.msra.mxu0 %v8083_v8  ;;  %v8119_v8 = vld [vmem:[#allocation8 + $0x668] ss:$48 sps:$4 sm:$0xff]  }
 0x194   :  { %3318 = vmatprep.subr.bf16.mxu0 %v8091_v9  ;;  %v8124_v9 = vld [vmem:[#allocation8 + $0x6c4] ss:$48 sps:$4 sm:$0xff]  }
 0x197   :  { %3319 = vmatpush1.bf16.msra.mxu0 %v8089_v11  ;;  %v8122_v11 = vld [vmem:[#allocation8 + $0x6c0] ss:$48 sps:$4 sm:$0xff]  }
 0x198   :  { %3320 = vmatprep.subr.bf16.mxu0 %v8097_v12  ;;  %v9151_v12 = vmov 0  }
 0x19b   :  { %3321 = vmatpush1.bf16.msra.mxu0 %v8095_v13  ;;  %v8125_v13 = vld [vmem:[#allocation8 + $0x6c8] ss:$48 sps:$4 sm:$0xff]  }
 0x19c   :  { %3322 = vmatprep.subr.bf16.mxu0 %v8103_v21  ;;  %v8137_v21 = vld [vmem:[#allocation8 + $0x788] ss:$48 sps:$4 sm:$0xff]  }
 0x19f   :  { %3323 = vmatpush1.bf16.msra.mxu0 %v8101_v23  ;;  %v8145_v23 = vld [vmem:[#allocation8 + $0x7ec] ss:$48 sps:$4 sm:$0xff]  }
 0x1a0   :  { %v7473_v14 = vpop.f32.mrb[0].mxu1  ;;  %3324 = vmatprep.subr.bf16.mxu0 %v8109_v25  ;;  %v8143_v25 = vld [vmem:[#allocation8 + $0x7e8] ss:$48 sps:$4 sm:$0xff]  }
 0x1a1   :  { %v7474_v15 = vpop.f32.mrb[1].mxu1 }
 0x1a2   :  { %v7475_v16 = vadd.f32 %v7474_v15, %v7473_v14  ;;  %v7476_v17 = vpop.f32.mrb[2].mxu1  ;;  %v8130_v14 = vld [vmem:[#allocation8 + $0x724] ss:$48 sps:$4 sm:$0xff]   ;;  %v8133_v15 = vld [vmem:[#allocation8 + $0x72c] ss:$48 sps:$4 sm:$0xff]  }
 0x1a3   :  { %v7477_v18 = vpop.f32.mrb[3].mxu1  ;;  %3325 = vmatpush1.bf16.msra.mxu0 %v8107_v27  ;;  %v8151_v27 = vld [vmem:[#allocation8 + $0x84c] ss:$48 sps:$4 sm:$0xff]  }
 0x1a4   :  { %v7478_v19 = vadd.f32 %v7477_v18, %v7476_v17  ;;  %3337 = vmatprep.subr.bf16.mxu0 %v8115_v29  ;;  %v1325_v35 = vadd.f32 %v7475_v16, %v359_v34  ;;  %v8128_v16 = vld [vmem:[#allocation8 + $0x720] ss:$48 sps:$4 sm:$0xff]   ;;  %v8131_v17 = vld [vmem:[#allocation8 + $0x728] ss:$48 sps:$4 sm:$0xff]   ;;  %v8136_v18 = vld [vmem:[#allocation8 + $0x784] ss:$48 sps:$4 sm:$0xff]  }
 0x1a5   :  { %v8149_v29 = vld [vmem:[#allocation8 + $0x848] ss:$48 sps:$4 sm:$0xff]  }
 0x1a6   :  { %v1328_v38 = vadd.f32 %v7478_v19, %v359_v34  ;;  %v8139_v19 = vld [vmem:[#allocation8 + $0x78c] ss:$48 sps:$4 sm:$0xff]   ;;  %v8152_v34 = vld [vmem:[#allocation8 + $0x8a0] ss:$48 sps:$4 sm:$0xff]  }
 0x1c0   :  { %v7495_v36 = vpop.f32.mrb[4].mxu1 }
 0x1c1   :  { %v7496_v37 = vpop.f32.mrb[5].mxu1 }
 0x1c2   :  { %v7497_v39 = vadd.f32 %v7496_v37, %v7495_v36  ;;  %v7498_v40 = vpop.f32.mrb[6].mxu1  ;;  %v8160_v36 = vld [vmem:[#allocation8 + $0x14] ss:$48 sps:$4 sm:$0xff]   ;;  %v8163_v37 = vld [vmem:[#allocation8 + $0x1c] ss:$48 sps:$4 sm:$0xff]  }
 0x1c3   :  { %v7499_v41 = vpop.f32.mrb[7].mxu1 }
 0x1c4   :  { %v1366_v42 = vadd.f32 %v7497_v39, %v1325_v35  ;;  %v7500_v43 = vadd.f32 %v7499_v41, %v7498_v40  ;;  %v8155_v35 = vld [vmem:[#allocation8 + $0x8a8] ss:$48 sps:$4 sm:$0xff]   ;;  %v8166_v41 = vld [vmem:[#allocation8 + $0x74] ss:$48 sps:$4 sm:$0xff]  }
 0x1c5   :  { %v8161_v40 = vld [vmem:[#allocation8 + $0x18] ss:$48 sps:$4 sm:$0xff]  }
 0x1c6   :  { %v1369_v44 = vadd.f32 %v7500_v43, %v1328_v38  ;;  %v8158_v38 = vld [vmem:[#allocation8 + $0x10] ss:$48 sps:$4 sm:$0xff]  }
 0x1c7   :  { %v8164_v43 = vld [vmem:[#allocation8 + $0x70] ss:$48 sps:$4 sm:$0xff]  }
 0x1e0   :  { %v7517_v45 = vpop.f32.mrb[8].mxu1 }
 0x1e1   :  { %v7518_v46 = vpop.f32.mrb[9].mxu1 }
 0x1e2   :  { %v7519_v47 = vadd.f32 %v7518_v46, %v7517_v45  ;;  %v7520_v48 = vpop.f32.mrb[10].mxu1  ;;  %v8172_v45 = vld [vmem:[#allocation8 + $0xd4] ss:$48 sps:$4 sm:$0xff]   ;;  %v8175_v46 = vld [vmem:[#allocation8 + $0xdc] ss:$48 sps:$4 sm:$0xff]  }
 0x1e3   :  { %v7521_v49 = vpop.f32.mrb[11].mxu1 }
 0x1e4   :  { %v9342_v50 = vadd.f32 %v7519_v47, %v1366_v42  ;;  %v7522_v51 = vadd.f32 %v7521_v49, %v7520_v48  ;;  %v8169_v42 = vld [vmem:[#allocation8 + $0x7c] ss:$48 sps:$4 sm:$0xff]   ;;  %v8170_v47 = vld [vmem:[#allocation8 + $0xd0] ss:$48 sps:$4 sm:$0xff]   ;;  %v8173_v48 = vld [vmem:[#allocation8 + $0xd8] ss:$48 sps:$4 sm:$0xff]  }
 0x1e5   :  { %v8178_v49 = vld [vmem:[#allocation8 + $0x134] ss:$48 sps:$4 sm:$0xff]  }
 0x1e6   :  { %v9344_v52 = vadd.f32 %v7522_v51, %v1369_v44  ;;  %v8167_v44 = vld [vmem:[#allocation8 + $0x78] ss:$48 sps:$4 sm:$0xff]   ;;  %v8181_v51 = vld [vmem:[#allocation8 + $0x13c] ss:$48 sps:$4 sm:$0xff]  }
 0x1e8   :  { %v9378_v39 = vpack.c.bf16 %v9344_v52, %v9342_v50 }
 0x239   :  { %v1281_v55 = vpop.f32.mrb[0].mxu0 }
 0x23a   :  { %v1283_v58 = vpop.f32.mrb[1].mxu0  ;;  %v9360_v2 = vadd.f32 %v1281_v55, %v351_v57  ;;  %v8176_v55 = vld [vmem:[#allocation8 + $0x130] ss:$48 sps:$4 sm:$0xff]  }
 0x23b   :  { %v1285_v59 = vpop.f32.mrb[2].mxu0  ;;  %v9356_v62 = vadd.f32 %v1283_v58, %v355_v56  ;;  %v8187_v58 = vld [vmem:[#allocation8 + $0x19c] ss:$48 sps:$4 sm:$0xff]  }
 0x23c   :  { %v9354_v60 = vadd.f32 %v1285_v59, %v351_v57  ;;  %v1287_v61 = vpop.f32.mrb[3].mxu0  ;;  %v8184_v57 = vld [vmem:[#allocation8 + $0x194] ss:$48 sps:$4 sm:$0xff]   ;;  %v8182_v59 = vld [vmem:[#allocation8 + $0x190] ss:$48 sps:$4 sm:$0xff]  }
 0x23d   :  { %v9358_v63 = vadd.f32 %v1287_v61, %v355_v56  ;;  %v8179_v56 = vld [vmem:[#allocation8 + $0x138] ss:$48 sps:$4 sm:$0xff]  }
 0x23e   :  { %v9368_v6 = vpack.c.bf16 %v9354_v60, %v9360_v2  ;;  %v8185_v61 = vld [vmem:[#allocation8 + $0x198] ss:$48 sps:$4 sm:$0xff]  }
 0x23f   :  { %v9364_v5 = vpack.c.bf16 %v9358_v63, %v9356_v62 }
 0x241   :  { %3240 = vmatprep.mubr.bf16.mxu1 %v9364_v5  ;;  %3326 = vmatprep.mubr.bf16.mxu0 %v9364_v5 }
 0x242   :  { %3241 = vmatmul.mubr.bf16.vlgmr.msra.gmra.mrb[12].mxu1 %v9368_v6  ;;  %3327 = vmatmul.mubr.bf16.vlgmr.msra.gmra.mrb[4].mxu0 %v9368_v6 }
 0x243   :  { %3252 = vmatpush1.bf16.msra.mxu1 %v8110_v0  ;;  %3338 = vmatpush1.bf16.msra.mxu0 %v8113_v1  ;;  %v8190_v0 = vld [vmem:[#allocation8 + $0x1f4] ss:$48 sps:$4 sm:$0xff]   ;;  %v8193_v1 = vld [vmem:[#allocation8 + $0x1fc] ss:$48 sps:$4 sm:$0xff]  }
 0x244   :  { %3253 = vmatprep.subr.bf16.mxu1 %v8118_v3  ;;  %3339 = vmatprep.subr.bf16.mxu0 %v8121_v4  ;;  %v8188_v3 = vld [vmem:[#allocation8 + $0x1f0] ss:$48 sps:$4 sm:$0xff]   ;;  %v8191_v4 = vld [vmem:[#allocation8 + $0x1f8] ss:$48 sps:$4 sm:$0xff]  }
 0x245   :  { %3283 = vmatprep.mubr.bf16.mxu1 %v9151_v12  ;;  %3369 = vmatprep.mubr.bf16.mxu0 %v9151_v12 }
 0x247   :  { %3254 = vmatpush1.bf16.msra.mxu1 %v8116_v7  ;;  %3340 = vmatpush1.bf16.msra.mxu0 %v8119_v8  ;;  %v8196_v7 = vld [vmem:[#allocation8 + $0x254] ss:$48 sps:$4 sm:$0xff]   ;;  %v8199_v8 = vld [vmem:[#allocation8 + $0x25c] ss:$48 sps:$4 sm:$0xff]  }
 0x248   :  { %3255 = vmatprep.subr.bf16.mxu1 %v8124_v9  ;;  %3341 = vmatprep.subr.bf16.mxu0 %v8127_v10  ;;  %v8194_v9 = vld [vmem:[#allocation8 + $0x250] ss:$48 sps:$4 sm:$0xff]   ;;  %v8197_v10 = vld [vmem:[#allocation8 + $0x258] ss:$48 sps:$4 sm:$0xff]  }
 0x24b   :  { %3256 = vmatpush1.bf16.msra.mxu1 %v8122_v11  ;;  %3342 = vmatpush1.bf16.msra.mxu0 %v8125_v13  ;;  %v8202_v11 = vld [vmem:[#allocation8 + $0x2b4] ss:$48 sps:$4 sm:$0xff]   ;;  %v8205_v13 = vld [vmem:[#allocation8 + $0x2bc] ss:$48 sps:$4 sm:$0xff]  }
 0x24c   :  { %3257 = vmatprep.subr.bf16.mxu1 %v8130_v14  ;;  %3343 = vmatprep.subr.bf16.mxu0 %v8133_v15  ;;  %v8200_v14 = vld [vmem:[#allocation8 + $0x2b0] ss:$48 sps:$4 sm:$0xff]   ;;  %v8203_v15 = vld [vmem:[#allocation8 + $0x2b8] ss:$48 sps:$4 sm:$0xff]  }
 0x24f   :  { %3258 = vmatpush1.bf16.msra.mxu1 %v8128_v16  ;;  %3344 = vmatpush1.bf16.msra.mxu0 %v8131_v17  ;;  %v8208_v16 = vld [vmem:[#allocation8 + $0x314] ss:$48 sps:$4 sm:$0xff]   ;;  %v8211_v17 = vld [vmem:[#allocation8 + $0x31c] ss:$48 sps:$4 sm:$0xff]  }
 0x250   :  { %3259 = vmatprep.subr.bf16.mxu1 %v8136_v18  ;;  %3345 = vmatprep.subr.bf16.mxu0 %v8139_v19  ;;  %v8206_v18 = vld [vmem:[#allocation8 + $0x310] ss:$48 sps:$4 sm:$0xff]   ;;  %v8209_v19 = vld [vmem:[#allocation8 + $0x318] ss:$48 sps:$4 sm:$0xff]  }
 0x253   :  { %3260 = vmatpush1.bf16.msra.mxu1 %v8134_v20  ;;  %3346 = vmatpush1.bf16.msra.mxu0 %v8137_v21  ;;  %v8214_v20 = vld [vmem:[#allocation8 + $0x374] ss:$48 sps:$4 sm:$0xff]   ;;  %v8217_v21 = vld [vmem:[#allocation8 + $0x37c] ss:$48 sps:$4 sm:$0xff]  }
 0x254   :  { %3261 = vmatprep.subr.bf16.mxu1 %v8142_v22  ;;  %3347 = vmatprep.subr.bf16.mxu0 %v8145_v23  ;;  %v8212_v22 = vld [vmem:[#allocation8 + $0x370] ss:$48 sps:$4 sm:$0xff]   ;;  %v8215_v23 = vld [vmem:[#allocation8 + $0x378] ss:$48 sps:$4 sm:$0xff]  }
 0x257   :  { %3262 = vmatpush1.bf16.msra.mxu1 %v8140_v24  ;;  %3348 = vmatpush1.bf16.msra.mxu0 %v8143_v25  ;;  %v8220_v24 = vld [vmem:[#allocation8 + $0x3d4] ss:$48 sps:$4 sm:$0xff]   ;;  %v8223_v25 = vld [vmem:[#allocation8 + $0x3dc] ss:$48 sps:$4 sm:$0xff]  }
 0x258   :  { %3263 = vmatprep.subr.bf16.mxu1 %v8148_v26  ;;  %3349 = vmatprep.subr.bf16.mxu0 %v8151_v27  ;;  %v8218_v26 = vld [vmem:[#allocation8 + $0x3d0] ss:$48 sps:$4 sm:$0xff]   ;;  %v8221_v27 = vld [vmem:[#allocation8 + $0x3d8] ss:$48 sps:$4 sm:$0xff]  }
 0x25b   :  { %3264 = vmatpush1.bf16.msra.mxu1 %v8146_v28  ;;  %3350 = vmatpush1.bf16.msra.mxu0 %v8149_v29  ;;  %v8226_v28 = vld [vmem:[#allocation8 + $0x434] ss:$48 sps:$4 sm:$0xff]   ;;  %v8229_v29 = vld [vmem:[#allocation8 + $0x43c] ss:$48 sps:$4 sm:$0xff]  }
 0x25c   :  { %3265 = vmatprep.subr.bf16.mxu1 %v8154_v30  ;;  %3351 = vmatprep.subr.bf16.mxu0 %v8157_v32  ;;  %v8224_v30 = vld [vmem:[#allocation8 + $0x430] ss:$48 sps:$4 sm:$0xff]   ;;  %v8227_v32 = vld [vmem:[#allocation8 + $0x438] ss:$48 sps:$4 sm:$0xff]  }
 0x25f   :  { %3266 = vmatpush1.bf16.msra.mxu1 %v8152_v34  ;;  %3352 = vmatpush1.bf16.msra.mxu0 %v8155_v35  ;;  %v8232_v34 = vld [vmem:[#allocation8 + $0x494] ss:$48 sps:$4 sm:$0xff]   ;;  %v8235_v35 = vld [vmem:[#allocation8 + $0x49c] ss:$48 sps:$4 sm:$0xff]  }
 0x260   :  { %3380 = vmatprep.subr.bf16.mxu1 %v8160_v36  ;;  %3466 = vmatprep.subr.bf16.mxu0 %v8163_v37  ;;  %v8230_v36 = vld [vmem:[#allocation8 + $0x490] ss:$48 sps:$4 sm:$0xff]   ;;  %v8233_v37 = vld [vmem:[#allocation8 + $0x498] ss:$48 sps:$4 sm:$0xff]  }
 0x262   :  { %3284 = vmatmul.mubr.bf16.vlgmr.msra.gmra.mrb[12].mxu1 %v9378_v39  ;;  %3370 = vmatmul.mubr.bf16.vlgmr.msra.gmra.mrb[4].mxu0 %v9378_v39 }
 0x263   :  { %3381 = vmatpush1.bf16.msra.mxu1 %v8158_v38  ;;  %3412 = vmatprep.mubr.bf16.mxu1 %v9364_v5  ;;  %v8238_v38 = vld [vmem:[#allocation8 + $0x4f4] ss:$48 sps:$4 sm:$0xff]  }
 0x264   :  { %3467 = vmatpush1.bf16.msra.mxu0 %v8161_v40  ;;  %3498 = vmatprep.mubr.bf16.mxu0 %v9364_v5  ;;  %v8241_v40 = vld [vmem:[#allocation8 + $0x4fc] ss:$48 sps:$4 sm:$0xff]  }
 0x265   :  { %3382 = vmatprep.subr.bf16.mxu1 %v8166_v41  ;;  %3468 = vmatprep.subr.bf16.mxu0 %v8169_v42  ;;  %v8236_v41 = vld [vmem:[#allocation8 + $0x4f0] ss:$48 sps:$4 sm:$0xff]   ;;  %v8239_v42 = vld [vmem:[#allocation8 + $0x4f8] ss:$48 sps:$4 sm:$0xff]  }
 0x267   :  { %3383 = vmatpush1.bf16.msra.mxu1 %v8164_v43  ;;  %v8244_v43 = vld [vmem:[#allocation8 + $0x554] ss:$48 sps:$4 sm:$0xff]  }
 0x268   :  { %3469 = vmatpush1.bf16.msra.mxu0 %v8167_v44  ;;  %3384 = vmatprep.subr.bf16.mxu1 %v8172_v45  ;;  %v8247_v44 = vld [vmem:[#allocation8 + $0x55c] ss:$48 sps:$4 sm:$0xff]   ;;  %v8242_v45 = vld [vmem:[#allocation8 + $0x550] ss:$48 sps:$4 sm:$0xff]  }
 0x269   :  { %3470 = vmatprep.subr.bf16.mxu0 %v8175_v46  ;;  %v8245_v46 = vld [vmem:[#allocation8 + $0x558] ss:$48 sps:$4 sm:$0xff]  }
 0x26b   :  { %3385 = vmatpush1.bf16.msra.mxu1 %v8170_v47  ;;  %v8250_v47 = vld [vmem:[#allocation8 + $0x5b4] ss:$48 sps:$4 sm:$0xff]  }
 0x26c   :  { %3471 = vmatpush1.bf16.msra.mxu0 %v8173_v48  ;;  %3386 = vmatprep.subr.bf16.mxu1 %v8178_v49  ;;  %v8253_v48 = vld [vmem:[#allocation8 + $0x5bc] ss:$48 sps:$4 sm:$0xff]   ;;  %v8248_v49 = vld [vmem:[#allocation8 + $0x5b0] ss:$48 sps:$4 sm:$0xff]  }
 0x26d   :  { %3472 = vmatprep.subr.bf16.mxu0 %v8181_v51  ;;  %v8251_v51 = vld [vmem:[#allocation8 + $0x5b8] ss:$48 sps:$4 sm:$0xff]  }
 0x26f   :  { %3387 = vmatpush1.bf16.msra.mxu1 %v8176_v55  ;;  %v8256_v55 = vld [vmem:[#allocation8 + $0x614] ss:$48 sps:$4 sm:$0xff]  }
 0x270   :  { %3473 = vmatpush1.bf16.msra.mxu0 %v8179_v56  ;;  %3388 = vmatprep.subr.bf16.mxu1 %v8184_v57  ;;  %v8259_v56 = vld [vmem:[#allocation8 + $0x61c] ss:$48 sps:$4 sm:$0xff]   ;;  %v8254_v57 = vld [vmem:[#allocation8 + $0x610] ss:$48 sps:$4 sm:$0xff]  }
 0x271   :  { %3474 = vmatprep.subr.bf16.mxu0 %v8187_v58  ;;  %v8257_v58 = vld [vmem:[#allocation8 + $0x618] ss:$48 sps:$4 sm:$0xff]  }
 0x273   :  { %3389 = vmatpush1.bf16.msra.mxu1 %v8182_v59  ;;  %v8262_v59 = vld [vmem:[#allocation8 + $0x674] ss:$48 sps:$4 sm:$0xff]  }
 0x274   :  { %3475 = vmatpush1.bf16.msra.mxu0 %v8185_v61  ;;  %3390 = vmatprep.subr.bf16.mxu1 %v8190_v0  ;;  %v8265_v61 = vld [vmem:[#allocation8 + $0x67c] ss:$48 sps:$4 sm:$0xff]   ;;  %v8260_v0 = vld [vmem:[#allocation8 + $0x670] ss:$48 sps:$4 sm:$0xff]  }
 0x275   :  { %3476 = vmatprep.subr.bf16.mxu0 %v8193_v1  ;;  %v8263_v1 = vld [vmem:[#allocation8 + $0x678] ss:$48 sps:$4 sm:$0xff]  }
 0x277   :  { %3391 = vmatpush1.bf16.msra.mxu1 %v8188_v3  ;;  %v8268_v3 = vld [vmem:[#allocation8 + $0x6d4] ss:$48 sps:$4 sm:$0xff]  }
 0x278   :  { %3477 = vmatpush1.bf16.msra.mxu0 %v8191_v4  ;;  %3392 = vmatprep.subr.bf16.mxu1 %v8196_v7  ;;  %v8271_v4 = vld [vmem:[#allocation8 + $0x6dc] ss:$48 sps:$4 sm:$0xff]   ;;  %v8266_v7 = vld [vmem:[#allocation8 + $0x6d0] ss:$48 sps:$4 sm:$0xff]  }
 0x279   :  { %3478 = vmatprep.subr.bf16.mxu0 %v8199_v8  ;;  %v8269_v8 = vld [vmem:[#allocation8 + $0x6d8] ss:$48 sps:$4 sm:$0xff]  }
 0x27b   :  { %3393 = vmatpush1.bf16.msra.mxu1 %v8194_v9  ;;  %v8274_v9 = vld [vmem:[#allocation8 + $0x734] ss:$48 sps:$4 sm:$0xff]  }
 0x27c   :  { %3479 = vmatpush1.bf16.msra.mxu0 %v8197_v10  ;;  %3394 = vmatprep.subr.bf16.mxu1 %v8202_v11  ;;  %v8277_v10 = vld [vmem:[#allocation8 + $0x73c] ss:$48 sps:$4 sm:$0xff]   ;;  %v8272_v11 = vld [vmem:[#allocation8 + $0x730] ss:$48 sps:$4 sm:$0xff]  }
 0x27d   :  { %3480 = vmatprep.subr.bf16.mxu0 %v8205_v13  ;;  %v8275_v13 = vld [vmem:[#allocation8 + $0x738] ss:$48 sps:$4 sm:$0xff]  }
 0x27f   :  { %3395 = vmatpush1.bf16.msra.mxu1 %v8200_v14  ;;  %v8280_v14 = vld [vmem:[#allocation8 + $0x794] ss:$48 sps:$4 sm:$0xff]  }
 0x280   :  { %3481 = vmatpush1.bf16.msra.mxu0 %v8203_v15  ;;  %3396 = vmatprep.subr.bf16.mxu1 %v8208_v16  ;;  %v8283_v15 = vld [vmem:[#allocation8 + $0x79c] ss:$48 sps:$4 sm:$0xff]   ;;  %v8278_v16 = vld [vmem:[#allocation8 + $0x790] ss:$48 sps:$4 sm:$0xff]  }
 0x281   :  { %3482 = vmatprep.subr.bf16.mxu0 %v8211_v17  ;;  %v8281_v17 = vld [vmem:[#allocation8 + $0x798] ss:$48 sps:$4 sm:$0xff]  }
 0x283   :  { %3397 = vmatpush1.bf16.msra.mxu1 %v8206_v18  ;;  %v8286_v18 = vld [vmem:[#allocation8 + $0x7f4] ss:$48 sps:$4 sm:$0xff]  }
 0x284   :  { %3483 = vmatpush1.bf16.msra.mxu0 %v8209_v19  ;;  %3398 = vmatprep.subr.bf16.mxu1 %v8214_v20  ;;  %v8289_v19 = vld [vmem:[#allocation8 + $0x7fc] ss:$48 sps:$4 sm:$0xff]   ;;  %v8284_v20 = vld [vmem:[#allocation8 + $0x7f0] ss:$48 sps:$4 sm:$0xff]  }
 0x285   :  { %3484 = vmatprep.subr.bf16.mxu0 %v8217_v21  ;;  %v8287_v21 = vld [vmem:[#allocation8 + $0x7f8] ss:$48 sps:$4 sm:$0xff]  }
 0x287   :  { %3399 = vmatpush1.bf16.msra.mxu1 %v8212_v22  ;;  %v8292_v22 = vld [vmem:[#allocation8 + $0x854] ss:$48 sps:$4 sm:$0xff]  }
 0x288   :  { %3485 = vmatpush1.bf16.msra.mxu0 %v8215_v23  ;;  %3400 = vmatprep.subr.bf16.mxu1 %v8220_v24  ;;  %v8295_v23 = vld [vmem:[#allocation8 + $0x85c] ss:$48 sps:$4 sm:$0xff]   ;;  %v8290_v24 = vld [vmem:[#allocation8 + $0x850] ss:$48 sps:$4 sm:$0xff]  }
 0x289   :  { %3486 = vmatprep.subr.bf16.mxu0 %v8223_v25  ;;  %v8293_v25 = vld [vmem:[#allocation8 + $0x858] ss:$48 sps:$4 sm:$0xff]  }
 0x28b   :  { %3401 = vmatpush1.bf16.msra.mxu1 %v8218_v26  ;;  %v8298_v26 = vld [vmem:[#allocation8 + $0x8b4] ss:$48 sps:$4 sm:$0xff]  }
 0x28c   :  { %3487 = vmatpush1.bf16.msra.mxu0 %v8221_v27  ;;  %3402 = vmatprep.subr.bf16.mxu1 %v8226_v28  ;;  %v8301_v27 = vld [vmem:[#allocation8 + $0x8bc] ss:$48 sps:$4 sm:$0xff]   ;;  %v8296_v28 = vld [vmem:[#allocation8 + $0x8b0] ss:$48 sps:$4 sm:$0xff]  }
 0x28d   :  { %3488 = vmatprep.subr.bf16.mxu0 %v8229_v29  ;;  %v8299_v29 = vld [vmem:[#allocation8 + $0x8b8] ss:$48 sps:$4 sm:$0xff]  }
 0x28f   :  { %3403 = vmatpush1.bf16.msra.mxu1 %v8224_v30  ;;  %v8304_v30 = vld [vmem:[#allocation8 + $0x24] ss:$48 sps:$4 sm:$0xff]  }
 0x290   :  { %3489 = vmatpush1.bf16.msra.mxu0 %v8227_v32  ;;  %3404 = vmatprep.subr.bf16.mxu1 %v8232_v34  ;;  %v8307_v32 = vld [vmem:[#allocation8 + $0x2c] ss:$48 sps:$4 sm:$0xff]   ;;  %v8302_v34 = vld [vmem:[#allocation8 + $0x20] ss:$48 sps:$4 sm:$0xff]  }
 0x291   :  { %3490 = vmatprep.subr.bf16.mxu0 %v8235_v35  ;;  %v8305_v35 = vld [vmem:[#allocation8 + $0x28] ss:$48 sps:$4 sm:$0xff]  }
 0x293   :  { %3405 = vmatpush1.bf16.msra.mxu1 %v8230_v36  ;;  %v8310_v36 = vld [vmem:[#allocation8 + $0x84] ss:$48 sps:$4 sm:$0xff]  }
 0x294   :  { %3491 = vmatpush1.bf16.msra.mxu0 %v8233_v37  ;;  %3406 = vmatprep.subr.bf16.mxu1 %v8238_v38  ;;  %v8313_v37 = vld [vmem:[#allocation8 + $0x8c] ss:$48 sps:$4 sm:$0xff]   ;;  %v8308_v38 = vld [vmem:[#allocation8 + $0x80] ss:$48 sps:$4 sm:$0xff]  }
 0x295   :  { %3492 = vmatprep.subr.bf16.mxu0 %v8241_v40  ;;  %v8311_v40 = vld [vmem:[#allocation8 + $0x88] ss:$48 sps:$4 sm:$0xff]  }
 0x297   :  { %3407 = vmatpush1.bf16.msra.mxu1 %v8236_v41  ;;  %v8316_v41 = vld [vmem:[#allocation8 + $0xe4] ss:$48 sps:$4 sm:$0xff]  }
 0x298   :  { %3493 = vmatpush1.bf16.msra.mxu0 %v8239_v42  ;;  %3408 = vmatprep.subr.bf16.mxu1 %v8244_v43  ;;  %v8319_v42 = vld [vmem:[#allocation8 + $0xec] ss:$48 sps:$4 sm:$0xff]   ;;  %v8314_v43 = vld [vmem:[#allocation8 + $0xe0] ss:$48 sps:$4 sm:$0xff]  }
 0x299   :  { %3494 = vmatprep.subr.bf16.mxu0 %v8247_v44  ;;  %v8317_v44 = vld [vmem:[#allocation8 + $0xe8] ss:$48 sps:$4 sm:$0xff]  }
 0x29b   :  { %3409 = vmatpush1.bf16.msra.mxu1 %v8242_v45  ;;  %v8322_v45 = vld [vmem:[#allocation8 + $0x144] ss:$48 sps:$4 sm:$0xff]  }
 0x29c   :  { %3495 = vmatpush1.bf16.msra.mxu0 %v8245_v46  ;;  %3410 = vmatprep.subr.bf16.mxu1 %v8250_v47  ;;  %v8325_v46 = vld [vmem:[#allocation8 + $0x14c] ss:$48 sps:$4 sm:$0xff]   ;;  %v8320_v47 = vld [vmem:[#allocation8 + $0x140] ss:$48 sps:$4 sm:$0xff]  }
 0x29d   :  { %3496 = vmatprep.subr.bf16.mxu0 %v8253_v48  ;;  %v8323_v48 = vld [vmem:[#allocation8 + $0x148] ss:$48 sps:$4 sm:$0xff]  }
 0x29f   :  { %3411 = vmatpush1.bf16.msra.mxu1 %v8248_v49  ;;  %v8328_v49 = vld [vmem:[#allocation8 + $0x1a4] ss:$48 sps:$4 sm:$0xff]  }
 0x2a0   :  { %3497 = vmatpush1.bf16.msra.mxu0 %v8251_v51  ;;  %3423 = vmatprep.subr.bf16.mxu1 %v8256_v55  ;;  %v8331_v51 = vld [vmem:[#allocation8 + $0x1ac] ss:$48 sps:$4 sm:$0xff]   ;;  %v8329_v55 = vld [vmem:[#allocation8 + $0x1a8] ss:$48 sps:$4 sm:$0xff]  }
 0x2a1   :  { %3509 = vmatprep.subr.bf16.mxu0 %v8259_v56  ;;  %v8334_v56 = vld [vmem:[#allocation8 + $0x204] ss:$48 sps:$4 sm:$0xff]  }
 0x2a2   :  { %3413 = vmatmul.mubr.bf16.vlgmr.msra.gmra.mrb[16].mxu1 %v9368_v6 }
 0x2a3   :  { %3499 = vmatmul.mubr.bf16.vlgmr.msra.gmra.mrb[8].mxu0 %v9368_v6  ;;  %3424 = vmatpush1.bf16.msra.mxu1 %v8254_v57  ;;  %v8337_v57 = vld [vmem:[#allocation8 + $0x20c] ss:$48 sps:$4 sm:$0xff]  }
 0x2a4   :  { %3510 = vmatpush1.bf16.msra.mxu0 %v8257_v58  ;;  %3425 = vmatprep.subr.bf16.mxu1 %v8262_v59  ;;  %v8332_v58 = vld [vmem:[#allocation8 + $0x200] ss:$48 sps:$4 sm:$0xff]   ;;  %v8335_v59 = vld [vmem:[#allocation8 + $0x208] ss:$48 sps:$4 sm:$0xff]  }
 0x2a5   :  { %3511 = vmatprep.subr.bf16.mxu0 %v8265_v61  ;;  %3455 = vmatprep.mubr.bf16.mxu1 %v9151_v12  ;;  %v8340_v61 = vld [vmem:[#allocation8 + $0x264] ss:$48 sps:$4 sm:$0xff]  }
 0x2a6   :  { %3541 = vmatprep.mubr.bf16.mxu0 %v9151_v12 }
 0x2a7   :  { %3426 = vmatpush1.bf16.msra.mxu1 %v8260_v0  ;;  %v8343_v0 = vld [vmem:[#allocation8 + $0x26c] ss:$48 sps:$4 sm:$0xff]  }
 0x2a8   :  { %3512 = vmatpush1.bf16.msra.mxu0 %v8263_v1  ;;  %3427 = vmatprep.subr.bf16.mxu1 %v8268_v3  ;;  %v8338_v1 = vld [vmem:[#allocation8 + $0x260] ss:$48 sps:$4 sm:$0xff]   ;;  %v8341_v3 = vld [vmem:[#allocation8 + $0x268] ss:$48 sps:$4 sm:$0xff]  }
 0x2a9   :  { %3513 = vmatprep.subr.bf16.mxu0 %v8271_v4  ;;  %v8346_v4 = vld [vmem:[#allocation8 + $0x2c4] ss:$48 sps:$4 sm:$0xff]  }
 0x2ab   :  { %3428 = vmatpush1.bf16.msra.mxu1 %v8266_v7  ;;  %v8349_v7 = vld [vmem:[#allocation8 + $0x2cc] ss:$48 sps:$4 sm:$0xff]  }
 0x2ac   :  { %3514 = vmatpush1.bf16.msra.mxu0 %v8269_v8  ;;  %3429 = vmatprep.subr.bf16.mxu1 %v8274_v9  ;;  %v8344_v8 = vld [vmem:[#allocation8 + $0x2c0] ss:$48 sps:$4 sm:$0xff]   ;;  %v8347_v9 = vld [vmem:[#allocation8 + $0x2c8] ss:$48 sps:$4 sm:$0xff]  }
 0x2ad   :  { %3515 = vmatprep.subr.bf16.mxu0 %v8277_v10  ;;  %v8352_v10 = vld [vmem:[#allocation8 + $0x324] ss:$48 sps:$4 sm:$0xff]  }
 0x2af   :  { %3430 = vmatpush1.bf16.msra.mxu1 %v8272_v11  ;;  %v8355_v11 = vld [vmem:[#allocation8 + $0x32c] ss:$48 sps:$4 sm:$0xff]  }
 0x2b0   :  { %3516 = vmatpush1.bf16.msra.mxu0 %v8275_v13  ;;  %3431 = vmatprep.subr.bf16.mxu1 %v8280_v14  ;;  %v8350_v13 = vld [vmem:[#allocation8 + $0x320] ss:$48 sps:$4 sm:$0xff]   ;;  %v8353_v14 = vld [vmem:[#allocation8 + $0x328] ss:$48 sps:$4 sm:$0xff]  }
 0x2b1   :  { %3517 = vmatprep.subr.bf16.mxu0 %v8283_v15  ;;  %v8358_v15 = vld [vmem:[#allocation8 + $0x384] ss:$48 sps:$4 sm:$0xff]  }
 0x2b3   :  { %3432 = vmatpush1.bf16.msra.mxu1 %v8278_v16  ;;  %v8361_v16 = vld [vmem:[#allocation8 + $0x38c] ss:$48 sps:$4 sm:$0xff]  }
 0x2b4   :  { %3518 = vmatpush1.bf16.msra.mxu0 %v8281_v17  ;;  %3433 = vmatprep.subr.bf16.mxu1 %v8286_v18  ;;  %v8356_v17 = vld [vmem:[#allocation8 + $0x380] ss:$48 sps:$4 sm:$0xff]   ;;  %v8359_v18 = vld [vmem:[#allocation8 + $0x388] ss:$48 sps:$4 sm:$0xff]  }
 0x2b5   :  { %3519 = vmatprep.subr.bf16.mxu0 %v8289_v19  ;;  %v8364_v19 = vld [vmem:[#allocation8 + $0x3e4] ss:$48 sps:$4 sm:$0xff]  }
 0x2b7   :  { %3434 = vmatpush1.bf16.msra.mxu1 %v8284_v20  ;;  %v8367_v20 = vld [vmem:[#allocation8 + $0x3ec] ss:$48 sps:$4 sm:$0xff]  }
 0x2b8   :  { %3520 = vmatpush1.bf16.msra.mxu0 %v8287_v21  ;;  %3435 = vmatprep.subr.bf16.mxu1 %v8292_v22  ;;  %v8362_v21 = vld [vmem:[#allocation8 + $0x3e0] ss:$48 sps:$4 sm:$0xff]   ;;  %v8365_v22 = vld [vmem:[#allocation8 + $0x3e8] ss:$48 sps:$4 sm:$0xff]  }
 0x2b9   :  { %3521 = vmatprep.subr.bf16.mxu0 %v8295_v23  ;;  %v8370_v23 = vld [vmem:[#allocation8 + $0x444] ss:$48 sps:$4 sm:$0xff]  }
 0x2bb   :  { %3436 = vmatpush1.bf16.msra.mxu1 %v8290_v24  ;;  %v8373_v24 = vld [vmem:[#allocation8 + $0x44c] ss:$48 sps:$4 sm:$0xff]  }
 0x2bc   :  { %3522 = vmatpush1.bf16.msra.mxu0 %v8293_v25  ;;  %3437 = vmatprep.subr.bf16.mxu1 %v8298_v26  ;;  %v8368_v25 = vld [vmem:[#allocation8 + $0x440] ss:$48 sps:$4 sm:$0xff]   ;;  %v8371_v26 = vld [vmem:[#allocation8 + $0x448] ss:$48 sps:$4 sm:$0xff]  }
 0x2bd   :  { %3523 = vmatprep.subr.bf16.mxu0 %v8301_v27  ;;  %v8376_v27 = vld [vmem:[#allocation8 + $0x4a4] ss:$48 sps:$4 sm:$0xff]  }
 0x2bf   :  { %3438 = vmatpush1.bf16.msra.mxu1 %v8296_v28  ;;  %v8379_v28 = vld [vmem:[#allocation8 + $0x4ac] ss:$48 sps:$4 sm:$0xff]  }
 0x2c0   :  { %3524 = vmatpush1.bf16.msra.mxu0 %v8299_v29  ;;  %3552 = vmatprep.subr.bf16.mxu1 %v8304_v30  ;;  %v8374_v29 = vld [vmem:[#allocation8 + $0x4a0] ss:$48 sps:$4 sm:$0xff]   ;;  %v8377_v30 = vld [vmem:[#allocation8 + $0x4a8] ss:$48 sps:$4 sm:$0xff]  }
 0x2c1   :  { %3638 = vmatprep.subr.bf16.mxu0 %v8307_v32  ;;  %v8382_v32 = vld [vmem:[#allocation8 + $0x504] ss:$48 sps:$4 sm:$0xff]  }
 0x2c2   :  { %3456 = vmatmul.mubr.bf16.vlgmr.msra.gmra.mrb[16].mxu1 %v9378_v39 }
 0x2c3   :  { %3542 = vmatmul.mubr.bf16.vlgmr.msra.gmra.mrb[8].mxu0 %v9378_v39  ;;  %3553 = vmatpush1.bf16.msra.mxu1 %v8302_v34  ;;  %v8385_v34 = vld [vmem:[#allocation8 + $0x50c] ss:$48 sps:$4 sm:$0xff]  }
 0x2c4   :  { %3584 = vmatprep.mubr.bf16.mxu1 %v9364_v5  ;;  %3639 = vmatpush1.bf16.msra.mxu0 %v8305_v35  ;;  %v8380_v35 = vld [vmem:[#allocation8 + $0x500] ss:$48 sps:$4 sm:$0xff]  }
 0x2c5   :  { %3670 = vmatprep.mubr.bf16.mxu0 %v9364_v5  ;;  %3554 = vmatprep.subr.bf16.mxu1 %v8310_v36  ;;  %v8326_v5 = vld [vmem:[#allocation8 + $0x1a0] ss:$48 sps:$4 sm:$0xff]   ;;  %v8383_v36 = vld [vmem:[#allocation8 + $0x508] ss:$48 sps:$4 sm:$0xff]  }
 0x2c6   :  { %3640 = vmatprep.subr.bf16.mxu0 %v8313_v37  ;;  %v8388_v37 = vld [vmem:[#allocation8 + $0x564] ss:$48 sps:$4 sm:$0xff]  }
 0x2c7   :  { %3555 = vmatpush1.bf16.msra.mxu1 %v8308_v38  ;;  %v8391_v38 = vld [vmem:[#allocation8 + $0x56c] ss:$48 sps:$4 sm:$0xff]  }
 0x2c8   :  { %3641 = vmatpush1.bf16.msra.mxu0 %v8311_v40  ;;  %3556 = vmatprep.subr.bf16.mxu1 %v8316_v41  ;;  %v8386_v40 = vld [vmem:[#allocation8 + $0x560] ss:$48 sps:$4 sm:$0xff]   ;;  %v8389_v41 = vld [vmem:[#allocation8 + $0x568] ss:$48 sps:$4 sm:$0xff]  }
 0x2c9   :  { %3642 = vmatprep.subr.bf16.mxu0 %v8319_v42  ;;  %v8394_v42 = vld [vmem:[#allocation8 + $0x5c4] ss:$48 sps:$4 sm:$0xff]  }
 0x2cb   :  { %3557 = vmatpush1.bf16.msra.mxu1 %v8314_v43  ;;  %v8397_v43 = vld [vmem:[#allocation8 + $0x5cc] ss:$48 sps:$4 sm:$0xff]  }
 0x2cc   :  { %3643 = vmatpush1.bf16.msra.mxu0 %v8317_v44  ;;  %3558 = vmatprep.subr.bf16.mxu1 %v8322_v45  ;;  %v8392_v44 = vld [vmem:[#allocation8 + $0x5c0] ss:$48 sps:$4 sm:$0xff]   ;;  %v8395_v45 = vld [vmem:[#allocation8 + $0x5c8] ss:$48 sps:$4 sm:$0xff]  }
 0x2cd   :  { %3644 = vmatprep.subr.bf16.mxu0 %v8325_v46  ;;  %v8400_v46 = vld [vmem:[#allocation8 + $0x624] ss:$48 sps:$4 sm:$0xff]  }
 0x2cf   :  { %3559 = vmatpush1.bf16.msra.mxu1 %v8320_v47  ;;  %v8403_v47 = vld [vmem:[#allocation8 + $0x62c] ss:$48 sps:$4 sm:$0xff]  }
 0x2d0   :  { %3645 = vmatpush1.bf16.msra.mxu0 %v8323_v48  ;;  %3560 = vmatprep.subr.bf16.mxu1 %v8328_v49  ;;  %v8398_v48 = vld [vmem:[#allocation8 + $0x620] ss:$48 sps:$4 sm:$0xff]   ;;  %v8401_v49 = vld [vmem:[#allocation8 + $0x628] ss:$48 sps:$4 sm:$0xff]  }
 0x2d1   :  { %3646 = vmatprep.subr.bf16.mxu0 %v8331_v51  ;;  %v8406_v51 = vld [vmem:[#allocation8 + $0x684] ss:$48 sps:$4 sm:$0xff]  }
 0x2d3   :  { %3561 = vmatpush1.bf16.msra.mxu1 %v8326_v5  ;;  %v8409_v5 = vld [vmem:[#allocation8 + $0x68c] ss:$48 sps:$4 sm:$0xff]  }
 0x2d4   :  { %3647 = vmatpush1.bf16.msra.mxu0 %v8329_v55  ;;  %3562 = vmatprep.subr.bf16.mxu1 %v8334_v56  ;;  %v8404_v55 = vld [vmem:[#allocation8 + $0x680] ss:$48 sps:$4 sm:$0xff]   ;;  %v8407_v56 = vld [vmem:[#allocation8 + $0x688] ss:$48 sps:$4 sm:$0xff]  }
 0x2d5   :  { %3648 = vmatprep.subr.bf16.mxu0 %v8337_v57  ;;  %v8412_v57 = vld [vmem:[#allocation8 + $0x6e4] ss:$48 sps:$4 sm:$0xff]  }
 0x2d7   :  { %3563 = vmatpush1.bf16.msra.mxu1 %v8332_v58  ;;  %v8415_v58 = vld [vmem:[#allocation8 + $0x6ec] ss:$48 sps:$4 sm:$0xff]  }
 0x2d8   :  { %3649 = vmatpush1.bf16.msra.mxu0 %v8335_v59  ;;  %3564 = vmatprep.subr.bf16.mxu1 %v8340_v61  ;;  %v8410_v59 = vld [vmem:[#allocation8 + $0x6e0] ss:$48 sps:$4 sm:$0xff]   ;;  %v8413_v61 = vld [vmem:[#allocation8 + $0x6e8] ss:$48 sps:$4 sm:$0xff]  }
 0x2d9   :  { %3650 = vmatprep.subr.bf16.mxu0 %v8343_v0  ;;  %v8418_v0 = vld [vmem:[#allocation8 + $0x744] ss:$48 sps:$4 sm:$0xff]  }
 0x2db   :  { %3565 = vmatpush1.bf16.msra.mxu1 %v8338_v1  ;;  %v8416_v1 = vld [vmem:[#allocation8 + $0x740] ss:$48 sps:$4 sm:$0xff]  }
 0x2dc   :  { %3651 = vmatpush1.bf16.msra.mxu0 %v8341_v3  ;;  %3566 = vmatprep.subr.bf16.mxu1 %v8346_v4  ;;  %v8419_v3 = vld [vmem:[#allocation8 + $0x748] ss:$48 sps:$4 sm:$0xff]   ;;  %v8424_v4 = vld [vmem:[#allocation8 + $0x7a4] ss:$48 sps:$4 sm:$0xff]  }
 0x2dd   :  { %3652 = vmatprep.subr.bf16.mxu0 %v8349_v7  ;;  %v8427_v7 = vld [vmem:[#allocation8 + $0x7ac] ss:$48 sps:$4 sm:$0xff]  }
 0x2df   :  { %3567 = vmatpush1.bf16.msra.mxu1 %v8344_v8  ;;  %v8422_v8 = vld [vmem:[#allocation8 + $0x7a0] ss:$48 sps:$4 sm:$0xff]  }
 0x2e0   :  { %3653 = vmatpush1.bf16.msra.mxu0 %v8347_v9  ;;  %3568 = vmatprep.subr.bf16.mxu1 %v8352_v10  ;;  %v8430_v9 = vld [vmem:[#allocation8 + $0x804] ss:$48 sps:$4 sm:$0xff]   ;;  %v8433_v10 = vld [vmem:[#allocation8 + $0x80c] ss:$48 sps:$4 sm:$0xff]  }
 0x2e1   :  { %3654 = vmatprep.subr.bf16.mxu0 %v8355_v11  ;;  %v8428_v11 = vld [vmem:[#allocation8 + $0x800] ss:$48 sps:$4 sm:$0xff]  }
 0x2e3   :  { %3569 = vmatpush1.bf16.msra.mxu1 %v8350_v13  ;;  %v8431_v13 = vld [vmem:[#allocation8 + $0x808] ss:$48 sps:$4 sm:$0xff]  }
 0x2e4   :  { %3655 = vmatpush1.bf16.msra.mxu0 %v8353_v14  ;;  %3570 = vmatprep.subr.bf16.mxu1 %v8358_v15  ;;  %v8436_v14 = vld [vmem:[#allocation8 + $0x864] ss:$48 sps:$4 sm:$0xff]   ;;  %v8439_v15 = vld [vmem:[#allocation8 + $0x86c] ss:$48 sps:$4 sm:$0xff]  }
 0x2e5   :  { %3656 = vmatprep.subr.bf16.mxu0 %v8361_v16  ;;  %v8434_v16 = vld [vmem:[#allocation8 + $0x860] ss:$48 sps:$4 sm:$0xff]  }
 0x2e7   :  { %3571 = vmatpush1.bf16.msra.mxu1 %v8356_v17  ;;  %v8437_v17 = vld [vmem:[#allocation8 + $0x868] ss:$48 sps:$4 sm:$0xff]  }
 0x2e8   :  { %3657 = vmatpush1.bf16.msra.mxu0 %v8359_v18  ;;  %3572 = vmatprep.subr.bf16.mxu1 %v8364_v19  ;;  %v8442_v18 = vld [vmem:[#allocation8 + $0x8c4] ss:$48 sps:$4 sm:$0xff]   ;;  %v8445_v19 = vld [vmem:[#allocation8 + $0x8cc] ss:$48 sps:$4 sm:$0xff]  }
 0x2e9   :  { %3658 = vmatprep.subr.bf16.mxu0 %v8367_v20  ;;  %v8440_v20 = vld [vmem:[#allocation8 + $0x8c0] ss:$48 sps:$4 sm:$0xff]  }
 0x2eb   :  { %3573 = vmatpush1.bf16.msra.mxu1 %v8362_v21  ;;  %v8443_v21 = vld [vmem:[#allocation8 + $0x8c8] ss:$48 sps:$4 sm:$0xff]  }
 0x2ec   :  { %3659 = vmatpush1.bf16.msra.mxu0 %v8365_v22  ;;  %3574 = vmatprep.subr.bf16.mxu1 %v8370_v23  ;;  %v8448_v22 = vld [vmem:[#allocation11 + $0x4] ss:$12 sps:$4 sm:$0xff]   ;;  %v8464_v23 = vld [vmem:[#allocation11 + $0xc8] ss:$12 sps:$4 sm:$0xff]  }
 0x2ed   :  { %3660 = vmatprep.subr.bf16.mxu0 %v8373_v24  ;;  %v8446_v24 = vld [vmem:[#allocation11] ss:$12 sps:$4 sm:$0xff]  }
 0x2ef   :  { %3575 = vmatpush1.bf16.msra.mxu1 %v8368_v25  ;;  %v8451_v25 = vld [vmem:[#allocation11 + $0x1c] ss:$12 sps:$4 sm:$0xff]  }
 0x2f0   :  { %3661 = vmatpush1.bf16.msra.mxu0 %v8371_v26  ;;  %3576 = vmatprep.subr.bf16.mxu1 %v8376_v27  ;;  %v8465_v26 = vld [vmem:[#allocation11 + $0x8] ss:$12 sps:$4 sm:$0xff]   ;;  %v8469_v27 = vld [vmem:[#allocation11 + $0xe0] ss:$12 sps:$4 sm:$0xff]  }
 0x2f1   :  { %3662 = vmatprep.subr.bf16.mxu0 %v8379_v28  ;;  %v8449_v28 = vld [vmem:[#allocation11 + $0x18] ss:$12 sps:$4 sm:$0xff]  }
 0x2f3   :  { %3577 = vmatpush1.bf16.msra.mxu1 %v8374_v29  ;;  %v8454_v29 = vld [vmem:[#allocation11 + $0x34] ss:$12 sps:$4 sm:$0xff]  }
 0x2f4   :  { %3663 = vmatpush1.bf16.msra.mxu0 %v8377_v30  ;;  %3578 = vmatprep.subr.bf16.mxu1 %v8382_v32  ;;  %v8470_v30 = vld [vmem:[#allocation11 + $0x20] ss:$12 sps:$4 sm:$0xff]   ;;  %v8474_v32 = vld [vmem:[#allocation11 + $0xf8] ss:$12 sps:$4 sm:$0xff]  }
 0x2f5   :  { %3664 = vmatprep.subr.bf16.mxu0 %v8385_v34  ;;  %v8452_v34 = vld [vmem:[#allocation11 + $0x30] ss:$12 sps:$4 sm:$0xff]  }
 0x2f7   :  { %3579 = vmatpush1.bf16.msra.mxu1 %v8380_v35  ;;  %v8457_v35 = vld [vmem:[#allocation11 + $0x4c] ss:$12 sps:$4 sm:$0xff]  }
 0x2f8   :  { %3665 = vmatpush1.bf16.msra.mxu0 %v8383_v36  ;;  %3580 = vmatprep.subr.bf16.mxu1 %v8388_v37  ;;  %v8475_v36 = vld [vmem:[#allocation11 + $0x38] ss:$12 sps:$4 sm:$0xff]   ;;  %v8479_v37 = vld [vmem:[#allocation11 + $0x110] ss:$12 sps:$4 sm:$0xff]  }
 0x2f9   :  { %3666 = vmatprep.subr.bf16.mxu0 %v8391_v38  ;;  %v8455_v38 = vld [vmem:[#allocation11 + $0x48] ss:$12 sps:$4 sm:$0xff]  }
 0x2fb   :  { %3581 = vmatpush1.bf16.msra.mxu1 %v8386_v40  ;;  %v8480_v40 = vld [vmem:[#allocation11 + $0x50] ss:$12 sps:$4 sm:$0xff]  }
 0x2fc   :  { %3667 = vmatpush1.bf16.msra.mxu0 %v8389_v41  ;;  %3582 = vmatprep.subr.bf16.mxu1 %v8394_v42  ;;  %v8484_v41 = vld [vmem:[#allocation11 + $0x128] ss:$12 sps:$4 sm:$0xff]   ;;  %v8458_v42 = vld [vmem:[#allocation11 + $0x60] ss:$12 sps:$4 sm:$0xff]  }
 0x2fd   :  { %3668 = vmatprep.subr.bf16.mxu0 %v8397_v43  ;;  %v9398_v43 = vld [vmem:[#allocation10] sm:$0xff] }
 0x2ff   :  { %3583 = vmatpush1.bf16.msra.mxu1 %v8392_v44  ;;  %v1722_v44 = vsub.s32 3, %v9336_v31 }
 0x300   :  { %3669 = vmatpush1.bf16.msra.mxu0 %v8395_v45  ;;  %3595 = vmatprep.subr.bf16.mxu1 %v8400_v46  ;;  %v8463_v45 = vld [vmem:[#allocation11 + $0x7c] ss:$12 sps:$4 sm:$0xff]  }
 0x301   :  { %3681 = vmatprep.subr.bf16.mxu0 %v8403_v47  ;;  %v8485_v46 = vld [vmem:[#allocation11 + $0x68] ss:$12 sps:$4 sm:$0xff]   ;;  %v8489_v47 = vld [vmem:[#allocation11 + $0x140] ss:$12 sps:$4 sm:$0xff]  }
 0x302   :  { %3585 = vmatmul.mubr.bf16.vlgmr.msra.gmra.mrb[20].mxu1 %v9368_v6 }
 0x303   :  { %3671 = vmatmul.mubr.bf16.vlgmr.msra.gmra.mrb[12].mxu0 %v9368_v6  ;;  %3596 = vmatpush1.bf16.msra.mxu1 %v8398_v48  ;;  %v8421_v6 = vld [vmem:[#allocation8 + $0x74c] ss:$48 sps:$4 sm:$0xff]   ;;  %v1711_v48 = vrot.slane %v9398_v43, %v9347_v53 }
 0x304   :  { %3682 = vmatpush1.bf16.msra.mxu0 %v8401_v49  ;;  %3597 = vmatprep.subr.bf16.mxu1 %v8406_v51  ;;  %v1719_v49 = vrot.slane %v9398_v43, %v9339_v33  ;;  %v1715_v51 = vrot.slane %v9398_v43, %v9350_v54 }
 0x305   :  { %3683 = vmatprep.subr.bf16.mxu0 %v8409_v5  ;;  %3627 = vmatprep.mubr.bf16.mxu1 %v9151_v12  ;;  %v1723_v5 = vrot.slane %v9398_v43, %v1722_v44 }
 0x306   :  { %3713 = vmatprep.mubr.bf16.mxu0 %v9151_v12  ;;  %v8425_v12 = vld [vmem:[#allocation8 + $0x7a8] ss:$48 sps:$4 sm:$0xff]  }
 0x307   :  { %3598 = vmatpush1.bf16.msra.mxu1 %v8404_v55  ;;  %v8461_v55 = vld [vmem:[#allocation11 + $0x78] ss:$12 sps:$4 sm:$0xff]  }
 0x308   :  { %3684 = vmatpush1.bf16.msra.mxu0 %v8407_v56  ;;  %3599 = vmatprep.subr.bf16.mxu1 %v8412_v57  ;;  %v8468_v56 = vld [vmem:[#allocation11 + $0x94] ss:$12 sps:$4 sm:$0xff]  }
 0x309   :  { %3685 = vmatprep.subr.bf16.mxu0 %v8415_v58 }
 0x30b   :  { %3600 = vmatpush1.bf16.msra.mxu1 %v8410_v59  ;;  %v8490_v59 = vld [vmem:[#allocation11 + $0x80] ss:$12 sps:$4 sm:$0xff]  }
 0x30c   :  { %3686 = vmatpush1.bf16.msra.mxu0 %v8413_v61  ;;  %3601 = vmatprep.subr.bf16.mxu1 %v8418_v0 }
 0x30d   :  { %3687 = vmatprep.subr.bf16.mxu0 %v8421_v6 }
 0x30f   :  { %3602 = vmatpush1.bf16.msra.mxu1 %v8416_v1 }
 0x310   :  { %3688 = vmatpush1.bf16.msra.mxu0 %v8419_v3  ;;  %3603 = vmatprep.subr.bf16.mxu1 %v8424_v4  ;;  %v8494_v3 = vld [vmem:[#allocation11 + $0x158] ss:$12 sps:$4 sm:$0xff]  }
 0x311   :  { %3689 = vmatprep.subr.bf16.mxu0 %v8427_v7 }
 0x313   :  { %3604 = vmatpush1.bf16.msra.mxu1 %v8422_v8 }
 0x314   :  { %3690 = vmatpush1.bf16.msra.mxu0 %v8425_v12  ;;  %3605 = vmatprep.subr.bf16.mxu1 %v8430_v9  ;;  %v8466_v9 = vld [vmem:[#allocation11 + $0x90] ss:$12 sps:$4 sm:$0xff]  }
 0x315   :  { %3691 = vmatprep.subr.bf16.mxu0 %v8433_v10 }
 0x317   :  { %3606 = vmatpush1.bf16.msra.mxu1 %v8428_v11 }
 0x318   :  { %3692 = vmatpush1.bf16.msra.mxu0 %v8431_v13  ;;  %3607 = vmatprep.subr.bf16.mxu1 %v8436_v14 }
 0x319   :  { %3693 = vmatprep.subr.bf16.mxu0 %v8439_v15 }
 0x31b   :  { %3608 = vmatpush1.bf16.msra.mxu1 %v8434_v16 }
 0x31c   :  { %3694 = vmatpush1.bf16.msra.mxu0 %v8437_v17  ;;  %3609 = vmatprep.subr.bf16.mxu1 %v8442_v18  ;;  %v8473_v17 = vld [vmem:[#allocation11 + $0xac] ss:$12 sps:$4 sm:$0xff]  }
 0x31d   :  { %3695 = vmatprep.subr.bf16.mxu0 %v8445_v19 }
 0x31f   :  { %3610 = vmatpush1.bf16.msra.mxu1 %v8440_v20 }
 0x320   :  { %3696 = vmatpush1.bf16.msra.mxu0 %v8443_v21  ;;  %5889 = vmatprep.subr.bf16.mxu1 %v8448_v22  ;;  %v8495_v22 = vld [vmem:[#allocation11 + $0x98] ss:$12 sps:$4 sm:$0xff]  }
 0x321   :  { %7523 = vmatprep.subr.bf16.mxu0 %v8464_v23 }
 0x322   :  { %3628 = vmatmul.mubr.bf16.vlgmr.msra.gmra.mrb[20].mxu1 %v9378_v39 }
 0x323   :  { %3714 = vmatmul.mubr.bf16.vlgmr.msra.gmra.mrb[12].mxu0 %v9378_v39  ;;  %5890 = vmatpush1.bf16.msra.mxu1 %v8446_v24  ;;  %v8460_v39 = vld [vmem:[#allocation11 + $0x64] ss:$12 sps:$4 sm:$0xff]  }
 0x324   :  { %5891 = vmatprep.subr.bf16.mxu1 %v8451_v25  ;;  %7524 = vmatpush3.bf16.msra.mxu0 %v8465_v26 }
 0x325   :  { %7525 = vmatprep.subr.bf16.mxu0 %v8469_v27  ;;  %v8499_v27 = vld [vmem:[#allocation11 + $0x170] ss:$12 sps:$4 sm:$0xff]  }
 0x327   :  { %5892 = vmatpush1.bf16.msra.mxu1 %v8449_v28 }
 0x328   :  { %5893 = vmatprep.subr.bf16.mxu1 %v8454_v29  ;;  %7526 = vmatpush3.bf16.msra.mxu0 %v8470_v30 }
 0x329   :  { %7527 = vmatprep.subr.bf16.mxu0 %v8474_v32 }
 0x32b   :  { %5894 = vmatpush1.bf16.msra.mxu1 %v8452_v34  ;;  %v8471_v34 = vld [vmem:[#allocation11 + $0xa8] ss:$12 sps:$4 sm:$0xff]  }
 0x32c   :  { %5895 = vmatprep.subr.bf16.mxu1 %v8457_v35  ;;  %7528 = vmatpush3.bf16.msra.mxu0 %v8475_v36 }
 0x32d   :  { %7529 = vmatprep.subr.bf16.mxu0 %v8479_v37 }
 0x32f   :  { %5896 = vmatpush1.bf16.msra.mxu1 %v8455_v38 }
 0x330   :  { %5897 = vmatprep.subr.bf16.mxu1 %v8460_v39  ;;  %7530 = vmatpush3.bf16.msra.mxu0 %v8480_v40  ;;  %v8478_v39 = vld [vmem:[#allocation11 + $0xc4] ss:$12 sps:$4 sm:$0xff]  }
 0x331   :  { %7531 = vmatprep.subr.bf16.mxu0 %v8484_v41 }
 0x333   :  { %5898 = vmatpush1.bf16.msra.mxu1 %v8458_v42 }
 0x334   :  { %5899 = vmatprep.subr.bf16.mxu1 %v8463_v45  ;;  %7532 = vmatpush3.bf16.msra.mxu0 %v8485_v46  ;;  %v8500_v46 = vld [vmem:[#allocation11 + $0xb0] ss:$12 sps:$4 sm:$0xff]  }
 0x335   :  { %v3285_v57 = vpop.f32.mrb[12].mxu1  ;;  %v3371_v58 = vpop.f32.mrb[4].mxu0  ;;  %7533 = vmatprep.subr.bf16.mxu0 %v8489_v47 }
 0x336   :  { %v9410_v61 = vadd.f32 %v3285_v57, %v1711_v48  ;;  %v9412_v0 = vadd.f32 %v3371_v58, %v1719_v49  ;;  %v3287_v6 = vpop.f32.mrb[13].mxu1  ;;  %v3373_v1 = vpop.f32.mrb[5].mxu0 }
 0x337   :  { %v9414_v4 = vadd.f32 %v3287_v6, %v1715_v51  ;;  %v9416_v7 = vadd.f32 %v3373_v1, %v1723_v5  ;;  %v3289_v8 = vpop.f32.mrb[14].mxu1  ;;  %v3375_v12 = vpop.f32.mrb[6].mxu0  ;;  %5900 = vmatpush1.bf16.msra.mxu1 %v8461_v55 }
 0x338   :  { %v3724_v10 = vmul.f32 %v9410_v61, %v9410_v61  ;;  %v3726_v11 = vmul.f32 %v9412_v0, %v9412_v0  ;;  %v9422_v13 = vadd.f32 %v3289_v8, %v1711_v48  ;;  %v9424_v14 = vadd.f32 %v3375_v12, %v1719_v49  ;;  %v3291_v15 = vpop.f32.mrb[15].mxu1  ;;  %v3377_v16 = vpop.f32.mrb[7].mxu0  ;;  %5901 = vmatprep.subr.bf16.mxu1 %v8468_v56  ;;  %v8483_v12 = vld [vmem:[#allocation11 + $0xdc] ss:$12 sps:$4 sm:$0xff]  }
 0x339   :  { %v3725_v18 = vmul.f32 %v9414_v4, %v9414_v4  ;;  %v3727_v19 = vmul.f32 %v9416_v7, %v9416_v7  ;;  %v9430_v20 = vadd.f32 %v3291_v15, %v1715_v51  ;;  %v9432_v21 = vadd.f32 %v3377_v16, %v1723_v5  ;;  %7534 = vmatpush3.bf16.msra.mxu0 %v8490_v59  ;;  %v8504_v5 = vld [vmem:[#allocation11 + $0x248] ss:$12 sps:$4 sm:$0xff]   ;;  %v8476_v59 = vld [vmem:[#allocation11 + $0xc0] ss:$12 sps:$4 sm:$0xff]  }
 0x33a   :  { %v3748_v23 = vmul.f32 %v9410_v61, %v3724_v10  ;;  %v3750_v24 = vmul.f32 %v9412_v0, %v3726_v11  ;;  %v3736_v25 = vmul.f32 %v9422_v13, %v9422_v13  ;;  %v3738_v26 = vmul.f32 %v9424_v14, %v9424_v14  ;;  %7535 = vmatprep.subr.bf16.mxu0 %v8494_v3 }
 0x33b   :  { %v3749_v28 = vmul.f32 %v9414_v4, %v3725_v18  ;;  %v3751_v29 = vmul.f32 %v9416_v7, %v3727_v19  ;;  %v3737_v30 = vmul.f32 %v9430_v20, %v9430_v20  ;;  %v3739_v32 = vmul.f32 %v9432_v21, %v9432_v21  ;;  %5902 = vmatpush1.bf16.msra.mxu1 %v8466_v9  ;;  %v8481_v18 = vld [vmem:[#allocation11 + $0xd8] ss:$12 sps:$4 sm:$0xff]  }
 0x33c   :  { %v3772_v35 = vmul.f32 0.044715, %v3748_v23  ;;  %v3774_v36 = vmul.f32 0.044715, %v3750_v24  ;;  %v3760_v37 = vmul.f32 %v9422_v13, %v3736_v25  ;;  %v3762_v38 = vmul.f32 %v9424_v14, %v3738_v26  ;;  %5903 = vmatprep.subr.bf16.mxu1 %v8473_v17  ;;  %v8486_v24 = vld [vmem:[#allocation11 + $0xf0] ss:$12 sps:$4 sm:$0xff]  }
 0x33d   :  { %v3773_v40 = vmul.f32 0.044715, %v3749_v28  ;;  %v3775_v41 = vmul.f32 0.044715, %v3751_v29  ;;  %v3761_v42 = vmul.f32 %v9430_v20, %v3737_v30  ;;  %v3763_v45 = vmul.f32 %v9432_v21, %v3739_v32  ;;  %7536 = vmatpush3.bf16.msra.mxu0 %v8495_v22  ;;  %v8488_v22 = vld [vmem:[#allocation11 + $0xf4] ss:$12 sps:$4 sm:$0xff]  }
 0x33e   :  { %v3796_v47 = vadd.f32 %v9410_v61, %v3772_v35  ;;  %v3798_v48 = vadd.f32 %v9412_v0, %v3774_v36  ;;  %v3784_v49 = vmul.f32 0.044715, %v3760_v37  ;;  %v3786_v51 = vmul.f32 0.044715, %v3762_v38  ;;  %7537 = vmatprep.subr.bf16.mxu0 %v8499_v27  ;;  %v8493_v25 = vld [vmem:[#allocation11 + $0x10c] ss:$12 sps:$4 sm:$0xff]  }
 0x33f   :  { %v3797_v55 = vadd.f32 %v9414_v4, %v3773_v40  ;;  %v3799_v56 = vadd.f32 %v9416_v7, %v3775_v41  ;;  %v3785_v57 = vmul.f32 0.044715, %v3761_v42  ;;  %v3787_v58 = vmul.f32 0.044715, %v3763_v45  ;;  %5904 = vmatpush1.bf16.msra.mxu1 %v8471_v34  ;;  %v8491_v26 = vld [vmem:[#allocation11 + $0x108] ss:$12 sps:$4 sm:$0xff]  }
 0x340   :  { %v3820_v6 = vmul.f32 0.7978846, %v3796_v47  ;;  %v3822_v1 = vmul.f32 0.7978846, %v3798_v48  ;;  %v3808_v3 = vadd.f32 %v9422_v13, %v3784_v49  ;;  %v3810_v8 = vadd.f32 %v9424_v14, %v3786_v51  ;;  %5905 = vmatprep.subr.bf16.mxu1 %v8478_v39  ;;  %v8498_v28 = vld [vmem:[#allocation11 + $0x124] ss:$12 sps:$4 sm:$0xff]  }
 0x341   :  { %v3821_v9 = vmul.f32 0.7978846, %v3797_v55  ;;  %v3823_v10 = vmul.f32 0.7978846, %v3799_v56  ;;  %v3809_v11 = vadd.f32 %v9430_v20, %v3785_v57  ;;  %v3811_v15 = vadd.f32 %v9432_v21, %v3787_v58  ;;  %7538 = vmatpush3.bf16.msra.mxu0 %v8500_v46  ;;  %v8496_v36 = vld [vmem:[#allocation11 + $0x120] ss:$12 sps:$4 sm:$0xff]  }
 0x342   :  { %8854 = vtanh.f32 %v3820_v6  ;;  %v3832_v16 = vmul.f32 0.7978846, %v3808_v3  ;;  %7545 = vmatprep.subr.bf16.mxu0 %v8504_v5  ;;  %v3834_v17 = vmul.f32 0.7978846, %v3810_v8  ;;  %v8503_v39 = vld [vmem:[#allocation11 + $0x13c] ss:$12 sps:$4 sm:$0xff]  }
 0x343   :  { %8856 = vtanh.f32 %v3822_v1  ;;  %5906 = vmatpush1.bf16.msra.mxu1 %v8476_v59  ;;  %v3833_v19 = vmul.f32 0.7978846, %v3809_v11  ;;  %v3835_v23 = vmul.f32 0.7978846, %v3811_v15  ;;  %v8501_v5 = vld [vmem:[#allocation11 + $0x138] ss:$12 sps:$4 sm:$0xff]  }
 0x344   :  { %8858 = vtanh.f32 %v3821_v9  ;;  %5907 = vmatprep.subr.bf16.mxu1 %v8483_v12  ;;  %v8508_v58 = vld [vmem:[#allocation11 + $0x154] ss:$12 sps:$4 sm:$0xff]  }
 0x345   :  { %8860 = vtanh.f32 %v3823_v10 }
 0x346   :  { %8862 = vtanh.f32 %v3832_v16 }
 0x347   :  { %8864 = vtanh.f32 %v3834_v17  ;;  %5908 = vmatpush1.bf16.msra.mxu1 %v8481_v18  ;;  %v8506_v17 = vld [vmem:[#allocation11 + $0x150] ss:$12 sps:$4 sm:$0xff]  }
 0x348   :  { %8866 = vtanh.f32 %v3833_v19  ;;  %5909 = vmatprep.subr.bf16.mxu1 %v8488_v22  ;;  %v8505_v22 = vld [vmem:[#allocation11 + $0x188] ss:$12 sps:$4 sm:$0xff]  }
 0x349   :  { %8868 = vtanh.f32 %v3835_v23  ;;  %v8509_v23 = vld [vmem:[#allocation11 + $0x260] ss:$12 sps:$4 sm:$0xff]  }
 0x34b   :  { %5910 = vmatpush1.bf16.msra.mxu1 %v8486_v24  ;;  %v8518_v24 = vld [vmem:[#allocation11 + $0x184] ss:$12 sps:$4 sm:$0xff]  }
 0x34c   :  { %v8855_v27 = vpop.eup %8854  ;;  %5911 = vmatprep.subr.bf16.mxu1 %v8493_v25  ;;  %v8515_v25 = vld [vmem:[#allocation11 + $0x1b8] ss:$12 sps:$4 sm:$0xff]  }
 0x34d   :  { %v8857_v29 = vpop.eup %8856  ;;  %v3868_v30 = vadd.f32 1.0, %v8855_v27  ;;  %v8519_v27 = vld [vmem:[#allocation11 + $0x290] ss:$12 sps:$4 sm:$0xff]  }
 0x34e   :  { %v8859_v32 = vpop.eup %8858  ;;  %v3870_v34 = vadd.f32 1.0, %v8857_v29  ;;  %v8520_v29 = vld [vmem:[#allocation11 + $0x1d0] ss:$12 sps:$4 sm:$0xff]  }
 0x34f   :  { %v8861_v35 = vpop.eup %8860  ;;  %5912 = vmatpush1.bf16.msra.mxu1 %v8491_v26  ;;  %v3869_v37 = vadd.f32 1.0, %v8859_v32  ;;  %v3892_v42 = vmul.f32 0.5, %v3868_v30  ;;  %v8523_v26 = vld [vmem:[#allocation11 + $0x19c] ss:$12 sps:$4 sm:$0xff]   ;;  %v8528_v30 = vld [vmem:[#allocation11 + $0x1b4] ss:$12 sps:$4 sm:$0xff]  }
 0x350   :  { %v8863_v38 = vpop.eup %8862  ;;  %5913 = vmatprep.subr.bf16.mxu1 %v8498_v28  ;;  %v3871_v40 = vadd.f32 1.0, %v8861_v35  ;;  %v3894_v47 = vmul.f32 0.5, %v3870_v34  ;;  %v8521_v28 = vld [vmem:[#allocation11 + $0x198] ss:$12 sps:$4 sm:$0xff]   ;;  %v8524_v32 = vld [vmem:[#allocation11 + $0x2a8] ss:$12 sps:$4 sm:$0xff]  }
 0x351   :  { %v8865_v41 = vpop.eup %8864  ;;  %v3880_v45 = vadd.f32 1.0, %v8863_v38  ;;  %v3893_v56 = vmul.f32 0.5, %v3869_v37  ;;  %v3916_v1 = vmul.f32 %v9410_v61, %v3892_v42  ;;  %v8526_v34 = vld [vmem:[#allocation11 + $0x1b0] ss:$12 sps:$4 sm:$0xff]   ;;  %v8525_v35 = vld [vmem:[#allocation11 + $0x1e8] ss:$12 sps:$4 sm:$0xff]  }
 0x352   :  { %v8867_v46 = vpop.eup %8866  ;;  %v3882_v48 = vadd.f32 1.0, %v8865_v41  ;;  %v3895_v6 = vmul.f32 0.5, %v3871_v40  ;;  %v3918_v12 = vmul.f32 %v9412_v0, %v3894_v47  ;;  %v8529_v37 = vld [vmem:[#allocation11 + $0x2c0] ss:$12 sps:$4 sm:$0xff]   ;;  %v8531_v38 = vld [vmem:[#allocation11 + $0x1c8] ss:$12 sps:$4 sm:$0xff]  }
 0x353   :  { %v8869_v49 = vpop.eup %8868  ;;  %v3904_v51 = vmul.f32 0.5, %v3880_v45  ;;  %5914 = vmatpush1.bf16.msra.mxu1 %v8496_v36  ;;  %v3881_v55 = vadd.f32 1.0, %v8867_v46  ;;  %v3917_v11 = vmul.f32 %v9414_v4, %v3893_v56  ;;  %v8511_v4 = vld [vmem:[#allocation11 + $0x168] ss:$12 sps:$4 sm:$0xff]   ;;  %v8533_v36 = vld [vmem:[#allocation11 + $0x1cc] ss:$12 sps:$4 sm:$0xff]  }
 0x354   :  { %v3906_v57 = vmul.f32 0.5, %v3882_v48  ;;  %5915 = vmatprep.subr.bf16.mxu1 %v8503_v39  ;;  %v3883_v59 = vadd.f32 1.0, %v8869_v49  ;;  %v3919_v18 = vmul.f32 %v9416_v7, %v3895_v6  ;;  %v8514_v7 = vld [vmem:[#allocation11 + $0x278] ss:$12 sps:$4 sm:$0xff]   ;;  %v8530_v39 = vld [vmem:[#allocation11 + $0x200] ss:$12 sps:$4 sm:$0xff]  }
 0x355   :  { %v3928_v3 = vmul.f32 %v9422_v13, %v3904_v51  ;;  %v3905_v8 = vmul.f32 0.5, %v3881_v55  ;;  %v8538_v40 = vld [vmem:[#allocation11 + $0x1e4] ss:$12 sps:$4 sm:$0xff]   ;;  %v8536_v42 = vld [vmem:[#allocation11 + $0x1e0] ss:$12 sps:$4 sm:$0xff]  }
 0x356   :  { %v3930_v9 = vmul.f32 %v9424_v14, %v3906_v57  ;;  %v3907_v10 = vmul.f32 0.5, %v3883_v59  ;;  %v8513_v14 = vld [vmem:[#allocation11 + $0x16c] ss:$12 sps:$4 sm:$0xff]   ;;  %v8543_v46 = vld [vmem:[#allocation11 + $0x1fc] ss:$12 sps:$4 sm:$0xff]  }
 0x357   :  { %5916 = vmatpush1.bf16.msra.mxu1 %v8501_v5  ;;  %v3929_v15 = vmul.f32 %v9430_v20, %v3905_v8  ;;  %v3940_v16 = vpack.c.bf16 %v3928_v3, %v3916_v1  ;;  %v8510_v20 = vld [vmem:[#allocation11 + $0x1a0] ss:$12 sps:$4 sm:$0xff]   ;;  %v8534_v41 = vld [vmem:[#allocation11 + $0x2d8] ss:$12 sps:$4 sm:$0xff]   ;;  %v8539_v47 = vld [vmem:[#allocation11 + $0x2f0] ss:$12 sps:$4 sm:$0xff]  }
 0x358   :  { %5917 = vmatprep.subr.bf16.mxu1 %v8508_v58  ;;  %v3931_v61 = vmul.f32 %v9432_v21, %v3907_v10  ;;  %v9466_v19 = vpack.c.bf16 %v3930_v9, %v3918_v12  ;;  %v8516_v21 = vld [vmem:[#allocation11 + $0x180] ss:$12 sps:$4 sm:$0xff]   ;;  %v8535_v45 = vld [vmem:[#allocation11 + $0x218] ss:$12 sps:$4 sm:$0xff]   ;;  %v8540_v49 = vld [vmem:[#allocation11 + $0x230] ss:$12 sps:$4 sm:$0xff]  }
 0x359   :  { %v3941_v13 = vpack.c.bf16 %v3929_v15, %v3917_v11  ;;  %v8541_v48 = vld [vmem:[#allocation11 + $0x1f8] ss:$12 sps:$4 sm:$0xff]   ;;  %v8546_v51 = vld [vmem:[#allocation11 + $0x214] ss:$12 sps:$4 sm:$0xff]   ;;  %v8544_v55 = vld [vmem:[#allocation11 + $0x210] ss:$12 sps:$4 sm:$0xff]  }
 0x35a   :  { %v3943_v0 = vpack.c.bf16 %v3931_v61, %v3919_v18  ;;  %v8568_v5 = vld [vmem:[#allocation11 + $0x3c8] ss:$12 sps:$4 sm:$0xff]   ;;  %v8549_v56 = vld [vmem:[#allocation11 + $0x22c] ss:$12 sps:$4 sm:$0xff]   ;;  %v8552_v6 = vld [vmem:[#allocation11 + $0x244] ss:$12 sps:$4 sm:$0xff]  }
 0x35b   :  { %5921 = vmatprep.mubr.bf16.mxu1 %v3941_v13  ;;  %6179 = vmatprep.mubr.bf16.mxu0 %v3941_v13  ;;  %v8569_v57 = vld [vmem:[#allocation11 + $0x308] ss:$12 sps:$4 sm:$0xff]   ;;  %v8573_v58 = vld [vmem:[#allocation11 + $0x3e0] ss:$12 sps:$4 sm:$0xff]   ;;  %v8578_v3 = vld [vmem:[#allocation11 + $0x3f8] ss:$12 sps:$4 sm:$0xff]  }
 0x35c   :  { %6180 = vmatmul.mubr.bf16.vlgmr.msra.gmra.mrb[16].mxu0 %v3940_v16  ;;  %5918 = vmatpush1.bf16.msra.mxu1 %v8506_v17  ;;  %v8547_v59 = vld [vmem:[#allocation11 + $0x228] ss:$12 sps:$4 sm:$0xff]   ;;  %v8574_v1 = vld [vmem:[#allocation11 + $0x320] ss:$12 sps:$4 sm:$0xff]   ;;  %v8579_v9 = vld [vmem:[#allocation11 + $0x338] ss:$12 sps:$4 sm:$0xff]  }
 0x35d   :  { %7546 = vmatpush3.bf16.msra.mxu0 %v8505_v22  ;;  %6220 = vmatprep.mubr.bf16.mxu0 %v3943_v0  ;;  %v8550_v8 = vld [vmem:[#allocation11 + $0x240] ss:$12 sps:$4 sm:$0xff]   ;;  %v8555_v12 = vld [vmem:[#allocation11 + $0x25c] ss:$12 sps:$4 sm:$0xff]   ;;  %v8553_v11 = vld [vmem:[#allocation11 + $0x258] ss:$12 sps:$4 sm:$0xff]  }
 0x35e   :  { %7547 = vmatprep.subr.bf16.mxu0 %v8509_v23  ;;  %5919 = vmatprep.subr.bf16.mxu1 %v8513_v14  ;;  %v8583_v10 = vld [vmem:[#allocation11 + $0x410] ss:$12 sps:$4 sm:$0xff]   ;;  %v8558_v15 = vld [vmem:[#allocation11 + $0x274] ss:$12 sps:$4 sm:$0xff]   ;;  %v8561_v61 = vld [vmem:[#allocation11 + $0x28c] ss:$12 sps:$4 sm:$0xff]  }
 0x35f   :  { %v8588_v17 = vld [vmem:[#allocation11 + $0x428] ss:$12 sps:$4 sm:$0xff]   ;;  %v8556_v18 = vld [vmem:[#allocation11 + $0x270] ss:$12 sps:$4 sm:$0xff]   ;;  %v8593_v22 = vld [vmem:[#allocation11 + $0x440] ss:$12 sps:$4 sm:$0xff]  }
 0x360   :  { %5920 = vmatpush1.bf16.msra.mxu1 %v8511_v4  ;;  %v8589_v13 = vld [vmem:[#allocation11 + $0x368] ss:$12 sps:$4 sm:$0xff]   ;;  %v8564_v23 = vld [vmem:[#allocation11 + $0x2a4] ss:$12 sps:$4 sm:$0xff]   ;;  %v8594_v14 = vld [vmem:[#allocation11 + $0x380] ss:$12 sps:$4 sm:$0xff]  }
 0x361   :  { %7548 = vmatpush3.bf16.msra.mxu0 %v8510_v20  ;;  %5932 = vmatprep.subr.bf16.mxu1 %v8518_v24  ;;  %v1726_v4 = vsub.s32 4, %v9336_v31  ;;  %v8598_v20 = vld [vmem:[#allocation11 + $0x458] ss:$12 sps:$4 sm:$0xff]   ;;  %v1734_v24 = vsub.s32 6, %v9336_v31 }
 0x362   :  { %7549 = vmatprep.subr.bf16.mxu0 %v8514_v7  ;;  %v1730_v7 = vsub.s32 5, %v9336_v31 }
 0x363   :  { %5922 = vmatmul.mubr.bf16.vlgmr.msra.gmra.mrb[24].mxu1 %v3940_v16  ;;  %v8584_v16 = vld [vmem:[#allocation11 + $0x350] ss:$12 sps:$4 sm:$0xff]  }
 0x364   :  { %5933 = vmatpush1.bf16.msra.mxu1 %v8516_v21  ;;  %5964 = vmatprep.mubr.bf16.mxu1 %v3943_v0  ;;  %v8559_v0 = vld [vmem:[#allocation11 + $0x288] ss:$12 sps:$4 sm:$0xff]   ;;  %v8562_v21 = vld [vmem:[#allocation11 + $0x2a0] ss:$12 sps:$4 sm:$0xff]  }
 0x365   :  { %7550 = vmatpush3.bf16.msra.mxu0 %v8515_v25  ;;  %5934 = vmatprep.subr.bf16.mxu1 %v8523_v26  ;;  %v1738_v25 = vsub.s32 7, %v9336_v31  ;;  %v8567_v26 = vld [vmem:[#allocation11 + $0x2bc] ss:$12 sps:$4 sm:$0xff]  }
 0x366   :  { %7551 = vmatprep.subr.bf16.mxu0 %v8519_v27  ;;  %v8599_v27 = vld [vmem:[#allocation11 + $0x398] ss:$12 sps:$4 sm:$0xff]  }
 0x368   :  { %5935 = vmatpush1.bf16.msra.mxu1 %v8521_v28  ;;  %v1727_v28 = vrot.slane %v9398_v43, %v1726_v4 }
 0x369   :  { %7552 = vmatpush3.bf16.msra.mxu0 %v8520_v29  ;;  %5936 = vmatprep.subr.bf16.mxu1 %v8528_v30  ;;  %v8603_v29 = vld [vmem:[#allocation11 + $0x470] ss:$12 sps:$4 sm:$0xff]   ;;  %v1735_v30 = vrot.slane %v9398_v43, %v1734_v24 }
 0x36a   :  { %7553 = vmatprep.subr.bf16.mxu0 %v8524_v32  ;;  %v1731_v32 = vrot.slane %v9398_v43, %v1730_v7  ;;  %v8582_v24 = vld [vmem:[#allocation11 + $0x304] ss:$12 sps:$4 sm:$0xff]  }
 0x36c   :  { %5937 = vmatpush1.bf16.msra.mxu1 %v8526_v34  ;;  %v1739_v34 = vrot.slane %v9398_v43, %v1738_v25 }
 0x36d   :  { %7554 = vmatpush3.bf16.msra.mxu0 %v8525_v35  ;;  %5938 = vmatprep.subr.bf16.mxu1 %v8533_v36  ;;  %v8565_v35 = vld [vmem:[#allocation11 + $0x2b8] ss:$12 sps:$4 sm:$0xff]  }
 0x36e   :  { %7555 = vmatprep.subr.bf16.mxu0 %v8529_v37  ;;  %v8572_v37 = vld [vmem:[#allocation11 + $0x2d4] ss:$12 sps:$4 sm:$0xff]  }
 0x370   :  { %5939 = vmatpush1.bf16.msra.mxu1 %v8531_v38 }
 0x371   :  { %7556 = vmatpush3.bf16.msra.mxu0 %v8530_v39  ;;  %5940 = vmatprep.subr.bf16.mxu1 %v8538_v40 }
 0x372   :  { %7557 = vmatprep.subr.bf16.mxu0 %v8534_v41  ;;  %v8604_v41 = vld [vmem:[#allocation11 + $0x3b0] ss:$12 sps:$4 sm:$0xff]  }
 0x374   :  { %5941 = vmatpush1.bf16.msra.mxu1 %v8536_v42 }
 0x375   :  { %7558 = vmatpush3.bf16.msra.mxu0 %v8535_v45  ;;  %5942 = vmatprep.subr.bf16.mxu1 %v8543_v46 }
 0x376   :  { %7559 = vmatprep.subr.bf16.mxu0 %v8539_v47 }
 0x378   :  { %5943 = vmatpush1.bf16.msra.mxu1 %v8541_v48  ;;  %v8608_v48 = vld [vmem:[#allocation11 + $0x548] ss:$12 sps:$4 sm:$0xff]  }
 0x379   :  { %7560 = vmatpush3.bf16.msra.mxu0 %v8540_v49  ;;  %5944 = vmatprep.subr.bf16.mxu1 %v8546_v51 }
 0x37a   :  { %7567 = vmatprep.subr.bf16.mxu0 %v8568_v5 }
 0x37c   :  { %6221 = vmatmul.mubr.bf16.vlgmr.msra.gmra.mrb[20].mxu0 %v9466_v19  ;;  %5945 = vmatpush1.bf16.msra.mxu1 %v8544_v55 }
 0x37d   :  { %5946 = vmatprep.subr.bf16.mxu1 %v8549_v56  ;;  %7568 = vmatpush3.bf16.msra.mxu0 %v8569_v57  ;;  %v8570_v56 = vld [vmem:[#allocation11 + $0x2d0] ss:$12 sps:$4 sm:$0xff]  }
 0x37e   :  { %7569 = vmatprep.subr.bf16.mxu0 %v8573_v58 }
 0x380   :  { %5947 = vmatpush1.bf16.msra.mxu1 %v8547_v59 }
 0x381   :  { %5948 = vmatprep.subr.bf16.mxu1 %v8552_v6  ;;  %7570 = vmatpush3.bf16.msra.mxu0 %v8574_v1 }
 0x382   :  { %7571 = vmatprep.subr.bf16.mxu0 %v8578_v3  ;;  %v8577_v3 = vld [vmem:[#allocation11 + $0x2ec] ss:$12 sps:$4 sm:$0xff]  }
 0x384   :  { %5949 = vmatpush1.bf16.msra.mxu1 %v8550_v8 }
 0x385   :  { %5950 = vmatprep.subr.bf16.mxu1 %v8555_v12  ;;  %7572 = vmatpush3.bf16.msra.mxu0 %v8579_v9 }
 0x386   :  { %7573 = vmatprep.subr.bf16.mxu0 %v8583_v10 }
 0x388   :  { %5951 = vmatpush1.bf16.msra.mxu1 %v8553_v11 }
 0x389   :  { %5952 = vmatprep.subr.bf16.mxu1 %v8558_v15  ;;  %7574 = vmatpush3.bf16.msra.mxu0 %v8584_v16 }
 0x38a   :  { %7575 = vmatprep.subr.bf16.mxu0 %v8588_v17 }
 0x38c   :  { %5953 = vmatpush1.bf16.msra.mxu1 %v8556_v18 }
 0x38d   :  { %5954 = vmatprep.subr.bf16.mxu1 %v8561_v61  ;;  %7576 = vmatpush3.bf16.msra.mxu0 %v8589_v13 }
 0x38e   :  { %7577 = vmatprep.subr.bf16.mxu0 %v8593_v22 }
 0x390   :  { %5955 = vmatpush1.bf16.msra.mxu1 %v8559_v0  ;;  %v8575_v0 = vld [vmem:[#allocation11 + $0x2e8] ss:$12 sps:$4 sm:$0xff]  }
 0x391   :  { %5956 = vmatprep.subr.bf16.mxu1 %v8564_v23  ;;  %7578 = vmatpush3.bf16.msra.mxu0 %v8594_v14 }
 0x392   :  { %7579 = vmatprep.subr.bf16.mxu0 %v8598_v20 }
 0x394   :  { %5957 = vmatpush1.bf16.msra.mxu1 %v8562_v21 }
 0x395   :  { %v3457_v36 = vpop.f32.mrb[16].mxu1  ;;  %5958 = vmatprep.subr.bf16.mxu1 %v8567_v26  ;;  %7580 = vmatpush3.bf16.msra.mxu0 %v8599_v27 }
 0x396   :  { %v9477_v38 = vadd.f32 %v3457_v36, %v1727_v28  ;;  %v3543_v39 = vpop.f32.mrb[8].mxu0  ;;  %v3459_v40 = vpop.f32.mrb[17].mxu1  ;;  %7581 = vmatprep.subr.bf16.mxu0 %v8603_v29 }
 0x397   :  { %v9479_v42 = vadd.f32 %v3543_v39, %v1735_v30  ;;  %v9481_v45 = vadd.f32 %v3459_v40, %v1731_v32  ;;  %v3545_v46 = vpop.f32.mrb[9].mxu0  ;;  %v3461_v47 = vpop.f32.mrb[18].mxu1 }
 0x398   :  { %v3728_v43 = vmul.f32 %v9477_v38, %v9477_v38  ;;  %v9485_v49 = vadd.f32 %v3545_v46, %v1739_v34  ;;  %v9487_v51 = vadd.f32 %v3461_v47, %v1727_v28  ;;  %v3547_v5 = vpop.f32.mrb[10].mxu0  ;;  %5959 = vmatpush1.bf16.msra.mxu1 %v8565_v35  ;;  %v3463_v55 = vpop.f32.mrb[19].mxu1  ;;  %v8587_v47 = vld [vmem:[#allocation11 + $0x31c] ss:$12 sps:$4 sm:$0xff]  }
 0x399   :  { %v3730_v57 = vmul.f32 %v9479_v42, %v9479_v42  ;;  %v3729_v58 = vmul.f32 %v9481_v45, %v9481_v45  ;;  %v9493_v59 = vadd.f32 %v3547_v5, %v1735_v30  ;;  %v9495_v6 = vadd.f32 %v3463_v55, %v1731_v32  ;;  %v3549_v1 = vpop.f32.mrb[11].mxu0  ;;  %5960 = vmatprep.subr.bf16.mxu1 %v8572_v37  ;;  %v8580_v37 = vld [vmem:[#allocation11 + $0x300] ss:$12 sps:$4 sm:$0xff]  }
 0x39a   :  { %v3752_v8 = vmul.f32 %v9477_v38, %v3728_v43  ;;  %v3731_v12 = vmul.f32 %v9485_v49, %v9485_v49  ;;  %v3740_v9 = vmul.f32 %v9487_v51, %v9487_v51  ;;  %v9502_v10 = vadd.f32 %v3549_v1, %v1739_v34  ;;  %7582 = vmatpush3.bf16.msra.mxu0 %v8604_v41  ;;  %v8592_v1 = vld [vmem:[#allocation11 + $0x334] ss:$12 sps:$4 sm:$0xff]  }
 0x39b   :  { %v3754_v11 = vmul.f32 %v9479_v42, %v3730_v57  ;;  %v3753_v15 = vmul.f32 %v9481_v45, %v3729_v58  ;;  %v3742_v16 = vmul.f32 %v9493_v59, %v9493_v59  ;;  %v3741_v17 = vmul.f32 %v9495_v6, %v9495_v6  ;;  %7589 = vmatprep.subr.bf16.mxu0 %v8608_v48  ;;  %v8585_v57 = vld [vmem:[#allocation11 + $0x318] ss:$12 sps:$4 sm:$0xff]  }
 0x39c   :  { %v3776_v18 = vmul.f32 0.044715, %v3752_v8  ;;  %v3755_v61 = vmul.f32 %v9485_v49, %v3731_v12  ;;  %v3764_v13 = vmul.f32 %v9487_v51, %v3740_v9  ;;  %v3743_v22 = vmul.f32 %v9502_v10, %v9502_v10  ;;  %5961 = vmatpush1.bf16.msra.mxu1 %v8570_v56  ;;  %v8597_v8 = vld [vmem:[#allocation11 + $0x34c] ss:$12 sps:$4 sm:$0xff]   ;;  %v8595_v9 = vld [vmem:[#allocation11 + $0x348] ss:$12 sps:$4 sm:$0xff]  }
 0x39d   :  { %v3778_v23 = vmul.f32 0.044715, %v3754_v11  ;;  %v3777_v14 = vmul.f32 0.044715, %v3753_v15  ;;  %v3766_v4 = vmul.f32 %v9493_v59, %v3742_v16  ;;  %v3765_v20 = vmul.f32 %v9495_v6, %v3741_v17  ;;  %5962 = vmatprep.subr.bf16.mxu1 %v8577_v3  ;;  %v8590_v3 = vld [vmem:[#allocation11 + $0x330] ss:$12 sps:$4 sm:$0xff]  }
 0x39e   :  { %v3800_v7 = vadd.f32 %v9477_v38, %v3776_v18  ;;  %v3779_v21 = vmul.f32 0.044715, %v3755_v61  ;;  %v3788_v25 = vmul.f32 0.044715, %v3764_v13  ;;  %v3767_v26 = vmul.f32 %v9502_v10, %v3743_v22  ;;  %v8602_v15 = vld [vmem:[#allocation11 + $0x364] ss:$12 sps:$4 sm:$0xff]  }
 0x39f   :  { %v3802_v27 = vadd.f32 %v9479_v42, %v3778_v23  ;;  %v3801_v28 = vadd.f32 %v9481_v45, %v3777_v14  ;;  %v3790_v29 = vmul.f32 0.044715, %v3766_v4  ;;  %v3789_v30 = vmul.f32 0.044715, %v3765_v20  ;;  %v8600_v22 = vld [vmem:[#allocation11 + $0x360] ss:$12 sps:$4 sm:$0xff]  }
 0x3a0   :  { %v3824_v32 = vmul.f32 0.7978846, %v3800_v7  ;;  %v3803_v34 = vadd.f32 %v9485_v49, %v3779_v21  ;;  %v3812_v35 = vadd.f32 %v9487_v51, %v3788_v25  ;;  %v3791_v36 = vmul.f32 0.044715, %v3767_v26  ;;  %5963 = vmatpush1.bf16.msra.mxu1 %v8575_v0  ;;  %v8607_v20 = vld [vmem:[#allocation11 + $0x37c] ss:$12 sps:$4 sm:$0xff]  }
 0x3a1   :  { %v3826_v39 = vmul.f32 0.7978846, %v3802_v27  ;;  %v3825_v40 = vmul.f32 0.7978846, %v3801_v28  ;;  %v3814_v41 = vadd.f32 %v9493_v59, %v3790_v29  ;;  %v3813_v46 = vadd.f32 %v9495_v6, %v3789_v30  ;;  %5975 = vmatprep.subr.bf16.mxu1 %v8582_v24  ;;  %v8605_v30 = vld [vmem:[#allocation11 + $0x378] ss:$12 sps:$4 sm:$0xff]  }
 0x3a2   :  { %8870 = vtanh.f32 %v3824_v32  ;;  %v3827_v48 = vmul.f32 0.7978846, %v3803_v34  ;;  %v3836_v43 = vmul.f32 0.7978846, %v3812_v35  ;;  %v3815_v5 = vadd.f32 %v9502_v10, %v3791_v36 }
 0x3a3   :  { %8872 = vtanh.f32 %v3826_v39  ;;  %v3838_v55 = vmul.f32 0.7978846, %v3814_v41  ;;  %5965 = vmatmul.mubr.bf16.vlgmr.msra.gmra.mrb[24].mxu1 %v9466_v19  ;;  %v3837_v56 = vmul.f32 0.7978846, %v3813_v46  ;;  %v8612_v39 = vld [vmem:[#allocation11 + $0x394] ss:$12 sps:$4 sm:$0xff]  }
 0x3a4   :  { %8874 = vtanh.f32 %v3825_v40  ;;  %5976 = vmatpush1.bf16.msra.mxu1 %v8580_v37  ;;  %v3839_v58 = vmul.f32 0.7978846, %v3815_v5  ;;  %v8610_v5 = vld [vmem:[#allocation11 + $0x390] ss:$12 sps:$4 sm:$0xff]  }
 0x3a5   :  { %8876 = vtanh.f32 %v3827_v48  ;;  %5977 = vmatprep.subr.bf16.mxu1 %v8587_v47 }
 0x3a6   :  { %8878 = vtanh.f32 %v3836_v43 }
 0x3a7   :  { %8880 = vtanh.f32 %v3838_v55 }
 0x3a8   :  { %8882 = vtanh.f32 %v3837_v56  ;;  %5978 = vmatpush1.bf16.msra.mxu1 %v8585_v57  ;;  %v8609_v57 = vld [vmem:[#allocation11 + $0x488] ss:$12 sps:$4 sm:$0xff]  }
 0x3a9   :  { %8884 = vtanh.f32 %v3839_v58  ;;  %5979 = vmatprep.subr.bf16.mxu1 %v8592_v1  ;;  %v8617_v58 = vld [vmem:[#allocation11 + $0x3ac] ss:$12 sps:$4 sm:$0xff]  }
 0x3aa   :  { %v8620_v1 = vld [vmem:[#allocation11 + $0x3c0] ss:$12 sps:$4 sm:$0xff]  }
 0x3ac   :  { %v8871_v12 = vpop.eup %8870  ;;  %5980 = vmatpush1.bf16.msra.mxu1 %v8590_v3  ;;  %v8619_v3 = vld [vmem:[#allocation11 + $0x4b8] ss:$12 sps:$4 sm:$0xff]  }
 0x3ad   :  { %v8873_v19 = vpop.eup %8872  ;;  %v3872_v11 = vadd.f32 1.0, %v8871_v12  ;;  %5981 = vmatprep.subr.bf16.mxu1 %v8597_v8  ;;  %v8627_v8 = vld [vmem:[#allocation11 + $0x3dc] ss:$12 sps:$4 sm:$0xff]  }
 0x3ae   :  { %v8875_v16 = vpop.eup %8874  ;;  %v3874_v17 = vadd.f32 1.0, %v8873_v19  ;;  %v8623_v12 = vld [vmem:[#allocation11 + $0x590] ss:$12 sps:$4 sm:$0xff]  }
 0x3af   :  { %v8877_v18 = vpop.eup %8876  ;;  %v3873_v61 = vadd.f32 1.0, %v8875_v16  ;;  %v3896_v14 = vmul.f32 0.5, %v3872_v11  ;;  %v8624_v19 = vld [vmem:[#allocation11 + $0x4d0] ss:$12 sps:$4 sm:$0xff]   ;;  %v8632_v11 = vld [vmem:[#allocation11 + $0x3f4] ss:$12 sps:$4 sm:$0xff]  }
 0x3b0   :  { %v8879_v13 = vpop.eup %8878  ;;  %5982 = vmatpush1.bf16.msra.mxu1 %v8595_v9  ;;  %v3875_v0 = vadd.f32 1.0, %v8877_v18  ;;  %v3898_v7 = vmul.f32 0.5, %v3874_v17  ;;  %v8625_v9 = vld [vmem:[#allocation11 + $0x3d8] ss:$12 sps:$4 sm:$0xff]   ;;  %v8630_v16 = vld [vmem:[#allocation11 + $0x3f0] ss:$12 sps:$4 sm:$0xff]  }
 0x3b1   :  { %v8881_v23 = vpop.eup %8880  ;;  %v3884_v4 = vadd.f32 1.0, %v8879_v13  ;;  %5983 = vmatprep.subr.bf16.mxu1 %v8602_v15  ;;  %v3897_v28 = vmul.f32 0.5, %v3873_v61  ;;  %v3920_v35 = vmul.f32 %v9477_v38, %v3896_v14  ;;  %v8628_v15 = vld [vmem:[#allocation11 + $0x5a8] ss:$12 sps:$4 sm:$0xff]   ;;  %v8637_v18 = vld [vmem:[#allocation11 + $0x40c] ss:$12 sps:$4 sm:$0xff]  }
 0x3b2   :  { %v8883_v24 = vpop.eup %8882  ;;  %v3886_v21 = vadd.f32 1.0, %v8881_v23  ;;  %v3899_v34 = vmul.f32 0.5, %v3875_v0  ;;  %v3922_v40 = vmul.f32 %v9479_v42, %v3898_v7  ;;  %v8629_v17 = vld [vmem:[#allocation11 + $0x4e8] ss:$12 sps:$4 sm:$0xff]   ;;  %v8633_v61 = vld [vmem:[#allocation11 + $0x5c0] ss:$12 sps:$4 sm:$0xff]  }
 0x3b3   :  { %v8885_v25 = vpop.eup %8884  ;;  %v3908_v26 = vmul.f32 0.5, %v3884_v4  ;;  %v3885_v27 = vadd.f32 1.0, %v8883_v24  ;;  %v3921_v47 = vmul.f32 %v9481_v45, %v3897_v28  ;;  %v8615_v45 = vld [vmem:[#allocation11 + $0x3a8] ss:$12 sps:$4 sm:$0xff]   ;;  %v8642_v0 = vld [vmem:[#allocation11 + $0x424] ss:$12 sps:$4 sm:$0xff]  }
 0x3b4   :  { %v3910_v29 = vmul.f32 0.5, %v3886_v21  ;;  %5984 = vmatpush1.bf16.msra.mxu1 %v8600_v22  ;;  %v3887_v32 = vadd.f32 1.0, %v8885_v25  ;;  %v3923_v38 = vmul.f32 %v9485_v49, %v3899_v34  ;;  %v8614_v49 = vld [vmem:[#allocation11 + $0x4a0] ss:$12 sps:$4 sm:$0xff]   ;;  %v8635_v13 = vld [vmem:[#allocation11 + $0x408] ss:$12 sps:$4 sm:$0xff]  }
 0x3b5   :  { %v3932_v36 = vmul.f32 %v9487_v51, %v3908_v26  ;;  %5985 = vmatprep.subr.bf16.mxu1 %v8607_v20  ;;  %v3909_v37 = vmul.f32 0.5, %v3885_v27  ;;  %v8634_v22 = vld [vmem:[#allocation11 + $0x500] ss:$12 sps:$4 sm:$0xff]   ;;  %v8638_v23 = vld [vmem:[#allocation11 + $0x5d8] ss:$12 sps:$4 sm:$0xff]  }
 0x3b6   :  { %v3934_v41 = vmul.f32 %v9493_v59, %v3910_v29  ;;  %v3911_v46 = vmul.f32 0.5, %v3887_v32  ;;  %v8613_v59 = vld [vmem:[#allocation11 + $0x560] ss:$12 sps:$4 sm:$0xff]   ;;  %v8639_v4 = vld [vmem:[#allocation11 + $0x518] ss:$12 sps:$4 sm:$0xff]  }
 0x3b7   :  { %v3933_v48 = vmul.f32 %v9495_v6, %v3909_v37  ;;  %v9532_v43 = vpack.c.bf16 %v3932_v36, %v3920_v35  ;;  %v8622_v6 = vld [vmem:[#allocation11 + $0x3c4] ss:$12 sps:$4 sm:$0xff]   ;;  %v8640_v14 = vld [vmem:[#allocation11 + $0x420] ss:$12 sps:$4 sm:$0xff]   ;;  %v8647_v20 = vld [vmem:[#allocation11 + $0x43c] ss:$12 sps:$4 sm:$0xff]  }
 0x3b8   :  { %5986 = vmatpush1.bf16.msra.mxu1 %v8605_v30  ;;  %v3935_v51 = vmul.f32 %v9502_v10, %v3911_v46  ;;  %v9536_v55 = vpack.c.bf16 %v3934_v41, %v3922_v40  ;;  %v8618_v10 = vld [vmem:[#allocation11 + $0x578] ss:$12 sps:$4 sm:$0xff]   ;;  %v8643_v24 = vld [vmem:[#allocation11 + $0x5f0] ss:$12 sps:$4 sm:$0xff]   ;;  %v8650_v25 = vld [vmem:[#allocation11 + $0x454] ss:$12 sps:$4 sm:$0xff]  }
 0x3b9   :  { %v3945_v56 = vpack.c.bf16 %v3933_v48, %v3921_v47  ;;  %5987 = vmatprep.subr.bf16.mxu1 %v8612_v39  ;;  %v8645_v7 = vld [vmem:[#allocation11 + $0x438] ss:$12 sps:$4 sm:$0xff]   ;;  %v8644_v21 = vld [vmem:[#allocation11 + $0x530] ss:$12 sps:$4 sm:$0xff]   ;;  %v8672_v26 = vld [vmem:[#allocation11 + $0x6c8] ss:$12 sps:$4 sm:$0xff]  }
 0x3ba   :  { %v9538_v42 = vpack.c.bf16 %v3935_v51, %v3923_v38  ;;  %v8648_v27 = vld [vmem:[#allocation11 + $0x450] ss:$12 sps:$4 sm:$0xff]   ;;  %v8653_v28 = vld [vmem:[#allocation11 + $0x46c] ss:$12 sps:$4 sm:$0xff]   ;;  %v8673_v29 = vld [vmem:[#allocation11 + $0x608] ss:$12 sps:$4 sm:$0xff]  }
 0x3bb   :  { %6007 = vmatprep.mubr.bf16.mxu1 %v3945_v56  ;;  %6261 = vmatprep.mubr.bf16.mxu0 %v3945_v56  ;;  %v8677_v30 = vld [vmem:[#allocation11 + $0x6e0] ss:$12 sps:$4 sm:$0xff]   ;;  %v8651_v32 = vld [vmem:[#allocation11 + $0x468] ss:$12 sps:$4 sm:$0xff]   ;;  %v8656_v34 = vld [vmem:[#allocation11 + $0x484] ss:$12 sps:$4 sm:$0xff]  }
 0x3bc   :  { %6262 = vmatmul.mubr.bf16.vlgmr.msra.gmra.mrb[24].mxu0 %v9532_v43  ;;  %5988 = vmatpush1.bf16.msra.mxu1 %v8610_v5  ;;  %v8678_v35 = vld [vmem:[#allocation11 + $0x620] ss:$12 sps:$4 sm:$0xff]   ;;  %v8682_v36 = vld [vmem:[#allocation11 + $0x6f8] ss:$12 sps:$4 sm:$0xff]   ;;  %v8659_v39 = vld [vmem:[#allocation11 + $0x49c] ss:$12 sps:$4 sm:$0xff]  }
 0x3bd   :  { %7590 = vmatpush3.bf16.msra.mxu0 %v8609_v57  ;;  %6302 = vmatprep.mubr.bf16.mxu0 %v9538_v42  ;;  %v8654_v37 = vld [vmem:[#allocation11 + $0x480] ss:$12 sps:$4 sm:$0xff]   ;;  %v8683_v40 = vld [vmem:[#allocation11 + $0x638] ss:$12 sps:$4 sm:$0xff]   ;;  %v8687_v41 = vld [vmem:[#allocation11 + $0x710] ss:$12 sps:$4 sm:$0xff]  }
 0x3be   :  { %7591 = vmatprep.subr.bf16.mxu0 %v8613_v59  ;;  %5989 = vmatprep.subr.bf16.mxu1 %v8617_v58  ;;  %v8657_v46 = vld [vmem:[#allocation11 + $0x498] ss:$12 sps:$4 sm:$0xff]   ;;  %v8662_v47 = vld [vmem:[#allocation11 + $0x4b4] ss:$12 sps:$4 sm:$0xff]   ;;  %v8688_v48 = vld [vmem:[#allocation11 + $0x650] ss:$12 sps:$4 sm:$0xff]  }
 0x3bf   :  { %v8692_v5 = vld [vmem:[#allocation11 + $0x728] ss:$12 sps:$4 sm:$0xff]   ;;  %v8660_v38 = vld [vmem:[#allocation11 + $0x4b0] ss:$12 sps:$4 sm:$0xff]   ;;  %v8665_v51 = vld [vmem:[#allocation11 + $0x4cc] ss:$12 sps:$4 sm:$0xff]  }
 0x3c0   :  { %5990 = vmatpush1.bf16.msra.mxu1 %v8615_v45  ;;  %v8693_v56 = vld [vmem:[#allocation11 + $0x668] ss:$12 sps:$4 sm:$0xff]   ;;  %v8697_v57 = vld [vmem:[#allocation11 + $0x740] ss:$12 sps:$4 sm:$0xff]   ;;  %v8668_v59 = vld [vmem:[#allocation11 + $0x4e4] ss:$12 sps:$4 sm:$0xff]  }
 0x3c1   :  { %7592 = vmatpush3.bf16.msra.mxu0 %v8614_v49  ;;  %5991 = vmatprep.subr.bf16.mxu1 %v8622_v6  ;;  %v8702_v58 = vld [vmem:[#allocation11 + $0x758] ss:$12 sps:$4 sm:$0xff]   ;;  %v1705_v45 = vld [vmem:[#allocation10 + $0x8] sm:$0xf]  ;;  %v8666_v49 = vld [vmem:[#allocation11 + $0x4e0] ss:$12 sps:$4 sm:$0xff]  }
 0x3c2   :  { %7593 = vmatprep.subr.bf16.mxu0 %v8618_v10  ;;  %v8671_v6 = vld [vmem:[#allocation11 + $0x4fc] ss:$12 sps:$4 sm:$0xff]   ;;  %v8703_v10 = vld [vmem:[#allocation11 + $0x698] ss:$12 sps:$4 sm:$0xff]  }
 0x3c4   :  { %5992 = vmatpush1.bf16.msra.mxu1 %v8620_v1  ;;  %v1743_v1 = vrot.slane %v1705_v45, %v9347_v53 }
 0x3c5   :  { %7594 = vmatpush3.bf16.msra.mxu0 %v8619_v3  ;;  %5993 = vmatprep.subr.bf16.mxu1 %v8627_v8  ;;  %v8707_v3 = vld [vmem:[#allocation11 + $0x770] ss:$12 sps:$4 sm:$0xff]   ;;  %v1751_v8 = vrot.slane %v1705_v45, %v9339_v33 }
 0x3c6   :  { %7595 = vmatprep.subr.bf16.mxu0 %v8623_v12  ;;  %v1747_v12 = vrot.slane %v1705_v45, %v9350_v54 }
 0x3c8   :  { %5994 = vmatpush1.bf16.msra.mxu1 %v8625_v9  ;;  %v1755_v9 = vrot.slane %v1705_v45, %v1722_v44 }
 0x3c9   :  { %7596 = vmatpush3.bf16.msra.mxu0 %v8624_v19  ;;  %5995 = vmatprep.subr.bf16.mxu1 %v8632_v11  ;;  %v8669_v19 = vld [vmem:[#allocation11 + $0x4f8] ss:$12 sps:$4 sm:$0xff]  }
 0x3ca   :  { %7597 = vmatprep.subr.bf16.mxu0 %v8628_v15  ;;  %v8676_v15 = vld [vmem:[#allocation11 + $0x514] ss:$12 sps:$4 sm:$0xff]  }
 0x3cc   :  { %5996 = vmatpush1.bf16.msra.mxu1 %v8630_v16 }
 0x3cd   :  { %7598 = vmatpush3.bf16.msra.mxu0 %v8629_v17  ;;  %5997 = vmatprep.subr.bf16.mxu1 %v8637_v18 }
 0x3ce   :  { %7599 = vmatprep.subr.bf16.mxu0 %v8633_v61  ;;  %v8708_v61 = vld [vmem:[#allocation11 + $0x6b0] ss:$12 sps:$4 sm:$0xff]  }
 0x3d0   :  { %5998 = vmatpush1.bf16.msra.mxu1 %v8635_v13 }
 0x3d1   :  { %7600 = vmatpush3.bf16.msra.mxu0 %v8634_v22  ;;  %5999 = vmatprep.subr.bf16.mxu1 %v8642_v0 }
 0x3d2   :  { %7601 = vmatprep.subr.bf16.mxu0 %v8638_v23 }
 0x3d4   :  { %6000 = vmatpush1.bf16.msra.mxu1 %v8640_v14  ;;  %v8712_v14 = vld [vmem:[#allocation11 + $0x848] ss:$12 sps:$4 sm:$0xff]  }
 0x3d5   :  { %7602 = vmatpush3.bf16.msra.mxu0 %v8639_v4  ;;  %6001 = vmatprep.subr.bf16.mxu1 %v8647_v20 }
 0x3d6   :  { %7603 = vmatprep.subr.bf16.mxu0 %v8643_v24 }
 0x3d8   :  { %6002 = vmatpush1.bf16.msra.mxu1 %v8645_v7  ;;  %v8674_v7 = vld [vmem:[#allocation11 + $0x510] ss:$12 sps:$4 sm:$0xff]  }
 0x3d9   :  { %7604 = vmatpush3.bf16.msra.mxu0 %v8644_v21  ;;  %6003 = vmatprep.subr.bf16.mxu1 %v8650_v25 }
 0x3da   :  { %7611 = vmatprep.subr.bf16.mxu0 %v8672_v26 }
 0x3dc   :  { %6303 = vmatmul.mubr.bf16.vlgmr.msra.gmra.mrb[28].mxu0 %v9536_v55  ;;  %6004 = vmatpush1.bf16.msra.mxu1 %v8648_v27 }
 0x3dd   :  { %6005 = vmatprep.subr.bf16.mxu1 %v8653_v28  ;;  %7612 = vmatpush3.bf16.msra.mxu0 %v8673_v29  ;;  %v8681_v29 = vld [vmem:[#allocation11 + $0x52c] ss:$12 sps:$4 sm:$0xff]  }
 0x3de   :  { %7613 = vmatprep.subr.bf16.mxu0 %v8677_v30 }
 0x3e0   :  { %6006 = vmatpush1.bf16.msra.mxu1 %v8651_v32 }
 0x3e1   :  { %6018 = vmatprep.subr.bf16.mxu1 %v8656_v34  ;;  %7614 = vmatpush3.bf16.msra.mxu0 %v8678_v35 }
 0x3e2   :  { %7615 = vmatprep.subr.bf16.mxu0 %v8682_v36 }
 0x3e3   :  { %6008 = vmatmul.mubr.bf16.vlgmr.msra.gmra.mrb[24].mxu1 %v9532_v43  ;;  %v8663_v43 = vld [vmem:[#allocation11 + $0x4c8] ss:$12 sps:$4 sm:$0xff]  }
 0x3e4   :  { %6019 = vmatpush1.bf16.msra.mxu1 %v8654_v37  ;;  %6050 = vmatprep.mubr.bf16.mxu1 %v9538_v42  ;;  %v8698_v42 = vld [vmem:[#allocation11 + $0x680] ss:$12 sps:$4 sm:$0xff]  }
 0x3e5   :  { %6020 = vmatprep.subr.bf16.mxu1 %v8659_v39  ;;  %7616 = vmatpush3.bf16.msra.mxu0 %v8683_v40 }
 0x3e6   :  { %7617 = vmatprep.subr.bf16.mxu0 %v8687_v41 }
 0x3e8   :  { %6021 = vmatpush1.bf16.msra.mxu1 %v8657_v46 }
 0x3e9   :  { %6022 = vmatprep.subr.bf16.mxu1 %v8662_v47  ;;  %7618 = vmatpush3.bf16.msra.mxu0 %v8688_v48 }
 0x3ea   :  { %7619 = vmatprep.subr.bf16.mxu0 %v8692_v5  ;;  %v8679_v5 = vld [vmem:[#allocation11 + $0x528] ss:$12 sps:$4 sm:$0xff]  }
 0x3ec   :  { %6023 = vmatpush1.bf16.msra.mxu1 %v8660_v38 }
 0x3ed   :  { %6024 = vmatprep.subr.bf16.mxu1 %v8665_v51  ;;  %7620 = vmatpush3.bf16.msra.mxu0 %v8693_v56 }
 0x3ee   :  { %7621 = vmatprep.subr.bf16.mxu0 %v8697_v57 }
 0x3f0   :  { %6025 = vmatpush1.bf16.msra.mxu1 %v8663_v43  ;;  %v8686_v43 = vld [vmem:[#allocation11 + $0x544] ss:$12 sps:$4 sm:$0xff]  }
 0x3f1   :  { %6026 = vmatprep.subr.bf16.mxu1 %v8668_v59  ;;  %7622 = vmatpush3.bf16.msra.mxu0 %v8698_v42 }
 0x3f2   :  { %7623 = vmatprep.subr.bf16.mxu0 %v8702_v58 }
 0x3f4   :  { %6027 = vmatpush1.bf16.msra.mxu1 %v8666_v49 }
 0x3f5   :  { %v3629_v11 = vpop.f32.mrb[20].mxu1  ;;  %6028 = vmatprep.subr.bf16.mxu1 %v8671_v6  ;;  %7624 = vmatpush3.bf16.msra.mxu0 %v8703_v10 }
 0x3f6   :  { %v9550_v16 = vadd.f32 %v3629_v11, %v1743_v1  ;;  %v3715_v17 = vpop.f32.mrb[12].mxu0  ;;  %v3631_v18 = vpop.f32.mrb[21].mxu1  ;;  %7625 = vmatprep.subr.bf16.mxu0 %v8707_v3 }
 0x3f7   :  { %v9552_v13 = vadd.f32 %v3715_v17, %v1751_v8  ;;  %v9554_v22 = vadd.f32 %v3631_v18, %v1747_v12  ;;  %v3717_v0 = vpop.f32.mrb[13].mxu0  ;;  %v3633_v23 = vpop.f32.mrb[22].mxu1 }
 0x3f8   :  { %v3732_v31 = vmul.f32 %v9550_v16, %v9550_v16  ;;  %v9558_v44 = vadd.f32 %v3717_v0, %v1755_v9  ;;  %v9560_v4 = vadd.f32 %v3633_v23, %v1743_v1  ;;  %v3719_v20 = vpop.f32.mrb[14].mxu0  ;;  %6029 = vmatpush1.bf16.msra.mxu1 %v8669_v19  ;;  %v3635_v24 = vpop.f32.mrb[23].mxu1  ;;  %v8684_v19 = vld [vmem:[#allocation11 + $0x540] ss:$12 sps:$4 sm:$0xff]  }
 0x3f9   :  { %v3734_v21 = vmul.f32 %v9552_v13, %v9552_v13  ;;  %v3733_v25 = vmul.f32 %v9554_v22, %v9554_v22  ;;  %v9566_v26 = vadd.f32 %v3719_v20, %v1751_v8  ;;  %v9568_v27 = vadd.f32 %v3635_v24, %v1747_v12  ;;  %v3721_v28 = vpop.f32.mrb[15].mxu0  ;;  %6030 = vmatprep.subr.bf16.mxu1 %v8676_v15  ;;  %v8689_v24 = vld [vmem:[#allocation11 + $0x558] ss:$12 sps:$4 sm:$0xff]  }
 0x3fa   :  { %v3756_v30 = vmul.f32 %v9550_v16, %v3732_v31  ;;  %v3735_v32 = vmul.f32 %v9558_v44, %v9558_v44  ;;  %v3744_v34 = vmul.f32 %v9560_v4, %v9560_v4  ;;  %v9575_v35 = vadd.f32 %v3721_v28, %v1755_v9  ;;  %7626 = vmatpush3.bf16.msra.mxu0 %v8708_v61  ;;  %v8691_v61 = vld [vmem:[#allocation11 + $0x55c] ss:$12 sps:$4 sm:$0xff]   ;;  %v8701_v28 = vld [vmem:[#allocation11 + $0x58c] ss:$12 sps:$4 sm:$0xff]  }
 0x3fb   :  { %v3758_v36 = vmul.f32 %v9552_v13, %v3734_v21  ;;  %v3757_v37 = vmul.f32 %v9554_v22, %v3733_v25  ;;  %v3746_v39 = vmul.f32 %v9566_v26, %v9566_v26  ;;  %v3745_v40 = vmul.f32 %v9568_v27, %v9568_v27  ;;  %7633 = vmatprep.subr.bf16.mxu0 %v8712_v14  ;;  %v8696_v21 = vld [vmem:[#allocation11 + $0x574] ss:$12 sps:$4 sm:$0xff]   ;;  %v8694_v25 = vld [vmem:[#allocation11 + $0x570] ss:$12 sps:$4 sm:$0xff]  }
 0x3fc   :  { %v3780_v41 = vmul.f32 0.044715, %v3756_v30  ;;  %v3759_v46 = vmul.f32 %v9558_v44, %v3735_v32  ;;  %v3768_v47 = vmul.f32 %v9560_v4, %v3744_v34  ;;  %v3747_v48 = vmul.f32 %v9575_v35, %v9575_v35  ;;  %6031 = vmatpush1.bf16.msra.mxu1 %v8674_v7  ;;  %v8699_v30 = vld [vmem:[#allocation11 + $0x588] ss:$12 sps:$4 sm:$0xff]  }
 0x3fd   :  { %v3782_v38 = vmul.f32 0.044715, %v3758_v36  ;;  %v3781_v51 = vmul.f32 0.044715, %v3757_v37  ;;  %v3770_v56 = vmul.f32 %v9566_v26, %v3746_v39  ;;  %v3769_v57 = vmul.f32 %v9568_v27, %v3745_v40  ;;  %6032 = vmatprep.subr.bf16.mxu1 %v8681_v29  ;;  %v8706_v36 = vld [vmem:[#allocation11 + $0x5a4] ss:$12 sps:$4 sm:$0xff]  }
 0x3fe   :  { %v3804_v59 = vadd.f32 %v9550_v16, %v3780_v41  ;;  %v3783_v42 = vmul.f32 0.044715, %v3759_v46  ;;  %v3792_v58 = vmul.f32 0.044715, %v3768_v47  ;;  %v3771_v45 = vmul.f32 %v9575_v35, %v3747_v48  ;;  %v8704_v47 = vld [vmem:[#allocation11 + $0x5a0] ss:$12 sps:$4 sm:$0xff]  }
 0x3ff   :  { %v3806_v49 = vadd.f32 %v9552_v13, %v3782_v38  ;;  %v3805_v6 = vadd.f32 %v9554_v22, %v3781_v51  ;;  %v3794_v10 = vmul.f32 0.044715, %v3770_v56  ;;  %v3793_v1 = vmul.f32 0.044715, %v3769_v57  ;;  %v8711_v56 = vld [vmem:[#allocation11 + $0x5bc] ss:$12 sps:$4 sm:$0xff]  }
 0x400   :  { %v3828_v3 = vmul.f32 0.7978846, %v3804_v59  ;;  %v3807_v8 = vadd.f32 %v9558_v44, %v3783_v42  ;;  %v3816_v12 = vadd.f32 %v9560_v4, %v3792_v58  ;;  %v3795_v9 = vmul.f32 0.044715, %v3771_v45  ;;  %6033 = vmatpush1.bf16.msra.mxu1 %v8679_v5 }
 0x401   :  { %v3830_v11 = vmul.f32 0.7978846, %v3806_v49  ;;  %v3829_v15 = vmul.f32 0.7978846, %v3805_v6  ;;  %v3818_v17 = vadd.f32 %v9566_v26, %v3794_v10  ;;  %v3817_v18 = vadd.f32 %v9568_v27, %v3793_v1  ;;  %6034 = vmatprep.subr.bf16.mxu1 %v8686_v43  ;;  %v8709_v10 = vld [vmem:[#allocation11 + $0x5b8] ss:$12 sps:$4 sm:$0xff]  }
 0x402   :  { %8886 = vtanh.f32 %v3828_v3  ;;  %v3831_v0 = vmul.f32 0.7978846, %v3807_v8  ;;  %v3840_v23 = vmul.f32 0.7978846, %v3816_v12  ;;  %v3819_v14 = vadd.f32 %v9575_v35, %v3795_v9 }
 0x403   :  { %8888 = vtanh.f32 %v3830_v11  ;;  %v3842_v31 = vmul.f32 0.7978846, %v3818_v17  ;;  %v3841_v20 = vmul.f32 0.7978846, %v3817_v18 }
 0x404   :  { %8890 = vtanh.f32 %v3829_v15  ;;  %6035 = vmatpush1.bf16.msra.mxu1 %v8684_v19  ;;  %v3843_v7 = vmul.f32 0.7978846, %v3819_v14  ;;  %v8716_v19 = vld [vmem:[#allocation11 + $0x5d4] ss:$12 sps:$4 sm:$0xff]  }
 0x405   :  { %8892 = vtanh.f32 %v3831_v0  ;;  %6036 = vmatprep.subr.bf16.mxu1 %v8691_v61 }
 0x406   :  { %8894 = vtanh.f32 %v3840_v23  ;;  %v8714_v23 = vld [vmem:[#allocation11 + $0x5d0] ss:$12 sps:$4 sm:$0xff]  }
 0x407   :  { %8896 = vtanh.f32 %v3842_v31 }
 0x408   :  { %8898 = vtanh.f32 %v3841_v20  ;;  %6037 = vmatpush1.bf16.msra.mxu1 %v8689_v24  ;;  %v8713_v20 = vld [vmem:[#allocation11 + $0x788] ss:$12 sps:$4 sm:$0xff]   ;;  %v8721_v24 = vld [vmem:[#allocation11 + $0x5ec] ss:$12 sps:$4 sm:$0xff]  }
 0x409   :  { %8900 = vtanh.f32 %v3843_v7  ;;  %6038 = vmatprep.subr.bf16.mxu1 %v8696_v21  ;;  %v8724_v7 = vld [vmem:[#allocation11 + $0x600] ss:$12 sps:$4 sm:$0xff]   ;;  %v8723_v21 = vld [vmem:[#allocation11 + $0x7b8] ss:$12 sps:$4 sm:$0xff]  }
 0x40c   :  { %v8887_v29 = vpop.eup %8886  ;;  %6039 = vmatpush1.bf16.msra.mxu1 %v8694_v25  ;;  %v8731_v25 = vld [vmem:[#allocation11 + $0x61c] ss:$12 sps:$4 sm:$0xff]  }
 0x40d   :  { %v8889_v32 = vpop.eup %8888  ;;  %v3876_v34 = vadd.f32 1.0, %v8887_v29  ;;  %6040 = vmatprep.subr.bf16.mxu1 %v8701_v28  ;;  %v8727_v28 = vld [vmem:[#allocation11 + $0x890] ss:$12 sps:$4 sm:$0xff]   ;;  %v8729_v29 = vld [vmem:[#allocation11 + $0x618] ss:$12 sps:$4 sm:$0xff]  }
 0x40e   :  { %v8891_v37 = vpop.eup %8890  ;;  %v3878_v39 = vadd.f32 1.0, %v8889_v32  ;;  %v8736_v32 = vld [vmem:[#allocation11 + $0x634] ss:$12 sps:$4 sm:$0xff]  }
 0x40f   :  { %v8893_v40 = vpop.eup %8892  ;;  %v3877_v41 = vadd.f32 1.0, %v8891_v37  ;;  %v3900_v38 = vmul.f32 0.5, %v3876_v34  ;;  %v8732_v34 = vld [vmem:[#allocation11 + $0x8a8] ss:$12 sps:$4 sm:$0xff]  }
 0x410   :  { %v8895_v46 = vpop.eup %8894  ;;  %6041 = vmatpush1.bf16.msra.mxu1 %v8699_v30  ;;  %v3879_v48 = vadd.f32 1.0, %v8893_v40  ;;  %v3902_v43 = vmul.f32 0.5, %v3878_v39  ;;  %v8728_v30 = vld [vmem:[#allocation11 + $0x7d0] ss:$12 sps:$4 sm:$0xff]   ;;  %v8733_v37 = vld [vmem:[#allocation11 + $0x7e8] ss:$12 sps:$4 sm:$0xff]  }
 0x411   :  { %v8897_v5 = vpop.eup %8896  ;;  %v3888_v51 = vadd.f32 1.0, %v8895_v46  ;;  %6042 = vmatprep.subr.bf16.mxu1 %v8706_v36  ;;  %v3901_v49 = vmul.f32 0.5, %v3877_v41  ;;  %v3924_v8 = vmul.f32 %v9550_v16, %v3900_v38  ;;  %v8734_v36 = vld [vmem:[#allocation11 + $0x630] ss:$12 sps:$4 sm:$0xff]   ;;  %v8741_v39 = vld [vmem:[#allocation11 + $0x64c] ss:$12 sps:$4 sm:$0xff]  }
 0x412   :  { %v8899_v57 = vpop.eup %8898  ;;  %v3890_v59 = vadd.f32 1.0, %v8897_v5  ;;  %v3903_v3 = vmul.f32 0.5, %v3879_v48  ;;  %v3926_v11 = vmul.f32 %v9552_v13, %v3902_v43  ;;  %v8737_v40 = vld [vmem:[#allocation11 + $0x8c0] ss:$12 sps:$4 sm:$0xff]   ;;  %v8739_v41 = vld [vmem:[#allocation11 + $0x648] ss:$12 sps:$4 sm:$0xff]  }
 0x413   :  { %v8901_v42 = vpop.eup %8900  ;;  %v3912_v58 = vmul.f32 0.5, %v3888_v51  ;;  %v3889_v45 = vadd.f32 1.0, %v8899_v57  ;;  %v3925_v18 = vmul.f32 %v9554_v22, %v3901_v49  ;;  %v8719_v22 = vld [vmem:[#allocation11 + $0x5e8] ss:$12 sps:$4 sm:$0xff]   ;;  %v8746_v46 = vld [vmem:[#allocation11 + $0x664] ss:$12 sps:$4 sm:$0xff]  }
 0x414   :  { %v3914_v6 = vmul.f32 0.5, %v3890_v59  ;;  %6043 = vmatpush1.bf16.msra.mxu1 %v8704_v47  ;;  %v3891_v1 = vadd.f32 1.0, %v8901_v42  ;;  %v3927_v16 = vmul.f32 %v9558_v44, %v3903_v3  ;;  %v8718_v44 = vld [vmem:[#allocation11 + $0x7a0] ss:$12 sps:$4 sm:$0xff]   ;;  %v8742_v47 = vld [vmem:[#allocation11 + $0x8d8] ss:$12 sps:$4 sm:$0xff]  }
 0x415   :  { %v3936_v12 = vmul.f32 %v9560_v4, %v3912_v58  ;;  %6044 = vmatprep.subr.bf16.mxu1 %v8711_v56  ;;  %v3913_v9 = vmul.f32 0.5, %v3889_v45  ;;  %v8744_v38 = vld [vmem:[#allocation11 + $0x660] ss:$12 sps:$4 sm:$0xff]   ;;  %v8743_v57 = vld [vmem:[#allocation11 + $0x818] ss:$12 sps:$4 sm:$0xff]  }
 0x416   :  { %v3938_v15 = vmul.f32 %v9566_v26, %v3914_v6  ;;  %v3915_v17 = vmul.f32 0.5, %v3891_v1  ;;  %v8717_v26 = vld [vmem:[#allocation11 + $0x860] ss:$12 sps:$4 sm:$0xff]   ;;  %v8751_v43 = vld [vmem:[#allocation11 + $0x67c] ss:$12 sps:$4 sm:$0xff]  }
 0x417   :  { %v3937_v61 = vmul.f32 %v9568_v27, %v3913_v9  ;;  %v9604_v0 = vpack.c.bf16 %v3936_v12, %v3924_v8  ;;  %v8726_v27 = vld [vmem:[#allocation11 + $0x604] ss:$12 sps:$4 sm:$0xff]   ;;  %v8754_v6 = vld [vmem:[#allocation11 + $0x694] ss:$12 sps:$4 sm:$0xff]   ;;  %v8757_v1 = vld [vmem:[#allocation11 + $0x6ac] ss:$12 sps:$4 sm:$0xff]  }
 0x418   :  { %6045 = vmatpush1.bf16.msra.mxu1 %v8709_v10  ;;  %v3939_v4 = vmul.f32 %v9575_v35, %v3915_v17  ;;  %v9608_v14 = vpack.c.bf16 %v3938_v15, %v3926_v11  ;;  %v8722_v35 = vld [vmem:[#allocation11 + $0x878] ss:$12 sps:$4 sm:$0xff]   ;;  %v8747_v42 = vld [vmem:[#allocation11 + $0x8f0] ss:$12 sps:$4 sm:$0xff]   ;;  %v8755_v3 = vld [vmem:[#allocation11 + $0x6a8] ss:$12 sps:$4 sm:$0xff]  }
 0x419   :  { %v3949_v31 = vpack.c.bf16 %v3937_v61, %v3925_v18  ;;  %6046 = vmatprep.subr.bf16.mxu1 %v8716_v19  ;;  %v8749_v45 = vld [vmem:[#allocation11 + $0x678] ss:$12 sps:$4 sm:$0xff]   ;;  %v8748_v49 = vld [vmem:[#allocation11 + $0x830] ss:$12 sps:$4 sm:$0xff]   ;;  %v8758_v12 = vld [vmem:[#allocation11 + $0x6c0] ss:$12 sps:$4 sm:$0xff]  }
 0x41a   :  { %v9610_v13 = vpack.c.bf16 %v3939_v4, %v3927_v16  ;;  %v8752_v10 = vld [vmem:[#allocation11 + $0x690] ss:$12 sps:$4 sm:$0xff]   ;;  %v8761_v19 = vld [vmem:[#allocation11 + $0x6d8] ss:$12 sps:$4 sm:$0xff]   ;;  %v8766_v11 = vld [vmem:[#allocation11 + $0x6f4] ss:$12 sps:$4 sm:$0xff]  }
 0x41b   :  { %6343 = vmatprep.mubr.bf16.mxu0 %v3949_v31  ;;  %v8760_v8 = vld [vmem:[#allocation11 + $0x6c4] ss:$12 sps:$4 sm:$0xff]   ;;  %v8763_v9 = vld [vmem:[#allocation11 + $0x6dc] ss:$12 sps:$4 sm:$0xff]   ;;  %v8769_v17 = vld [vmem:[#allocation11 + $0x70c] ss:$12 sps:$4 sm:$0xff]  }
 0x41c   :  { %6344 = vmatmul.mubr.bf16.vlgmr.msra.gmra.mrb[32].mxu0 %v9604_v0  ;;  %6047 = vmatpush1.bf16.msra.mxu1 %v8714_v23  ;;  %v8764_v15 = vld [vmem:[#allocation11 + $0x6f0] ss:$12 sps:$4 sm:$0xff]   ;;  %v9616_v18 = vld [vmem:[#allocation13] sm:$0x7]  ;;  %v8767_v61 = vld [vmem:[#allocation11 + $0x708] ss:$12 sps:$4 sm:$0xff]  }
 0x41d   :  { %7634 = vmatpush3.bf16.msra.mxu0 %v8713_v20  ;;  %6384 = vmatprep.mubr.bf16.mxu0 %v9610_v13  ;;  %v4349_v23 = vrot.slane %v9616_v18, %v9339_v33  ;;  %v8772_v16 = vld [vmem:[#allocation11 + $0x724] ss:$12 sps:$4 sm:$0xff]   ;;  %v8770_v20 = vld [vmem:[#allocation11 + $0x720] ss:$12 sps:$4 sm:$0xff]  }
 0x41e   :  { %7635 = vmatprep.subr.bf16.mxu0 %v8717_v26  ;;  %6048 = vmatprep.subr.bf16.mxu1 %v8721_v24  ;;  %v8778_v33 = vld [vmem:[#allocation11 + $0x754] ss:$12 sps:$4 sm:$0xff]  }
 0x420   :  { %6049 = vmatpush1.bf16.msra.mxu1 %v8719_v22 }
 0x421   :  { %7636 = vmatpush3.bf16.msra.mxu0 %v8718_v44  ;;  %6061 = vmatprep.subr.bf16.mxu1 %v8726_v27  ;;  %v8775_v44 = vld [vmem:[#allocation11 + $0x73c] ss:$12 sps:$4 sm:$0xff]  }
 0x422   :  { %7637 = vmatprep.subr.bf16.mxu0 %v8722_v35 }
 0x423   :  { %6051 = vmatmul.mubr.bf16.vlgmr.msra.gmra.mrb[24].mxu1 %v9536_v55  ;;  %v8738_v55 = vld [vmem:[#allocation11 + $0x800] ss:$12 sps:$4 sm:$0xff]  }
 0x424   :  { %6062 = vmatpush1.bf16.msra.mxu1 %v8724_v7  ;;  %6093 = vmatprep.mubr.bf16.mxu1 %v3949_v31 }
 0x425   :  { %7638 = vmatpush3.bf16.msra.mxu0 %v8723_v21  ;;  %6063 = vmatprep.subr.bf16.mxu1 %v8731_v25  ;;  %v8773_v25 = vld [vmem:[#allocation11 + $0x738] ss:$12 sps:$4 sm:$0xff]  }
 0x426   :  { %7639 = vmatprep.subr.bf16.mxu0 %v8727_v28 }
 0x428   :  { %6064 = vmatpush1.bf16.msra.mxu1 %v8729_v29  ;;  %v8776_v29 = vld [vmem:[#allocation11 + $0x750] ss:$12 sps:$4 sm:$0xff]  }
 0x429   :  { %7640 = vmatpush3.bf16.msra.mxu0 %v8728_v30  ;;  %6065 = vmatprep.subr.bf16.mxu1 %v8736_v32  ;;  %v8781_v30 = vld [vmem:[#allocation11 + $0x76c] ss:$12 sps:$4 sm:$0xff]   ;;  %v8779_v32 = vld [vmem:[#allocation11 + $0x768] ss:$12 sps:$4 sm:$0xff]  }
 0x42a   :  { %7641 = vmatprep.subr.bf16.mxu0 %v8732_v34  ;;  %v8784_v34 = vld [vmem:[#allocation11 + $0x784] ss:$12 sps:$4 sm:$0xff]  }
 0x42c   :  { %6066 = vmatpush1.bf16.msra.mxu1 %v8734_v36  ;;  %v8782_v36 = vld [vmem:[#allocation11 + $0x780] ss:$12 sps:$4 sm:$0xff]  }
 0x42d   :  { %7642 = vmatpush3.bf16.msra.mxu0 %v8733_v37  ;;  %6067 = vmatprep.subr.bf16.mxu1 %v8741_v39  ;;  %v8787_v37 = vld [vmem:[#allocation11 + $0x79c] ss:$12 sps:$4 sm:$0xff]   ;;  %v8785_v39 = vld [vmem:[#allocation11 + $0x798] ss:$12 sps:$4 sm:$0xff]  }
 0x42e   :  { %7643 = vmatprep.subr.bf16.mxu0 %v8737_v40  ;;  %v8790_v40 = vld [vmem:[#allocation11 + $0x7b4] ss:$12 sps:$4 sm:$0xff]  }
 0x42f   :  { %v7539_v48 = vpop.f32.mrb[16].mxu0 }
 0x430   :  { %v7540_v5 = vpop.f32.mrb[17].mxu0  ;;  %6068 = vmatpush1.bf16.msra.mxu1 %v8739_v41  ;;  %v8788_v41 = vld [vmem:[#allocation11 + $0x7b0] ss:$12 sps:$4 sm:$0xff]  }
 0x431   :  { %v7541_v51 = vadd.f32 %v7540_v5, %v7539_v48  ;;  %7644 = vmatpush3.bf16.msra.mxu0 %v8738_v55  ;;  %v7542_v56 = vpop.f32.mrb[18].mxu0  ;;  %6069 = vmatprep.subr.bf16.mxu1 %v8746_v46  ;;  %v8793_v55 = vld [vmem:[#allocation11 + $0x7cc] ss:$12 sps:$4 sm:$0xff]   ;;  %v8791_v46 = vld [vmem:[#allocation11 + $0x7c8] ss:$12 sps:$4 sm:$0xff]  }
 0x432   :  { %v7543_v59 = vpop.f32.mrb[19].mxu0  ;;  %7645 = vmatprep.subr.bf16.mxu0 %v8742_v47  ;;  %v8796_v47 = vld [vmem:[#allocation11 + $0x7e4] ss:$12 sps:$4 sm:$0xff]   ;;  %v8794_v48 = vld [vmem:[#allocation11 + $0x7e0] ss:$12 sps:$4 sm:$0xff]  }
 0x433   :  { %v7544_v58 = vadd.f32 %v7543_v59, %v7542_v56  ;;  %v6182_v26 = vadd.f32 %v7541_v51, %v4349_v23  ;;  %v8799_v5 = vld [vmem:[#allocation11 + $0x7fc] ss:$12 sps:$4 sm:$0xff]   ;;  %v8805_v51 = vld [vmem:[#allocation11 + $0x82c] ss:$12 sps:$4 sm:$0xff]  }
 0x434   :  { %6070 = vmatpush1.bf16.msra.mxu1 %v8744_v38  ;;  %v8802_v38 = vld [vmem:[#allocation11 + $0x814] ss:$12 sps:$4 sm:$0xff]   ;;  %v8811_v59 = vld [vmem:[#allocation11 + $0x85c] ss:$12 sps:$4 sm:$0xff]  }
 0x435   :  { %7646 = vmatpush3.bf16.msra.mxu0 %v8743_v57  ;;  %6071 = vmatprep.subr.bf16.mxu1 %v8751_v43  ;;  %v6185_v35 = vadd.f32 %v7544_v58, %v4349_v23  ;;  %v8803_v56 = vld [vmem:[#allocation11 + $0x828] ss:$12 sps:$4 sm:$0xff]   ;;  %v8808_v57 = vld [vmem:[#allocation11 + $0x844] ss:$12 sps:$4 sm:$0xff]   ;;  %v8806_v43 = vld [vmem:[#allocation11 + $0x840] ss:$12 sps:$4 sm:$0xff]  }
 0x436   :  { %7647 = vmatprep.subr.bf16.mxu0 %v8747_v42  ;;  %v8809_v42 = vld [vmem:[#allocation11 + $0x858] ss:$12 sps:$4 sm:$0xff]   ;;  %v8814_v58 = vld [vmem:[#allocation11 + $0x874] ss:$12 sps:$4 sm:$0xff]  }
 0x438   :  { %6072 = vmatpush1.bf16.msra.mxu1 %v8749_v45  ;;  %v8812_v45 = vld [vmem:[#allocation11 + $0x870] ss:$12 sps:$4 sm:$0xff]  }
 0x439   :  { %7648 = vmatpush3.bf16.msra.mxu0 %v8748_v49  ;;  %6073 = vmatprep.subr.bf16.mxu1 %v8754_v6  ;;  %v8817_v49 = vld [vmem:[#allocation11 + $0x88c] ss:$12 sps:$4 sm:$0xff]   ;;  %v8815_v6 = vld [vmem:[#allocation11 + $0x888] ss:$12 sps:$4 sm:$0xff]  }
 0x43c   :  { %6385 = vmatmul.mubr.bf16.vlgmr.msra.gmra.mrb[36].mxu0 %v9608_v14  ;;  %6074 = vmatpush1.bf16.msra.mxu1 %v8752_v10  ;;  %v8820_v10 = vld [vmem:[#allocation11 + $0x8a4] ss:$12 sps:$4 sm:$0xff]  }
 0x43d   :  { %6075 = vmatprep.subr.bf16.mxu1 %v8757_v1 }
 0x440   :  { %6076 = vmatpush1.bf16.msra.mxu1 %v8755_v3 }
 0x441   :  { %6077 = vmatprep.subr.bf16.mxu1 %v8760_v8  ;;  %v8818_v8 = vld [vmem:[#allocation11 + $0x8a0] ss:$12 sps:$4 sm:$0xff]  }
 0x444   :  { %6078 = vmatpush1.bf16.msra.mxu1 %v8758_v12 }
 0x445   :  { %6079 = vmatprep.subr.bf16.mxu1 %v8763_v9 }
 0x448   :  { %6080 = vmatpush1.bf16.msra.mxu1 %v8761_v19  ;;  %v8823_v19 = vld [vmem:[#allocation11 + $0x8bc] ss:$12 sps:$4 sm:$0xff]  }
 0x449   :  { %6081 = vmatprep.subr.bf16.mxu1 %v8766_v11 }
 0x44c   :  { %6082 = vmatpush1.bf16.msra.mxu1 %v8764_v15 }
 0x44d   :  { %6083 = vmatprep.subr.bf16.mxu1 %v8769_v17 }
 0x44f   :  { %v7561_v4 = vpop.f32.mrb[20].mxu0 }
 0x450   :  { %v7562_v31 = vpop.f32.mrb[21].mxu0  ;;  %6084 = vmatpush1.bf16.msra.mxu1 %v8767_v61  ;;  %v8821_v61 = vld [vmem:[#allocation11 + $0x8b8] ss:$12 sps:$4 sm:$0xff]  }
 0x451   :  { %v7563_v24 = vadd.f32 %v7562_v31, %v7561_v4  ;;  %v7564_v22 = vpop.f32.mrb[22].mxu0  ;;  %6085 = vmatprep.subr.bf16.mxu1 %v8772_v16  ;;  %v8826_v16 = vld [vmem:[#allocation11 + $0x8d4] ss:$12 sps:$4 sm:$0xff]   ;;  %v8824_v4 = vld [vmem:[#allocation11 + $0x8d0] ss:$12 sps:$4 sm:$0xff]  }
 0x452   :  { %v7565_v27 = vpop.f32.mrb[23].mxu0  ;;  %v8829_v31 = vld [vmem:[#allocation11 + $0x8ec] ss:$12 sps:$4 sm:$0xff]  }
 0x453   :  { %v9620_v7 = vadd.f32 %v7563_v24, %v6182_v26  ;;  %v7566_v21 = vadd.f32 %v7565_v27, %v7564_v22  ;;  %v8831_v26 = vld [vmem:[#allocation14] sm:$0xff]   ;;  %v8832_v24 = vld [vmem:[#allocation14 + $0x48] sm:$0xff]   ;;  %v8834_v27 = vld [vmem:[#allocation14 + $0x50] sm:$0xff]  }
 0x454   :  { %6086 = vmatpush1.bf16.msra.mxu1 %v8770_v20  ;;  %v8830_v20 = vld [vmem:[#allocation14 + $0x40] sm:$0xff]  }
 0x455   :  { %v9622_v28 = vadd.f32 %v7566_v21, %v6185_v35  ;;  %6087 = vmatprep.subr.bf16.mxu1 %v8775_v44  ;;  %7655 = vmatprep.subr.bf16.mxu0 %v8830_v20  ;;  %v8827_v22 = vld [vmem:[#allocation11 + $0x8e8] ss:$12 sps:$4 sm:$0xff]   ;;  %v8833_v44 = vld [vmem:[#allocation14 + $0x8] sm:$0xff]   ;;  %v8837_v21 = vld [vmem:[#allocation14 + $0x18] sm:$0xff]  }
 0x456   :  { %7656 = vmatpush3.bf16.msra.mxu0 %v8831_v26  ;;  %v8835_v35 = vld [vmem:[#allocation14 + $0x10] sm:$0xff]  }
 0x457   :  { %7657 = vmatprep.subr.bf16.mxu0 %v8832_v24 }
 0x458   :  { %6088 = vmatpush1.bf16.msra.mxu1 %v8773_v25  ;;  %v8838_v25 = vld [vmem:[#allocation14 + $0x60] sm:$0xff]  }
 0x459   :  { %6089 = vmatprep.subr.bf16.mxu1 %v8778_v33  ;;  %v8840_v33 = vld [vmem:[#allocation14 + $0x68] sm:$0xff]  }
 0x45a   :  { %7658 = vmatpush3.bf16.msra.mxu0 %v8833_v44  ;;  %v8853_v44 = vld [vmem:[#allocation14 + $0xb8] sm:$0xff]  }
 0x45b   :  { %7659 = vmatprep.subr.bf16.mxu0 %v8834_v27 }
 0x45c   :  { %6090 = vmatpush1.bf16.msra.mxu1 %v8776_v29  ;;  %v8841_v29 = vld [vmem:[#allocation14 + $0x28] sm:$0xff]  }
 0x45d   :  { %6091 = vmatprep.subr.bf16.mxu1 %v8781_v30 }
 0x45e   :  { %7660 = vmatpush3.bf16.msra.mxu0 %v8835_v35 }
 0x460   :  { %6092 = vmatpush1.bf16.msra.mxu1 %v8779_v32 }
 0x461   :  { %6104 = vmatprep.subr.bf16.mxu1 %v8784_v34 }
 0x463   :  { %6094 = vmatmul.mubr.bf16.vlgmr.msra.gmra.mrb[24].mxu1 %v9604_v0  ;;  %v8797_v0 = vld [vmem:[#allocation11 + $0x7f8] ss:$12 sps:$4 sm:$0xff]  }
 0x464   :  { %6105 = vmatpush1.bf16.msra.mxu1 %v8782_v36  ;;  %6136 = vmatprep.mubr.bf16.mxu1 %v9610_v13  ;;  %v8800_v13 = vld [vmem:[#allocation11 + $0x810] ss:$12 sps:$4 sm:$0xff]  }
 0x465   :  { %6106 = vmatprep.subr.bf16.mxu1 %v8787_v37 }
 0x468   :  { %6107 = vmatpush1.bf16.msra.mxu1 %v8785_v39 }
 0x469   :  { %6108 = vmatprep.subr.bf16.mxu1 %v8790_v40 }
 0x46c   :  { %6109 = vmatpush1.bf16.msra.mxu1 %v8788_v41 }
 0x46d   :  { %6110 = vmatprep.subr.bf16.mxu1 %v8793_v55 }
 0x470   :  { %6111 = vmatpush1.bf16.msra.mxu1 %v8791_v46 }
 0x471   :  { %6112 = vmatprep.subr.bf16.mxu1 %v8796_v47 }
 0x474   :  { %6113 = vmatpush1.bf16.msra.mxu1 %v8794_v48 }
 0x475   :  { %6114 = vmatprep.subr.bf16.mxu1 %v8799_v5 }
 0x478   :  { %6115 = vmatpush1.bf16.msra.mxu1 %v8797_v0 }
 0x479   :  { %6116 = vmatprep.subr.bf16.mxu1 %v8802_v38 }
 0x47c   :  { %6117 = vmatpush1.bf16.msra.mxu1 %v8800_v13  ;;  %v8842_v13 = vld [vmem:[#allocation14 + $0x70] sm:$0xff]  }
 0x47d   :  { %6118 = vmatprep.subr.bf16.mxu1 %v8805_v51  ;;  %v8843_v51 = vld [vmem:[#allocation14 + $0x30] sm:$0xff]  }
 0x480   :  { %6119 = vmatpush1.bf16.msra.mxu1 %v8803_v56  ;;  %v8844_v56 = vld [vmem:[#allocation14 + $0x78] sm:$0xff]  }
 0x481   :  { %6120 = vmatprep.subr.bf16.mxu1 %v8808_v57  ;;  %v8845_v57 = vld [vmem:[#allocation14 + $0x38] sm:$0xff]  }
 0x484   :  { %6121 = vmatpush1.bf16.msra.mxu1 %v8806_v43  ;;  %v9152_v43 = vmov 0.0  }
 0x485   :  { %6122 = vmatprep.subr.bf16.mxu1 %v8811_v59 }
 0x488   :  { %6123 = vmatpush1.bf16.msra.mxu1 %v8809_v42 }
 0x489   :  { %6124 = vmatprep.subr.bf16.mxu1 %v8814_v58 }
 0x48c   :  { %6125 = vmatpush1.bf16.msra.mxu1 %v8812_v45 }
 0x48d   :  { %6126 = vmatprep.subr.bf16.mxu1 %v8817_v49 }
 0x48f   :  { %v7583_v1 = vpop.f32.mrb[24].mxu0 }
 0x490   :  { %v7584_v3 = vpop.f32.mrb[25].mxu0  ;;  %6127 = vmatpush1.bf16.msra.mxu1 %v8815_v6 }
 0x491   :  { %v7585_v12 = vadd.f32 %v7584_v3, %v7583_v1  ;;  %v7586_v9 = vpop.f32.mrb[26].mxu0  ;;  %6128 = vmatprep.subr.bf16.mxu1 %v8820_v10 }
 0x492   :  { %v7587_v11 = vpop.f32.mrb[27].mxu0 }
 0x493   :  { %v6264_v15 = vadd.f32 %v7585_v12, %v9620_v7  ;;  %v7588_v17 = vadd.f32 %v7587_v11, %v7586_v9  ;;  %v8836_v7 = vld [vmem:[#allocation14 + $0x58] sm:$0xff]   ;;  %v4341_v9 = vrot.slane %v9616_v18, %v9347_v53 }
 0x494   :  { %6129 = vmatpush1.bf16.msra.mxu1 %v8818_v8  ;;  %7661 = vmatprep.subr.bf16.mxu0 %v8836_v7 }
 0x495   :  { %v6267_v23 = vadd.f32 %v7588_v17, %v9622_v28  ;;  %6130 = vmatprep.subr.bf16.mxu1 %v8823_v19  ;;  %7662 = vmatpush3.bf16.msra.mxu0 %v8837_v21  ;;  %v8839_v28 = vld [vmem:[#allocation14 + $0x20] sm:$0xff]   ;;  %v4345_v19 = vrot.slane %v9616_v18, %v9350_v54  ;;  %v8847_v54 = vld [vmem:[#allocation14 + $0x88] sm:$0xff]   ;;  %v8848_v18 = vld [vmem:[#allocation14 + $0x90] sm:$0xff]  }
 0x496   :  { %7663 = vmatprep.subr.bf16.mxu0 %v8838_v25 }
 0x498   :  { %6131 = vmatpush1.bf16.msra.mxu1 %v8821_v61 }
 0x499   :  { %6132 = vmatprep.subr.bf16.mxu1 %v8826_v16  ;;  %7664 = vmatpush3.bf16.msra.mxu0 %v8839_v28 }
 0x49a   :  { %7665 = vmatprep.subr.bf16.mxu0 %v8840_v33  ;;  %v7432_v33 = vld [vmem:[#allocation16] ss:$0 sm:$0xff] }
 0x49c   :  { %6133 = vmatpush1.bf16.msra.mxu1 %v8824_v4 }
 0x49d   :  { %6134 = vmatprep.subr.bf16.mxu1 %v8829_v31  ;;  %7666 = vmatpush3.bf16.msra.mxu0 %v8841_v29 }
 0x49e   :  { %7667 = vmatprep.subr.bf16.mxu0 %v8842_v13 }
 0x4a0   :  { %6135 = vmatpush1.bf16.msra.mxu1 %v8827_v22  ;;  %v8846_v22 = vld [vmem:[#allocation14 + $0x80] sm:$0xff]  }
 0x4a1   :  { %7668 = vmatpush3.bf16.msra.mxu0 %v8843_v51 }
 0x4a2   :  { %7669 = vmatprep.subr.bf16.mxu0 %v8844_v56 }
 0x4a3   :  { %6137 = vmatmul.mubr.bf16.vlgmr.msra.gmra.mrb[24].mxu1 %v9608_v14 }
 0x4a5   :  { %7670 = vmatpush3.bf16.msra.mxu0 %v8845_v57 }
 0x4a6   :  { %7686 = vmatprep.subr.bf16.mxu0 %v9152_v43 }
 0x4af   :  { %v7605_v30 = vpop.f32.mrb[28].mxu0 }
 0x4b0   :  { %v7606_v32 = vpop.f32.mrb[29].mxu0 }
 0x4b1   :  { %v7607_v34 = vadd.f32 %v7606_v32, %v7605_v30  ;;  %v7608_v36 = vpop.f32.mrb[30].mxu0 }
 0x4b2   :  { %v7609_v37 = vpop.f32.mrb[31].mxu0 }
 0x4b3   :  { %v6305_v39 = vadd.f32 %v7607_v34, %v6264_v15  ;;  %v7610_v40 = vadd.f32 %v7609_v37, %v7608_v36 }
 0x4b5   :  { %v6308_v14 = vadd.f32 %v7610_v40, %v6267_v23 }
 0x4ef   :  { %v7627_v41 = vpop.f32.mrb[32].mxu0 }
 0x4f0   :  { %v7628_v55 = vpop.f32.mrb[33].mxu0 }
 0x4f1   :  { %v7629_v46 = vadd.f32 %v7628_v55, %v7627_v41  ;;  %v7630_v47 = vpop.f32.mrb[34].mxu0 }
 0x4f2   :  { %v7631_v48 = vpop.f32.mrb[35].mxu0 }
 0x4f3   :  { %v6346_v5 = vadd.f32 %v7629_v46, %v6305_v39  ;;  %v7632_v0 = vadd.f32 %v7631_v48, %v7630_v47 }
 0x4f5   :  { %v6349_v38 = vadd.f32 %v7632_v0, %v6308_v14 }
 0x50f   :  { %v7649_v59 = vpop.f32.mrb[36].mxu0 }
 0x510   :  { %v7650_v42 = vpop.f32.mrb[37].mxu0 }
 0x511   :  { %v7651_v58 = vadd.f32 %v7650_v42, %v7649_v59  ;;  %v7652_v45 = vpop.f32.mrb[38].mxu0 }
 0x512   :  { %v7653_v49 = vpop.f32.mrb[39].mxu0 }
 0x513   :  { %v6387_v6 = vadd.f32 %v7651_v58, %v6346_v5  ;;  %v7654_v10 = vadd.f32 %v7653_v49, %v7652_v45 }
 0x515   :  { %v6390_v1 = vadd.f32 %v7654_v10, %v6349_v38  ;;  %v6395_v3 = vadd.f32 %v6387_v6, %v9342_v50 }
 0x517   :  { %v6398_v8 = vadd.f32 %v6390_v1, %v9344_v52 }
 0x519   :  { %v6401_v12 = vpack.c.bf16 %v6398_v8, %v6395_v3 }
 0x576   :  { %v6138_v11 = vpop.f32.mrb[24].mxu1 }
 0x577   :  { %v7734_v15 = vadd.f32 %v6138_v11, %v4341_v9  ;;  %v6140_v17 = vpop.f32.mrb[25].mxu1 }
 0x578   :  { %v7735_v61 = vadd.f32 %v6140_v17, %v4345_v19  ;;  %v6142_v23 = vpop.f32.mrb[26].mxu1 }
 0x579   :  { %v7736_v16 = vadd.f32 %v6142_v23, %v4341_v9  ;;  %v6144_v4 = vpop.f32.mrb[27].mxu1  ;;  %v6393_v20 = vadd.f32 %v7734_v15, %v9360_v2  ;;  %v8849_v2 = vld [vmem:[#allocation14 + $0x98] sm:$0xff]  }
 0x57a   :  { %v7737_v31 = vadd.f32 %v6144_v4, %v4345_v19  ;;  %v6394_v52 = vadd.f32 %v7735_v61, %v9356_v62  ;;  %v8851_v62 = vld [vmem:[#allocation14 + $0xa8] sm:$0xff]  }
 0x57b   :  { %v6396_v50 = vadd.f32 %v7736_v16, %v9354_v60  ;;  %v8850_v60 = vld [vmem:[#allocation14 + $0xa0] sm:$0xff]  }
 0x57c   :  { %v6397_v26 = vadd.f32 %v7737_v31, %v9358_v63  ;;  %v8852_v63 = vld [vmem:[#allocation14 + $0xb0] sm:$0xff]  }
 0x57d   :  { %v6399_v53 = vpack.c.bf16 %v6396_v50, %v6393_v20 }
 0x57e   :  { %v6400_v24 = vpack.c.bf16 %v6397_v26, %v6394_v52 }
 0x580   :  { %6633 = vmatprep.mubr.bf16.mxu0 %v6400_v24 }
 0x581   :  { %6634 = vmatmul.mubr.bf16.vlgmr.msra.gmra.mrb[40].mxu0 %v6399_v53 }
 0x582   :  { %7687 = vmatpush3.bf16.msra.mxu0 %v8846_v22  ;;  %7702 = vmatprep.mubr.msk.bf16.mxu0 %vm9153_vm0, %v9152_v43 }
 0x583   :  { %7688 = vmatprep.subr.bf16.mxu0 %v9152_v43 }
 0x586   :  { %7689 = vmatpush3.bf16.msra.mxu0 %v8847_v54 }
 0x587   :  { %7690 = vmatprep.subr.bf16.mxu0 %v9152_v43 }
 0x58a   :  { %7691 = vmatpush3.bf16.msra.mxu0 %v8848_v18 }
 0x58b   :  { %7692 = vmatprep.subr.bf16.mxu0 %v9152_v43 }
 0x58e   :  { %7693 = vmatpush3.bf16.msra.mxu0 %v8849_v2 }
 0x58f   :  { %7694 = vmatprep.subr.bf16.mxu0 %v9152_v43 }
 0x592   :  { %7695 = vmatpush3.bf16.msra.mxu0 %v8850_v60 }
 0x593   :  { %7696 = vmatprep.subr.bf16.mxu0 %v9152_v43 }
 0x596   :  { %7697 = vmatpush3.bf16.msra.mxu0 %v8851_v62 }
 0x597   :  { %7698 = vmatprep.subr.bf16.mxu0 %v9152_v43 }
 0x59a   :  { %7699 = vmatpush3.bf16.msra.mxu0 %v8852_v63 }
 0x59b   :  { %7700 = vmatprep.subr.bf16.mxu0 %v9152_v43 }
 0x59e   :  { %7701 = vmatpush3.bf16.msra.mxu0 %v8853_v44 }
 0x5a1   :  { %7703 = vmatmul.mubr.bf16.vlgmr.msra.gmra.mrb[44].mxu0 %v6401_v12 }
 0x654   :  { %v7671_v27 = vpop.f32.mrb[40].mxu0 }
 0x655   :  { %v7672_v35 = vpop.f32.mrb[41].mxu0 }
 0x656   :  { %v7673_v7 = vadd.f32 %v7672_v35, %v7671_v27  ;;  %v7674_v21 = vpop.f32.mrb[42].mxu0 }
 0x657   :  { %v7675_v25 = vpop.f32.mrb[43].mxu0 }
 0x658   :  { %v7676_v28 = vadd.f32 %v7675_v25, %v7674_v21  ;;  %v6636_v29 = vadd.f32 %v7673_v7, %v7432_v33 }
 0x65a   :  { %v6639_v36 = vadd.f32 %v7676_v28, %v7432_v33 }
 0x674   :  { %v6676_v30 = vpop.f32.mrb[44].mxu0 }
 0x675   :  { %v6677_v32 = vadd.f32 %v6676_v30, %v6636_v29  ;;  %v7704_v34 = vpop.f32.mrb[45].mxu0 }
 0x676   :  { %v6679_v37 = vpop.f32.mrb[46].mxu0 }
 0x677   :  { %6683 = vst [vmem:[#allocation17] sm:$0xff] %v6677_v32  ;;  %v6680_v39 = vadd.f32 %v6679_v37, %v6639_v36  ;;  %v7705_v40 = vpop.f32.mrb[47].mxu0 }
 0x679   :  { %6684 = vst [vmem:[#allocation17 + $0x8] sm:$0xff] %v6680_v39 }
 0x67a   :  { %9111 = shalt.err (!%p9108_p6)
}
 0x67b   :  { %s9112_s30 = scalar_lea.hbm %s9660_s9, 256 }
 0x67c   :  { %p9113_p7 = scmp.ne.s32.totalorder %s9660_s9, %s9112_s30  ;;  %p9116_p8 = scmp.lt.u32.totalorder %s9112_s30, %s9660_s9 }
 0x67e   :  { %p9118_p9 = pnand %p9116_p8, %p9113_p7 }
 0x680   :  { %9121 = shalt.err (!%p9118_p9)
}
 0x681   :  { %s9155_s14 = smov 128   ;;  %s9156_s15 = smov 8  }
 0x682   :  { %6696 = dma.vmem_to_hbm [thread:$0]  %s6691_s7, 256, %s9660_s9, [#allocation4], %s9155_s14, %s9155_s14, %s9156_s15  }
 0x683   :  { %9132 = dma.done.wait [#allocation4], 256  }
 0x684   :  { %9133 = vsyncadd [#allocation4], 4294967040 }
 0x685   :  { %6700 = vsyncpa [#allocation3], 1 }
 0x686   :  { %6701 = vsyncpa [#allocation6], 1 }
 0x687   :  { %6702 = vsyncpa [#allocation9], 1 }
 0x688   :  { %6703 = vsyncpa [#allocation12], 1 }
 0x689   :  { %6704 = vsyncpa [#allocation15], 1 }
 0x68a   :  { %6705 = vsyncpa [#allocation4], 1 }

</bundles_post_ra>
